<compile_context>
chip_gen: v7x
topology: tpu7x:2x2x1
jax: 0.10.0
libtpu: 0.0.40
codegen_flags: <defaults>
</compile_context>

<pallas_src>
import functools

import jax
import jax.numpy as jnp
from jax import lax
from jax.experimental import pallas as pl
from jax.experimental.pallas import tpu as pltpu


# --------------------------------------------------------------------------
# shared in-kernel helpers
# --------------------------------------------------------------------------

def _gn_silu(x, gamma, beta, mgc, mcg, count, eps):
    """GroupNorm (biased var, torch semantics) + SiLU on an (rows, R) f32 slab.

    Rows are channel-major (spatial: rows = C, temporal: rows = F*C).
    gamma/beta: (rows, 1).  mgc: (G, rows) row->group one-hot gather.
    mcg: (rows, G) group->row one-hot broadcast.
    """
    s = jnp.sum(x, axis=1, keepdims=True)                         # (rows, 1)
    sq = jnp.sum(x * x, axis=1, keepdims=True)                    # (rows, 1)
    gs = jnp.dot(mgc, s, preferred_element_type=jnp.float32)      # (G, 1)
    gsq = jnp.dot(mgc, sq, preferred_element_type=jnp.float32)    # (G, 1)
    mean_g = gs / count
    var_g = jnp.maximum(gsq / count - mean_g * mean_g, 0.0)       # clamp: no NaN
    inv_g = lax.rsqrt(var_g + eps)
    mean_r = jnp.dot(mcg, mean_g, preferred_element_type=jnp.float32)  # (rows, 1)
    inv_r = jnp.dot(mcg, inv_g, preferred_element_type=jnp.float32)
    y = (x - mean_r) * inv_r * gamma + beta
    return y * jax.nn.sigmoid(y)                                  # SiLU


def _shift_lanes(y, d):
    """tap[:, r] = y[:, r + d] (static d), zero-filled outside [0, R)."""
    if d == 0:
        return y
    rows, r_len = y.shape
    pad = jnp.zeros((rows, abs(d)), y.dtype)
    if d > 0:
        return jnp.concatenate([y[:, d:], pad], axis=1)
    return jnp.concatenate([pad, y[:, :r_len + d]], axis=1)


# --------------------------------------------------------------------------
# spatial ResnetBlock2D: norm1+SiLU -> 3x3 conv (+bias +temb)
#                        -> norm2+SiLU -> 3x3 conv (+bias) -> +residual
# one pallas_call, grid over N = batch*frames, block (C, H*W)
# --------------------------------------------------------------------------

def _spatial_block_kernel(x_ref, mgc_ref, mcg_ref,
                          g1_ref, b1_ref, w1_ref, cb1_ref, temb_ref,
                          g2_ref, b2_ref, w2_ref, cb2_ref,
                          out_ref, *, H, W, eps):
    C, R = x_ref.shape                                    # channels x (H*W)
    x = x_ref[...].astype(jnp.float32)
    mgc = mgc_ref[...]
    mcg = mcg_ref[...]
    count = float(R * (C // mgc.shape[0]))

    # Lane masks for the +/-1 column (dx) shifts; the row (dy) shifts are
    # handled for free by the zero fill in _shift_lanes (flattened H*W lanes).
    ww = lax.broadcasted_iota(jnp.int32, (1, R), 1) % W
    mask_l = (ww >= 1).astype(jnp.bfloat16)               # tap reads column w-1
    mask_r = (ww <= W - 2).astype(jnp.bfloat16)           # tap reads column w+1

    def conv3x3(y_bf, w_ref, cb):
        # Per-tap accumulated bf16 MXU dots (no im2col, no padded scratch).
        acc = jnp.zeros((C, R), jnp.float32)
        k = 0
        for ody in (-1, 0, 1):
            for odx in (-1, 0, 1):
                tap = _shift_lanes(y_bf, ody * W + odx)
                if odx < 0:
                    tap = tap * mask_l
                elif odx > 0:
                    tap = tap * mask_r
                acc = acc + jnp.dot(w_ref[k], tap,
                                    preferred_element_type=jnp.float32)
                k += 1
        return acc + cb

    # norm1 -> SiLU -> conv1 (+bias +temb)
    y1 = _gn_silu(x, g1_ref[...], b1_ref[...], mgc, mcg, count, eps)
    h = conv3x3(y1.astype(jnp.bfloat16), w1_ref, cb1_ref[...])
    h = h + temb_ref[...]                                  # (C, 1) broadcast
    # norm2 -> SiLU -> conv2 (+bias) -> identity residual
    y2 = _gn_silu(h, g2_ref[...], b2_ref[...], mgc, mcg, count, eps)
    h = conv3x3(y2.astype(jnp.bfloat16), w2_ref, cb2_ref[...])
    out_ref[...] = (x + h).astype(out_ref.dtype)


def _spatial_call(x2d, mgc, mcg, p, temb_sp, *, BF, C, H, W, G, R, eps):
    kernel = functools.partial(_spatial_block_kernel, H=H, W=W, eps=eps)
    const2 = lambda n: (0, 0)
    vec_spec = pl.BlockSpec((C, 1), const2)
    w_spec = pl.BlockSpec((9, C, C), lambda n: (0, 0, 0))
    in_specs = [
        pl.BlockSpec((C, R), lambda n: (n, 0)),           # x        (lane-dense)
        pl.BlockSpec((G, C), const2),                     # mgc
        pl.BlockSpec((C, G), const2),                     # mcg
        vec_spec, vec_spec,                               # norm1 gamma / beta
        w_spec, vec_spec,                                 # conv1 w (bf16) / bias
        pl.BlockSpec((C, 1), lambda n: (n, 0)),           # temb (per frame)
        vec_spec, vec_spec,                               # norm2 gamma / beta
        w_spec, vec_spec,                                 # conv2 w (bf16) / bias
    ]
    return pl.pallas_call(
        kernel,
        out_shape=jax.ShapeDtypeStruct((BF * C, R), jnp.bfloat16),
        grid=(BF,),
        in_specs=in_specs,
        out_specs=pl.BlockSpec((C, R), lambda n: (n, 0)),
        compiler_params=pltpu.CompilerParams(
            dimension_semantics=("parallel",),
            vmem_limit_bytes=64 * 1024 * 1024),
    )(x2d, mgc, mcg,
      p["norm1_g"], p["norm1_b"],
      p["conv1_w"].astype(jnp.bfloat16), p["conv1_b"],
      temb_sp,
      p["norm2_g"], p["norm2_b"],
      p["conv2_w"].astype(jnp.bfloat16), p["conv2_b"])


# --------------------------------------------------------------------------
# temporal TemporalResnetBlock + fused AlphaBlender
# one pallas_call, grid over batch, block (F*C, H*W)
# --------------------------------------------------------------------------

def _temporal_block_kernel(x_ref, mgc_ref, mcg_ref,
                           g1_ref, b1_ref, w1_ref, cb1_ref, temb_ref,
                           g2_ref, b2_ref, w2_ref, cb2_ref, oma_ref,
                           out_ref, *, F, C, eps):
    _, R = x_ref.shape                                     # (F*C, H*W)
    b = pl.program_id(0)
    x = x_ref[...].astype(jnp.float32)
    mgc = mgc_ref[...]
    mcg = mcg_ref[...]
    count = float(F * R * (C // mgc.shape[0]))

    def conv_t(y_bf, w_ref):
        # (3,1,1) temporal conv: per-frame accumulated MXU dots; frame zero
        # padding handled statically by skipping out-of-range taps.
        outs = []
        for f in range(F):
            acc = jnp.zeros((C, R), jnp.float32)
            for dt in (-1, 0, 1):
                ff = f + dt
                if 0 <= ff < F:
                    acc = acc + jnp.dot(w_ref[dt + 1],
                                        y_bf[ff * C:(ff + 1) * C, :],
                                        preferred_element_type=jnp.float32)
            outs.append(acc)
        return outs

    # norm1 -> SiLU -> conv1 (+bias +temb)
    y1 = _gn_silu(x, g1_ref[...], b1_ref[...], mgc, mcg, count, eps)
    h_f = conv_t(y1.astype(jnp.bfloat16), w1_ref)
    cb1 = cb1_ref[...]                                     # (C, 1)
    temb = temb_ref[...]                                   # (C, F)
    h = jnp.concatenate(
        [h_f[f] + cb1 + temb[:, f:f + 1] for f in range(F)], axis=0)  # (F*C, R)

    # norm2 -> SiLU -> conv2 (+bias), then residual + AlphaBlender fused:
    #   out = a*x + (1-a)*(x + h2) = x + (1-a)*h2
    y2 = _gn_silu(h, g2_ref[...], b2_ref[...], mgc, mcg, count, eps)
    h2_f = conv_t(y2.astype(jnp.bfloat16), w2_ref)
    cb2 = cb2_ref[...]
    for f in range(F):
        oma = oma_ref[b, f]                                # scalar (1 - alpha_{b,f})
        res = x[f * C:(f + 1) * C, :]
        out_ref[f * C:(f + 1) * C, :] = (
            res + oma * (h2_f[f] + cb2)).astype(out_ref.dtype)


def _temporal_call(x2d_bf, mgc, mcg, p, temb_t, one_minus_alpha,
                   *, B, F, C, R, G, eps):
    FC = F * C
    mgc_t = jnp.tile(mgc, (1, F))                          # (G, F*C)
    mcg_t = jnp.tile(mcg, (F, 1))                          # (F*C, G)
    tile_c = lambda a: jnp.tile(a, (F, 1))                 # (C,1) -> (F*C,1)
    kernel = functools.partial(_temporal_block_kernel, F=F, C=C, eps=eps)
    const2 = lambda b: (0, 0)
    w_spec = pl.BlockSpec((3, C, C), lambda b: (0, 0, 0))
    in_specs = [
        pl.BlockSpec((FC, R), lambda b: (b, 0)),           # spatial out / residual
        pl.BlockSpec((G, FC), const2),                     # mgc tiled
        pl.BlockSpec((FC, G), const2),                     # mcg tiled
        pl.BlockSpec((FC, 1), const2),                     # norm1 gamma (tiled)
        pl.BlockSpec((FC, 1), const2),                     # norm1 beta
        w_spec,                                            # conv1 w (bf16)
        pl.BlockSpec((C, 1), const2),                      # conv1 bias
        pl.BlockSpec((C, F), lambda b: (b, 0)),            # temb (per batch)
        pl.BlockSpec((FC, 1), const2),                     # norm2 gamma
        pl.BlockSpec((FC, 1), const2),                     # norm2 beta
        w_spec,                                            # conv2 w (bf16)
        pl.BlockSpec((C, 1), const2),                      # conv2 bias
        pl.BlockSpec(memory_space=pltpu.MemorySpace.SMEM), # (B, F) 1-alpha scalars
    ]
    return pl.pallas_call(
        kernel,
        out_shape=jax.ShapeDtypeStruct((B * FC, R), jnp.float32),
        grid=(B,),
        in_specs=in_specs,
        out_specs=pl.BlockSpec((FC, R), lambda b: (b, 0)),
        compiler_params=pltpu.CompilerParams(
            dimension_semantics=("parallel",),
            vmem_limit_bytes=64 * 1024 * 1024),
    )(x2d_bf, mgc_t, mcg_t,
      tile_c(p["norm1_g"]), tile_c(p["norm1_b"]),
      p["conv1_w"].astype(jnp.bfloat16), p["conv1_b"],
      temb_t,
      tile_c(p["norm2_g"]), tile_c(p["norm2_b"]),
      p["conv2_w"].astype(jnp.bfloat16), p["conv2_b"],
      one_minus_alpha)


# --------------------------------------------------------------------------
# JAX glue / full forward
# --------------------------------------------------------------------------

def spatio_temporal_res_block(x_nchw, temb, image_only_indicator, params):
    """Forward of SpatioTemporalResBlock.  x_nchw: (batch*frames, C, H, W)."""
    BF, C, H, W = x_nchw.shape
    B, F = image_only_indicator.shape
    G = 32
    R = H * W
    eps = 1e-6

    # channel -> group one-hot matrices (torch groups = contiguous channel blocks)
    gid = jnp.arange(C) // (C // G)
    mgc = (jnp.arange(G)[:, None] == gid[None, :]).astype(jnp.float32)  # (G, C)
    mcg = mgc.T                                                         # (C, G)

    # PyTorch-native layout: channels on sublanes, H*W on lanes. No transposes.
    x2d = x_nchw.reshape(BF * C, R)

    # SiLU(temb) + the two tiny Linear projections are left to XLA.
    t = temb * jax.nn.sigmoid(temb)

    # ---- spatial ResnetBlock2D (in_channels == out_channels, identity shortcut) ----
    ps = params["spatial"]
    temb_sp = (t @ ps["time_w"] + ps["time_b"]).reshape(BF * C, 1)
    spatial_out = _spatial_call(x2d, mgc, mcg, ps, temb_sp,
                                BF=BF, C=C, H=H, W=W, G=G, R=R, eps=eps)  # bf16

    # ---- temporal TemporalResnetBlock + AlphaBlender ----
    pt = params["temporal"]
    temb_t = (t @ pt["time_w"] + pt["time_b"])                 # (BF, C)
    temb_t = temb_t.reshape(B, F, C).transpose(0, 2, 1).reshape(B * C, F)

    # AlphaBlender(learned_with_images, switch_spatial_to_temporal_mix=False)
    alpha = jnp.where(image_only_indicator.astype(bool), 1.0,
                      jax.nn.sigmoid(params["mix_factor"]))
    one_minus_alpha = (1.0 - alpha).astype(jnp.float32)        # (B, F)

    out2d = _temporal_call(spatial_out, mgc, mcg, pt, temb_t, one_minus_alpha,
                           B=B, F=F, C=C, R=R, G=G, eps=eps)
    return out2d.reshape(BF, C, H, W)


# --------------------------------------------------------------------------
# parameter init
#   conv taps stored as (ntaps, Cout, Cin):
#     spatial  == torch_conv2d.weight.permute(2, 3, 0, 1).reshape(9, Cout, Cin)
#     temporal == torch_conv3d.weight[:, :, :, 0, 0].permute(2, 0, 1)
#   time_w == torch_linear.weight.T
# --------------------------------------------------------------------------

def init_params(key, C, temb_channels):
    ks = list(jax.random.split(key, 20))

    def w(k, shape, scale=0.05):
        return scale * jax.random.normal(k, shape, jnp.float32)

    def block(keys, ntaps):
        return dict(
            norm1_g=1.0 + w(keys[0], (C, 1), 0.05),
            norm1_b=w(keys[1], (C, 1), 0.02),
            conv1_w=w(keys[2], (ntaps, C, C)),
            conv1_b=w(keys[3], (C, 1), 0.02),
            time_w=w(keys[4], (temb_channels, C)),
            time_b=w(keys[5], (1, C), 0.02),
            norm2_g=1.0 + w(keys[6], (C, 1), 0.05),
            norm2_b=w(keys[7], (C, 1), 0.02),
            conv2_w=w(keys[8], (ntaps, C, C)),
            conv2_b=w(keys[9], (C, 1), 0.02),
        )

    return {
        "spatial": block(ks[0:10], ntaps=9),     # 3x3 conv -> 9 taps
        "temporal": block(ks[10:20], ntaps=3),   # (3,1,1) conv -> 3 taps
        "mix_factor": jnp.float32(0.5),          # AlphaBlender merge_factor
    }


# --------------------------------------------------------------------------
# main
# --------------------------------------------------------------------------

if __name__ == "__main__":
    key = jax.random.PRNGKey(0)
    B, F, C, H, W, TEMB = 1, 4, 32, 16, 16, 64   # C must be divisible by 32 (GroupNorm)
    kx, kt, kp = jax.random.split(key, 3)

    x = jax.random.normal(kx, (B * F, C, H, W), jnp.float32)      # (batch*frames, C, H, W)
    temb = jax.random.normal(kt, (B * F, TEMB), jnp.float32)      # (batch*frames, temb_channels)
    image_only_indicator = jnp.array([[0.0, 0.0, 1.0, 0.0]], jnp.float32)  # (B, F)

    params = init_params(kp, C, TEMB)

    out = jax.jit(spatio_temporal_res_block)(x, temb, image_only_indicator, params)
    jax.block_until_ready(out)
    assert out.shape == (B * F, C, H, W) and out.dtype == jnp.float32
    assert bool(jnp.all(jnp.isfinite(out)))
    print("KERNEL_OK")
</pallas_src>

<mosaic_0001>
module attributes {stable_mosaic.version = 11 : i64} {
  func.func @_spatial_block_kernel(%arg0: i32, %arg1: memref<32x256xf32, #tpu.memory_space<vmem>>, %arg2: memref<32x32xf32, #tpu.memory_space<vmem>>, %arg3: memref<32x32xf32, #tpu.memory_space<vmem>>, %arg4: memref<32x1xf32, #tpu.memory_space<vmem>>, %arg5: memref<32x1xf32, #tpu.memory_space<vmem>>, %arg6: memref<9x32x32xbf16, #tpu.memory_space<vmem>>, %arg7: memref<32x1xf32, #tpu.memory_space<vmem>>, %arg8: memref<32x1xf32, #tpu.memory_space<vmem>>, %arg9: memref<32x1xf32, #tpu.memory_space<vmem>>, %arg10: memref<32x1xf32, #tpu.memory_space<vmem>>, %arg11: memref<9x32x32xbf16, #tpu.memory_space<vmem>>, %arg12: memref<32x1xf32, #tpu.memory_space<vmem>>, %arg13: memref<32x256xbf16, #tpu.memory_space<vmem>>) attributes {dimension_semantics = [#tpu.dimension_semantics<parallel>], iteration_bounds = array<i64: 4>, scalar_prefetch = 0 : i64, scratch_operands = 0 : i64, tpu.core_type = #tpu.core_type<tc>, window_params = [{transform_indices = @transform_0, window_bounds = array<i64: 32, 256>}, {pipeline_mode = #tpu.pipeline_mode<synchronous>, transform_indices = @transform_1, window_bounds = array<i64: 32, 32>}, {pipeline_mode = #tpu.pipeline_mode<synchronous>, transform_indices = @transform_2, window_bounds = array<i64: 32, 32>}, {pipeline_mode = #tpu.pipeline_mode<synchronous>, transform_indices = @transform_3, window_bounds = array<i64: 32, 1>}, {pipeline_mode = #tpu.pipeline_mode<synchronous>, transform_indices = @transform_4, window_bounds = array<i64: 32, 1>}, {pipeline_mode = #tpu.pipeline_mode<synchronous>, transform_indices = @transform_5, window_bounds = array<i64: 9, 32, 32>}, {pipeline_mode = #tpu.pipeline_mode<synchronous>, transform_indices = @transform_6, window_bounds = array<i64: 32, 1>}, {transform_indices = @transform_7, window_bounds = array<i64: 32, 1>}, {pipeline_mode = #tpu.pipeline_mode<synchronous>, transform_indices = @transform_8, window_bounds = array<i64: 32, 1>}, {pipeline_mode = #tpu.pipeline_mode<synchronous>, transform_indices = @transform_9, window_bounds = array<i64: 32, 1>}, {pipeline_mode = #tpu.pipeline_mode<synchronous>, transform_indices = @transform_10, window_bounds = array<i64: 9, 32, 32>}, {pipeline_mode = #tpu.pipeline_mode<synchronous>, transform_indices = @transform_11, window_bounds = array<i64: 32, 1>}, {transform_indices = @transform_12, window_bounds = array<i64: 32, 256>}]} {
    %c0 = arith.constant 0 : index
    %c0_0 = arith.constant 0 : index
    %0 = vector.load %arg1[%c0, %c0_0] : memref<32x256xf32, #tpu.memory_space<vmem>>, vector<32x256xf32>
    %c0_1 = arith.constant 0 : index
    %c0_2 = arith.constant 0 : index
    %1 = vector.load %arg2[%c0_1, %c0_2] : memref<32x32xf32, #tpu.memory_space<vmem>>, vector<32x32xf32>
    %c0_3 = arith.constant 0 : index
    %c0_4 = arith.constant 0 : index
    %2 = vector.load %arg3[%c0_3, %c0_4] : memref<32x32xf32, #tpu.memory_space<vmem>>, vector<32x32xf32>
    %3 = tpu.iota {dimensions = array<i32: 1>} : vector<1x256xi32>
    %c16_i32 = arith.constant 16 : i32
    %c0_i32 = arith.constant 0 : i32
    %4 = arith.cmpi eq, %c16_i32, %c0_i32 : i32
    %c1_i32 = arith.constant 1 : i32
    %5 = arith.select %4, %c1_i32, %c16_i32 : i32
    %6 = vector.broadcast %5 : i32 to vector<1x256xi32>
    %7 = arith.remsi %3, %6 : vector<1x256xi32>
    %c0_i32_5 = arith.constant 0 : i32
    %8 = vector.broadcast %c0_i32_5 : i32 to vector<1x256xi32>
    %9 = arith.cmpi ne, %7, %8 : vector<1x256xi32>
    %c0_i32_6 = arith.constant 0 : i32
    %10 = vector.broadcast %c0_i32_6 : i32 to vector<1x256xi32>
    %11 = arith.cmpi slt, %7, %10 : vector<1x256xi32>
    %c0_i32_7 = arith.constant 0 : i32
    %12 = arith.cmpi slt, %5, %c0_i32_7 : i32
    %13 = vector.broadcast %12 : i1 to vector<1x256xi1>
    %14 = vector.broadcast %13 : vector<1x256xi1> to vector<1x256xi1>
    %15 = arith.xori %11, %14 : vector<1x256xi1>
    %16 = arith.andi %15, %9 : vector<1x256xi1>
    %17 = vector.broadcast %5 : i32 to vector<1x256xi32>
    %18 = arith.addi %7, %17 : vector<1x256xi32>
    %19 = arith.select %16, %18, %7 : vector<1x256xi1>, vector<1x256xi32>
    %c1_i32_8 = arith.constant 1 : i32
    %20 = vector.broadcast %c1_i32_8 : i32 to vector<1x256xi32>
    %21 = arith.cmpi sge, %19, %20 : vector<1x256xi32>
    %22 = arith.extui %21 : vector<1x256xi1> to vector<1x256xi32>
    %23 = arith.sitofp %22 : vector<1x256xi32> to vector<1x256xf32>
    %24 = arith.truncf %23 : vector<1x256xf32> to vector<1x256xbf16>
    %c14_i32 = arith.constant 14 : i32
    %25 = vector.broadcast %c14_i32 : i32 to vector<1x256xi32>
    %26 = arith.cmpi sle, %19, %25 : vector<1x256xi32>
    %27 = arith.extui %26 : vector<1x256xi1> to vector<1x256xi32>
    %28 = arith.sitofp %27 : vector<1x256xi32> to vector<1x256xf32>
    %29 = arith.truncf %28 : vector<1x256xf32> to vector<1x256xbf16>
    %c0_9 = arith.constant 0 : index
    %c0_10 = arith.constant 0 : index
    %30 = vector.load %arg4[%c0_9, %c0_10] : memref<32x1xf32, #tpu.memory_space<vmem>>, vector<32x1xf32>
    %c0_11 = arith.constant 0 : index
    %c0_12 = arith.constant 0 : index
    %31 = vector.load %arg5[%c0_11, %c0_12] : memref<32x1xf32, #tpu.memory_space<vmem>>, vector<32x1xf32>
    %cst = arith.constant dense<0.000000e+00> : vector<32xf32>
    %32 = vector.multi_reduction <add>, %0, %cst [1] : vector<32x256xf32> to vector<32xf32>
    %33 = vector.shape_cast %32 : vector<32xf32> to vector<32x1xf32>
    %34 = arith.mulf %0, %0 : vector<32x256xf32>
    %cst_13 = arith.constant dense<0.000000e+00> : vector<32xf32>
    %35 = vector.multi_reduction <add>, %34, %cst_13 [1] : vector<32x256xf32> to vector<32xf32>
    %36 = vector.shape_cast %35 : vector<32xf32> to vector<32x1xf32>
    %cst_14 = arith.constant dense<0.000000e+00> : vector<32x1xf32>
    %37 = tpu.matmul %1, %33, %cst_14 {dimension_numbers = #tpu.dot_dimension_numbers<[1], [0], [0], [1], [0, 0, 1, 1], [], []>} : vector<32x32xf32>, vector<32x1xf32>, vector<32x1xf32> -> vector<32x1xf32>
    %cst_15 = arith.constant dense<0.000000e+00> : vector<32x1xf32>
    %38 = tpu.matmul %1, %36, %cst_15 {dimension_numbers = #tpu.dot_dimension_numbers<[1], [0], [0], [1], [0, 0, 1, 1], [], []>} : vector<32x32xf32>, vector<32x1xf32>, vector<32x1xf32> -> vector<32x1xf32>
    %cst_16 = arith.constant 2.560000e+02 : f32
    %39 = vector.broadcast %cst_16 : f32 to vector<32x1xf32>
    %40 = arith.divf %37, %39 : vector<32x1xf32>
    %cst_17 = arith.constant 2.560000e+02 : f32
    %41 = vector.broadcast %cst_17 : f32 to vector<32x1xf32>
    %42 = arith.divf %38, %41 : vector<32x1xf32>
    %43 = arith.mulf %40, %40 : vector<32x1xf32>
    %44 = arith.subf %42, %43 : vector<32x1xf32>
    %cst_18 = arith.constant 0.000000e+00 : f32
    %45 = vector.broadcast %cst_18 : f32 to vector<32x1xf32>
    %46 = arith.maximumf %44, %45 : vector<32x1xf32>
    %cst_19 = arith.constant 9.99999997E-7 : f32
    %47 = vector.broadcast %cst_19 : f32 to vector<32x1xf32>
    %48 = arith.addf %46, %47 : vector<32x1xf32>
    %49 = math.rsqrt %48 : vector<32x1xf32>
    %cst_20 = arith.constant dense<0.000000e+00> : vector<32x1xf32>
    %50 = tpu.matmul %2, %40, %cst_20 {dimension_numbers = #tpu.dot_dimension_numbers<[1], [0], [0], [1], [0, 0, 1, 1], [], []>} : vector<32x32xf32>, vector<32x1xf32>, vector<32x1xf32> -> vector<32x1xf32>
    %cst_21 = arith.constant dense<0.000000e+00> : vector<32x1xf32>
    %51 = tpu.matmul %2, %49, %cst_21 {dimension_numbers = #tpu.dot_dimension_numbers<[1], [0], [0], [1], [0, 0, 1, 1], [], []>} : vector<32x32xf32>, vector<32x1xf32>, vector<32x1xf32> -> vector<32x1xf32>
    %52 = vector.broadcast %50 : vector<32x1xf32> to vector<32x256xf32>
    %53 = arith.subf %0, %52 : vector<32x256xf32>
    %54 = vector.broadcast %51 : vector<32x1xf32> to vector<32x256xf32>
    %55 = arith.mulf %53, %54 : vector<32x256xf32>
    %56 = vector.broadcast %30 : vector<32x1xf32> to vector<32x256xf32>
    %57 = arith.mulf %55, %56 : vector<32x256xf32>
    %58 = vector.broadcast %31 : vector<32x1xf32> to vector<32x256xf32>
    %59 = arith.addf %57, %58 : vector<32x256xf32>
    %60 = arith.negf %59 : vector<32x256xf32>
    %61 = math.exp %60 : vector<32x256xf32>
    %cst_22 = arith.constant 1.000000e+00 : f32
    %62 = vector.broadcast %cst_22 : f32 to vector<32x256xf32>
    %63 = arith.addf %62, %61 : vector<32x256xf32>
    %64 = arith.divf %62, %63 : vector<32x256xf32>
    %65 = arith.mulf %59, %64 : vector<32x256xf32>
    %66 = arith.truncf %65 : vector<32x256xf32> to vector<32x256xbf16>
    %c0_23 = arith.constant 0 : index
    %c0_24 = arith.constant 0 : index
    %67 = vector.load %arg7[%c0_23, %c0_24] : memref<32x1xf32, #tpu.memory_space<vmem>>, vector<32x1xf32>
    %cst_25 = arith.constant 0.000000e+00 : f32
    %68 = vector.broadcast %cst_25 : f32 to vector<32x256xf32>
    %cst_26 = arith.constant 0.000000e+00 : bf16
    %69 = vector.broadcast %cst_26 : bf16 to vector<32x17xbf16>
    %70 = vector.extract_strided_slice %66 {offsets = [0, 0], sizes = [32, 239], strides = [1, 1]} : vector<32x256xbf16> to vector<32x239xbf16>
    %71 = tpu.concatenate %69, %70 in 1 : vector<32x17xbf16>, vector<32x239xbf16> -> vector<32x256xbf16>
    %72 = vector.broadcast %24 : vector<1x256xbf16> to vector<32x256xbf16>
    %73 = arith.mulf %71, %72 : vector<32x256xbf16>
    %c0_27 = arith.constant 0 : index
    %c0_28 = arith.constant 0 : index
    %c0_29 = arith.constant 0 : index
    %74 = vector.load %arg6[%c0_27, %c0_28, %c0_29] : memref<9x32x32xbf16, #tpu.memory_space<vmem>>, vector<1x32x32xbf16>
    %75 = vector.shape_cast %74 : vector<1x32x32xbf16> to vector<32x32xbf16>
    %cst_30 = arith.constant dense<0.000000e+00> : vector<32x256xf32>
    %76 = tpu.matmul %75, %73, %cst_30 {dimension_numbers = #tpu.dot_dimension_numbers<[1], [0], [0], [1], [0, 0, 1, 1], [], []>} : vector<32x32xbf16>, vector<32x256xbf16>, vector<32x256xf32> -> vector<32x256xf32>
    %77 = arith.addf %68, %76 : vector<32x256xf32>
    %cst_31 = arith.constant 0.000000e+00 : bf16
    %78 = vector.broadcast %cst_31 : bf16 to vector<32x16xbf16>
    %79 = vector.extract_strided_slice %66 {offsets = [0, 0], sizes = [32, 240], strides = [1, 1]} : vector<32x256xbf16> to vector<32x240xbf16>
    %80 = tpu.concatenate %78, %79 in 1 : vector<32x16xbf16>, vector<32x240xbf16> -> vector<32x256xbf16>
    %c1 = arith.constant 1 : index
    %c0_32 = arith.constant 0 : index
    %c0_33 = arith.constant 0 : index
    %81 = vector.load %arg6[%c1, %c0_32, %c0_33] : memref<9x32x32xbf16, #tpu.memory_space<vmem>>, vector<1x32x32xbf16>
    %82 = vector.shape_cast %81 : vector<1x32x32xbf16> to vector<32x32xbf16>
    %cst_34 = arith.constant dense<0.000000e+00> : vector<32x256xf32>
    %83 = tpu.matmul %82, %80, %cst_34 {dimension_numbers = #tpu.dot_dimension_numbers<[1], [0], [0], [1], [0, 0, 1, 1], [], []>} : vector<32x32xbf16>, vector<32x256xbf16>, vector<32x256xf32> -> vector<32x256xf32>
    %84 = arith.addf %77, %83 : vector<32x256xf32>
    %cst_35 = arith.constant 0.000000e+00 : bf16
    %85 = vector.broadcast %cst_35 : bf16 to vector<32x15xbf16>
    %86 = vector.extract_strided_slice %66 {offsets = [0, 0], sizes = [32, 241], strides = [1, 1]} : vector<32x256xbf16> to vector<32x241xbf16>
    %87 = tpu.concatenate %85, %86 in 1 : vector<32x15xbf16>, vector<32x241xbf16> -> vector<32x256xbf16>
    %88 = vector.broadcast %29 : vector<1x256xbf16> to vector<32x256xbf16>
    %89 = arith.mulf %87, %88 : vector<32x256xbf16>
    %c2 = arith.constant 2 : index
    %c0_36 = arith.constant 0 : index
    %c0_37 = arith.constant 0 : index
    %90 = vector.load %arg6[%c2, %c0_36, %c0_37] : memref<9x32x32xbf16, #tpu.memory_space<vmem>>, vector<1x32x32xbf16>
    %91 = vector.shape_cast %90 : vector<1x32x32xbf16> to vector<32x32xbf16>
    %cst_38 = arith.constant dense<0.000000e+00> : vector<32x256xf32>
    %92 = tpu.matmul %91, %89, %cst_38 {dimension_numbers = #tpu.dot_dimension_numbers<[1], [0], [0], [1], [0, 0, 1, 1], [], []>} : vector<32x32xbf16>, vector<32x256xbf16>, vector<32x256xf32> -> vector<32x256xf32>
    %93 = arith.addf %84, %92 : vector<32x256xf32>
    %cst_39 = arith.constant 0.000000e+00 : bf16
    %94 = vector.broadcast %cst_39 : bf16 to vector<32x1xbf16>
    %95 = vector.extract_strided_slice %66 {offsets = [0, 0], sizes = [32, 255], strides = [1, 1]} : vector<32x256xbf16> to vector<32x255xbf16>
    %96 = tpu.concatenate %94, %95 in 1 : vector<32x1xbf16>, vector<32x255xbf16> -> vector<32x256xbf16>
    %97 = vector.broadcast %24 : vector<1x256xbf16> to vector<32x256xbf16>
    %98 = arith.mulf %96, %97 : vector<32x256xbf16>
    %c3 = arith.constant 3 : index
    %c0_40 = arith.constant 0 : index
    %c0_41 = arith.constant 0 : index
    %99 = vector.load %arg6[%c3, %c0_40, %c0_41] : memref<9x32x32xbf16, #tpu.memory_space<vmem>>, vector<1x32x32xbf16>
    %100 = vector.shape_cast %99 : vector<1x32x32xbf16> to vector<32x32xbf16>
    %cst_42 = arith.constant dense<0.000000e+00> : vector<32x256xf32>
    %101 = tpu.matmul %100, %98, %cst_42 {dimension_numbers = #tpu.dot_dimension_numbers<[1], [0], [0], [1], [0, 0, 1, 1], [], []>} : vector<32x32xbf16>, vector<32x256xbf16>, vector<32x256xf32> -> vector<32x256xf32>
    %102 = arith.addf %93, %101 : vector<32x256xf32>
    %c4 = arith.constant 4 : index
    %c0_43 = arith.constant 0 : index
    %c0_44 = arith.constant 0 : index
    %103 = vector.load %arg6[%c4, %c0_43, %c0_44] : memref<9x32x32xbf16, #tpu.memory_space<vmem>>, vector<1x32x32xbf16>
    %104 = vector.shape_cast %103 : vector<1x32x32xbf16> to vector<32x32xbf16>
    %cst_45 = arith.constant dense<0.000000e+00> : vector<32x256xf32>
    %105 = tpu.matmul %104, %66, %cst_45 {dimension_numbers = #tpu.dot_dimension_numbers<[1], [0], [0], [1], [0, 0, 1, 1], [], []>} : vector<32x32xbf16>, vector<32x256xbf16>, vector<32x256xf32> -> vector<32x256xf32>
    %106 = arith.addf %102, %105 : vector<32x256xf32>
    %cst_46 = arith.constant 0.000000e+00 : bf16
    %107 = vector.broadcast %cst_46 : bf16 to vector<32x1xbf16>
    %108 = vector.extract_strided_slice %66 {offsets = [0, 1], sizes = [32, 255], strides = [1, 1]} : vector<32x256xbf16> to vector<32x255xbf16>
    %109 = tpu.concatenate %108, %107 in 1 : vector<32x255xbf16>, vector<32x1xbf16> -> vector<32x256xbf16>
    %110 = vector.broadcast %29 : vector<1x256xbf16> to vector<32x256xbf16>
    %111 = arith.mulf %109, %110 : vector<32x256xbf16>
    %c5 = arith.constant 5 : index
    %c0_47 = arith.constant 0 : index
    %c0_48 = arith.constant 0 : index
    %112 = vector.load %arg6[%c5, %c0_47, %c0_48] : memref<9x32x32xbf16, #tpu.memory_space<vmem>>, vector<1x32x32xbf16>
    %113 = vector.shape_cast %112 : vector<1x32x32xbf16> to vector<32x32xbf16>
    %cst_49 = arith.constant dense<0.000000e+00> : vector<32x256xf32>
    %114 = tpu.matmul %113, %111, %cst_49 {dimension_numbers = #tpu.dot_dimension_numbers<[1], [0], [0], [1], [0, 0, 1, 1], [], []>} : vector<32x32xbf16>, vector<32x256xbf16>, vector<32x256xf32> -> vector<32x256xf32>
    %115 = arith.addf %106, %114 : vector<32x256xf32>
    %cst_50 = arith.constant 0.000000e+00 : bf16
    %116 = vector.broadcast %cst_50 : bf16 to vector<32x15xbf16>
    %117 = vector.extract_strided_slice %66 {offsets = [0, 15], sizes = [32, 241], strides = [1, 1]} : vector<32x256xbf16> to vector<32x241xbf16>
    %118 = tpu.concatenate %117, %116 in 1 : vector<32x241xbf16>, vector<32x15xbf16> -> vector<32x256xbf16>
    %119 = vector.broadcast %24 : vector<1x256xbf16> to vector<32x256xbf16>
    %120 = arith.mulf %118, %119 : vector<32x256xbf16>
    %c6 = arith.constant 6 : index
    %c0_51 = arith.constant 0 : index
    %c0_52 = arith.constant 0 : index
    %121 = vector.load %arg6[%c6, %c0_51, %c0_52] : memref<9x32x32xbf16, #tpu.memory_space<vmem>>, vector<1x32x32xbf16>
    %122 = vector.shape_cast %121 : vector<1x32x32xbf16> to vector<32x32xbf16>
    %cst_53 = arith.constant dense<0.000000e+00> : vector<32x256xf32>
    %123 = tpu.matmul %122, %120, %cst_53 {dimension_numbers = #tpu.dot_dimension_numbers<[1], [0], [0], [1], [0, 0, 1, 1], [], []>} : vector<32x32xbf16>, vector<32x256xbf16>, vector<32x256xf32> -> vector<32x256xf32>
    %124 = arith.addf %115, %123 : vector<32x256xf32>
    %cst_54 = arith.constant 0.000000e+00 : bf16
    %125 = vector.broadcast %cst_54 : bf16 to vector<32x16xbf16>
    %126 = vector.extract_strided_slice %66 {offsets = [0, 16], sizes = [32, 240], strides = [1, 1]} : vector<32x256xbf16> to vector<32x240xbf16>
    %127 = tpu.concatenate %126, %125 in 1 : vector<32x240xbf16>, vector<32x16xbf16> -> vector<32x256xbf16>
    %c7 = arith.constant 7 : index
    %c0_55 = arith.constant 0 : index
    %c0_56 = arith.constant 0 : index
    %128 = vector.load %arg6[%c7, %c0_55, %c0_56] : memref<9x32x32xbf16, #tpu.memory_space<vmem>>, vector<1x32x32xbf16>
    %129 = vector.shape_cast %128 : vector<1x32x32xbf16> to vector<32x32xbf16>
    %cst_57 = arith.constant dense<0.000000e+00> : vector<32x256xf32>
    %130 = tpu.matmul %129, %127, %cst_57 {dimension_numbers = #tpu.dot_dimension_numbers<[1], [0], [0], [1], [0, 0, 1, 1], [], []>} : vector<32x32xbf16>, vector<32x256xbf16>, vector<32x256xf32> -> vector<32x256xf32>
    %131 = arith.addf %124, %130 : vector<32x256xf32>
    %cst_58 = arith.constant 0.000000e+00 : bf16
    %132 = vector.broadcast %cst_58 : bf16 to vector<32x17xbf16>
    %133 = vector.extract_strided_slice %66 {offsets = [0, 17], sizes = [32, 239], strides = [1, 1]} : vector<32x256xbf16> to vector<32x239xbf16>
    %134 = tpu.concatenate %133, %132 in 1 : vector<32x239xbf16>, vector<32x17xbf16> -> vector<32x256xbf16>
    %135 = vector.broadcast %29 : vector<1x256xbf16> to vector<32x256xbf16>
    %136 = arith.mulf %134, %135 : vector<32x256xbf16>
    %c8 = arith.constant 8 : index
    %c0_59 = arith.constant 0 : index
    %c0_60 = arith.constant 0 : index
    %137 = vector.load %arg6[%c8, %c0_59, %c0_60] : memref<9x32x32xbf16, #tpu.memory_space<vmem>>, vector<1x32x32xbf16>
    %138 = vector.shape_cast %137 : vector<1x32x32xbf16> to vector<32x32xbf16>
    %cst_61 = arith.constant dense<0.000000e+00> : vector<32x256xf32>
    %139 = tpu.matmul %138, %136, %cst_61 {dimension_numbers = #tpu.dot_dimension_numbers<[1], [0], [0], [1], [0, 0, 1, 1], [], []>} : vector<32x32xbf16>, vector<32x256xbf16>, vector<32x256xf32> -> vector<32x256xf32>
    %140 = arith.addf %131, %139 : vector<32x256xf32>
    %141 = vector.broadcast %67 : vector<32x1xf32> to vector<32x256xf32>
    %142 = arith.addf %140, %141 : vector<32x256xf32>
    %c0_62 = arith.constant 0 : index
    %c0_63 = arith.constant 0 : index
    %143 = vector.load %arg8[%c0_62, %c0_63] : memref<32x1xf32, #tpu.memory_space<vmem>>, vector<32x1xf32>
    %144 = vector.broadcast %143 : vector<32x1xf32> to vector<32x256xf32>
    %145 = arith.addf %142, %144 : vector<32x256xf32>
    %c0_64 = arith.constant 0 : index
    %c0_65 = arith.constant 0 : index
    %146 = vector.load %arg9[%c0_64, %c0_65] : memref<32x1xf32, #tpu.memory_space<vmem>>, vector<32x1xf32>
    %c0_66 = arith.constant 0 : index
    %c0_67 = arith.constant 0 : index
    %147 = vector.load %arg10[%c0_66, %c0_67] : memref<32x1xf32, #tpu.memory_space<vmem>>, vector<32x1xf32>
    %cst_68 = arith.constant dense<0.000000e+00> : vector<32xf32>
    %148 = vector.multi_reduction <add>, %145, %cst_68 [1] : vector<32x256xf32> to vector<32xf32>
    %149 = vector.shape_cast %148 : vector<32xf32> to vector<32x1xf32>
    %150 = arith.mulf %145, %145 : vector<32x256xf32>
    %cst_69 = arith.constant dense<0.000000e+00> : vector<32xf32>
    %151 = vector.multi_reduction <add>, %150, %cst_69 [1] : vector<32x256xf32> to vector<32xf32>
    %152 = vector.shape_cast %151 : vector<32xf32> to vector<32x1xf32>
    %cst_70 = arith.constant dense<0.000000e+00> : vector<32x1xf32>
    %153 = tpu.matmul %1, %149, %cst_70 {dimension_numbers = #tpu.dot_dimension_numbers<[1], [0], [0], [1], [0, 0, 1, 1], [], []>} : vector<32x32xf32>, vector<32x1xf32>, vector<32x1xf32> -> vector<32x1xf32>
    %cst_71 = arith.constant dense<0.000000e+00> : vector<32x1xf32>
    %154 = tpu.matmul %1, %152, %cst_71 {dimension_numbers = #tpu.dot_dimension_numbers<[1], [0], [0], [1], [0, 0, 1, 1], [], []>} : vector<32x32xf32>, vector<32x1xf32>, vector<32x1xf32> -> vector<32x1xf32>
    %cst_72 = arith.constant 2.560000e+02 : f32
    %155 = vector.broadcast %cst_72 : f32 to vector<32x1xf32>
    %156 = arith.divf %153, %155 : vector<32x1xf32>
    %cst_73 = arith.constant 2.560000e+02 : f32
    %157 = vector.broadcast %cst_73 : f32 to vector<32x1xf32>
    %158 = arith.divf %154, %157 : vector<32x1xf32>
    %159 = arith.mulf %156, %156 : vector<32x1xf32>
    %160 = arith.subf %158, %159 : vector<32x1xf32>
    %cst_74 = arith.constant 0.000000e+00 : f32
    %161 = vector.broadcast %cst_74 : f32 to vector<32x1xf32>
    %162 = arith.maximumf %160, %161 : vector<32x1xf32>
    %cst_75 = arith.constant 9.99999997E-7 : f32
    %163 = vector.broadcast %cst_75 : f32 to vector<32x1xf32>
    %164 = arith.addf %162, %163 : vector<32x1xf32>
    %165 = math.rsqrt %164 : vector<32x1xf32>
    %cst_76 = arith.constant dense<0.000000e+00> : vector<32x1xf32>
    %166 = tpu.matmul %2, %156, %cst_76 {dimension_numbers = #tpu.dot_dimension_numbers<[1], [0], [0], [1], [0, 0, 1, 1], [], []>} : vector<32x32xf32>, vector<32x1xf32>, vector<32x1xf32> -> vector<32x1xf32>
    %cst_77 = arith.constant dense<0.000000e+00> : vector<32x1xf32>
    %167 = tpu.matmul %2, %165, %cst_77 {dimension_numbers = #tpu.dot_dimension_numbers<[1], [0], [0], [1], [0, 0, 1, 1], [], []>} : vector<32x32xf32>, vector<32x1xf32>, vector<32x1xf32> -> vector<32x1xf32>
    %168 = vector.broadcast %166 : vector<32x1xf32> to vector<32x256xf32>
    %169 = arith.subf %145, %168 : vector<32x256xf32>
    %170 = vector.broadcast %167 : vector<32x1xf32> to vector<32x256xf32>
    %171 = arith.mulf %169, %170 : vector<32x256xf32>
    %172 = vector.broadcast %146 : vector<32x1xf32> to vector<32x256xf32>
    %173 = arith.mulf %171, %172 : vector<32x256xf32>
    %174 = vector.broadcast %147 : vector<32x1xf32> to vector<32x256xf32>
    %175 = arith.addf %173, %174 : vector<32x256xf32>
    %176 = arith.negf %175 : vector<32x256xf32>
    %177 = math.exp %176 : vector<32x256xf32>
    %cst_78 = arith.constant 1.000000e+00 : f32
    %178 = vector.broadcast %cst_78 : f32 to vector<32x256xf32>
    %179 = arith.addf %178, %177 : vector<32x256xf32>
    %180 = arith.divf %178, %179 : vector<32x256xf32>
    %181 = arith.mulf %175, %180 : vector<32x256xf32>
    %182 = arith.truncf %181 : vector<32x256xf32> to vector<32x256xbf16>
    %c0_79 = arith.constant 0 : index
    %c0_80 = arith.constant 0 : index
    %183 = vector.load %arg12[%c0_79, %c0_80] : memref<32x1xf32, #tpu.memory_space<vmem>>, vector<32x1xf32>
    %cst_81 = arith.constant 0.000000e+00 : f32
    %184 = vector.broadcast %cst_81 : f32 to vector<32x256xf32>
    %cst_82 = arith.constant 0.000000e+00 : bf16
    %185 = vector.broadcast %cst_82 : bf16 to vector<32x17xbf16>
    %186 = vector.extract_strided_slice %182 {offsets = [0, 0], sizes = [32, 239], strides = [1, 1]} : vector<32x256xbf16> to vector<32x239xbf16>
    %187 = tpu.concatenate %185, %186 in 1 : vector<32x17xbf16>, vector<32x239xbf16> -> vector<32x256xbf16>
    %188 = vector.broadcast %24 : vector<1x256xbf16> to vector<32x256xbf16>
    %189 = arith.mulf %187, %188 : vector<32x256xbf16>
    %c0_83 = arith.constant 0 : index
    %c0_84 = arith.constant 0 : index
    %c0_85 = arith.constant 0 : index
    %190 = vector.load %arg11[%c0_83, %c0_84, %c0_85] : memref<9x32x32xbf16, #tpu.memory_space<vmem>>, vector<1x32x32xbf16>
    %191 = vector.shape_cast %190 : vector<1x32x32xbf16> to vector<32x32xbf16>
    %cst_86 = arith.constant dense<0.000000e+00> : vector<32x256xf32>
    %192 = tpu.matmul %191, %189, %cst_86 {dimension_numbers = #tpu.dot_dimension_numbers<[1], [0], [0], [1], [0, 0, 1, 1], [], []>} : vector<32x32xbf16>, vector<32x256xbf16>, vector<32x256xf32> -> vector<32x256xf32>
    %193 = arith.addf %184, %192 : vector<32x256xf32>
    %cst_87 = arith.constant 0.000000e+00 : bf16
    %194 = vector.broadcast %cst_87 : bf16 to vector<32x16xbf16>
    %195 = vector.extract_strided_slice %182 {offsets = [0, 0], sizes = [32, 240], strides = [1, 1]} : vector<32x256xbf16> to vector<32x240xbf16>
    %196 = tpu.concatenate %194, %195 in 1 : vector<32x16xbf16>, vector<32x240xbf16> -> vector<32x256xbf16>
    %c1_88 = arith.constant 1 : index
    %c0_89 = arith.constant 0 : index
    %c0_90 = arith.constant 0 : index
    %197 = vector.load %arg11[%c1_88, %c0_89, %c0_90] : memref<9x32x32xbf16, #tpu.memory_space<vmem>>, vector<1x32x32xbf16>
    %198 = vector.shape_cast %197 : vector<1x32x32xbf16> to vector<32x32xbf16>
    %cst_91 = arith.constant dense<0.000000e+00> : vector<32x256xf32>
    %199 = tpu.matmul %198, %196, %cst_91 {dimension_numbers = #tpu.dot_dimension_numbers<[1], [0], [0], [1], [0, 0, 1, 1], [], []>} : vector<32x32xbf16>, vector<32x256xbf16>, vector<32x256xf32> -> vector<32x256xf32>
    %200 = arith.addf %193, %199 : vector<32x256xf32>
    %cst_92 = arith.constant 0.000000e+00 : bf16
    %201 = vector.broadcast %cst_92 : bf16 to vector<32x15xbf16>
    %202 = vector.extract_strided_slice %182 {offsets = [0, 0], sizes = [32, 241], strides = [1, 1]} : vector<32x256xbf16> to vector<32x241xbf16>
    %203 = tpu.concatenate %201, %202 in 1 : vector<32x15xbf16>, vector<32x241xbf16> -> vector<32x256xbf16>
    %204 = vector.broadcast %29 : vector<1x256xbf16> to vector<32x256xbf16>
    %205 = arith.mulf %203, %204 : vector<32x256xbf16>
    %c2_93 = arith.constant 2 : index
    %c0_94 = arith.constant 0 : index
    %c0_95 = arith.constant 0 : index
    %206 = vector.load %arg11[%c2_93, %c0_94, %c0_95] : memref<9x32x32xbf16, #tpu.memory_space<vmem>>, vector<1x32x32xbf16>
    %207 = vector.shape_cast %206 : vector<1x32x32xbf16> to vector<32x32xbf16>
    %cst_96 = arith.constant dense<0.000000e+00> : vector<32x256xf32>
    %208 = tpu.matmul %207, %205, %cst_96 {dimension_numbers = #tpu.dot_dimension_numbers<[1], [0], [0], [1], [0, 0, 1, 1], [], []>} : vector<32x32xbf16>, vector<32x256xbf16>, vector<32x256xf32> -> vector<32x256xf32>
    %209 = arith.addf %200, %208 : vector<32x256xf32>
    %cst_97 = arith.constant 0.000000e+00 : bf16
    %210 = vector.broadcast %cst_97 : bf16 to vector<32x1xbf16>
    %211 = vector.extract_strided_slice %182 {offsets = [0, 0], sizes = [32, 255], strides = [1, 1]} : vector<32x256xbf16> to vector<32x255xbf16>
    %212 = tpu.concatenate %210, %211 in 1 : vector<32x1xbf16>, vector<32x255xbf16> -> vector<32x256xbf16>
    %213 = vector.broadcast %24 : vector<1x256xbf16> to vector<32x256xbf16>
    %214 = arith.mulf %212, %213 : vector<32x256xbf16>
    %c3_98 = arith.constant 3 : index
    %c0_99 = arith.constant 0 : index
    %c0_100 = arith.constant 0 : index
    %215 = vector.load %arg11[%c3_98, %c0_99, %c0_100] : memref<9x32x32xbf16, #tpu.memory_space<vmem>>, vector<1x32x32xbf16>
    %216 = vector.shape_cast %215 : vector<1x32x32xbf16> to vector<32x32xbf16>
    %cst_101 = arith.constant dense<0.000000e+00> : vector<32x256xf32>
    %217 = tpu.matmul %216, %214, %cst_101 {dimension_numbers = #tpu.dot_dimension_numbers<[1], [0], [0], [1], [0, 0, 1, 1], [], []>} : vector<32x32xbf16>, vector<32x256xbf16>, vector<32x256xf32> -> vector<32x256xf32>
    %218 = arith.addf %209, %217 : vector<32x256xf32>
    %c4_102 = arith.constant 4 : index
    %c0_103 = arith.constant 0 : index
    %c0_104 = arith.constant 0 : index
    %219 = vector.load %arg11[%c4_102, %c0_103, %c0_104] : memref<9x32x32xbf16, #tpu.memory_space<vmem>>, vector<1x32x32xbf16>
    %220 = vector.shape_cast %219 : vector<1x32x32xbf16> to vector<32x32xbf16>
    %cst_105 = arith.constant dense<0.000000e+00> : vector<32x256xf32>
    %221 = tpu.matmul %220, %182, %cst_105 {dimension_numbers = #tpu.dot_dimension_numbers<[1], [0], [0], [1], [0, 0, 1, 1], [], []>} : vector<32x32xbf16>, vector<32x256xbf16>, vector<32x256xf32> -> vector<32x256xf32>
    %222 = arith.addf %218, %221 : vector<32x256xf32>
    %cst_106 = arith.constant 0.000000e+00 : bf16
    %223 = vector.broadcast %cst_106 : bf16 to vector<32x1xbf16>
    %224 = vector.extract_strided_slice %182 {offsets = [0, 1], sizes = [32, 255], strides = [1, 1]} : vector<32x256xbf16> to vector<32x255xbf16>
    %225 = tpu.concatenate %224, %223 in 1 : vector<32x255xbf16>, vector<32x1xbf16> -> vector<32x256xbf16>
    %226 = vector.broadcast %29 : vector<1x256xbf16> to vector<32x256xbf16>
    %227 = arith.mulf %225, %226 : vector<32x256xbf16>
    %c5_107 = arith.constant 5 : index
    %c0_108 = arith.constant 0 : index
    %c0_109 = arith.constant 0 : index
    %228 = vector.load %arg11[%c5_107, %c0_108, %c0_109] : memref<9x32x32xbf16, #tpu.memory_space<vmem>>, vector<1x32x32xbf16>
    %229 = vector.shape_cast %228 : vector<1x32x32xbf16> to vector<32x32xbf16>
    %cst_110 = arith.constant dense<0.000000e+00> : vector<32x256xf32>
    %230 = tpu.matmul %229, %227, %cst_110 {dimension_numbers = #tpu.dot_dimension_numbers<[1], [0], [0], [1], [0, 0, 1, 1], [], []>} : vector<32x32xbf16>, vector<32x256xbf16>, vector<32x256xf32> -> vector<32x256xf32>
    %231 = arith.addf %222, %230 : vector<32x256xf32>
    %cst_111 = arith.constant 0.000000e+00 : bf16
    %232 = vector.broadcast %cst_111 : bf16 to vector<32x15xbf16>
    %233 = vector.extract_strided_slice %182 {offsets = [0, 15], sizes = [32, 241], strides = [1, 1]} : vector<32x256xbf16> to vector<32x241xbf16>
    %234 = tpu.concatenate %233, %232 in 1 : vector<32x241xbf16>, vector<32x15xbf16> -> vector<32x256xbf16>
    %235 = vector.broadcast %24 : vector<1x256xbf16> to vector<32x256xbf16>
    %236 = arith.mulf %234, %235 : vector<32x256xbf16>
    %c6_112 = arith.constant 6 : index
    %c0_113 = arith.constant 0 : index
    %c0_114 = arith.constant 0 : index
    %237 = vector.load %arg11[%c6_112, %c0_113, %c0_114] : memref<9x32x32xbf16, #tpu.memory_space<vmem>>, vector<1x32x32xbf16>
    %238 = vector.shape_cast %237 : vector<1x32x32xbf16> to vector<32x32xbf16>
    %cst_115 = arith.constant dense<0.000000e+00> : vector<32x256xf32>
    %239 = tpu.matmul %238, %236, %cst_115 {dimension_numbers = #tpu.dot_dimension_numbers<[1], [0], [0], [1], [0, 0, 1, 1], [], []>} : vector<32x32xbf16>, vector<32x256xbf16>, vector<32x256xf32> -> vector<32x256xf32>
    %240 = arith.addf %231, %239 : vector<32x256xf32>
    %cst_116 = arith.constant 0.000000e+00 : bf16
    %241 = vector.broadcast %cst_116 : bf16 to vector<32x16xbf16>
    %242 = vector.extract_strided_slice %182 {offsets = [0, 16], sizes = [32, 240], strides = [1, 1]} : vector<32x256xbf16> to vector<32x240xbf16>
    %243 = tpu.concatenate %242, %241 in 1 : vector<32x240xbf16>, vector<32x16xbf16> -> vector<32x256xbf16>
    %c7_117 = arith.constant 7 : index
    %c0_118 = arith.constant 0 : index
    %c0_119 = arith.constant 0 : index
    %244 = vector.load %arg11[%c7_117, %c0_118, %c0_119] : memref<9x32x32xbf16, #tpu.memory_space<vmem>>, vector<1x32x32xbf16>
    %245 = vector.shape_cast %244 : vector<1x32x32xbf16> to vector<32x32xbf16>
    %cst_120 = arith.constant dense<0.000000e+00> : vector<32x256xf32>
    %246 = tpu.matmul %245, %243, %cst_120 {dimension_numbers = #tpu.dot_dimension_numbers<[1], [0], [0], [1], [0, 0, 1, 1], [], []>} : vector<32x32xbf16>, vector<32x256xbf16>, vector<32x256xf32> -> vector<32x256xf32>
    %247 = arith.addf %240, %246 : vector<32x256xf32>
    %cst_121 = arith.constant 0.000000e+00 : bf16
    %248 = vector.broadcast %cst_121 : bf16 to vector<32x17xbf16>
    %249 = vector.extract_strided_slice %182 {offsets = [0, 17], sizes = [32, 239], strides = [1, 1]} : vector<32x256xbf16> to vector<32x239xbf16>
    %250 = tpu.concatenate %249, %248 in 1 : vector<32x239xbf16>, vector<32x17xbf16> -> vector<32x256xbf16>
    %251 = vector.broadcast %29 : vector<1x256xbf16> to vector<32x256xbf16>
    %252 = arith.mulf %250, %251 : vector<32x256xbf16>
    %c8_122 = arith.constant 8 : index
    %c0_123 = arith.constant 0 : index
    %c0_124 = arith.constant 0 : index
    %253 = vector.load %arg11[%c8_122, %c0_123, %c0_124] : memref<9x32x32xbf16, #tpu.memory_space<vmem>>, vector<1x32x32xbf16>
    %254 = vector.shape_cast %253 : vector<1x32x32xbf16> to vector<32x32xbf16>
    %cst_125 = arith.constant dense<0.000000e+00> : vector<32x256xf32>
    %255 = tpu.matmul %254, %252, %cst_125 {dimension_numbers = #tpu.dot_dimension_numbers<[1], [0], [0], [1], [0, 0, 1, 1], [], []>} : vector<32x32xbf16>, vector<32x256xbf16>, vector<32x256xf32> -> vector<32x256xf32>
    %256 = arith.addf %247, %255 : vector<32x256xf32>
    %257 = vector.broadcast %183 : vector<32x1xf32> to vector<32x256xf32>
    %258 = arith.addf %256, %257 : vector<32x256xf32>
    %259 = arith.addf %0, %258 : vector<32x256xf32>
    %260 = arith.truncf %259 : vector<32x256xf32> to vector<32x256xbf16>
    %c0_126 = arith.constant 0 : index
    %c0_127 = arith.constant 0 : index
    %261 = vector.load %arg13[%c0_126, %c0_127] : memref<32x256xbf16, #tpu.memory_space<vmem>>, vector<32x256xbf16>
    tpu.vector_store %arg13[%c0_126, %c0_127], %260 {strides = array<i32>} : memref<32x256xbf16, #tpu.memory_space<vmem>>, vector<32x256xbf16>,
    return
  }
  func.func @transform_0(%arg0: i32) -> (i32, i32) {
    %c0_i32 = arith.constant 0 : i32
    %c0_i32_0 = arith.constant 0 : i32
    return %arg0, %c0_i32 : i32, i32
  }
  func.func @transform_1(%arg0: i32) -> (i32, i32) {
    %c0_i32 = arith.constant 0 : i32
    %c0_i32_0 = arith.constant 0 : i32
    %c0_i32_1 = arith.constant 0 : i32
    return %c0_i32, %c0_i32_0 : i32, i32
  }
  func.func @transform_2(%arg0: i32) -> (i32, i32) {
    %c0_i32 = arith.constant 0 : i32
    %c0_i32_0 = arith.constant 0 : i32
    %c0_i32_1 = arith.constant 0 : i32
    return %c0_i32, %c0_i32_0 : i32, i32
  }
  func.func @transform_3(%arg0: i32) -> (i32, i32) {
    %c0_i32 = arith.constant 0 : i32
    %c0_i32_0 = arith.constant 0 : i32
    %c0_i32_1 = arith.constant 0 : i32
    return %c0_i32, %c0_i32_0 : i32, i32
  }
  func.func @transform_4(%arg0: i32) -> (i32, i32) {
    %c0_i32 = arith.constant 0 : i32
    %c0_i32_0 = arith.constant 0 : i32
    %c0_i32_1 = arith.constant 0 : i32
    return %c0_i32, %c0_i32_0 : i32, i32
  }
  func.func @transform_5(%arg0: i32) -> (i32, i32, i32) {
    %c0_i32 = arith.constant 0 : i32
    %c0_i32_0 = arith.constant 0 : i32
    %c0_i32_1 = arith.constant 0 : i32
    %c0_i32_2 = arith.constant 0 : i32
    return %c0_i32, %c0_i32_0, %c0_i32_1 : i32, i32, i32
  }
  func.func @transform_6(%arg0: i32) -> (i32, i32) {
    %c0_i32 = arith.constant 0 : i32
    %c0_i32_0 = arith.constant 0 : i32
    %c0_i32_1 = arith.constant 0 : i32
    return %c0_i32, %c0_i32_0 : i32, i32
  }
  func.func @transform_7(%arg0: i32) -> (i32, i32) {
    %c0_i32 = arith.constant 0 : i32
    %c0_i32_0 = arith.constant 0 : i32
    return %arg0, %c0_i32 : i32, i32
  }
  func.func @transform_8(%arg0: i32) -> (i32, i32) {
    %c0_i32 = arith.constant 0 : i32
    %c0_i32_0 = arith.constant 0 : i32
    %c0_i32_1 = arith.constant 0 : i32
    return %c0_i32, %c0_i32_0 : i32, i32
  }
  func.func @transform_9(%arg0: i32) -> (i32, i32) {
    %c0_i32 = arith.constant 0 : i32
    %c0_i32_0 = arith.constant 0 : i32
    %c0_i32_1 = arith.constant 0 : i32
    return %c0_i32, %c0_i32_0 : i32, i32
  }
  func.func @transform_10(%arg0: i32) -> (i32, i32, i32) {
    %c0_i32 = arith.constant 0 : i32
    %c0_i32_0 = arith.constant 0 : i32
    %c0_i32_1 = arith.constant 0 : i32
    %c0_i32_2 = arith.constant 0 : i32
    return %c0_i32, %c0_i32_0, %c0_i32_1 : i32, i32, i32
  }
  func.func @transform_11(%arg0: i32) -> (i32, i32) {
    %c0_i32 = arith.constant 0 : i32
    %c0_i32_0 = arith.constant 0 : i32
    %c0_i32_1 = arith.constant 0 : i32
    return %c0_i32, %c0_i32_0 : i32, i32
  }
  func.func @transform_12(%arg0: i32) -> (i32, i32) {
    %c0_i32 = arith.constant 0 : i32
    %c0_i32_0 = arith.constant 0 : i32
    return %arg0, %c0_i32 : i32, i32
  }
}

module attributes {stable_mosaic.version = 11 : i64} {
  func.func @_temporal_block_kernel(%arg0: i32, %arg1: memref<128x256xbf16, #tpu.memory_space<vmem>>, %arg2: memref<32x128xf32, #tpu.memory_space<vmem>>, %arg3: memref<128x32xf32, #tpu.memory_space<vmem>>, %arg4: memref<128x1xf32, #tpu.memory_space<vmem>>, %arg5: memref<128x1xf32, #tpu.memory_space<vmem>>, %arg6: memref<3x32x32xbf16, #tpu.memory_space<vmem>>, %arg7: memref<32x1xf32, #tpu.memory_space<vmem>>, %arg8: memref<32x4xf32, #tpu.memory_space<vmem>>, %arg9: memref<128x1xf32, #tpu.memory_space<vmem>>, %arg10: memref<128x1xf32, #tpu.memory_space<vmem>>, %arg11: memref<3x32x32xbf16, #tpu.memory_space<vmem>>, %arg12: memref<32x1xf32, #tpu.memory_space<vmem>>, %arg13: memref<1x4xf32, #tpu.memory_space<smem>>, %arg14: memref<128x256xf32, #tpu.memory_space<vmem>>) attributes {dimension_semantics = [#tpu.dimension_semantics<parallel>], iteration_bounds = array<i64: 1>, scalar_prefetch = 0 : i64, scratch_operands = 0 : i64, tpu.core_type = #tpu.core_type<tc>, window_params = [{transform_indices = @transform_0, window_bounds = array<i64: 128, 256>}, {pipeline_mode = #tpu.pipeline_mode<synchronous>, transform_indices = @transform_1, window_bounds = array<i64: 32, 128>}, {pipeline_mode = #tpu.pipeline_mode<synchronous>, transform_indices = @transform_2, window_bounds = array<i64: 128, 32>}, {pipeline_mode = #tpu.pipeline_mode<synchronous>, transform_indices = @transform_3, window_bounds = array<i64: 128, 1>}, {pipeline_mode = #tpu.pipeline_mode<synchronous>, transform_indices = @transform_4, window_bounds = array<i64: 128, 1>}, {pipeline_mode = #tpu.pipeline_mode<synchronous>, transform_indices = @transform_5, window_bounds = array<i64: 3, 32, 32>}, {pipeline_mode = #tpu.pipeline_mode<synchronous>, transform_indices = @transform_6, window_bounds = array<i64: 32, 1>}, {transform_indices = @transform_7, window_bounds = array<i64: 32, 4>}, {pipeline_mode = #tpu.pipeline_mode<synchronous>, transform_indices = @transform_8, window_bounds = array<i64: 128, 1>}, {pipeline_mode = #tpu.pipeline_mode<synchronous>, transform_indices = @transform_9, window_bounds = array<i64: 128, 1>}, {pipeline_mode = #tpu.pipeline_mode<synchronous>, transform_indices = @transform_10, window_bounds = array<i64: 3, 32, 32>}, {pipeline_mode = #tpu.pipeline_mode<synchronous>, transform_indices = @transform_11, window_bounds = array<i64: 32, 1>}, {transform_indices = @transform_12, window_bounds = array<i64: 1, 4>}, {transform_indices = @transform_13, window_bounds = array<i64: 128, 256>}]} {
    %c0 = arith.constant 0 : index
    %c0_0 = arith.constant 0 : index
    %0 = vector.load %arg1[%c0, %c0_0] : memref<128x256xbf16, #tpu.memory_space<vmem>>, vector<128x256xbf16>
    %1 = arith.extf %0 : vector<128x256xbf16> to vector<128x256xf32>
    %c0_1 = arith.constant 0 : index
    %c0_2 = arith.constant 0 : index
    %2 = vector.load %arg2[%c0_1, %c0_2] : memref<32x128xf32, #tpu.memory_space<vmem>>, vector<32x128xf32>
    %c0_3 = arith.constant 0 : index
    %c0_4 = arith.constant 0 : index
    %3 = vector.load %arg3[%c0_3, %c0_4] : memref<128x32xf32, #tpu.memory_space<vmem>>, vector<128x32xf32>
    %c0_5 = arith.constant 0 : index
    %c0_6 = arith.constant 0 : index
    %4 = vector.load %arg4[%c0_5, %c0_6] : memref<128x1xf32, #tpu.memory_space<vmem>>, vector<128x1xf32>
    %c0_7 = arith.constant 0 : index
    %c0_8 = arith.constant 0 : index
    %5 = vector.load %arg5[%c0_7, %c0_8] : memref<128x1xf32, #tpu.memory_space<vmem>>, vector<128x1xf32>
    %cst = arith.constant dense<0.000000e+00> : vector<128xf32>
    %6 = vector.multi_reduction <add>, %1, %cst [1] : vector<128x256xf32> to vector<128xf32>
    %7 = vector.shape_cast %6 : vector<128xf32> to vector<128x1xf32>
    %8 = arith.mulf %1, %1 : vector<128x256xf32>
    %cst_9 = arith.constant dense<0.000000e+00> : vector<128xf32>
    %9 = vector.multi_reduction <add>, %8, %cst_9 [1] : vector<128x256xf32> to vector<128xf32>
    %10 = vector.shape_cast %9 : vector<128xf32> to vector<128x1xf32>
    %cst_10 = arith.constant dense<0.000000e+00> : vector<32x1xf32>
    %11 = tpu.matmul %2, %7, %cst_10 {dimension_numbers = #tpu.dot_dimension_numbers<[1], [0], [0], [1], [0, 0, 1, 1], [], []>} : vector<32x128xf32>, vector<128x1xf32>, vector<32x1xf32> -> vector<32x1xf32>
    %cst_11 = arith.constant dense<0.000000e+00> : vector<32x1xf32>
    %12 = tpu.matmul %2, %10, %cst_11 {dimension_numbers = #tpu.dot_dimension_numbers<[1], [0], [0], [1], [0, 0, 1, 1], [], []>} : vector<32x128xf32>, vector<128x1xf32>, vector<32x1xf32> -> vector<32x1xf32>
    %cst_12 = arith.constant 1.024000e+03 : f32
    %13 = vector.broadcast %cst_12 : f32 to vector<32x1xf32>
    %14 = arith.divf %11, %13 : vector<32x1xf32>
    %cst_13 = arith.constant 1.024000e+03 : f32
    %15 = vector.broadcast %cst_13 : f32 to vector<32x1xf32>
    %16 = arith.divf %12, %15 : vector<32x1xf32>
    %17 = arith.mulf %14, %14 : vector<32x1xf32>
    %18 = arith.subf %16, %17 : vector<32x1xf32>
    %cst_14 = arith.constant 0.000000e+00 : f32
    %19 = vector.broadcast %cst_14 : f32 to vector<32x1xf32>
    %20 = arith.maximumf %18, %19 : vector<32x1xf32>
    %cst_15 = arith.constant 9.99999997E-7 : f32
    %21 = vector.broadcast %cst_15 : f32 to vector<32x1xf32>
    %22 = arith.addf %20, %21 : vector<32x1xf32>
    %23 = math.rsqrt %22 : vector<32x1xf32>
    %cst_16 = arith.constant dense<0.000000e+00> : vector<128x1xf32>
    %24 = tpu.matmul %3, %14, %cst_16 {dimension_numbers = #tpu.dot_dimension_numbers<[1], [0], [0], [1], [0, 0, 1, 1], [], []>} : vector<128x32xf32>, vector<32x1xf32>, vector<128x1xf32> -> vector<128x1xf32>
    %cst_17 = arith.constant dense<0.000000e+00> : vector<128x1xf32>
    %25 = tpu.matmul %3, %23, %cst_17 {dimension_numbers = #tpu.dot_dimension_numbers<[1], [0], [0], [1], [0, 0, 1, 1], [], []>} : vector<128x32xf32>, vector<32x1xf32>, vector<128x1xf32> -> vector<128x1xf32>
    %26 = vector.broadcast %24 : vector<128x1xf32> to vector<128x256xf32>
    %27 = arith.subf %1, %26 : vector<128x256xf32>
    %28 = vector.broadcast %25 : vector<128x1xf32> to vector<128x256xf32>
    %29 = arith.mulf %27, %28 : vector<128x256xf32>
    %30 = vector.broadcast %4 : vector<128x1xf32> to vector<128x256xf32>
    %31 = arith.mulf %29, %30 : vector<128x256xf32>
    %32 = vector.broadcast %5 : vector<128x1xf32> to vector<128x256xf32>
    %33 = arith.addf %31, %32 : vector<128x256xf32>
    %34 = arith.negf %33 : vector<128x256xf32>
    %35 = math.exp %34 : vector<128x256xf32>
    %cst_18 = arith.constant 1.000000e+00 : f32
    %36 = vector.broadcast %cst_18 : f32 to vector<128x256xf32>
    %37 = arith.addf %36, %35 : vector<128x256xf32>
    %38 = arith.divf %36, %37 : vector<128x256xf32>
    %39 = arith.mulf %33, %38 : vector<128x256xf32>
    %40 = arith.truncf %39 : vector<128x256xf32> to vector<128x256xbf16>
    %cst_19 = arith.constant 0.000000e+00 : f32
    %41 = vector.broadcast %cst_19 : f32 to vector<32x256xf32>
    %c1 = arith.constant 1 : index
    %c0_20 = arith.constant 0 : index
    %c0_21 = arith.constant 0 : index
    %42 = vector.load %arg6[%c1, %c0_20, %c0_21] : memref<3x32x32xbf16, #tpu.memory_space<vmem>>, vector<1x32x32xbf16>
    %43 = vector.shape_cast %42 : vector<1x32x32xbf16> to vector<32x32xbf16>
    %44 = vector.extract_strided_slice %40 {offsets = [0, 0], sizes = [32, 256], strides = [1, 1]} : vector<128x256xbf16> to vector<32x256xbf16>
    %cst_22 = arith.constant dense<0.000000e+00> : vector<32x256xf32>
    %45 = tpu.matmul %43, %44, %cst_22 {dimension_numbers = #tpu.dot_dimension_numbers<[1], [0], [0], [1], [0, 0, 1, 1], [], []>} : vector<32x32xbf16>, vector<32x256xbf16>, vector<32x256xf32> -> vector<32x256xf32>
    %46 = arith.addf %41, %45 : vector<32x256xf32>
    %c2 = arith.constant 2 : index
    %c0_23 = arith.constant 0 : index
    %c0_24 = arith.constant 0 : index
    %47 = vector.load %arg6[%c2, %c0_23, %c0_24] : memref<3x32x32xbf16, #tpu.memory_space<vmem>>, vector<1x32x32xbf16>
    %48 = vector.shape_cast %47 : vector<1x32x32xbf16> to vector<32x32xbf16>
    %49 = vector.extract_strided_slice %40 {offsets = [32, 0], sizes = [32, 256], strides = [1, 1]} : vector<128x256xbf16> to vector<32x256xbf16>
    %cst_25 = arith.constant dense<0.000000e+00> : vector<32x256xf32>
    %50 = tpu.matmul %48, %49, %cst_25 {dimension_numbers = #tpu.dot_dimension_numbers<[1], [0], [0], [1], [0, 0, 1, 1], [], []>} : vector<32x32xbf16>, vector<32x256xbf16>, vector<32x256xf32> -> vector<32x256xf32>
    %51 = arith.addf %46, %50 : vector<32x256xf32>
    %cst_26 = arith.constant 0.000000e+00 : f32
    %52 = vector.broadcast %cst_26 : f32 to vector<32x256xf32>
    %c0_27 = arith.constant 0 : index
    %c0_28 = arith.constant 0 : index
    %c0_29 = arith.constant 0 : index
    %53 = vector.load %arg6[%c0_27, %c0_28, %c0_29] : memref<3x32x32xbf16, #tpu.memory_space<vmem>>, vector<1x32x32xbf16>
    %54 = vector.shape_cast %53 : vector<1x32x32xbf16> to vector<32x32xbf16>
    %55 = vector.extract_strided_slice %40 {offsets = [0, 0], sizes = [32, 256], strides = [1, 1]} : vector<128x256xbf16> to vector<32x256xbf16>
    %cst_30 = arith.constant dense<0.000000e+00> : vector<32x256xf32>
    %56 = tpu.matmul %54, %55, %cst_30 {dimension_numbers = #tpu.dot_dimension_numbers<[1], [0], [0], [1], [0, 0, 1, 1], [], []>} : vector<32x32xbf16>, vector<32x256xbf16>, vector<32x256xf32> -> vector<32x256xf32>
    %57 = arith.addf %52, %56 : vector<32x256xf32>
    %c1_31 = arith.constant 1 : index
    %c0_32 = arith.constant 0 : index
    %c0_33 = arith.constant 0 : index
    %58 = vector.load %arg6[%c1_31, %c0_32, %c0_33] : memref<3x32x32xbf16, #tpu.memory_space<vmem>>, vector<1x32x32xbf16>
    %59 = vector.shape_cast %58 : vector<1x32x32xbf16> to vector<32x32xbf16>
    %60 = vector.extract_strided_slice %40 {offsets = [32, 0], sizes = [32, 256], strides = [1, 1]} : vector<128x256xbf16> to vector<32x256xbf16>
    %cst_34 = arith.constant dense<0.000000e+00> : vector<32x256xf32>
    %61 = tpu.matmul %59, %60, %cst_34 {dimension_numbers = #tpu.dot_dimension_numbers<[1], [0], [0], [1], [0, 0, 1, 1], [], []>} : vector<32x32xbf16>, vector<32x256xbf16>, vector<32x256xf32> -> vector<32x256xf32>
    %62 = arith.addf %57, %61 : vector<32x256xf32>
    %c2_35 = arith.constant 2 : index
    %c0_36 = arith.constant 0 : index
    %c0_37 = arith.constant 0 : index
    %63 = vector.load %arg6[%c2_35, %c0_36, %c0_37] : memref<3x32x32xbf16, #tpu.memory_space<vmem>>, vector<1x32x32xbf16>
    %64 = vector.shape_cast %63 : vector<1x32x32xbf16> to vector<32x32xbf16>
    %65 = vector.extract_strided_slice %40 {offsets = [64, 0], sizes = [32, 256], strides = [1, 1]} : vector<128x256xbf16> to vector<32x256xbf16>
    %cst_38 = arith.constant dense<0.000000e+00> : vector<32x256xf32>
    %66 = tpu.matmul %64, %65, %cst_38 {dimension_numbers = #tpu.dot_dimension_numbers<[1], [0], [0], [1], [0, 0, 1, 1], [], []>} : vector<32x32xbf16>, vector<32x256xbf16>, vector<32x256xf32> -> vector<32x256xf32>
    %67 = arith.addf %62, %66 : vector<32x256xf32>
    %cst_39 = arith.constant 0.000000e+00 : f32
    %68 = vector.broadcast %cst_39 : f32 to vector<32x256xf32>
    %c0_40 = arith.constant 0 : index
    %c0_41 = arith.constant 0 : index
    %c0_42 = arith.constant 0 : index
    %69 = vector.load %arg6[%c0_40, %c0_41, %c0_42] : memref<3x32x32xbf16, #tpu.memory_space<vmem>>, vector<1x32x32xbf16>
    %70 = vector.shape_cast %69 : vector<1x32x32xbf16> to vector<32x32xbf16>
    %71 = vector.extract_strided_slice %40 {offsets = [32, 0], sizes = [32, 256], strides = [1, 1]} : vector<128x256xbf16> to vector<32x256xbf16>
    %cst_43 = arith.constant dense<0.000000e+00> : vector<32x256xf32>
    %72 = tpu.matmul %70, %71, %cst_43 {dimension_numbers = #tpu.dot_dimension_numbers<[1], [0], [0], [1], [0, 0, 1, 1], [], []>} : vector<32x32xbf16>, vector<32x256xbf16>, vector<32x256xf32> -> vector<32x256xf32>
    %73 = arith.addf %68, %72 : vector<32x256xf32>
    %c1_44 = arith.constant 1 : index
    %c0_45 = arith.constant 0 : index
    %c0_46 = arith.constant 0 : index
    %74 = vector.load %arg6[%c1_44, %c0_45, %c0_46] : memref<3x32x32xbf16, #tpu.memory_space<vmem>>, vector<1x32x32xbf16>
    %75 = vector.shape_cast %74 : vector<1x32x32xbf16> to vector<32x32xbf16>
    %76 = vector.extract_strided_slice %40 {offsets = [64, 0], sizes = [32, 256], strides = [1, 1]} : vector<128x256xbf16> to vector<32x256xbf16>
    %cst_47 = arith.constant dense<0.000000e+00> : vector<32x256xf32>
    %77 = tpu.matmul %75, %76, %cst_47 {dimension_numbers = #tpu.dot_dimension_numbers<[1], [0], [0], [1], [0, 0, 1, 1], [], []>} : vector<32x32xbf16>, vector<32x256xbf16>, vector<32x256xf32> -> vector<32x256xf32>
    %78 = arith.addf %73, %77 : vector<32x256xf32>
    %c2_48 = arith.constant 2 : index
    %c0_49 = arith.constant 0 : index
    %c0_50 = arith.constant 0 : index
    %79 = vector.load %arg6[%c2_48, %c0_49, %c0_50] : memref<3x32x32xbf16, #tpu.memory_space<vmem>>, vector<1x32x32xbf16>
    %80 = vector.shape_cast %79 : vector<1x32x32xbf16> to vector<32x32xbf16>
    %81 = vector.extract_strided_slice %40 {offsets = [96, 0], sizes = [32, 256], strides = [1, 1]} : vector<128x256xbf16> to vector<32x256xbf16>
    %cst_51 = arith.constant dense<0.000000e+00> : vector<32x256xf32>
    %82 = tpu.matmul %80, %81, %cst_51 {dimension_numbers = #tpu.dot_dimension_numbers<[1], [0], [0], [1], [0, 0, 1, 1], [], []>} : vector<32x32xbf16>, vector<32x256xbf16>, vector<32x256xf32> -> vector<32x256xf32>
    %83 = arith.addf %78, %82 : vector<32x256xf32>
    %cst_52 = arith.constant 0.000000e+00 : f32
    %84 = vector.broadcast %cst_52 : f32 to vector<32x256xf32>
    %c0_53 = arith.constant 0 : index
    %c0_54 = arith.constant 0 : index
    %c0_55 = arith.constant 0 : index
    %85 = vector.load %arg6[%c0_53, %c0_54, %c0_55] : memref<3x32x32xbf16, #tpu.memory_space<vmem>>, vector<1x32x32xbf16>
    %86 = vector.shape_cast %85 : vector<1x32x32xbf16> to vector<32x32xbf16>
    %87 = vector.extract_strided_slice %40 {offsets = [64, 0], sizes = [32, 256], strides = [1, 1]} : vector<128x256xbf16> to vector<32x256xbf16>
    %cst_56 = arith.constant dense<0.000000e+00> : vector<32x256xf32>
    %88 = tpu.matmul %86, %87, %cst_56 {dimension_numbers = #tpu.dot_dimension_numbers<[1], [0], [0], [1], [0, 0, 1, 1], [], []>} : vector<32x32xbf16>, vector<32x256xbf16>, vector<32x256xf32> -> vector<32x256xf32>
    %89 = arith.addf %84, %88 : vector<32x256xf32>
    %c1_57 = arith.constant 1 : index
    %c0_58 = arith.constant 0 : index
    %c0_59 = arith.constant 0 : index
    %90 = vector.load %arg6[%c1_57, %c0_58, %c0_59] : memref<3x32x32xbf16, #tpu.memory_space<vmem>>, vector<1x32x32xbf16>
    %91 = vector.shape_cast %90 : vector<1x32x32xbf16> to vector<32x32xbf16>
    %92 = vector.extract_strided_slice %40 {offsets = [96, 0], sizes = [32, 256], strides = [1, 1]} : vector<128x256xbf16> to vector<32x256xbf16>
    %cst_60 = arith.constant dense<0.000000e+00> : vector<32x256xf32>
    %93 = tpu.matmul %91, %92, %cst_60 {dimension_numbers = #tpu.dot_dimension_numbers<[1], [0], [0], [1], [0, 0, 1, 1], [], []>} : vector<32x32xbf16>, vector<32x256xbf16>, vector<32x256xf32> -> vector<32x256xf32>
    %94 = arith.addf %89, %93 : vector<32x256xf32>
    %c0_61 = arith.constant 0 : index
    %c0_62 = arith.constant 0 : index
    %95 = vector.load %arg7[%c0_61, %c0_62] : memref<32x1xf32, #tpu.memory_space<vmem>>, vector<32x1xf32>
    %c0_63 = arith.constant 0 : index
    %c0_64 = arith.constant 0 : index
    %96 = vector.load %arg8[%c0_63, %c0_64] : memref<32x4xf32, #tpu.memory_space<vmem>>, vector<32x4xf32>
    %97 = vector.broadcast %95 : vector<32x1xf32> to vector<32x256xf32>
    %98 = arith.addf %51, %97 : vector<32x256xf32>
    %99 = vector.extract_strided_slice %96 {offsets = [0, 0], sizes = [32, 1], strides = [1, 1]} : vector<32x4xf32> to vector<32x1xf32>
    %100 = vector.broadcast %99 : vector<32x1xf32> to vector<32x256xf32>
    %101 = arith.addf %98, %100 : vector<32x256xf32>
    %102 = vector.broadcast %95 : vector<32x1xf32> to vector<32x256xf32>
    %103 = arith.addf %67, %102 : vector<32x256xf32>
    %104 = vector.extract_strided_slice %96 {offsets = [0, 1], sizes = [32, 1], strides = [1, 1]} : vector<32x4xf32> to vector<32x1xf32>
    %105 = vector.broadcast %104 : vector<32x1xf32> to vector<32x256xf32>
    %106 = arith.addf %103, %105 : vector<32x256xf32>
    %107 = vector.broadcast %95 : vector<32x1xf32> to vector<32x256xf32>
    %108 = arith.addf %83, %107 : vector<32x256xf32>
    %109 = vector.extract_strided_slice %96 {offsets = [0, 2], sizes = [32, 1], strides = [1, 1]} : vector<32x4xf32> to vector<32x1xf32>
    %110 = vector.broadcast %109 : vector<32x1xf32> to vector<32x256xf32>
    %111 = arith.addf %108, %110 : vector<32x256xf32>
    %112 = vector.broadcast %95 : vector<32x1xf32> to vector<32x256xf32>
    %113 = arith.addf %94, %112 : vector<32x256xf32>
    %114 = vector.extract_strided_slice %96 {offsets = [0, 3], sizes = [32, 1], strides = [1, 1]} : vector<32x4xf32> to vector<32x1xf32>
    %115 = vector.broadcast %114 : vector<32x1xf32> to vector<32x256xf32>
    %116 = arith.addf %113, %115 : vector<32x256xf32>
    %117 = tpu.concatenate %101, %106, %111, %116 in 0 : vector<32x256xf32>, vector<32x256xf32>, vector<32x256xf32>, vector<32x256xf32> -> vector<128x256xf32>
    %c0_65 = arith.constant 0 : index
    %c0_66 = arith.constant 0 : index
    %118 = vector.load %arg9[%c0_65, %c0_66] : memref<128x1xf32, #tpu.memory_space<vmem>>, vector<128x1xf32>
    %c0_67 = arith.constant 0 : index
    %c0_68 = arith.constant 0 : index
    %119 = vector.load %arg10[%c0_67, %c0_68] : memref<128x1xf32, #tpu.memory_space<vmem>>, vector<128x1xf32>
    %cst_69 = arith.constant dense<0.000000e+00> : vector<128xf32>
    %120 = vector.multi_reduction <add>, %117, %cst_69 [1] : vector<128x256xf32> to vector<128xf32>
    %121 = vector.shape_cast %120 : vector<128xf32> to vector<128x1xf32>
    %122 = arith.mulf %117, %117 : vector<128x256xf32>
    %cst_70 = arith.constant dense<0.000000e+00> : vector<128xf32>
    %123 = vector.multi_reduction <add>, %122, %cst_70 [1] : vector<128x256xf32> to vector<128xf32>
    %124 = vector.shape_cast %123 : vector<128xf32> to vector<128x1xf32>
    %cst_71 = arith.constant dense<0.000000e+00> : vector<32x1xf32>
    %125 = tpu.matmul %2, %121, %cst_71 {dimension_numbers = #tpu.dot_dimension_numbers<[1], [0], [0], [1], [0, 0, 1, 1], [], []>} : vector<32x128xf32>, vector<128x1xf32>, vector<32x1xf32> -> vector<32x1xf32>
    %cst_72 = arith.constant dense<0.000000e+00> : vector<32x1xf32>
    %126 = tpu.matmul %2, %124, %cst_72 {dimension_numbers = #tpu.dot_dimension_numbers<[1], [0], [0], [1], [0, 0, 1, 1], [], []>} : vector<32x128xf32>, vector<128x1xf32>, vector<32x1xf32> -> vector<32x1xf32>
    %cst_73 = arith.constant 1.024000e+03 : f32
    %127 = vector.broadcast %cst_73 : f32 to vector<32x1xf32>
    %128 = arith.divf %125, %127 : vector<32x1xf32>
    %cst_74 = arith.constant 1.024000e+03 : f32
    %129 = vector.broadcast %cst_74 : f32 to vector<32x1xf32>
    %130 = arith.divf %126, %129 : vector<32x1xf32>
    %131 = arith.mulf %128, %128 : vector<32x1xf32>
    %132 = arith.subf %130, %131 : vector<32x1xf32>
    %cst_75 = arith.constant 0.000000e+00 : f32
    %133 = vector.broadcast %cst_75 : f32 to vector<32x1xf32>
    %134 = arith.maximumf %132, %133 : vector<32x1xf32>
    %cst_76 = arith.constant 9.99999997E-7 : f32
    %135 = vector.broadcast %cst_76 : f32 to vector<32x1xf32>
    %136 = arith.addf %134, %135 : vector<32x1xf32>
    %137 = math.rsqrt %136 : vector<32x1xf32>
    %cst_77 = arith.constant dense<0.000000e+00> : vector<128x1xf32>
    %138 = tpu.matmul %3, %128, %cst_77 {dimension_numbers = #tpu.dot_dimension_numbers<[1], [0], [0], [1], [0, 0, 1, 1], [], []>} : vector<128x32xf32>, vector<32x1xf32>, vector<128x1xf32> -> vector<128x1xf32>
    %cst_78 = arith.constant dense<0.000000e+00> : vector<128x1xf32>
    %139 = tpu.matmul %3, %137, %cst_78 {dimension_numbers = #tpu.dot_dimension_numbers<[1], [0], [0], [1], [0, 0, 1, 1], [], []>} : vector<128x32xf32>, vector<32x1xf32>, vector<128x1xf32> -> vector<128x1xf32>
    %140 = vector.broadcast %138 : vector<128x1xf32> to vector<128x256xf32>
    %141 = arith.subf %117, %140 : vector<128x256xf32>
    %142 = vector.broadcast %139 : vector<128x1xf32> to vector<128x256xf32>
    %143 = arith.mulf %141, %142 : vector<128x256xf32>
    %144 = vector.broadcast %118 : vector<128x1xf32> to vector<128x256xf32>
    %145 = arith.mulf %143, %144 : vector<128x256xf32>
    %146 = vector.broadcast %119 : vector<128x1xf32> to vector<128x256xf32>
    %147 = arith.addf %145, %146 : vector<128x256xf32>
    %148 = arith.negf %147 : vector<128x256xf32>
    %149 = math.exp %148 : vector<128x256xf32>
    %cst_79 = arith.constant 1.000000e+00 : f32
    %150 = vector.broadcast %cst_79 : f32 to vector<128x256xf32>
    %151 = arith.addf %150, %149 : vector<128x256xf32>
    %152 = arith.divf %150, %151 : vector<128x256xf32>
    %153 = arith.mulf %147, %152 : vector<128x256xf32>
    %154 = arith.truncf %153 : vector<128x256xf32> to vector<128x256xbf16>
    %cst_80 = arith.constant 0.000000e+00 : f32
    %155 = vector.broadcast %cst_80 : f32 to vector<32x256xf32>
    %c1_81 = arith.constant 1 : index
    %c0_82 = arith.constant 0 : index
    %c0_83 = arith.constant 0 : index
    %156 = vector.load %arg11[%c1_81, %c0_82, %c0_83] : memref<3x32x32xbf16, #tpu.memory_space<vmem>>, vector<1x32x32xbf16>
    %157 = vector.shape_cast %156 : vector<1x32x32xbf16> to vector<32x32xbf16>
    %158 = vector.extract_strided_slice %154 {offsets = [0, 0], sizes = [32, 256], strides = [1, 1]} : vector<128x256xbf16> to vector<32x256xbf16>
    %cst_84 = arith.constant dense<0.000000e+00> : vector<32x256xf32>
    %159 = tpu.matmul %157, %158, %cst_84 {dimension_numbers = #tpu.dot_dimension_numbers<[1], [0], [0], [1], [0, 0, 1, 1], [], []>} : vector<32x32xbf16>, vector<32x256xbf16>, vector<32x256xf32> -> vector<32x256xf32>
    %160 = arith.addf %155, %159 : vector<32x256xf32>
    %c2_85 = arith.constant 2 : index
    %c0_86 = arith.constant 0 : index
    %c0_87 = arith.constant 0 : index
    %161 = vector.load %arg11[%c2_85, %c0_86, %c0_87] : memref<3x32x32xbf16, #tpu.memory_space<vmem>>, vector<1x32x32xbf16>
    %162 = vector.shape_cast %161 : vector<1x32x32xbf16> to vector<32x32xbf16>
    %163 = vector.extract_strided_slice %154 {offsets = [32, 0], sizes = [32, 256], strides = [1, 1]} : vector<128x256xbf16> to vector<32x256xbf16>
    %cst_88 = arith.constant dense<0.000000e+00> : vector<32x256xf32>
    %164 = tpu.matmul %162, %163, %cst_88 {dimension_numbers = #tpu.dot_dimension_numbers<[1], [0], [0], [1], [0, 0, 1, 1], [], []>} : vector<32x32xbf16>, vector<32x256xbf16>, vector<32x256xf32> -> vector<32x256xf32>
    %165 = arith.addf %160, %164 : vector<32x256xf32>
    %cst_89 = arith.constant 0.000000e+00 : f32
    %166 = vector.broadcast %cst_89 : f32 to vector<32x256xf32>
    %c0_90 = arith.constant 0 : index
    %c0_91 = arith.constant 0 : index
    %c0_92 = arith.constant 0 : index
    %167 = vector.load %arg11[%c0_90, %c0_91, %c0_92] : memref<3x32x32xbf16, #tpu.memory_space<vmem>>, vector<1x32x32xbf16>
    %168 = vector.shape_cast %167 : vector<1x32x32xbf16> to vector<32x32xbf16>
    %169 = vector.extract_strided_slice %154 {offsets = [0, 0], sizes = [32, 256], strides = [1, 1]} : vector<128x256xbf16> to vector<32x256xbf16>
    %cst_93 = arith.constant dense<0.000000e+00> : vector<32x256xf32>
    %170 = tpu.matmul %168, %169, %cst_93 {dimension_numbers = #tpu.dot_dimension_numbers<[1], [0], [0], [1], [0, 0, 1, 1], [], []>} : vector<32x32xbf16>, vector<32x256xbf16>, vector<32x256xf32> -> vector<32x256xf32>
    %171 = arith.addf %166, %170 : vector<32x256xf32>
    %c1_94 = arith.constant 1 : index
    %c0_95 = arith.constant 0 : index
    %c0_96 = arith.constant 0 : index
    %172 = vector.load %arg11[%c1_94, %c0_95, %c0_96] : memref<3x32x32xbf16, #tpu.memory_space<vmem>>, vector<1x32x32xbf16>
    %173 = vector.shape_cast %172 : vector<1x32x32xbf16> to vector<32x32xbf16>
    %174 = vector.extract_strided_slice %154 {offsets = [32, 0], sizes = [32, 256], strides = [1, 1]} : vector<128x256xbf16> to vector<32x256xbf16>
    %cst_97 = arith.constant dense<0.000000e+00> : vector<32x256xf32>
    %175 = tpu.matmul %173, %174, %cst_97 {dimension_numbers = #tpu.dot_dimension_numbers<[1], [0], [0], [1], [0, 0, 1, 1], [], []>} : vector<32x32xbf16>, vector<32x256xbf16>, vector<32x256xf32> -> vector<32x256xf32>
    %176 = arith.addf %171, %175 : vector<32x256xf32>
    %c2_98 = arith.constant 2 : index
    %c0_99 = arith.constant 0 : index
    %c0_100 = arith.constant 0 : index
    %177 = vector.load %arg11[%c2_98, %c0_99, %c0_100] : memref<3x32x32xbf16, #tpu.memory_space<vmem>>, vector<1x32x32xbf16>
    %178 = vector.shape_cast %177 : vector<1x32x32xbf16> to vector<32x32xbf16>
    %179 = vector.extract_strided_slice %154 {offsets = [64, 0], sizes = [32, 256], strides = [1, 1]} : vector<128x256xbf16> to vector<32x256xbf16>
    %cst_101 = arith.constant dense<0.000000e+00> : vector<32x256xf32>
    %180 = tpu.matmul %178, %179, %cst_101 {dimension_numbers = #tpu.dot_dimension_numbers<[1], [0], [0], [1], [0, 0, 1, 1], [], []>} : vector<32x32xbf16>, vector<32x256xbf16>, vector<32x256xf32> -> vector<32x256xf32>
    %181 = arith.addf %176, %180 : vector<32x256xf32>
    %cst_102 = arith.constant 0.000000e+00 : f32
    %182 = vector.broadcast %cst_102 : f32 to vector<32x256xf32>
    %c0_103 = arith.constant 0 : index
    %c0_104 = arith.constant 0 : index
    %c0_105 = arith.constant 0 : index
    %183 = vector.load %arg11[%c0_103, %c0_104, %c0_105] : memref<3x32x32xbf16, #tpu.memory_space<vmem>>, vector<1x32x32xbf16>
    %184 = vector.shape_cast %183 : vector<1x32x32xbf16> to vector<32x32xbf16>
    %185 = vector.extract_strided_slice %154 {offsets = [32, 0], sizes = [32, 256], strides = [1, 1]} : vector<128x256xbf16> to vector<32x256xbf16>
    %cst_106 = arith.constant dense<0.000000e+00> : vector<32x256xf32>
    %186 = tpu.matmul %184, %185, %cst_106 {dimension_numbers = #tpu.dot_dimension_numbers<[1], [0], [0], [1], [0, 0, 1, 1], [], []>} : vector<32x32xbf16>, vector<32x256xbf16>, vector<32x256xf32> -> vector<32x256xf32>
    %187 = arith.addf %182, %186 : vector<32x256xf32>
    %c1_107 = arith.constant 1 : index
    %c0_108 = arith.constant 0 : index
    %c0_109 = arith.constant 0 : index
    %188 = vector.load %arg11[%c1_107, %c0_108, %c0_109] : memref<3x32x32xbf16, #tpu.memory_space<vmem>>, vector<1x32x32xbf16>
    %189 = vector.shape_cast %188 : vector<1x32x32xbf16> to vector<32x32xbf16>
    %190 = vector.extract_strided_slice %154 {offsets = [64, 0], sizes = [32, 256], strides = [1, 1]} : vector<128x256xbf16> to vector<32x256xbf16>
    %cst_110 = arith.constant dense<0.000000e+00> : vector<32x256xf32>
    %191 = tpu.matmul %189, %190, %cst_110 {dimension_numbers = #tpu.dot_dimension_numbers<[1], [0], [0], [1], [0, 0, 1, 1], [], []>} : vector<32x32xbf16>, vector<32x256xbf16>, vector<32x256xf32> -> vector<32x256xf32>
    %192 = arith.addf %187, %191 : vector<32x256xf32>
    %c2_111 = arith.constant 2 : index
    %c0_112 = arith.constant 0 : index
    %c0_113 = arith.constant 0 : index
    %193 = vector.load %arg11[%c2_111, %c0_112, %c0_113] : memref<3x32x32xbf16, #tpu.memory_space<vmem>>, vector<1x32x32xbf16>
    %194 = vector.shape_cast %193 : vector<1x32x32xbf16> to vector<32x32xbf16>
    %195 = vector.extract_strided_slice %154 {offsets = [96, 0], sizes = [32, 256], strides = [1, 1]} : vector<128x256xbf16> to vector<32x256xbf16>
    %cst_114 = arith.constant dense<0.000000e+00> : vector<32x256xf32>
    %196 = tpu.matmul %194, %195, %cst_114 {dimension_numbers = #tpu.dot_dimension_numbers<[1], [0], [0], [1], [0, 0, 1, 1], [], []>} : vector<32x32xbf16>, vector<32x256xbf16>, vector<32x256xf32> -> vector<32x256xf32>
    %197 = arith.addf %192, %196 : vector<32x256xf32>
    %cst_115 = arith.constant 0.000000e+00 : f32
    %198 = vector.broadcast %cst_115 : f32 to vector<32x256xf32>
    %c0_116 = arith.constant 0 : index
    %c0_117 = arith.constant 0 : index
    %c0_118 = arith.constant 0 : index
    %199 = vector.load %arg11[%c0_116, %c0_117, %c0_118] : memref<3x32x32xbf16, #tpu.memory_space<vmem>>, vector<1x32x32xbf16>
    %200 = vector.shape_cast %199 : vector<1x32x32xbf16> to vector<32x32xbf16>
    %201 = vector.extract_strided_slice %154 {offsets = [64, 0], sizes = [32, 256], strides = [1, 1]} : vector<128x256xbf16> to vector<32x256xbf16>
    %cst_119 = arith.constant dense<0.000000e+00> : vector<32x256xf32>
    %202 = tpu.matmul %200, %201, %cst_119 {dimension_numbers = #tpu.dot_dimension_numbers<[1], [0], [0], [1], [0, 0, 1, 1], [], []>} : vector<32x32xbf16>, vector<32x256xbf16>, vector<32x256xf32> -> vector<32x256xf32>
    %203 = arith.addf %198, %202 : vector<32x256xf32>
    %c1_120 = arith.constant 1 : index
    %c0_121 = arith.constant 0 : index
    %c0_122 = arith.constant 0 : index
    %204 = vector.load %arg11[%c1_120, %c0_121, %c0_122] : memref<3x32x32xbf16, #tpu.memory_space<vmem>>, vector<1x32x32xbf16>
    %205 = vector.shape_cast %204 : vector<1x32x32xbf16> to vector<32x32xbf16>
    %206 = vector.extract_strided_slice %154 {offsets = [96, 0], sizes = [32, 256], strides = [1, 1]} : vector<128x256xbf16> to vector<32x256xbf16>
    %cst_123 = arith.constant dense<0.000000e+00> : vector<32x256xf32>
    %207 = tpu.matmul %205, %206, %cst_123 {dimension_numbers = #tpu.dot_dimension_numbers<[1], [0], [0], [1], [0, 0, 1, 1], [], []>} : vector<32x32xbf16>, vector<32x256xbf16>, vector<32x256xf32> -> vector<32x256xf32>
    %208 = arith.addf %203, %207 : vector<32x256xf32>
    %c0_124 = arith.constant 0 : index
    %c0_125 = arith.constant 0 : index
    %209 = vector.load %arg12[%c0_124, %c0_125] : memref<32x1xf32, #tpu.memory_space<vmem>>, vector<32x1xf32>
    %210 = arith.index_cast %arg0 : i32 to index
    %c0_126 = arith.constant 0 : index
    %211 = memref.load %arg13[%210, %c0_126] : memref<1x4xf32, #tpu.memory_space<smem>>
    %212 = vector.extract_strided_slice %1 {offsets = [0, 0], sizes = [32, 256], strides = [1, 1]} : vector<128x256xf32> to vector<32x256xf32>
    %213 = vector.broadcast %209 : vector<32x1xf32> to vector<32x256xf32>
    %214 = arith.addf %165, %213 : vector<32x256xf32>
    %215 = vector.broadcast %211 : f32 to vector<32x256xf32>
    %216 = arith.mulf %215, %214 : vector<32x256xf32>
    %217 = arith.addf %212, %216 : vector<32x256xf32>
    %c0_127 = arith.constant 0 : index
    %c0_128 = arith.constant 0 : index
    %218 = vector.load %arg14[%c0_127, %c0_128] : memref<128x256xf32, #tpu.memory_space<vmem>>, vector<32x256xf32>
    tpu.vector_store %arg14[%c0_127, %c0_128], %217 {strides = array<i32>} : memref<128x256xf32, #tpu.memory_space<vmem>>, vector<32x256xf32>,
    %219 = arith.index_cast %arg0 : i32 to index
    %c1_129 = arith.constant 1 : index
    %220 = memref.load %arg13[%219, %c1_129] : memref<1x4xf32, #tpu.memory_space<smem>>
    %221 = vector.extract_strided_slice %1 {offsets = [32, 0], sizes = [32, 256], strides = [1, 1]} : vector<128x256xf32> to vector<32x256xf32>
    %222 = vector.broadcast %209 : vector<32x1xf32> to vector<32x256xf32>
    %223 = arith.addf %181, %222 : vector<32x256xf32>
    %224 = vector.broadcast %220 : f32 to vector<32x256xf32>
    %225 = arith.mulf %224, %223 : vector<32x256xf32>
    %226 = arith.addf %221, %225 : vector<32x256xf32>
    %c32 = arith.constant 32 : index
    %c0_130 = arith.constant 0 : index
    %227 = vector.load %arg14[%c32, %c0_130] : memref<128x256xf32, #tpu.memory_space<vmem>>, vector<32x256xf32>
    tpu.vector_store %arg14[%c32, %c0_130], %226 {strides = array<i32>} : memref<128x256xf32, #tpu.memory_space<vmem>>, vector<32x256xf32>,
    %228 = arith.index_cast %arg0 : i32 to index
    %c2_131 = arith.constant 2 : index
    %229 = memref.load %arg13[%228, %c2_131] : memref<1x4xf32, #tpu.memory_space<smem>>
    %230 = vector.extract_strided_slice %1 {offsets = [64, 0], sizes = [32, 256], strides = [1, 1]} : vector<128x256xf32> to vector<32x256xf32>
    %231 = vector.broadcast %209 : vector<32x1xf32> to vector<32x256xf32>
    %232 = arith.addf %197, %231 : vector<32x256xf32>
    %233 = vector.broadcast %229 : f32 to vector<32x256xf32>
    %234 = arith.mulf %233, %232 : vector<32x256xf32>
    %235 = arith.addf %230, %234 : vector<32x256xf32>
    %c64 = arith.constant 64 : index
    %c0_132 = arith.constant 0 : index
    %236 = vector.load %arg14[%c64, %c0_132] : memref<128x256xf32, #tpu.memory_space<vmem>>, vector<32x256xf32>
    tpu.vector_store %arg14[%c64, %c0_132], %235 {strides = array<i32>} : memref<128x256xf32, #tpu.memory_space<vmem>>, vector<32x256xf32>,
    %237 = arith.index_cast %arg0 : i32 to index
    %c3 = arith.constant 3 : index
    %238 = memref.load %arg13[%237, %c3] : memref<1x4xf32, #tpu.memory_space<smem>>
    %239 = vector.extract_strided_slice %1 {offsets = [96, 0], sizes = [32, 256], strides = [1, 1]} : vector<128x256xf32> to vector<32x256xf32>
    %240 = vector.broadcast %209 : vector<32x1xf32> to vector<32x256xf32>
    %241 = arith.addf %208, %240 : vector<32x256xf32>
    %242 = vector.broadcast %238 : f32 to vector<32x256xf32>
    %243 = arith.mulf %242, %241 : vector<32x256xf32>
    %244 = arith.addf %239, %243 : vector<32x256xf32>
    %c96 = arith.constant 96 : index
    %c0_133 = arith.constant 0 : index
    %245 = vector.load %arg14[%c96, %c0_133] : memref<128x256xf32, #tpu.memory_space<vmem>>, vector<32x256xf32>
    tpu.vector_store %arg14[%c96, %c0_133], %244 {strides = array<i32>} : memref<128x256xf32, #tpu.memory_space<vmem>>, vector<32x256xf32>,
    return
  }
  func.func @transform_0(%arg0: i32) -> (i32, i32) {
    %c0_i32 = arith.constant 0 : i32
    %c0_i32_0 = arith.constant 0 : i32
    return %arg0, %c0_i32 : i32, i32
  }
  func.func @transform_1(%arg0: i32) -> (i32, i32) {
    %c0_i32 = arith.constant 0 : i32
    %c0_i32_0 = arith.constant 0 : i32
    %c0_i32_1 = arith.constant 0 : i32
    return %c0_i32, %c0_i32_0 : i32, i32
  }
  func.func @transform_2(%arg0: i32) -> (i32, i32) {
    %c0_i32 = arith.constant 0 : i32
    %c0_i32_0 = arith.constant 0 : i32
    %c0_i32_1 = arith.constant 0 : i32
    return %c0_i32, %c0_i32_0 : i32, i32
  }
  func.func @transform_3(%arg0: i32) -> (i32, i32) {
    %c0_i32 = arith.constant 0 : i32
    %c0_i32_0 = arith.constant 0 : i32
    %c0_i32_1 = arith.constant 0 : i32
    return %c0_i32, %c0_i32_0 : i32, i32
  }
  func.func @transform_4(%arg0: i32) -> (i32, i32) {
    %c0_i32 = arith.constant 0 : i32
    %c0_i32_0 = arith.constant 0 : i32
    %c0_i32_1 = arith.constant 0 : i32
    return %c0_i32, %c0_i32_0 : i32, i32
  }
  func.func @transform_5(%arg0: i32) -> (i32, i32, i32) {
    %c0_i32 = arith.constant 0 : i32
    %c0_i32_0 = arith.constant 0 : i32
    %c0_i32_1 = arith.constant 0 : i32
    %c0_i32_2 = arith.constant 0 : i32
    return %c0_i32, %c0_i32_0, %c0_i32_1 : i32, i32, i32
  }
  func.func @transform_6(%arg0: i32) -> (i32, i32) {
    %c0_i32 = arith.constant 0 : i32
    %c0_i32_0 = arith.constant 0 : i32
    %c0_i32_1 = arith.constant 0 : i32
    return %c0_i32, %c0_i32_0 : i32, i32
  }
  func.func @transform_7(%arg0: i32) -> (i32, i32) {
    %c0_i32 = arith.constant 0 : i32
    %c0_i32_0 = arith.constant 0 : i32
    return %arg0, %c0_i32 : i32, i32
  }
  func.func @transform_8(%arg0: i32) -> (i32, i32) {
    %c0_i32 = arith.constant 0 : i32
    %c0_i32_0 = arith.constant 0 : i32
    %c0_i32_1 = arith.constant 0 : i32
    return %c0_i32, %c0_i32_0 : i32, i32
  }
  func.func @transform_9(%arg0: i32) -> (i32, i32) {
    %c0_i32 = arith.constant 0 : i32
    %c0_i32_0 = arith.constant 0 : i32
    %c0_i32_1 = arith.constant 0 : i32
    return %c0_i32, %c0_i32_0 : i32, i32
  }
  func.func @transform_10(%arg0: i32) -> (i32, i32, i32) {
    %c0_i32 = arith.constant 0 : i32
    %c0_i32_0 = arith.constant 0 : i32
    %c0_i32_1 = arith.constant 0 : i32
    %c0_i32_2 = arith.constant 0 : i32
    return %c0_i32, %c0_i32_0, %c0_i32_1 : i32, i32, i32
  }
  func.func @transform_11(%arg0: i32) -> (i32, i32) {
    %c0_i32 = arith.constant 0 : i32
    %c0_i32_0 = arith.constant 0 : i32
    %c0_i32_1 = arith.constant 0 : i32
    return %c0_i32, %c0_i32_0 : i32, i32
  }
  func.func @transform_12(%arg0: i32) -> (i32, i32) {
    %c0_i32 = arith.constant 0 : i32
    %c0_i32_0 = arith.constant 0 : i32
    %c0_i32_1 = arith.constant 0 : i32
    return %c0_i32, %c0_i32_0 : i32, i32
  }
  func.func @transform_13(%arg0: i32) -> (i32, i32) {
    %c0_i32 = arith.constant 0 : i32
    %c0_i32_0 = arith.constant 0 : i32
    return %arg0, %c0_i32 : i32, i32
  }
}

</mosaic_0001>

<bundles_post_ra>
// kernel: tile.34
= control target key start
LH: loop header
LB: loop body
LE: loop exit
PB: predicated region body
PF: predicated region fallthrough
CT: control target
= control target key end

     0   :  { %vm163_vm0 = vcmask 1047556   ;;  %s422_s10 = smov 96   ;;  %vm165_vm1 = vcmask 261120   ;;  %s568_s0 = inlined_call_operand.vmem [shape: f32[32,4,32], index: 0, kind: input, shape index: {}]   ;;  %s569_s1 = inlined_call_operand.hbm [shape: f32[32,128], index: 1, kind: output, shape index: {}]  }
   0x1   :  { %v387_v0 = vld [vmem:[%s568_s0 + $0x1c] sm:$0xf]  ;;  %v388_v1 = vld [vmem:[%s568_s0 + $0x18] sm:$0xf]  ;;  %v389_v2 = vld [vmem:[%s568_s0 + $0x14] sm:$0xf] }
   0x2   :  { %129 = vst [vmem:[#allocation2 + $0x38] sm:$0xf] %v387_v0  ;;  %134 = vst [vmem:[#allocation2 + $0x30] sm:$0xf] %v388_v1  ;;  %v390_v3 = vld [vmem:[%s568_s0 + $0x10] sm:$0xf] }
   0x3   :  { %139 = vst [vmem:[#allocation2 + $0x28] sm:$0xf] %v389_v2  ;;  %v391_v4 = vld [vmem:[%s568_s0 + $0xc] sm:$0xf]  ;;  %v392_v5 = vld [vmem:[%s568_s0 + $0x8] sm:$0xf] }
   0x4   :  { %144 = vst [vmem:[#allocation2 + $0x20] sm:$0xf] %v390_v3  ;;  %149 = vst [vmem:[#allocation2 + $0x18] sm:$0xf] %v391_v4  ;;  %v393_v6 = vld [vmem:[%s568_s0 + $0x4] sm:$0xf] }
   0x5   :  { %154 = vst [vmem:[#allocation2 + $0x10] sm:$0xf] %v392_v5  ;;  %v159_v7 = vld [vmem:[%s568_s0] sm:$0xf]  ;;  %158 = vst [vmem:[#allocation2 + $0x8] sm:$0xf] %v393_v6 }
   0x6   :  { %160 = vst [vmem:[#allocation2] sm:$0xf] %v159_v7  ;;  %v371_v8 = vld [vmem:[%s568_s0 + $0x5c] sm:$0xf]  ;;  %v372_v9 = vld [vmem:[%s568_s0 + $0x58] sm:$0xf] }
   0x7   :  { %v373_v10 = vld [vmem:[%s568_s0 + $0x54] sm:$0xf]  ;;  %49 = vst [vmem:[#allocation2 + $0xb8] sm:$0xf] %v371_v8  ;;  %54 = vst [vmem:[#allocation2 + $0xb0] sm:$0xf] %v372_v9 }
   0x8   :  { %59 = vst [vmem:[#allocation2 + $0xa8] sm:$0xf] %v373_v10  ;;  %v374_v11 = vld [vmem:[%s568_s0 + $0x50] sm:$0xf]  ;;  %v375_v12 = vld [vmem:[%s568_s0 + $0x4c] sm:$0xf] }
   0x9   :  { %v376_v13 = vld [vmem:[%s568_s0 + $0x48] sm:$0xf]  ;;  %64 = vst [vmem:[#allocation2 + $0xa0] sm:$0xf] %v374_v11  ;;  %69 = vst [vmem:[#allocation2 + $0x98] sm:$0xf] %v375_v12 }
   0xa   :  { %74 = vst [vmem:[#allocation2 + $0x90] sm:$0xf] %v376_v13  ;;  %v377_v14 = vld [vmem:[%s568_s0 + $0x44] sm:$0xf]  ;;  %v378_v15 = vld [vmem:[%s568_s0 + $0x40] sm:$0xf] }
   0xb   :  { %v379_v16 = vld [vmem:[%s568_s0 + $0x3c] sm:$0xf]  ;;  %79 = vst [vmem:[#allocation2 + $0x88] sm:$0xf] %v377_v14  ;;  %84 = vst [vmem:[#allocation2 + $0x80] sm:$0xf] %v378_v15 }
   0xc   :  { %89 = vst [vmem:[#allocation2 + $0x78] sm:$0xf] %v379_v16  ;;  %v380_v17 = vld [vmem:[%s568_s0 + $0x38] sm:$0xf]  ;;  %v381_v18 = vld [vmem:[%s568_s0 + $0x34] sm:$0xf] }
   0xd   :  { %v382_v19 = vld [vmem:[%s568_s0 + $0x30] sm:$0xf]  ;;  %94 = vst [vmem:[#allocation2 + $0x70] sm:$0xf] %v380_v17  ;;  %99 = vst [vmem:[#allocation2 + $0x68] sm:$0xf] %v381_v18 }
   0xe   :  { %104 = vst [vmem:[#allocation2 + $0x60] sm:$0xf] %v382_v19  ;;  %v383_v20 = vld [vmem:[%s568_s0 + $0x2c] sm:$0xf]  ;;  %v384_v21 = vld [vmem:[%s568_s0 + $0x28] sm:$0xf] }
   0xf   :  { %v385_v22 = vld [vmem:[%s568_s0 + $0x24] sm:$0xf]  ;;  %109 = vst [vmem:[#allocation2 + $0x58] sm:$0xf] %v383_v20  ;;  %114 = vst [vmem:[#allocation2 + $0x50] sm:$0xf] %v384_v21 }
  0x10   :  { %119 = vst [vmem:[#allocation2 + $0x48] sm:$0xf] %v385_v22  ;;  %v386_v23 = vld [vmem:[%s568_s0 + $0x20] sm:$0xf]  ;;  %v363_v24 = vld [vmem:[%s568_s0 + $0x7c] sm:$0xf] }
  0x11   :  { %v364_v25 = vld [vmem:[%s568_s0 + $0x78] sm:$0xf]  ;;  %124 = vst [vmem:[#allocation2 + $0x40] sm:$0xf] %v386_v23  ;;  %9 = vst [vmem:[#allocation2 + $0xf8] sm:$0xf] %v363_v24 }
  0x12   :  { %v197_v26 = vld [vmem:[#allocation2 + $0x3] ss:$8 sm:$0xf0]   ;;  %14 = vst [vmem:[#allocation2 + $0xf0] sm:$0xf] %v364_v25 }
  0x13   :  { %v365_v27 = vld [vmem:[%s568_s0 + $0x74] sm:$0xf]  ;;  %v195_v28 = vld [vmem:[#allocation2 + $0x3] ss:$8 sm:$0xf]  }
  0x14   :  { %19 = vst [vmem:[#allocation2 + $0xe8] sm:$0xf] %v365_v27  ;;  %v366_v29 = vld [vmem:[%s568_s0 + $0x70] sm:$0xf]  ;;  %v199_v30 = vsel %vm163_vm0, %v197_v26, %v195_v28  ;;  %v367_v31 = vld [vmem:[%s568_s0 + $0x6c] sm:$0xf] }
  0x15   :  { %24 = vst [vmem:[#allocation2 + $0xe0] sm:$0xf] %v366_v29  ;;  %v368_v32 = vld [vmem:[%s568_s0 + $0x68] sm:$0xf]  ;;  %v369_v33 = vld [vmem:[%s568_s0 + $0x64] sm:$0xf]  ;;  %200 = vrot.lane.b32.xlu0 %v199_v30, %s422_s10 }
  0x16   :  { %v218_v34 = vld [vmem:[#allocation2 + $0x83] ss:$8 sm:$0xf0]   ;;  %29 = vst [vmem:[#allocation2 + $0xd8] sm:$0xf] %v367_v31 }
  0x17   :  { %34 = vst [vmem:[#allocation2 + $0xd0] sm:$0xf] %v368_v32  ;;  %39 = vst [vmem:[#allocation2 + $0xc8] sm:$0xf] %v369_v33  ;;  %v370_v35 = vld [vmem:[%s568_s0 + $0x60] sm:$0xf] }
  0x18   :  { %v216_v36 = vld [vmem:[#allocation2 + $0x83] ss:$8 sm:$0xf]   ;;  %44 = vst [vmem:[#allocation2 + $0xc0] sm:$0xf] %v370_v35  ;;  %s423_s0 = smov 64  }
  0x19   :  { %v220_v37 = vsel %vm163_vm0, %v218_v34, %v216_v36  ;;  %v207_v38 = vld [vmem:[#allocation2 + $0x43] ss:$8 sm:$0xf0]   ;;  %v238_v39 = vld [vmem:[#allocation2 + $0x2] ss:$8 sm:$0xf]  }
  0x1a   :  { %221 = vrot.lane.b32.xlu1 %v220_v37, %s422_s10  ;;  %v205_v40 = vld [vmem:[#allocation2 + $0x43] ss:$8 sm:$0xf]   ;;  %v240_v41 = vld [vmem:[#allocation2 + $0x2] ss:$8 sm:$0xf0]  }
  0x1b   :  { %v209_v42 = vsel %vm163_vm0, %v207_v38, %v205_v40  ;;  %v250_v44 = vld [vmem:[#allocation2 + $0x42] ss:$8 sm:$0xf0]   ;;  %v242_v45 = vsel %vm163_vm0, %v240_v41, %v238_v39  ;;  %v281_v52 = vld [vmem:[#allocation2 + $0x1] ss:$8 sm:$0xf]  }
  0x1c   :  { %210 = vrot.lane.b32.xlu0 %v209_v42, %s422_s10  ;;  %v229_v43 = vld [vmem:[#allocation2 + $0xc3] ss:$8 sm:$0xf0]   ;;  %v248_v46 = vld [vmem:[#allocation2 + $0x42] ss:$8 sm:$0xf]  }
  0x1d   :  { %v259_v47 = vld [vmem:[#allocation2 + $0x82] ss:$8 sm:$0xf]   ;;  %v252_v53 = vsel %vm163_vm0, %v250_v44, %v248_v46  ;;  %v283_v55 = vld [vmem:[#allocation2 + $0x1] ss:$8 sm:$0xf0]  }
  0x1e   :  { %v261_v49 = vld [vmem:[#allocation2 + $0x82] ss:$8 sm:$0xf0]   ;;  %v161_v56 = vld [vmem:[#allocation2] ss:$8 sm:$0xf]   ;;  %v285_v5 = vsel %vm163_vm0, %v283_v55, %v281_v52 }
  0x1f   :  { %v227_v48 = vld [vmem:[#allocation2 + $0xc3] ss:$8 sm:$0xf]   ;;  %v272_v51 = vld [vmem:[#allocation2 + $0xc2] ss:$8 sm:$0xf0]   ;;  %v263_v54 = vsel %vm163_vm0, %v261_v49, %v259_v47 }
  0x20   :  { %v231_v50 = vsel %vm163_vm0, %v229_v43, %v227_v48  ;;  %243 = vrot.lane.b32.xlu0 %v242_v45, %s423_s0  ;;  %v270_v57 = vld [vmem:[#allocation2 + $0xc2] ss:$8 sm:$0xf]   ;;  %v162_v58 = vld [vmem:[#allocation2] ss:$8 sm:$0xf0]  }
  0x21   :  { %232 = vrot.lane.b32.xlu1 %v231_v50, %s422_s10  ;;  %v164_v59 = vsel %vm163_vm0, %v162_v58, %v161_v56  ;;  %v177_v60 = vld [vmem:[#allocation2 + $0x80] ss:$8 sm:$0xf]   ;;  %v291_v62 = vld [vmem:[#allocation2 + $0x41] ss:$8 sm:$0xf]   ;;  %v274_v4 = vsel %vm163_vm0, %v272_v51, %v270_v57 }
  0x22   :  { %v179_v61 = vld [vmem:[#allocation2 + $0x80] ss:$8 sm:$0xf0]   ;;  %v293_v63 = vld [vmem:[#allocation2 + $0x41] ss:$8 sm:$0xf0]  }
  0x23   :  { %v302_v0 = vld [vmem:[#allocation2 + $0x81] ss:$8 sm:$0xf]   ;;  %166 = vst.msk [vmem:[#allocation0] sm:$0xff] %vm165_vm1, %v164_v59   ;;  %v181_v1 = vsel %vm163_vm0, %v179_v61, %v177_v60 }
  0x24   :  { %264 = vrot.lane.b32.xlu0 %v263_v54, %s423_s0  ;;  %v168_v2 = vld [vmem:[#allocation2 + $0x40] ss:$8 sm:$0xf]   ;;  %184 = vst.msk [vmem:[#allocation0 + $0x10] sm:$0xff] %vm165_vm1, %v181_v1  }
  0x25   :  { %253 = vrot.lane.b32.xlu1 %v252_v53, %s423_s0  ;;  %v170_v3 = vld [vmem:[#allocation2 + $0x40] ss:$8 sm:$0xf0]   ;;  %v304_v9 = vld [vmem:[#allocation2 + $0x81] ss:$8 sm:$0xf0]  }
  0x26   :  { %v172_v6 = vsel %vm163_vm0, %v170_v3, %v168_v2  ;;  %v186_v7 = vld [vmem:[#allocation2 + $0xc0] ss:$8 sm:$0xf]  }
  0x27   :  { %v188_v8 = vld [vmem:[#allocation2 + $0xc0] ss:$8 sm:$0xf0]   ;;  %175 = vst.msk [vmem:[#allocation0 + $0x8] sm:$0xff] %vm165_vm1, %v172_v6  }
  0x28   :  { %v190_v10 = vsel %vm163_vm0, %v188_v8, %v186_v7 }
  0x29   :  { %2 = vsyncpa [#allocation1], 0  ;;  %193 = vst.msk [vmem:[#allocation0 + $0x18] sm:$0xff] %vm165_vm1, %v190_v10   ;;  %275 = vrot.lane.b32.xlu1 %v274_v4, %s423_s0  ;;  %s424_s13 = smov 32   ;;  %v295_v11 = vsel %vm163_vm0, %v293_v63, %v291_v62  ;;  %v306_v12 = vsel %vm163_vm0, %v304_v9, %v302_v0  ;;  %vm202_vm2 = vcmask 1048320   ;;  %vm245_vm3 = vcmask 785920  }
  0x2a   :  { %286 = vrot.lane.b32.xlu0 %v285_v5, %s424_s13  ;;  %v313_v13 = vld [vmem:[#allocation2 + $0xc1] ss:$8 sm:$0xf]   ;;  %vm288_vm4 = vcmask 523520   ;;  %s425_s14 = smov [#allocation0]  }
  0x2b   :  { %v315_v14 = vld [vmem:[#allocation2 + $0xc1] ss:$8 sm:$0xf0]   ;;  %s327_s15 = sshll.u32 %s425_s14, 4  ;;  %s328_s15 = int_to_ptr.vmem [resolvable:$true] %s327_s15 }
  0x2c   :  { %v317_v15 = vsel %vm163_vm0, %v315_v14, %v313_v13  ;;  %s398_s16 = scalar_lea.vmem %s328_s15, 512  ;;  %p403_p1 = scmp.lt.s32.totalorder %s328_s15, %s328_s15 }
  0x2d   :  { %296 = vrot.lane.b32.xlu1 %v295_v11, %s424_s13  ;;  %p399_p0 = scmp.ne.s32.totalorder %s328_s15, %s398_s16  ;;  %p404_p2 = scmp.lt.s32.totalorder %s398_s16, %s398_s16 }
  0x2e   :  { %307 = vrot.lane.b32.xlu0 %v306_v12, %s424_s13 }
  0x2f   :  { %p405_p3 = por %p404_p2, %p403_p1 }
  0x31   :  { %318 = vrot.lane.b32.xlu1 %v317_v15, %s424_s13  ;;  %p406_p4 = pnand %p405_p3, %p399_p0 }
  0x87   :  { %v201_v16 = vpop.permute.xlu0 %200  }
  0x88   :  { %203 = vst.msk [vmem:[#allocation0] sm:$0xff] %vm202_vm2, %v201_v16  }
  0x8c   :  { %v222_v17 = vpop.permute.xlu1 %221  }
  0x8d   :  { %225 = vst.msk [vmem:[#allocation0 + $0x10] sm:$0xff] %vm202_vm2, %v222_v17  }
  0x8e   :  { %v211_v18 = vpop.permute.xlu0 %210  }
  0x8f   :  { %214 = vst.msk [vmem:[#allocation0 + $0x8] sm:$0xff] %vm202_vm2, %v211_v18  }
  0x92   :  { %v244_v20 = vpop.permute.xlu0 %243  }
  0x93   :  { %v233_v19 = vpop.permute.xlu1 %232   ;;  %246 = vst.msk [vmem:[#allocation0] sm:$0xff] %vm245_vm3, %v244_v20  }
  0x94   :  { %236 = vst.msk [vmem:[#allocation0 + $0x18] sm:$0xff] %vm202_vm2, %v233_v19  }
  0x96   :  { %v265_v22 = vpop.permute.xlu0 %264  }
  0x97   :  { %v254_v21 = vpop.permute.xlu1 %253   ;;  %268 = vst.msk [vmem:[#allocation0 + $0x10] sm:$0xff] %vm245_vm3, %v265_v22  }
  0x98   :  { %257 = vst.msk [vmem:[#allocation0 + $0x8] sm:$0xff] %vm245_vm3, %v254_v21  }
  0x9b   :  { %v276_v23 = vpop.permute.xlu1 %275  }
  0x9c   :  { %v287_v24 = vpop.permute.xlu0 %286   ;;  %279 = vst.msk [vmem:[#allocation0 + $0x18] sm:$0xff] %vm245_vm3, %v276_v23  }
  0x9d   :  { %289 = vst.msk [vmem:[#allocation0] sm:$0xff] %vm288_vm4, %v287_v24  }
  0x9f   :  { %v297_v25 = vpop.permute.xlu1 %296  }
  0xa0   :  { %v308_v26 = vpop.permute.xlu0 %307   ;;  %300 = vst.msk [vmem:[#allocation0 + $0x8] sm:$0xff] %vm288_vm4, %v297_v25  }
  0xa1   :  { %311 = vst.msk [vmem:[#allocation0 + $0x10] sm:$0xff] %vm288_vm4, %v308_v26  }
  0xa3   :  { %v319_v27 = vpop.permute.xlu1 %318  }
  0xa4   :  { %322 = vst.msk [vmem:[#allocation0 + $0x18] sm:$0xff] %vm288_vm4, %v319_v27  }
  0xa5   :  { %409 = shalt.err (!%p406_p4)
}
  0xa6   :  { %s410_s19 = scalar_lea.hbm %s569_s1, 512 }
  0xa7   :  { %p411_p5 = scmp.ne.s32.totalorder %s569_s1, %s410_s19  ;;  %p414_p6 = scmp.lt.u32.totalorder %s410_s19, %s569_s1 }
  0xa9   :  { %p416_p7 = pnand %p414_p6, %p411_p5 }
  0xab   :  { %419 = shalt.err (!%p416_p7)
}
  0xac   :  { %330 = dma.vmem_to_hbm [thread:$0]  %s328_s15, 512, %s569_s1, [#allocation1]  }
  0xad   :  { %420 = dma.done.wait [#allocation1], 512  }
  0xae   :  { %421 = vsyncadd [#allocation1], 4294966784 }
  0xaf   :  { %332 = vsyncpa [#allocation1], 1 }

// kernel: spatio_temporal_res_block.2
= control target key start
LH: loop header
LB: loop body
LE: loop exit
PB: predicated region body
PF: predicated region fallthrough
CT: control target
= control target key end

     0   :  { %s6444_s0 = inlined_call_operand.hbm [shape: f32[128,256], index: 0, kind: input, shape index: {}]   ;;  %s6445_s1 = inlined_call_operand.hbm [shape: f32[32,32], index: 1, kind: input, shape index: {}]   ;;  %s6446_s2 = inlined_call_operand.hbm [shape: f32[32,32], index: 2, kind: input, shape index: {}]   ;;  %s6447_s3 = inlined_call_operand.hbm [shape: f32[32,1], index: 3, kind: input, shape index: {}]   ;;  %s6448_s4 = inlined_call_operand.hbm [shape: f32[32,1], index: 4, kind: input, shape index: {}]   ;;  %s6449_s5 = inlined_call_operand.hbm [shape: bf16[9,32,32], index: 5, kind: input, shape index: {}]   ;;  %s6450_s6 = inlined_call_operand.hbm [shape: f32[32,1], index: 6, kind: input, shape index: {}]   ;;  %s6451_s7 = inlined_call_operand.hbm [shape: f32[128,1], index: 7, kind: input, shape index: {}]   ;;  %s6452_s8 = inlined_call_operand.hbm [shape: f32[32,1], index: 8, kind: input, shape index: {}]   ;;  %s6453_s9 = inlined_call_operand.hbm [shape: f32[32,1], index: 9, kind: input, shape index: {}]   ;;  %s6454_s10 = inlined_call_operand.hbm [shape: bf16[9,32,32], index: 10, kind: input, shape index: {}]   ;;  %s6455_s11 = inlined_call_operand.hbm [shape: f32[32,1], index: 11, kind: input, shape index: {}]   ;;  %s6456_s12 = inlined_call_operand.hbm [shape: bf16[128,256], index: 12, kind: output, shape index: {}]  }
   0x1   :  { %6469 = sst [smem:[#allocation33_spill]] %s6444_s0 }
   0x2   :  { %6470 = sst [smem:[#allocation34_spill]] %s6445_s1 }
   0x3   :  { %6471 = sst [smem:[#allocation35_spill]] %s6446_s2 }
   0x4   :  { %6472 = sst [smem:[#allocation36_spill]] %s6447_s3 }
   0x5   :  { %6473 = sst [smem:[#allocation37_spill]] %s6448_s4 }
   0x6   :  { %6474 = sst [smem:[#allocation38_spill]] %s6449_s5 }
   0x7   :  { %6475 = sst [smem:[#allocation39_spill]] %s6450_s6 }
   0x8   :  { %6476 = sst [smem:[#allocation40_spill]] %s6451_s7 }
   0x9   :  { %6477 = sst [smem:[#allocation41_spill]] %s6452_s8 }
   0xa   :  { %6478 = sst [smem:[#allocation42_spill]] %s6453_s9 }
   0xb   :  { %6479 = sst [smem:[#allocation43_spill]] %s6454_s10 }
   0xc   :  { %6480 = sst [smem:[#allocation44_spill]] %s6455_s11 }
   0xd   :  { %6481 = sst [smem:[#allocation45_spill]] %s6456_s12 }
   0xe   :  { %17 = vsyncpa [#allocation3], 0 }
   0xf   :  { %19 = vsyncpa [#allocation3 + $0x1], 0 }
  0x10   :  { %20 = vsyncpa [#allocation6], 0 }
  0x11   :  { %21 = vsyncpa [#allocation9], 0 }
  0x12   :  { %22 = vsyncpa [#allocation12], 0 }
  0x13   :  { %23 = vsyncpa [#allocation15], 0 }
  0x14   :  { %25 = vsyncpa [#allocation15 + $0x1], 0 }
  0x15   :  { %26 = vsyncpa [#allocation18], 0 }
  0x16   :  { %27 = vsyncpa [#allocation21], 0 }
  0x17   :  { %28 = vsyncpa [#allocation4], 0 }
  0x18   :  { %30 = vsyncpa [#allocation4 + $0x1], 0  ;;  %s5401_s21 = smov 0   ;;  %s5403_s22 = smov 0  }
  0x19   :  { %s5405_s23 = smov 0   ;;  %s5407_s24 = smov 0  }
  0x1a LB: > { %s5305_s25 = smov [#allocation5]   ;;  %s5422_s27 = sadd.s32 4294967295, %s5303_s24   ;;  %s5303_s24 = sphi %s5407_s24, %s6530_s24   ;;  %s5299_s23 = sphi %s5405_s23, %s6529_s23   ;;  %s5295_s22 = sphi %s5403_s22, %s6528_s22   ;;  %s5291_s21 = sphi %s5401_s21, %s6527_s21  }
  0x1b   : > { %s341_s26 = sshll.u32 %s5305_s25, 4  ;;  %p4009_p0 = scmp.ge.s32.totalorder %s5303_s24, 1  ;;  %s5427_s26 = int_to_ptr.vmem [resolvable:$true] %s341_s26 }
  0x1c   : > { %p6465_p1 = scmp.eq.s32.totalorder %s5422_s27, 0  ;;  %p329_p2 = scmp.lt.s32.totalorder %s5303_s24, 5 }
  0x1d   : > { %s5306_s29 = smov [#allocation8]   ;;  %s5307_s14 = smov [#allocation11]  }
  0x1e   : > { %p5429_p3 = pnand %p4009_p0, %p329_p2  ;;  %s367_s30 = sshll.u32 %s5306_s29, 4  ;;  %s5441_s30 = int_to_ptr.vmem [resolvable:$true] %s367_s30 }
  0x1f   : > { %s393_s15 = sshll.u32 %s5307_s14, 4  ;;  %s6485_s1 = sld [smem:[#allocation34_spill]]  ;;  %s5443_s15 = int_to_ptr.vmem [resolvable:$true] %s393_s15 }
  0x20   : > { %s6482_s28 = scalar_select %p5429_p3, 1, 0 }
  0x21   : > { %p4611_p4 = pneg %p5429_p3 }
  0x22   : > { %6483 = sst [smem:[#allocation32_spill]] %s6482_s28 }
  0x23   : > { %p5437_p5 = pnand %p4611_p4, %p6465_p1 }
  0x25   : > { %s4869_s18 = scalar_lea.hbm %s6485_s1, 512  ;;  %p5453_p7 = pneg %p5437_p5 }
  0x26   : > { %p4870_p6 = scmp.ne.s32.totalorder %s6485_s1, %s4869_s18  ;;  %p4876_p10 = scmp.lt.u32.totalorder %s4869_s18, %s6485_s1 }
  0x28   : > { %p4872_p8 = pnand %p5453_p7, %p4870_p6 }
  0x2a   : > { %p4873_p9 = pneg %p4872_p8 }
  0x2c   : > { %p4878_p11 = pnand %p4876_p10, %p4873_p9 }
  0x2e   : > { %4881 = shalt.err (!%p4878_p11)
}
  0x2f   : > { %s4882_s16 = scalar_lea.vmem %s5427_s26, 512  ;;  %p4890_p2 = scmp.lt.s32.totalorder %s5427_s26, %s5427_s26 }
  0x30   : > { %p4883_p12 = scmp.ne.s32.totalorder %s5427_s26, %s4882_s16  ;;  %p4891_p4 = scmp.lt.s32.totalorder %s4882_s16, %s4882_s16 }
  0x32   : > { %p4885_p13 = pnand %p4883_p12, %p5453_p7  ;;  %p4892_p6 = por %p4891_p4, %p4890_p2 }
  0x34   : > { %p4886_p0 = pneg %p4885_p13 }
  0x36   : > { %p4893_p8 = pnand %p4892_p6, %p4886_p0 }
  0x38   : > { %4896 = shalt.err (!%p4893_p8)
}
  0x39   : > { %s6461_s17 = smov 128   ;;  %s6463_s18 = smov 8  }
  0x3a   : > { %4614 = dma.hbm_to_vmem [thread:$0]  (!%p5437_p5), %s6485_s1, 512, %s5427_s26, [#allocation6], %s6461_s17, %s6461_s17, %s6463_s18  }
  0x3b   : > { %s6487_s3 = sld [smem:[#allocation36_spill]] }
  0x41   : > { %s4897_s16 = scalar_lea.hbm %s6487_s3, 512 }
  0x42   : > { %p4898_p9 = scmp.ne.s32.totalorder %s6487_s3, %s4897_s16  ;;  %p4904_p12 = scmp.lt.u32.totalorder %s4897_s16, %s6487_s3 }
  0x44   : > { %p4900_p10 = pnand %p4898_p9, %p5453_p7 }
  0x46   : > { %p4901_p11 = pneg %p4900_p10 }
  0x48   : > { %p4906_p13 = pnand %p4904_p12, %p4901_p11 }
  0x4a   : > { %4909 = shalt.err (!%p4906_p13)
}
  0x4b   : > { %s4910_s26 = scalar_lea.vmem %s5441_s30, 512  ;;  %p4918_p6 = scmp.lt.s32.totalorder %s5441_s30, %s5441_s30 }
  0x4c   : > { %p4911_p0 = scmp.ne.s32.totalorder %s5441_s30, %s4910_s26  ;;  %p4919_p8 = scmp.lt.s32.totalorder %s4910_s26, %s4910_s26 }
  0x4e   : > { %p4913_p2 = pnand %p4911_p0, %p5453_p7  ;;  %p4920_p9 = por %p4919_p8, %p4918_p6 }
  0x50   : > { %p4914_p4 = pneg %p4913_p2 }
  0x52   : > { %p4921_p10 = pnand %p4920_p9, %p4914_p4 }
  0x54   : > { %4924 = shalt.err (!%p4921_p10)
}
  0x55   : > { %4620 = dma.hbm_to_vmem [thread:$0]  (!%p5437_p5), %s6487_s3, 512, %s5441_s30, [#allocation9], %s6461_s17, %s6461_s17, %s6463_s18  }
  0x56   : > { %s6488_s5 = sld [smem:[#allocation38_spill]] }
  0x5c   : > { %s4925_s19 = scalar_lea.hbm %s6488_s5, 2304 }
  0x5d   : > { %p4926_p11 = scmp.ne.s32.totalorder %s6488_s5, %s4925_s19  ;;  %p4932_p0 = scmp.lt.u32.totalorder %s4925_s19, %s6488_s5 }
  0x5f   : > { %p4928_p12 = pnand %p4926_p11, %p5453_p7 }
  0x61   : > { %p4929_p13 = pneg %p4928_p12 }
  0x63   : > { %p4934_p2 = pnand %p4932_p0, %p4929_p13 }
  0x65   : > { %4937 = shalt.err (!%p4934_p2)
}
  0x66   : > { %s4938_s30 = scalar_lea.vmem %s5443_s15, 2304  ;;  %p4946_p9 = scmp.lt.s32.totalorder %s5443_s15, %s5443_s15 }
  0x67   : > { %p4939_p4 = scmp.ne.s32.totalorder %s5443_s15, %s4938_s30  ;;  %p4947_p10 = scmp.lt.s32.totalorder %s4938_s30, %s4938_s30 }
  0x69   : > { %p4941_p6 = pnand %p4939_p4, %p5453_p7  ;;  %p4948_p11 = por %p4947_p10, %p4946_p9 }
  0x6b   : > { %p4942_p8 = pneg %p4941_p6 }
  0x6d   : > { %p4949_p12 = pnand %p4948_p11, %p4942_p8 }
  0x6f   : > { %4952 = shalt.err (!%p4949_p12)
}
  0x70   : > { %s6467_s26 = smov 64   ;;  %s5311_s0 = smov 4  }
  0x71   : > { %4626 = dma.hbm_to_vmem [thread:$0]  (!%p5437_p5), %s6488_s5, 2304, %s5443_s15, [#allocation12], %s6467_s26, %s6467_s26, %s5311_s0  }
  0x72   : > { %s5312_s28 = smov [#allocation16]   ;;  %s5313_s20 = smov [#allocation17]  }
  0x73   : > { %s419_s19 = sshll.u32 %s5312_s28, 4  ;;  %s432_s29 = sshll.u32 %s5313_s20, 4  ;;  %s420_s19 = int_to_ptr.vmem [resolvable:$true] %s419_s19  ;;  %s433_s29 = int_to_ptr.vmem [resolvable:$true] %s432_s29 }
  0x74   : > { %s6489_s8 = sld [smem:[#allocation41_spill]] }
  0x7a   : > { %s4953_s30 = scalar_lea.hbm %s6489_s8, 512 }
  0x7b   : > { %p4954_p13 = scmp.ne.s32.totalorder %s6489_s8, %s4953_s30  ;;  %p4960_p4 = scmp.lt.u32.totalorder %s4953_s30, %s6489_s8 }
  0x7d   : > { %p4956_p0 = pnand %p4954_p13, %p5453_p7 }
  0x7f   : > { %p4957_p2 = pneg %p4956_p0 }
  0x81   : > { %p4962_p6 = pnand %p4960_p4, %p4957_p2 }
  0x83   : > { %4965 = shalt.err (!%p4962_p6)
}
  0x84   : > { %s4966_s15 = scalar_lea.vmem %s420_s19, 512  ;;  %p4974_p11 = scmp.lt.s32.totalorder %s420_s19, %s420_s19 }
  0x85   : > { %p4967_p8 = scmp.ne.s32.totalorder %s420_s19, %s4966_s15  ;;  %p4975_p12 = scmp.lt.s32.totalorder %s4966_s15, %s4966_s15 }
  0x87   : > { %p4969_p9 = pnand %p4967_p8, %p5453_p7  ;;  %p4976_p1 = por %p4975_p12, %p4974_p11 }
  0x89   : > { %p4970_p10 = pneg %p4969_p9 }
  0x8b   : > { %p4977_p3 = pnand %p4976_p1, %p4970_p10 }
  0x8d   : > { %4980 = shalt.err (!%p4977_p3)
}
  0x8e   : > { %s6490_s17 = smov 8   ;;  %s6491_s18 = smov 128  }
  0x8f   : > { %4632 = dma.hbm_to_vmem [thread:$0]  (!%p5437_p5), %s6489_s8, 512, %s420_s19, [#allocation15], %s6491_s18, %s6491_s18, %s6490_s17  }
  0x90   : > { %s6492_s9 = sld [smem:[#allocation42_spill]] }
  0x96   : > { %s4981_s28 = scalar_lea.hbm %s6492_s9, 512 }
  0x97   : > { %p4982_p1 = scmp.ne.s32.totalorder %s6492_s9, %s4981_s28  ;;  %p4988_p0 = scmp.lt.u32.totalorder %s4981_s28, %s6492_s9 }
  0x99   : > { %p4984_p3 = pnand %p4982_p1, %p5453_p7 }
  0x9b   : > { %p4985_p13 = pneg %p4984_p3 }
  0x9d   : > { %p4990_p2 = pnand %p4988_p0, %p4985_p13 }
  0x9f   : > { %4993 = shalt.err (!%p4990_p2)
}
  0xa0   : > { %s4994_s15 = scalar_lea.vmem %s433_s29, 512  ;;  %p5002_p9 = scmp.lt.s32.totalorder %s433_s29, %s433_s29 }
  0xa1   : > { %p4995_p4 = scmp.ne.s32.totalorder %s433_s29, %s4994_s15  ;;  %p5003_p10 = scmp.lt.s32.totalorder %s4994_s15, %s4994_s15 }
  0xa3   : > { %p4997_p6 = pnand %p4995_p4, %p5453_p7  ;;  %p5004_p11 = por %p5003_p10, %p5002_p9 }
  0xa5   : > { %p4998_p8 = pneg %p4997_p6 }
  0xa7   : > { %p5005_p12 = pnand %p5004_p11, %p4998_p8 }
  0xa9   : > { %5008 = shalt.err (!%p5005_p12)
}
  0xaa   : > { %4635 = dma.hbm_to_vmem [thread:$0]  (!%p5437_p5), %s6492_s9, 512, %s433_s29, [#allocation18], %s6491_s18, %s6491_s18, %s6490_s17  }
  0xab   : > { %s5314_s3 = smov [#allocation7]   ;;  %s5315_s12 = smov [#allocation10]  }
  0xac   : > { %s354_s7 = sshll.u32 %s5314_s3, 4  ;;  %s380_s28 = sshll.u32 %s5315_s12, 4  ;;  %s355_s7 = int_to_ptr.vmem [resolvable:$true] %s354_s7  ;;  %s381_s28 = int_to_ptr.vmem [resolvable:$true] %s380_s28 }
  0xad   : > { %s6493_s2 = sld [smem:[#allocation35_spill]] }
  0xb3   : > { %s5009_s16 = scalar_lea.hbm %s6493_s2, 512 }
  0xb4   : > { %p5010_p1 = scmp.ne.s32.totalorder %s6493_s2, %s5009_s16  ;;  %p5016_p0 = scmp.lt.u32.totalorder %s5009_s16, %s6493_s2 }
  0xb6   : > { %p5012_p3 = pnand %p5010_p1, %p5453_p7 }
  0xb8   : > { %p5013_p13 = pneg %p5012_p3 }
  0xba   : > { %p5018_p2 = pnand %p5016_p0, %p5013_p13 }
  0xbc   : > { %5021 = shalt.err (!%p5018_p2)
}
  0xbd   : > { %s5022_s29 = scalar_lea.vmem %s355_s7, 512  ;;  %p5030_p9 = scmp.lt.s32.totalorder %s355_s7, %s355_s7 }
  0xbe   : > { %p5023_p4 = scmp.ne.s32.totalorder %s355_s7, %s5022_s29  ;;  %p5031_p10 = scmp.lt.s32.totalorder %s5022_s29, %s5022_s29 }
  0xc0   : > { %p5025_p6 = pnand %p5023_p4, %p5453_p7  ;;  %p5032_p11 = por %p5031_p10, %p5030_p9 }
  0xc2   : > { %p5026_p8 = pneg %p5025_p6 }
  0xc4   : > { %p5033_p12 = pnand %p5032_p11, %p5026_p8 }
  0xc6   : > { %5036 = shalt.err (!%p5033_p12)
}
  0xc7   : > { %4617 = dma.hbm_to_vmem [thread:$0]  (!%p5437_p5), %s6493_s2, 512, %s355_s7, [#allocation6], %s6491_s18, %s6491_s18, %s6490_s17  }
  0xc8   : > { %s6494_s4 = sld [smem:[#allocation37_spill]] }
  0xce   : > { %s5037_s20 = scalar_lea.hbm %s6494_s4, 512 }
  0xcf   : > { %p5038_p1 = scmp.ne.s32.totalorder %s6494_s4, %s5037_s20  ;;  %p5044_p0 = scmp.lt.u32.totalorder %s5037_s20, %s6494_s4 }
  0xd1   : > { %p5040_p3 = pnand %p5038_p1, %p5453_p7 }
  0xd3   : > { %p5041_p13 = pneg %p5040_p3 }
  0xd5   : > { %p5046_p2 = pnand %p5044_p0, %p5041_p13 }
  0xd7   : > { %5049 = shalt.err (!%p5046_p2)
}
  0xd8   : > { %s5050_s19 = scalar_lea.vmem %s381_s28, 512  ;;  %p5058_p9 = scmp.lt.s32.totalorder %s381_s28, %s381_s28 }
  0xd9   : > { %p5051_p4 = scmp.ne.s32.totalorder %s381_s28, %s5050_s19  ;;  %p5059_p10 = scmp.lt.s32.totalorder %s5050_s19, %s5050_s19 }
  0xdb   : > { %p5053_p6 = pnand %p5051_p4, %p5453_p7  ;;  %p5060_p11 = por %p5059_p10, %p5058_p9 }
  0xdd   : > { %p5054_p8 = pneg %p5053_p6 }
  0xdf   : > { %p5061_p12 = pnand %p5060_p11, %p5054_p8 }
  0xe1   : > { %5064 = shalt.err (!%p5061_p12)
}
  0xe2   : > { %4623 = dma.hbm_to_vmem [thread:$0]  (!%p5437_p5), %s6494_s4, 512, %s381_s28, [#allocation9], %s6491_s18, %s6491_s18, %s6490_s17  }
  0xe3   : > { %s5316_s26 = smov [#allocation13]   ;;  %s5317_s3 = smov [#allocation19]  }
  0xe4   : > { %s406_s1 = sshll.u32 %s5316_s26, 4  ;;  %s445_s12 = sshll.u32 %s5317_s3, 4  ;;  %s407_s1 = int_to_ptr.vmem [resolvable:$true] %s406_s1  ;;  %s446_s12 = int_to_ptr.vmem [resolvable:$true] %s445_s12 }
  0xe5   : > { %s6495_s6 = sld [smem:[#allocation39_spill]] }
  0xeb   : > { %s5065_s16 = scalar_lea.hbm %s6495_s6, 512 }
  0xec   : > { %p5066_p1 = scmp.ne.s32.totalorder %s6495_s6, %s5065_s16  ;;  %p5072_p0 = scmp.lt.u32.totalorder %s5065_s16, %s6495_s6 }
  0xee   : > { %p5068_p3 = pnand %p5066_p1, %p5453_p7 }
  0xf0   : > { %p5069_p13 = pneg %p5068_p3 }
  0xf2   : > { %p5074_p2 = pnand %p5072_p0, %p5069_p13 }
  0xf4   : > { %5077 = shalt.err (!%p5074_p2)
}
  0xf5   : > { %s5078_s28 = scalar_lea.vmem %s407_s1, 512  ;;  %p5086_p9 = scmp.lt.s32.totalorder %s407_s1, %s407_s1 }
  0xf6   : > { %p5079_p4 = scmp.ne.s32.totalorder %s407_s1, %s5078_s28  ;;  %p5087_p10 = scmp.lt.s32.totalorder %s5078_s28, %s5078_s28 }
  0xf8   : > { %p5081_p6 = pnand %p5079_p4, %p5453_p7  ;;  %p5088_p11 = por %p5087_p10, %p5086_p9 }
  0xfa   : > { %p5082_p8 = pneg %p5081_p6 }
  0xfc   : > { %p5089_p12 = pnand %p5088_p11, %p5082_p8 }
  0xfe   : > { %5092 = shalt.err (!%p5089_p12)
}
  0xff   : > { %4629 = dma.hbm_to_vmem [thread:$0]  (!%p5437_p5), %s6495_s6, 512, %s407_s1, [#allocation12], %s6491_s18, %s6491_s18, %s6490_s17  }
 0x100   : > { %s6496_s10 = sld [smem:[#allocation43_spill]] }
 0x106   : > { %s5093_s14 = scalar_lea.hbm %s6496_s10, 2304 }
 0x107   : > { %p5094_p1 = scmp.ne.s32.totalorder %s6496_s10, %s5093_s14  ;;  %p5100_p0 = scmp.lt.u32.totalorder %s5093_s14, %s6496_s10 }
 0x109   : > { %p5096_p3 = pnand %p5094_p1, %p5453_p7 }
 0x10b   : > { %p5097_p13 = pneg %p5096_p3 }
 0x10d   : > { %p5102_p2 = pnand %p5100_p0, %p5097_p13 }
 0x10f   : > { %5105 = shalt.err (!%p5102_p2)
}
 0x110   : > { %s5106_s7 = scalar_lea.vmem %s446_s12, 2304  ;;  %p5114_p9 = scmp.lt.s32.totalorder %s446_s12, %s446_s12 }
 0x111   : > { %p5107_p4 = scmp.ne.s32.totalorder %s446_s12, %s5106_s7  ;;  %p5115_p10 = scmp.lt.s32.totalorder %s5106_s7, %s5106_s7 }
 0x113   : > { %p5109_p6 = pnand %p5107_p4, %p5453_p7  ;;  %p5116_p11 = por %p5115_p10, %p5114_p9 }
 0x115   : > { %p5110_p8 = pneg %p5109_p6 }
 0x117   : > { %p5117_p12 = pnand %p5116_p11, %p5110_p8 }
 0x119   : > { %5120 = shalt.err (!%p5117_p12)
}
 0x11a   : > { %s6497_s1 = smov 64   ;;  %s5318_s26 = smov [#allocation20]  }
 0x11b   : > { %4638 = dma.hbm_to_vmem [thread:$0]  (!%p5437_p5), %s6496_s10, 2304, %s446_s12, [#allocation18], %s6497_s1, %s6497_s1, %s5311_s0  }
 0x11c   : > { %s458_s3 = sshll.u32 %s5318_s26, 4  ;;  %s6498_s11 = sld [smem:[#allocation44_spill]]  ;;  %s459_s3 = int_to_ptr.vmem [resolvable:$true] %s458_s3 }
 0x122   : > { %s5121_s16 = scalar_lea.hbm %s6498_s11, 512 }
 0x123   : > { %p5122_p1 = scmp.ne.s32.totalorder %s6498_s11, %s5121_s16  ;;  %p5128_p0 = scmp.lt.u32.totalorder %s5121_s16, %s6498_s11 }
 0x125   : > { %p5124_p3 = pnand %p5122_p1, %p5453_p7 }
 0x127   : > { %p5125_p13 = pneg %p5124_p3 }
 0x129   : > { %p5130_p2 = pnand %p5128_p0, %p5125_p13 }
 0x12b   : > { %5133 = shalt.err (!%p5130_p2)
}
 0x12c   : > { %s5134_s0 = scalar_lea.vmem %s459_s3, 512  ;;  %p5142_p9 = scmp.lt.s32.totalorder %s459_s3, %s459_s3 }
 0x12d   : > { %p5135_p4 = scmp.ne.s32.totalorder %s459_s3, %s5134_s0  ;;  %p5143_p10 = scmp.lt.s32.totalorder %s5134_s0, %s5134_s0 }
 0x12f   : > { %p5137_p6 = pnand %p5135_p4, %p5453_p7  ;;  %p5144_p11 = por %p5143_p10, %p5142_p9 }
 0x131   : > { %p5138_p8 = pneg %p5137_p6 }
 0x133   : > { %p5145_p12 = pnand %p5144_p11, %p5138_p8 }
 0x135   : > { %5148 = shalt.err (!%p5145_p12)
}
 0x136   : > { %4641 = dma.hbm_to_vmem [thread:$0]  (!%p5437_p5), %s6498_s11, 512, %s459_s3, [#allocation21], %s6491_s18, %s6491_s18, %s6490_s17  }
 0x137   : > { %s4008_s13 = sadd.s32 4294967294, %s5303_s24   ;;  %s5678_s25 = sadd.s32 1, %s5303_s24  }
 0x138   : > { %s40_s28 = ssub.s32 %s5303_s24, %s5678_s25  ;;  %s43_s29 = sadd.s32 1, %s5299_s23 }
 0x139   : > { %p41_p7 = scmp.eq.s32.totalorder %s40_s28, 0  ;;  %p50_p1 = scmp.ne.s32.totalorder %s5299_s23, %s5295_s22 }
 0x13a   : > { %p51_p3 = scmp.eq.s32.totalorder %s5303_s24, 0  ;;  %p56_p13 = scmp.ne.s32.totalorder %s5295_s22, %s5291_s21 }
 0x13b   : > { %s5689_s26 = scalar_select %p41_p7, %s5299_s23, %s43_s29  }
 0x13c   : > { %p5691_p0 = por %p51_p3, %p50_p1  ;;  %p6500_p2 = scmp.eq.s32.totalorder %s5422_s27, 0 }
 0x13d   : > { %p316_p4 = scmp.eq.s32.totalorder %s5422_s27, 3  ;;  %p322_p6 = scmp.eq.s32.totalorder %s4008_s13, 3 }
 0x13e   : > { %p5697_p5 = por %p6500_p2, %p56_p13  ;;  %p4663_p8 = scmp.lt.s32.totalorder %s5303_s24, 4 }
 0x13f   : > { %s5704_s14 = sand.u32 1, %s5299_s23   ;;  %p5706_p9 = por %p316_p4, %p50_p1 }
 0x140   : > { %p5710_p10 = por %p322_p6, %p56_p13  ;;  %s4021_s15 = sshll.u32 %s5704_s14, 6 }
 0x141   : > { %s6502_s16 = scalar_select %p5706_p9, 1, 0 }
 0x142   : > { %s6503_s30 = scalar_select %p5710_p10, 1, 0 }
 0x143   : > { %s4189_s19 = sshll.u32 %s5303_s24, 10  ;;  %s6504_s12 = sld [smem:[#allocation33_spill]] }
 0x144   : > { %s476_s13 = scalar_lea.vmem [#allocation2], %s4021_s15  ;;  %p5725_p11 = pnand %p4663_p8, %p5691_p0 }
 0x145   : > { %s484_s28 = sshll.u32 %s476_s13, 4  ;;  %s473_s4 = scalar_lea.sflag [#allocation3], %s5704_s14  ;;  %s5721_s28 = int_to_ptr.vmem [resolvable:$true] %s484_s28 }
 0x146   : > { %p5151_p7 = pneg %p5725_p11 }
 0x149   : > { %s5719_s1 = scalar_lea.hbm %s6504_s12, %s4189_s19  ;;  %s5154_s20 = scalar_lea.hbm %s6504_s12, 4096 }
 0x14a   : > { %s5149_s7 = scalar_lea.hbm %s5719_s1, 1024  ;;  %p5155_p13 = scmp.lt.u32.totalorder %s5719_s1, %s6504_s12 }
 0x14b   : > { %p5150_p12 = scmp.ne.s32.totalorder %s5719_s1, %s5149_s7  ;;  %p5156_p0 = scmp.lt.u32.totalorder %s5154_s20, %s5149_s7 }
 0x14c   : > { %p5158_p4 = scmp.lt.u32.totalorder %s5149_s7, %s5719_s1 }
 0x14d   : > { %p5152_p1 = pnand %p5151_p7, %p5150_p12  ;;  %p5157_p2 = por %p5156_p0, %p5155_p13 }
 0x14f   : > { %p5153_p3 = pneg %p5152_p1  ;;  %p5159_p6 = por %p5158_p4, %p5157_p2 }
 0x151   : > { %p5160_p8 = pnand %p5159_p6, %p5153_p3 }
 0x153   : > { %5163 = shalt.err (!%p5160_p8)
}
 0x154   : > { %s5164_s2 = scalar_lea.vmem %s5721_s28, 1024  ;;  %s5319_s15 = smov [#allocation2]  }
 0x155   : > { %p5165_p12 = scmp.ne.s32.totalorder %s5721_s28, %s5164_s2  ;;  %s5169_s19 = sshll.u32 %s5319_s15, 4  ;;  %s5170_s19 = int_to_ptr.vmem [resolvable:$false] %s5169_s19 }
 0x156   : > { %s5171_s0 = scalar_lea.vmem %s5170_s19, 2048  ;;  %p5172_p9 = scmp.lt.s32.totalorder %s5721_s28, %s5170_s19 }
 0x157   : > { %p5167_p1 = pnand %p5165_p12, %p5151_p7  ;;  %p5173_p13 = scmp.lt.s32.totalorder %s5171_s0, %s5164_s2 }
 0x159   : > { %p5168_p10 = pneg %p5167_p1  ;;  %p5174_p0 = por %p5173_p13, %p5172_p9 }
 0x15b   : > { %p5175_p2 = pnand %p5174_p0, %p5168_p10 }
 0x15d   : > { %5178 = shalt.err (!%p5175_p2)
}
 0x15e   : > { %s5320_s7 = smov 256   ;;  %s5321_s20 = smov 16  }
 0x15f   : > { %4645 = dma.hbm_to_vmem [thread:$0]  (!%p5725_p11), %s5719_s1, 1024, %s5721_s28, %s473_s4, %s5320_s7, %s5320_s7, %s5321_s20  }
 0x160   : > { %s4025_s13 = sshll.u32 %s5704_s14, 5  ;;  %s4190_s15 = sshll.u32 %s5303_s24, 9 }
 0x161   : > { %s6506_s0 = sld [smem:[#allocation40_spill]]  ;;  %s498_s6 = scalar_lea.vmem [#allocation14], %s4025_s13 }
 0x162   : > { %s505_s8 = sshll.u32 %s498_s6, 4  ;;  %s6507_s9 = sand.u32 1, %s5303_s24   ;;  %s5765_s8 = int_to_ptr.vmem [resolvable:$true] %s505_s8 }
 0x163   : > { %s5769_s10 = scalar_lea.sflag [#allocation15], %s6507_s9 }
 0x167   : > { %s5763_s5 = scalar_lea.hbm %s6506_s0, %s4190_s15  ;;  %s5184_s1 = scalar_lea.hbm %s6506_s0, 2048 }
 0x168   : > { %s5179_s11 = scalar_lea.hbm %s5763_s5, 512  ;;  %p5185_p4 = scmp.lt.u32.totalorder %s5763_s5, %s6506_s0 }
 0x169   : > { %p5180_p9 = scmp.ne.s32.totalorder %s5763_s5, %s5179_s11  ;;  %p5186_p6 = scmp.lt.u32.totalorder %s5184_s1, %s5179_s11 }
 0x16a   : > { %p5188_p12 = scmp.lt.u32.totalorder %s5179_s11, %s5763_s5 }
 0x16b   : > { %p5182_p10 = pnand %p5180_p9, %p5151_p7  ;;  %p5187_p8 = por %p5186_p6, %p5185_p4 }
 0x16d   : > { %p5183_p3 = pneg %p5182_p10  ;;  %p5189_p1 = por %p5188_p12, %p5187_p8 }
 0x16f   : > { %p5190_p13 = pnand %p5189_p1, %p5183_p3 }
 0x171   : > { %5193 = shalt.err (!%p5190_p13)
}
 0x172   : > { %s5194_s6 = scalar_lea.vmem %s5765_s8, 512  ;;  %s5322_s9 = smov [#allocation14]  }
 0x173   : > { %p5195_p0 = scmp.ne.s32.totalorder %s5765_s8, %s5194_s6  ;;  %s5199_s20 = sshll.u32 %s5322_s9, 4  ;;  %s5200_s20 = int_to_ptr.vmem [resolvable:$false] %s5199_s20 }
 0x174   : > { %s5201_s13 = scalar_lea.vmem %s5200_s20, 1024  ;;  %p5202_p10 = scmp.lt.s32.totalorder %s5765_s8, %s5200_s20 }
 0x175   : > { %p5197_p2 = pnand %p5195_p0, %p5151_p7  ;;  %p5203_p4 = scmp.lt.s32.totalorder %s5201_s13, %s5194_s6 }
 0x177   : > { %p5198_p9 = pneg %p5197_p2  ;;  %p5204_p6 = por %p5203_p4, %p5202_p10 }
 0x179   : > { %p5205_p8 = pnand %p5204_p6, %p5198_p9 }
 0x17b   : > { %5208 = shalt.err (!%p5205_p8)
}
 0x17c   : > { %4648 = dma.hbm_to_vmem [thread:$0]  (!%p5725_p11), %s5763_s5, 512, %s5765_s8, %s5769_s10, %s6491_s18, %s6491_s18, %s6490_s17  }
 0x17d   : > { %s6508_s11 = sld [smem:[#allocation32_spill]] }
 0x183   : > { %p6509_p7 = scmp.ne.s32.totalorder %s6508_s11, 0 }
 0x184   : > { %s5801_s15 = sand.u32 (!%p6509_p7), 1, %s5295_s22  }
 0x185   : > { %517 = sbr.rel (%p6509_p7) target bundleno = 2948 (0xb84), region = 68  ;;  %s4029_s19 = sshll.u32 (!%p6509_p7), %s5801_s15, 6 }
 0x186   : > { %s520_s2 = scalar_lea.sflag (!%p6509_p7), [#allocation3], %s5801_s15  ;;  %s5805_s4 = scalar_lea.vmem (!%p6509_p7), [#allocation2], %s4029_s19 }
 0x18c   : > { %5254 = dma.done.wait (%p5697_p5), %s520_s2, 1024  }
 0x18d   : > { %5256 = vsyncadd (%p5697_p5), %s520_s2, 4294966272  ;;  %p6510_p11 = scmp.eq.s32.totalorder %s5422_s27, 0 }
 0x18f   : > { %5258 = dma.done.wait (%p6510_p11), [#allocation6], 1024   ;;  %p6511_p3 = pmov %p6510_p11 }
 0x191   : > { %5260 = vsyncadd (%p6511_p3), [#allocation6], 4294966272  ;;  %p6512_p12 = pmov %p6511_p3 }
 0x192   : > { %p6513_p1 = pmov %p6511_p3 }
 0x193   : > { %5262 = dma.done.wait (%p6512_p12), [#allocation9], 1024  }
 0x194   : > { %5264 = vsyncadd (%p6513_p1), [#allocation9], 4294966272  ;;  %p6514_p13 = pmov %p6513_p1 }
 0x195   : > { %p6515_p0 = pmov %p6513_p1 }
 0x196   : > { %5266 = dma.done.wait (%p6514_p13), [#allocation12], 2816  }
 0x197   : > { %5268 = vsyncadd (%p6515_p0), [#allocation12], 4294964480  ;;  %s552_s5 = sand.u32 1, %s5422_s27   ;;  %s4036_s8 = sshll.u32 %s5801_s15, 5 }
 0x198   : > { %s553_s10 = scalar_lea.sflag [#allocation15], %s552_s5  ;;  %s5827_s17 = scalar_lea.vmem [#allocation14], %s4036_s8 }
 0x199   : > { %5270 = dma.done.wait (%p5697_p5), %s553_s10, 512  }
 0x19a   : > { %5272 = vsyncadd (%p5697_p5), %s553_s10, 4294966784  ;;  %p6516_p2 = pmov %p6515_p0 }
 0x19b   : > { %p6517_p9 = pmov %p6515_p0 }
 0x19c   : > { %5274 = dma.done.wait (%p6516_p2), [#allocation15], 512  }
 0x19d   : > { %5276 = vsyncadd (%p6517_p9), [#allocation15], 4294966784  ;;  %p6518_p10 = pmov %p6515_p0 }
 0x19e   : > { %p6519_p4 = pmov %p6515_p0 }
 0x19f   : > { %5278 = dma.done.wait (%p6518_p10), [#allocation18], 2816  }
 0x1a0   : > { %5280 = vsyncadd (%p6519_p4), [#allocation18], 4294964480  ;;  %p6520_p6 = pmov %p6515_p0 }
 0x1a1   : > { %p6521_p8 = pmov %p6515_p0 }
 0x1a2   : > { %5282 = dma.done.wait (%p6520_p6), [#allocation21], 512  }
 0x1a3   : > { %5284 = vsyncadd (%p6521_p8), [#allocation21], 4294966784  ;;  %v5846_v0 = vld [vmem:[%s5805_s4 + $0x30] sm:$0xff]  ;;  %v5849_v1 = vld [vmem:[%s5805_s4 + $0x38] sm:$0xff]  ;;  %vm721_vm0 = vcmask 261120   ;;  %v5323_v42 = vmov 0  }
 0x1a4   : > { %v5852_v2 = vld [vmem:[%s5805_s4] sm:$0xff]  ;;  %v698_v3 = vadd.f32 %v5849_v1, %v5846_v0  ;;  %v5857_v4 = vld [vmem:[%s5805_s4 + $0x8] sm:$0xff]  ;;  %v5862_v6 = vld [vmem:[%s5805_s4 + $0x10] sm:$0xff]  ;;  %v707_v17 = vmul.f32 %v5846_v0, %v5846_v0  ;;  %v708_v18 = vmul.f32 %v5849_v1, %v5849_v1  ;;  %4735 = vset.pattern.permute.xlu1 %v5323_v42  ;;  %4736 = vset.pattern.permute.xlu0 %v5323_v42  ;;  %s5324_s18 = smov 16   ;;  %s5325_s3 = smov 17   ;;  %vm1332_vm1 = vcmask 130048  }
 0x1a5   : > { %v701_v5 = vmul.f32 %v5852_v2, %v5852_v2  ;;  %v5865_v7 = vld [vmem:[%s5805_s4 + $0x18] sm:$0xff]  ;;  %v689_v8 = vadd.f32 %v5857_v4, %v5852_v2  ;;  %v702_v9 = vmul.f32 %v5857_v4, %v5857_v4  ;;  %v703_v10 = vmul.f32 %v5862_v6, %v5862_v6  ;;  %v5876_v12 = vld [vmem:[%s5805_s4 + $0x20] sm:$0xff]  ;;  %v5879_v13 = vld [vmem:[%s5805_s4 + $0x28] sm:$0xff]  ;;  %s5326_s29 = smov 15   ;;  %s5327_s14 = smov 1  }
 0x1a6   : > { %699 = vadd.xlane.f32.xlu1 %v698_v3  ;;  %v704_v11 = vmul.f32 %v5865_v7, %v5865_v7  ;;  %v692_v15 = vadd.f32 %v5865_v7, %v5862_v6  ;;  %v695_v19 = vadd.f32 %v5879_v13, %v5876_v12  ;;  %v705_v20 = vmul.f32 %v5876_v12, %v5876_v12  ;;  %v5893_v24 = vld [vmem:[#allocation5] sm:$0xff]  ;;  %v631_v36 = vld [vmem:[#allocation5 + $0x8] sm:$0xff]  ;;  %v632_v38 = vld [vmem:[#allocation5 + $0x10] sm:$0xff]  ;;  %s5328_s1 = smov 127   ;;  %s5329_s28 = smov 113  }
 0x1a7   : > { %690 = vadd.xlane.f32.xlu0 %v689_v8  ;;  %v709_v14 = vadd.f32 %v702_v9, %v701_v5  ;;  %v706_v21 = vmul.f32 %v5879_v13, %v5879_v13  ;;  %v718_v22 = vadd.f32 %v708_v18, %v707_v17  ;;  %4269 = vmatprep.mubr.msk.f32.mxu0 %vm721_vm0, %v5893_v24  ;;  %v633_v39 = vld [vmem:[#allocation5 + $0x18] sm:$0xff]  ;;  %v634_v40 = vld [vmem:[#allocation7] sm:$0xff]  ;;  %v682_v43 = vld [vmem:[#allocation8 + $0x8] sm:$0xff]  ;;  %s5330_s7 = smov 112   ;;  %s5331_s6 = smov 111   ;;  %vm1303_vm5 = vcmask 138240  }
 0x1a8   : > { %v712_v16 = vadd.f32 %v704_v11, %v703_v10  ;;  %4283 = vmatprep.mubr.msk.f32.mxu1 %vm721_vm0, %v5893_v24  ;;  %v681_v41 = vld [vmem:[#allocation8] sm:$0xff]  ;;  %v683_v45 = vld [vmem:[#allocation8 + $0x10] sm:$0xff]  ;;  %v635_v18 = vld [vmem:[#allocation7 + $0x8] sm:$0xff]  ;;  %vm1495_vm7 = vcmask 121856   ;;  %vm1601_vm9 = vcmask 7168   ;;  %vm1789_vm10 = vcmask 1039360  }
 0x1a9   : > { %v715_v23 = vadd.f32 %v706_v21, %v705_v20  ;;  %v685_v44 = vld [vmem:[#allocation10] sm:$0xff]  ;;  %v636_v21 = vld [vmem:[#allocation7 + $0x10] sm:$0xff]  ;;  %vm6011_vm3 = vmneg %vm1332_vm1  ;;  %vm1895_vm11 = vcmask 924672   ;;  %vm2001_vm12 = vcmask 916480   ;;  %vm2103_vm13 = vcmask 908288   ;;  %s617_s9 = scalar_lea.vmem [#allocation22], %s4036_s8 }
 0x1aa   : > { %710 = vadd.xlane.f32.xlu1 %v709_v14  ;;  %s3817_s20 = sshll.u32 %s617_s9, 4  ;;  %s4196_s13 = sshll.u32 %s5422_s27, 9  ;;  %s6395_s20 = int_to_ptr.vmem [resolvable:$true] %s3817_s20 }
 0x1ab   : > { %693 = vadd.xlane.f32.xlu0 %v692_v15  ;;  %s6524_s2 = sld [smem:[#allocation45_spill]]  ;;  %s3803_s8 = scalar_lea.sflag [#allocation4], %s5801_s15 }
 0x1ac   : > { %s5209_s27 = scalar_lea.vmem %s6395_s20, 512  ;;  %p6525_p7 = scmp.ne.s32.totalorder %s6502_s16, 0 }
 0x1ad   : > { %p5210_p5 = scmp.ne.s32.totalorder %s6395_s20, %s5209_s27  ;;  %s5333_s10 = smov [#allocation22]  }
 0x1ae   : > { %713 = vadd.xlane.f32.xlu1 %v712_v16 }
 0x1af   : > { %696 = vadd.xlane.f32.xlu0 %v695_v19  ;;  %p5211_p11 = pnand %p5210_p5, %p6525_p7 }
 0x1b1   : > { %s6401_s5 = scalar_lea.hbm %s6524_s2, %s4196_s13  ;;  %p5212_p3 = pneg %p5211_p11 }
 0x1b2   : > { %719 = vadd.xlane.f32.xlu1 %v718_v22 }
 0x1b3   : > { %716 = vadd.xlane.f32.xlu0 %v715_v23 }
 0x1c3   : > { %1173 = vperm.xlu1 %4735, %v681_v41  }
 0x1c7   : > { %1178 = vperm.xlu1 %4735, %v682_v43  }
 0x1cb   : > { %1201 = vperm.xlu1 %4735, %v685_v44  }
 0x1cf   : > { %1183 = vperm.xlu1 %4735, %v683_v45   ;;  %v687_v45 = vld [vmem:[#allocation10 + $0x10] sm:$0xff] }
 0x233   : > { %v700_v25 = vpop.xlane.xlu1 %699 }
 0x234   : > { %v691_v26 = vpop.xlane.xlu0 %690 }
 0x237   : > { %v711_v27 = vpop.xlane.xlu1 %710 }
 0x238   : > { %v694_v28 = vpop.xlane.xlu0 %693 }
 0x239   : > { %v4373_v29 = vpack.c.bf16 %v694_v28, %v691_v26  ;;  %v637_v26 = vld [vmem:[#allocation7 + $0x18] sm:$0xff] }
 0x23b   : > { %4374 = vmatprep.subr.bf16.mxu0 %v4373_v29  ;;  %v714_v30 = vpop.xlane.xlu1 %713 }
 0x23c   : > { %4376 = vmatpush3.bf16.msra.mxu0 %v4373_v29  ;;  %v697_v31 = vpop.xlane.xlu0 %696  ;;  %v4381_v32 = vpack.c.bf16 %v714_v30, %v711_v27 }
 0x23d   : > { %v4377_v33 = vpack.c.bf16 %v700_v25, %v697_v31 }
 0x23e   : > { %4382 = vmatprep.subr.bf16.mxu1 %v4381_v32 }
 0x23f   : > { %4378 = vmatprep.subr.bf16.mxu0 %v4377_v33  ;;  %4384 = vmatpush3.bf16.msra.mxu1 %v4381_v32  ;;  %v720_v34 = vpop.xlane.xlu1 %719 }
 0x240   : > { %4380 = vmatpush3.bf16.msra.mxu0 %v4377_v33  ;;  %v717_v35 = vpop.xlane.xlu0 %716 }
 0x241   : > { %v4385_v37 = vpack.c.bf16 %v720_v34, %v717_v35  ;;  %v686_v34 = vld [vmem:[#allocation10 + $0x8] sm:$0xff] }
 0x242   : > { %1206 = vperm.xlu0 %4736, %v686_v34  }
 0x243   : > { %4270 = vmatmul.mubr.msk.f32.vlgmr.msra.gmra.mrb[0].mxu0 %vm721_vm0, %v631_v36  ;;  %4386 = vmatprep.subr.bf16.mxu1 %v4385_v37 }
 0x244   : > { %4388 = vmatpush3.bf16.msra.mxu1 %v4385_v37  ;;  %4272 = vmatprep.mubr.msk.f32.mxu0 %vm721_vm0, %v632_v38  ;;  %v684_v37 = vld [vmem:[#allocation8 + $0x18] sm:$0xff] }
 0x247   : > { %4273 = vmatmul.mubr.msk.f32.gmra.mrb[2].mxu0 %vm721_vm0, %v633_v39  ;;  %4284 = vmatmul.mubr.msk.f32.vlgmr.msra.gmra.mrb[0].mxu1 %vm721_vm0, %v631_v36 }
 0x248   : > { %4286 = vmatprep.mubr.msk.f32.mxu1 %vm721_vm0, %v632_v38  ;;  %4297 = vmatprep.mubr.msk.f32.mxu0 %vm721_vm0, %v634_v40 }
 0x24b   : > { %4287 = vmatmul.mubr.msk.f32.gmra.mrb[2].mxu1 %vm721_vm0, %v633_v39 }
 0x24c   : > { %4311 = vmatprep.mubr.msk.f32.mxu1 %vm721_vm0, %v634_v40 }
 0x316   : > { %v4271_v46 = vpop.f32.mrb[0].mxu0 }
 0x317   : > { %v906_v47 = vmul.f32 0.00390625, %v4271_v46  ;;  %v800_v48 = vpop.f32.mrb[1].mxu0  ;;  %v1174_v46 = vpop.permute.xlu1 %1173 }
 0x318   : > { %v905_v49 = vmul.f32 0.00390625, %v800_v48 }
 0x319   : > { %v914_v50 = vmul.f32 %v906_v47, %v906_v47 }
 0x31a   : > { %v913_v51 = vmul.f32 %v905_v49, %v905_v49  ;;  %v4389_v52 = vpack.c.bf16 %v906_v47, %v905_v49  ;;  %v4274_v53 = vpop.f32.mrb[2].mxu0  ;;  %v4285_v54 = vpop.f32.mrb[0].mxu1 }
 0x31b   : > { %v908_v55 = vmul.f32 0.00390625, %v4274_v53  ;;  %v910_v56 = vmul.f32 0.00390625, %v4285_v54  ;;  %v810_v57 = vpop.f32.mrb[3].mxu0  ;;  %v885_v58 = vpop.f32.mrb[1].mxu1 }
 0x31c   : > { %v907_v59 = vmul.f32 0.00390625, %v810_v57  ;;  %v909_v60 = vmul.f32 0.00390625, %v885_v58  ;;  %4390 = vmatprep.subr.bf16.mxu0 %v4389_v52  ;;  %v1179_v47 = vpop.permute.xlu1 %1178 }
 0x31d   : > { %v916_v61 = vmul.f32 %v908_v55, %v908_v55  ;;  %v918_v62 = vsub.f32 %v910_v56, %v914_v50  ;;  %4392 = vmatpush3.bf16.msra.mxu0 %v4389_v52  ;;  %v1207_v52 = vpop.permute.xlu0 %1206 }
 0x31e   : > { %v915_v63 = vmul.f32 %v907_v59, %v907_v59  ;;  %v4393_v3 = vpack.c.bf16 %v908_v55, %v907_v59  ;;  %v917_v5 = vsub.f32 %v909_v60, %v913_v51  ;;  %v4288_v8 = vpop.f32.mrb[2].mxu1 }
 0x31f   : > { %v922_v9 = vmax.f32 %v918_v62, 0.0  ;;  %v912_v10 = vmul.f32 0.00390625, %v4288_v8  ;;  %v895_v11 = vpop.f32.mrb[3].mxu1 }
 0x320   : > { %v921_v14 = vmax.f32 %v917_v5, 0.0  ;;  %v911_v15 = vmul.f32 0.00390625, %v895_v11  ;;  %4394 = vmatprep.subr.bf16.mxu0 %v4393_v3  ;;  %v1202_v48 = vpop.permute.xlu1 %1201 }
 0x321   : > { %v926_v16 = vadd.f32 1e-06, %v922_v9  ;;  %v920_v17 = vsub.f32 %v912_v10, %v916_v61  ;;  %4396 = vmatpush3.bf16.msra.mxu0 %v4393_v3 }
 0x322   : > { %v925_v19 = vadd.f32 1e-06, %v921_v14  ;;  %v919_v20 = vsub.f32 %v911_v15, %v915_v63 }
 0x323   : > { %4773 = vrsqrt.f32 %v926_v16  ;;  %v924_v22 = vmax.f32 %v920_v17, 0.0 }
 0x324   : > { %4775 = vrsqrt.f32 %v925_v19  ;;  %v923_v23 = vmax.f32 %v919_v20, 0.0  ;;  %4298 = vmatmul.mubr.msk.f32.vlgmr.msra.gmra.mrb[4].mxu0 %vm721_vm0, %v635_v18  ;;  %v1184_v49 = vpop.permute.xlu1 %1183 }
 0x325   : > { %v928_v25 = vadd.f32 1e-06, %v924_v22  ;;  %4300 = vmatprep.mubr.msk.f32.mxu0 %vm721_vm0, %v636_v21 }
 0x326   : > { %v927_v27 = vadd.f32 1e-06, %v923_v23 }
 0x327   : > { %4777 = vrsqrt.f32 %v928_v25 }
 0x328   : > { %4779 = vrsqrt.f32 %v927_v27  ;;  %4301 = vmatmul.mubr.msk.f32.gmra.mrb[6].mxu0 %vm721_vm0, %v637_v26 }
 0x329   : > { %1397 = vmatprep.mubr.bf16.mxu0 %v5323_v42 }
 0x32d   : > { %v4774_v28 = vpop.eup %4773 }
 0x32e   : > { %v4776_v29 = vpop.eup %4775 }
 0x32f   : > { %v4397_v30 = vpack.c.bf16 %v4774_v28, %v4776_v29 }
 0x331   : > { %v4778_v31 = vpop.eup %4777  ;;  %4398 = vmatprep.subr.bf16.mxu1 %v4397_v30 }
 0x332   : > { %v4780_v32 = vpop.eup %4779  ;;  %4400 = vmatpush3.bf16.msra.mxu1 %v4397_v30 }
 0x333   : > { %v4401_v33 = vpack.c.bf16 %v4778_v31, %v4780_v32 }
 0x335   : > { %4402 = vmatprep.subr.bf16.mxu1 %v4401_v33 }
 0x336   : > { %4404 = vmatpush3.bf16.msra.mxu1 %v4401_v33 }
 0x339   : > { %4312 = vmatmul.mubr.msk.f32.vlgmr.msra.gmra.mrb[4].mxu1 %vm721_vm0, %v635_v18 }
 0x33a   : > { %4314 = vmatprep.mubr.msk.f32.mxu1 %vm721_vm0, %v636_v21 }
 0x33d   : > { %4315 = vmatmul.mubr.msk.f32.gmra.mrb[6].mxu1 %vm721_vm0, %v637_v26 }
 0x33e   : > { %4325 = vmatprep.mubr.msk.f32.mxu1 %vm721_vm0, %v5893_v24  ;;  %v688_v24 = vld [vmem:[#allocation10 + $0x18] sm:$0xff] }
 0x3f7   : > { %v4299_v35 = vpop.f32.mrb[4].mxu0 }
 0x3f8   : > { %1122 = vperm.xlu1 %4735, %v4299_v35   ;;  %v1011_v36 = vpop.f32.mrb[5].mxu0 }
 0x3f9   : > { %1117 = vperm.xlu0 %4736, %v1011_v36  }
 0x3fb   : > { %v4302_v38 = vpop.f32.mrb[6].mxu0 }
 0x3fc   : > { %1132 = vperm.xlu1 %4735, %v4302_v38   ;;  %v1021_v39 = vpop.f32.mrb[7].mxu0 }
 0x3fd   : > { %1188 = vperm.xlu0 %4736, %v684_v37  }
 0x400   : > { %1127 = vperm.xlu1 %4735, %v1021_v39  }
 0x40c   : > { %v4313_v40 = vpop.f32.mrb[4].mxu1 }
 0x40d   : > { %1150 = vperm.xlu1 %4735, %v4313_v40   ;;  %v1096_v41 = vpop.f32.mrb[5].mxu1 }
 0x410   : > { %v4316_v43 = vpop.f32.mrb[6].mxu1 }
 0x411   : > { %1145 = vperm.xlu1 %4735, %v1096_v41   ;;  %1160 = vperm.xlu0 %4736, %v4316_v43   ;;  %v1106_v44 = vpop.f32.mrb[7].mxu1 }
 0x415   : > { %1216 = vperm.xlu0 %4736, %v688_v24   ;;  %1155 = vperm.xlu1 %4735, %v1106_v44  }
 0x419   : > { %1211 = vperm.xlu1 %4735, %v687_v45  }
 0x477   : > { %v1123_v50 = vpop.permute.xlu1 %1122 }
 0x478   : > { %v1118_v54 = vpop.permute.xlu0 %1117  ;;  %v1137_v55 = vsub.f32 %v5862_v6, %v1123_v50  ;;  %v1138_v56 = vsub.f32 %v5865_v7, %v1123_v50 }
 0x479   : > { %v1135_v61 = vsub.f32 %v5852_v2, %v1118_v54  ;;  %v1136_v62 = vsub.f32 %v5857_v4, %v1118_v54 }
 0x47b   : > { %v1133_v51 = vpop.permute.xlu1 %1132 }
 0x47c   : > { %v1189_v57 = vpop.permute.xlu0 %1188  ;;  %v1141_v5 = vsub.f32 %v5846_v0, %v1133_v51  ;;  %v1142_v8 = vsub.f32 %v5849_v1, %v1133_v51 }
 0x47f   : > { %v1128_v53 = vpop.permute.xlu1 %1127 }
 0x480   : > { %v1139_v15 = vsub.f32 %v5876_v12, %v1128_v53  ;;  %v1140_v1 = vsub.f32 %v5879_v13, %v1128_v53 }
 0x48c   : > { %v1151_v58 = vpop.permute.xlu1 %1150 }
 0x48d   : > { %v1165_v59 = vmul.f32 %v1151_v58, %v1137_v55  ;;  %v1166_v60 = vmul.f32 %v1151_v58, %v1138_v56 }
 0x48f   : > { %v1193_v63 = vmul.f32 %v1179_v47, %v1165_v59  ;;  %v1194_v3 = vmul.f32 %v1179_v47, %v1166_v60 }
 0x490   : > { %v1146_v9 = vpop.permute.xlu1 %1145  ;;  %v1161_v10 = vpop.permute.xlu0 %1160 }
 0x491   : > { %v5924_v11 = vadd.f32 %v1207_v52, %v1193_v63  ;;  %v5926_v6 = vadd.f32 %v1207_v52, %v1194_v3  ;;  %v1163_v7 = vmul.f32 %v1146_v9, %v1135_v61  ;;  %v1164_v14 = vmul.f32 %v1146_v9, %v1136_v62 }
 0x492   : > { %v1169_v16 = vmul.f32 %v1161_v10, %v1141_v5  ;;  %v1170_v2 = vmul.f32 %v1161_v10, %v1142_v8 }
 0x493   : > { %v4064_v4 = vmul.f32 -1.442695, %v5924_v11  ;;  %v4065_v17 = vmul.f32 -1.442695, %v5926_v6  ;;  %v1191_v18 = vmul.f32 %v1174_v46, %v1163_v7  ;;  %v1192_v0 = vmul.f32 %v1174_v46, %v1164_v14 }
 0x494   : > { %v1156_v19 = vpop.permute.xlu1 %1155  ;;  %v1197_v20 = vmul.f32 %v1189_v57, %v1169_v16  ;;  %v1198_v21 = vmul.f32 %v1189_v57, %v1170_v2  ;;  %v1217_v22 = vpop.permute.xlu0 %1216  ;;  %v1287_v2 = vld [vmem:[#allocation13] sm:$0xff] }
 0x495   : > { %4781 = vpow2.f32 %v4064_v4  ;;  %v1219_v23 = vadd.f32 %v1202_v48, %v1191_v18  ;;  %v1220_v25 = vadd.f32 %v1202_v48, %v1192_v0  ;;  %v1167_v26 = vmul.f32 %v1156_v19, %v1139_v15  ;;  %v1288_v4 = vld [vmem:[#allocation13 + $0x8] sm:$0xff]  ;;  %v1289_v0 = vld [vmem:[#allocation13 + $0x10] sm:$0xff] }
 0x496   : > { %4783 = vpow2.f32 %v4065_v17  ;;  %v1168_v12 = vmul.f32 %v1156_v19, %v1140_v1  ;;  %v1225_v27 = vadd.f32 %v1217_v22, %v1197_v20  ;;  %v1226_v28 = vadd.f32 %v1217_v22, %v1198_v21  ;;  %v2229_v17 = vld [vmem:[%s5827_s17] sm:$0xff]  ;;  %v2230_v18 = vld [vmem:[%s5827_s17 + $0x8] sm:$0xff]  ;;  %v1290_v1 = vld [vmem:[#allocation13 + $0x18] sm:$0xff] }
 0x497   : > { %v4062_v29 = vmul.f32 -1.442695, %v1219_v23  ;;  %v4063_v30 = vmul.f32 -1.442695, %v1220_v25  ;;  %v1195_v31 = vmul.f32 %v1184_v49, %v1167_v26  ;;  %v2231_v19 = vld [vmem:[%s5827_s17 + $0x10] sm:$0xff]  ;;  %v2232_v20 = vld [vmem:[%s5827_s17 + $0x18] sm:$0xff]  ;;  %v638_v21 = vlaneseq }
 0x498   : > { %v4068_v32 = vmul.f32 -1.442695, %v1225_v27  ;;  %v4069_v33 = vmul.f32 -1.442695, %v1226_v28  ;;  %v1196_v34 = vmul.f32 %v1184_v49, %v1168_v12  ;;  %v1212_v35 = vpop.permute.xlu1 %1211  ;;  %s5213_s17 = sshll.u32 %s5333_s10, 4  ;;  %s5214_s17 = int_to_ptr.vmem [resolvable:$false] %s5213_s17 }
 0x499   : > { %4785 = vpow2.f32 %v4062_v29  ;;  %v1223_v13 = vadd.f32 %v1212_v35, %v1195_v31  ;;  %v639_v22 = vand.u32 127, %v638_v21  ;;  %p5216_p12 = scmp.lt.s32.totalorder %s6395_s20, %s5214_s17 }
 0x49a   : > { %4787 = vpow2.f32 %v4063_v30  ;;  %v1224_v36 = vadd.f32 %v1212_v35, %v1196_v34  ;;  %v5332_v30 = vmov 0.0  }
 0x49b   : > { %4789 = vpow2.f32 %v4068_v32  ;;  %v4066_v37 = vmul.f32 -1.442695, %v1223_v13 }
 0x49c   : > { %4791 = vpow2.f32 %v4069_v33  ;;  %v4067_v38 = vmul.f32 -1.442695, %v1224_v36 }
 0x49d   : > { %4793 = vpow2.f32 %v4066_v37  ;;  %v4737_v37 = vld [vmem:[#allocation11 + $0x10] sm:$0xff]  }
 0x49e   : > { %4795 = vpow2.f32 %v4067_v38 }
 0x49f   : > { %v4782_v39 = vpop.eup %4781 }
 0x4a0   : > { %v4784_v40 = vpop.eup %4783  ;;  %v1253_v41 = vadd.f32 1.0, %v4782_v39 }
 0x4a1   : > { %v1254_v43 = vadd.f32 1.0, %v4784_v40 }
 0x4a2   : > { %4797 = vrcp.f32 %v1253_v41 }
 0x4a3   : > { %v4786_v44 = vpop.eup %4785  ;;  %4799 = vrcp.f32 %v1254_v43 }
 0x4a4   : > { %v4788_v24 = vpop.eup %4787  ;;  %v1251_v45 = vadd.f32 1.0, %v4786_v44 }
 0x4a5   : > { %v4790_v46 = vpop.eup %4789  ;;  %v1252_v47 = vadd.f32 1.0, %v4788_v24 }
 0x4a6   : > { %v4792_v48 = vpop.eup %4791  ;;  %4801 = vrcp.f32 %v1251_v45  ;;  %v1257_v49 = vadd.f32 1.0, %v4790_v46 }
 0x4a7   : > { %v4794_v50 = vpop.eup %4793  ;;  %4803 = vrcp.f32 %v1252_v47  ;;  %v1258_v51 = vadd.f32 1.0, %v4792_v48 }
 0x4a8   : > { %v4796_v52 = vpop.eup %4795  ;;  %4805 = vrcp.f32 %v1257_v49  ;;  %v1255_v53 = vadd.f32 1.0, %v4794_v50 }
 0x4a9   : > { %4807 = vrcp.f32 %v1258_v51  ;;  %v1256_v54 = vadd.f32 1.0, %v4796_v52  ;;  %v4738_v52 = vld [vmem:[#allocation11 + $0x18] sm:$0xff]  }
 0x4aa   : > { %4809 = vrcp.f32 %v1255_v53 }
 0x4ab   : > { %4811 = vrcp.f32 %v1256_v54 }
 0x4ac   : > { %v4798_v55 = vpop.eup %4797 }
 0x4ad   : > { %v4800_v56 = vpop.eup %4799  ;;  %v1277_v59 = vmul.f32 %v4798_v55, %v5924_v11 }
 0x4ae   : > { %v1278_v62 = vmul.f32 %v4800_v56, %v5926_v6 }
 0x4b0   : > { %v4802_v57 = vpop.eup %4801 }
 0x4b1   : > { %v4804_v58 = vpop.eup %4803  ;;  %v1275_v60 = vmul.f32 %v4802_v57, %v1219_v23  ;;  %v640_v23 = vadd.s32 128, %v639_v22 }
 0x4b2   : > { %v4806_v61 = vpop.eup %4805  ;;  %v1276_v63 = vmul.f32 %v4804_v58, %v1220_v25  ;;  %v645_v25 = vand.u32 15, %v639_v22 }
 0x4b3   : > { %v4808_v3 = vpop.eup %4807  ;;  %v5934_v5 = vpack.c.bf16 %v1277_v59, %v1275_v60  ;;  %v1281_v7 = vmul.f32 %v4806_v61, %v1225_v27  ;;  %v652_v26 = vand.u32 15, %v640_v23 }
 0x4b4   : > { %v4810_v8 = vpop.eup %4809  ;;  %v5936_v9 = vpack.c.bf16 %v1278_v62, %v1276_v63  ;;  %v1282_v15 = vmul.f32 %v4808_v3, %v1226_v28  ;;  %vm665_vm2 = vcmp.ge.s32.totalorder %v645_v25, 1  ;;  %vm673_vm8 = vcmp.le.s32.totalorder %v645_v25, 14  ;;  %v4739_v62 = vld [vmem:[#allocation11] sm:$0xff]   ;;  %v4742_v25 = vld [vmem:[#allocation11 + $0x28] sm:$0xff]  }
 0x4b5   : > { %v4812_v10 = vpop.eup %4811  ;;  %v1279_v14 = vmul.f32 %v4810_v8, %v1223_v13  ;;  %1324 = vrot.lane.b32.xlu1 %v5934_v5, %s5324_s18  ;;  %vm666_vm4 = vcmp.ge.s32.totalorder %v652_v26, 1  ;;  %v4042_v31 = vsel %vm665_vm2, 1.0, %v5332_v30  ;;  %vm674_vm6 = vcmp.le.s32.totalorder %v652_v26, 14  ;;  %v4743_v26 = vld [vmem:[#allocation11 + $0x30] sm:$0xff]  }
 0x4b6   : > { %v1280_v11 = vmul.f32 %v4812_v10, %v1224_v36  ;;  %1326 = vrot.lane.b32.xlu0 %v5936_v9, %s5324_s18  ;;  %v4043_v33 = vsel %vm666_vm4, 1.0, %v5332_v30  ;;  %v6019_v13 = vpack.c.bf16 %v4042_v31, %v4042_v31  ;;  %v4045_v45 = vsel %vm674_vm6, 1.0, %v5332_v30 }
 0x4b7   : > { %v5942_v6 = vpack.c.bf16 %v1281_v7, %v1279_v14  ;;  %v6021_v36 = vpack.c.bf16 %v4043_v33, %v4043_v33  ;;  %v6035_v51 = vpack.c.bf16 %v4045_v45, %v4045_v45  ;;  %v4044_v56 = vsel %vm673_vm8, 1.0, %v5332_v30  ;;  %v4745_v33 = vld [vmem:[#allocation11 + $0x40] sm:$0xff]   ;;  %v4747_v45 = vld [vmem:[#allocation11 + $0x50] sm:$0xff]  }
 0x4b8   : > { %v5944_v16 = vpack.c.bf16 %v1282_v15, %v1280_v11  ;;  %v6041_v60 = vpack.c.bf16 %v4044_v56, %v4044_v56 }
 0x4b9   : > { %1328 = vrot.lane.b32.xlu1 %v5942_v6, %s5324_s18 }
 0x4ba   : > { %1330 = vrot.lane.b32.xlu0 %v5944_v16, %s5324_s18 }
 0x4bd   : > { %1295 = vrot.lane.b32.xlu1 %v5934_v5, %s5325_s3 }
 0x4be   : > { %1297 = vrot.lane.b32.xlu0 %v5936_v9, %s5325_s3 }
 0x4c1   : > { %1299 = vrot.lane.b32.xlu1 %v5942_v6, %s5325_s3 }
 0x4c2   : > { %1301 = vrot.lane.b32.xlu0 %v5944_v16, %s5325_s3 }
 0x4c5   : > { %1487 = vrot.lane.b32.xlu1 %v5934_v5, %s5326_s29 }
 0x4c6   : > { %1489 = vrot.lane.b32.xlu0 %v5936_v9, %s5326_s29 }
 0x4c9   : > { %1491 = vrot.lane.b32.xlu1 %v5942_v6, %s5326_s29 }
 0x4ca   : > { %1493 = vrot.lane.b32.xlu0 %v5944_v16, %s5326_s29 }
 0x4cd   : > { %1593 = vrot.lane.b32.xlu1 %v5934_v5, %s5327_s14 }
 0x4ce   : > { %1595 = vrot.lane.b32.xlu0 %v5936_v9, %s5327_s14 }
 0x4d1   : > { %1597 = vrot.lane.b32.xlu1 %v5942_v6, %s5327_s14 }
 0x4d2   : > { %1599 = vrot.lane.b32.xlu0 %v5944_v16, %s5327_s14 }
 0x4d5   : > { %1783 = vrot.lane.b32.xlu1 %v5936_v9, %s5328_s1 }
 0x4d6   : > { %1781 = vrot.lane.b32.xlu0 %v5934_v5, %s5328_s1 }
 0x4d9   : > { %1787 = vrot.lane.b32.xlu1 %v5944_v16, %s5328_s1 }
 0x4da   : > { %1785 = vrot.lane.b32.xlu0 %v5942_v6, %s5328_s1 }
 0x4dd   : > { %1889 = vrot.lane.b32.xlu1 %v5936_v9, %s5329_s28 }
 0x4de   : > { %1887 = vrot.lane.b32.xlu0 %v5934_v5, %s5329_s28 }
 0x4e1   : > { %1893 = vrot.lane.b32.xlu1 %v5944_v16, %s5329_s28 }
 0x4e2   : > { %1891 = vrot.lane.b32.xlu0 %v5942_v6, %s5329_s28 }
 0x4e5   : > { %1993 = vrot.lane.b32.xlu1 %v5934_v5, %s5330_s7 }
 0x4e6   : > { %1995 = vrot.lane.b32.xlu0 %v5936_v9, %s5330_s7 }
 0x4e9   : > { %1997 = vrot.lane.b32.xlu1 %v5942_v6, %s5330_s7 }
 0x4ea   : > { %1999 = vrot.lane.b32.xlu0 %v5944_v16, %s5330_s7 }
 0x4ed   : > { %2097 = vrot.lane.b32.xlu1 %v5936_v9, %s5331_s6 }
 0x4ee   : > { %2095 = vrot.lane.b32.xlu0 %v5934_v5, %s5331_s6 }
 0x4f1   : > { %2101 = vrot.lane.b32.xlu1 %v5944_v16, %s5331_s6 }
 0x4f2   : > { %2099 = vrot.lane.b32.xlu0 %v5942_v6, %s5331_s6 }
 0x4f5   : > { %2203 = vperm.xlu1 %4735, %v1287_v2  }
 0x4f6   : > { %2208 = vperm.xlu0 %4736, %v1288_v4   ;;  %v4740_v4 = vld [vmem:[#allocation11 + $0x8] sm:$0xff]  }
 0x4f9   : > { %2235 = vperm.xlu1 %4735, %v2229_v17  }
 0x4fa   : > { %2240 = vperm.xlu0 %4736, %v2230_v18  }
 0x4fd   : > { %2213 = vperm.xlu1 %4735, %v1289_v0  }
 0x4fe   : > { %2218 = vperm.xlu0 %4736, %v1290_v1   ;;  %v4741_v1 = vld [vmem:[#allocation11 + $0x20] sm:$0xff]  }
 0x501   : > { %2245 = vperm.xlu1 %4735, %v2231_v19  }
 0x502   : > { %2250 = vperm.xlu0 %4736, %v2232_v20  }
 0x527   : > { %v1325_v12 = vpop.permute.xlu1 %1324 }
 0x528   : > { %v1327_v27 = vpop.permute.xlu0 %1326 }
 0x529   : > { %v1333_v29 = vsel %vm1332_vm1, %v1325_v12, %v1327_v27 }
 0x52a   : > { %1365 = vmatprep.subr.bf16.mxu0 %v1333_v29 }
 0x52b   : > { %4073 = vmatpush1.bf16.msk.msra.mxu0 %vm6011_vm3, %v1325_v12  ;;  %v1329_v32 = vpop.permute.xlu1 %1328 }
 0x52c   : > { %v1331_v34 = vpop.permute.xlu0 %1330 }
 0x52d   : > { %v1334_v35 = vsel %vm1332_vm1, %v1329_v32, %v1331_v34 }
 0x52e   : > { %1367 = vmatprep.subr.bf16.mxu0 %v1334_v35 }
 0x52f   : > { %4075 = vmatpush1.bf16.msk.msra.mxu0 %vm6011_vm3, %v1329_v32  ;;  %v1296_v38 = vpop.permute.xlu1 %1295 }
 0x530   : > { %v1311_v39 = vsel %vm1303_vm5, 0, %v1296_v38  ;;  %v1298_v40 = vpop.permute.xlu0 %1297 }
 0x531   : > { %v1316_v41 = vmul.bf16 %v1311_v39, %v6019_v13  ;;  %v1304_v43 = vsel %vm1303_vm5, %v1296_v38, %v1298_v40 }
 0x532   : > { %v1317_v44 = vmul.bf16 %v1304_v43, %v6021_v36  ;;  %4076 = vmatmul.mubr.msk.bf16.vlgmr.msra.gmra.mrb[8].mxu0 %vm721_vm0, %v4737_v37 }
 0x533   : > { %v1300_v24 = vpop.permute.xlu1 %1299  ;;  %1407 = vmatprep.mubr.bf16.mxu0 %v5323_v42 }
 0x534   : > { %v1314_v46 = vsel %vm1303_vm5, 0, %v1300_v24  ;;  %1434 = vmatprep.subr.bf16.mxu0 %v1317_v44  ;;  %v1302_v47 = vpop.permute.xlu0 %1301 }
 0x535   : > { %v1318_v48 = vmul.bf16 %v1314_v46, %v6019_v13  ;;  %v1305_v49 = vsel %vm1303_vm5, %v1300_v24, %v1302_v47  ;;  %1435 = vmatpush1.bf16.msra.mxu0 %v1316_v41  ;;  %v4746_v41 = vld [vmem:[#allocation11 + $0x48] sm:$0xff]  }
 0x536   : > { %v1319_v50 = vmul.bf16 %v1305_v49, %v6021_v36 }
 0x537   : > { %v1488_v53 = vpop.permute.xlu1 %1487 }
 0x538   : > { %1436 = vmatprep.subr.bf16.mxu0 %v1319_v50  ;;  %v1490_v54 = vpop.permute.xlu0 %1489  ;;  %v1502_v61 = vsel %vm1495_vm7, 0, %v1488_v53 }
 0x539   : > { %v1496_v55 = vsel %vm1495_vm7, %v1488_v53, %v1490_v54  ;;  %1437 = vmatpush1.bf16.msra.mxu0 %v1318_v48  ;;  %v1507_v10 = vmul.bf16 %v1502_v61, %v6041_v60  ;;  %v4748_v54 = vld [vmem:[#allocation11 + $0x58] sm:$0xff]  }
 0x53a   : > { %v1508_v57 = vmul.bf16 %v1496_v55, %v6035_v51  ;;  %4077 = vmatmul.mubr.msk.bf16.gmra.mrb[12].mxu0 %vm721_vm0, %v4738_v52 }
 0x53b   : > { %v1492_v58 = vpop.permute.xlu1 %1491  ;;  %1466 = vmatprep.mubr.bf16.mxu0 %v5323_v42 }
 0x53c   : > { %1532 = vmatprep.subr.bf16.mxu0 %v1508_v57  ;;  %v1494_v59 = vpop.permute.xlu0 %1493  ;;  %v1505_v7 = vsel %vm1495_vm7, 0, %v1492_v58  ;;  %v4749_v57 = vld [vmem:[#allocation11 + $0x60] sm:$0xff]  }
 0x53d   : > { %v1497_v63 = vsel %vm1495_vm7, %v1492_v58, %v1494_v59  ;;  %v1509_v11 = vmul.bf16 %v1505_v7, %v6041_v60 }
 0x53e   : > { %v1510_v14 = vmul.bf16 %v1497_v63, %v6035_v51 }
 0x53f   : > { %v1594_v3 = vpop.permute.xlu1 %1593 }
 0x540   : > { %v1596_v8 = vpop.permute.xlu0 %1595  ;;  %v1608_v0 = vsel %vm1601_vm9, 0, %v1594_v3 }
 0x541   : > { %v1602_v15 = vsel %vm1601_vm9, %v1594_v3, %v1596_v8  ;;  %v1613_v20 = vmul.bf16 %v1608_v0, %v6019_v13  ;;  %v4750_v8 = vld [vmem:[#allocation11 + $0x68] sm:$0xff]  }
 0x542   : > { %4080 = vmatmul.mubr.msk.bf16.vlgmr.msra.gmra.mrb[8].mxu0 %vm721_vm0, %v4739_v62  ;;  %v1614_v2 = vmul.bf16 %v1602_v15, %v6021_v36  ;;  %v4751_v15 = vld [vmem:[#allocation11 + $0x70] sm:$0xff]  }
 0x543   : > { %1533 = vmatpush1.bf16.msra.mxu0 %v1507_v10  ;;  %1476 = vmatprep.mubr.bf16.mxu0 %v5323_v42  ;;  %v1598_v17 = vpop.permute.xlu1 %1597 }
 0x544   : > { %1534 = vmatprep.subr.bf16.mxu0 %v1510_v14  ;;  %v1600_v18 = vpop.permute.xlu0 %1599  ;;  %v1611_v21 = vsel %vm1601_vm9, 0, %v1598_v17 }
 0x545   : > { %v1603_v19 = vsel %vm1601_vm9, %v1598_v17, %v1600_v18  ;;  %v1615_v23 = vmul.bf16 %v1611_v21, %v6019_v13 }
 0x546   : > { %v1616_v22 = vmul.bf16 %v1603_v19, %v6021_v36  ;;  %v4753_v19 = vld [vmem:[#allocation11 + $0x80] sm:$0xff]  }
 0x547   : > { %1535 = vmatpush1.bf16.msra.mxu0 %v1509_v11  ;;  %v1784_v12 = vpop.permute.xlu1 %1783 }
 0x548   : > { %1638 = vmatprep.subr.bf16.mxu0 %v1614_v2  ;;  %v1796_v27 = vsel %vm1789_vm10, %v1784_v12, 0  ;;  %v1782_v30 = vpop.permute.xlu0 %1781 }
 0x549   : > { %v1802_v29 = vmul.bf16 %v1796_v27, %v6035_v51  ;;  %v1790_v32 = vsel %vm1789_vm10, %v1782_v30, %v1784_v12 }
 0x54a   : > { %4081 = vmatmul.mubr.msk.bf16.gmra.mrb[12].mxu0 %vm721_vm0, %v4740_v4  ;;  %v1801_v35 = vmul.bf16 %v1790_v32, %v6041_v60 }
 0x54b   : > { %1564 = vmatprep.mubr.bf16.mxu0 %v5323_v42  ;;  %v1788_v31 = vpop.permute.xlu1 %1787 }
 0x54c   : > { %v1786_v34 = vpop.permute.xlu0 %1785 }
 0x550   : > { %v1888_v43 = vpop.permute.xlu0 %1887 }
 0x552   : > { %4084 = vmatmul.mubr.msk.bf16.vlgmr.msra.gmra.mrb[8].mxu0 %vm721_vm0, %v4741_v1  ;;  %v4752_v1 = vld [vmem:[#allocation11 + $0x78] sm:$0xff]  }
 0x553   : > { %1639 = vmatpush1.bf16.msra.mxu0 %v1613_v20  ;;  %1574 = vmatprep.mubr.bf16.mxu0 %v5323_v42  ;;  %v4754_v20 = vld [vmem:[#allocation11 + $0x88] sm:$0xff]  }
 0x554   : > { %1640 = vmatprep.subr.bf16.mxu0 %v1616_v22  ;;  %v1892_v47 = vpop.permute.xlu0 %1891 }
 0x557   : > { %1641 = vmatpush1.bf16.msra.mxu0 %v1615_v23 }
 0x558   : > { %1720 = vmatprep.subr.bf16.mxu0 %v5936_v9  ;;  %v4744_v9 = vld [vmem:[#allocation11 + $0x38] sm:$0xff]   ;;  %v1996_v55 = vpop.permute.xlu0 %1995 }
 0x55a   : > { %4085 = vmatmul.mubr.msk.bf16.gmra.mrb[12].mxu0 %vm721_vm0, %v4742_v25 }
 0x55b   : > { %1670 = vmatprep.mubr.bf16.mxu0 %v5323_v42 }
 0x55c   : > { %v2000_v61 = vpop.permute.xlu0 %1999 }
 0x560   : > { %v2096_v10 = vpop.permute.xlu0 %2095 }
 0x562   : > { %4088 = vmatmul.mubr.msk.bf16.vlgmr.msra.gmra.mrb[8].mxu0 %vm721_vm0, %v4743_v26 }
 0x563   : > { %1721 = vmatpush1.bf16.msra.mxu0 %v5934_v5  ;;  %1680 = vmatprep.mubr.bf16.mxu0 %v5323_v42  ;;  %v1799_v5 = vsel %vm1789_vm10, %v1788_v31, 0 }
 0x564   : > { %1722 = vmatprep.subr.bf16.mxu0 %v5944_v16  ;;  %v1890_v16 = vpop.permute.xlu1 %1889  ;;  %v1804_v37 = vmul.bf16 %v1799_v5, %v6035_v51  ;;  %v2100_v2 = vpop.permute.xlu0 %2099 }
 0x565   : > { %v1902_v38 = vsel %vm1895_vm11, %v1890_v16, 0  ;;  %v1896_v24 = vsel %vm1895_vm11, %v1888_v43, %v1890_v16 }
 0x566   : > { %v1908_v40 = vmul.bf16 %v1902_v38, %v6021_v36  ;;  %v1907_v48 = vmul.bf16 %v1896_v24, %v6019_v13 }
 0x567   : > { %1723 = vmatpush1.bf16.msra.mxu0 %v5942_v6  ;;  %v1791_v6 = vsel %vm1789_vm10, %v1786_v34, %v1788_v31 }
 0x568   : > { %1826 = vmatprep.subr.bf16.mxu0 %v1802_v29  ;;  %v1803_v39 = vmul.bf16 %v1791_v6, %v6041_v60  ;;  %v1894_v44 = vpop.permute.xlu1 %1893 }
 0x569   : > { %v1905_v46 = vsel %vm1895_vm11, %v1894_v44, 0  ;;  %v1897_v50 = vsel %vm1895_vm11, %v1892_v47, %v1894_v44 }
 0x56a   : > { %4089 = vmatmul.mubr.msk.bf16.gmra.mrb[12].mxu0 %vm721_vm0, %v4744_v9  ;;  %v1910_v49 = vmul.bf16 %v1905_v46, %v6021_v36  ;;  %v1909_v53 = vmul.bf16 %v1897_v50, %v6019_v13 }
 0x56b   : > { %1752 = vmatprep.mubr.bf16.mxu0 %v5323_v42 }
 0x56c   : > { %v1994_v52 = vpop.permute.xlu1 %1993 }
 0x56d   : > { %v2002_v59 = vsel %vm2001_vm12, %v1994_v52, %v1996_v55 }
 0x570   : > { %v1998_v56 = vpop.permute.xlu1 %1997 }
 0x571   : > { %v2003_v63 = vsel %vm2001_vm12, %v1998_v56, %v2000_v61 }
 0x572   : > { %4092 = vmatmul.mubr.msk.bf16.vlgmr.msra.gmra.mrb[8].mxu0 %vm721_vm0, %v4745_v33 }
 0x573   : > { %1827 = vmatpush1.bf16.msra.mxu0 %v1801_v35  ;;  %1762 = vmatprep.mubr.bf16.mxu0 %v5323_v42 }
 0x574   : > { %1828 = vmatprep.subr.bf16.mxu0 %v1804_v37  ;;  %v2098_v58 = vpop.permute.xlu1 %2097 }
 0x575   : > { %v2110_v62 = vsel %vm2103_vm13, %v2098_v58, 0  ;;  %v2104_v14 = vsel %vm2103_vm13, %v2096_v10, %v2098_v58  ;;  %v2209_v22 = vpop.permute.xlu0 %2208 }
 0x576   : > { %v2116_v3 = vmul.bf16 %v2110_v62, %v6035_v51  ;;  %v2115_v4 = vmul.bf16 %v2104_v14, %v6041_v60 }
 0x577   : > { %1829 = vmatpush1.bf16.msra.mxu0 %v1803_v39 }
 0x578   : > { %1932 = vmatprep.subr.bf16.mxu0 %v1908_v40  ;;  %v2102_v7 = vpop.permute.xlu1 %2101 }
 0x579   : > { %v2113_v11 = vsel %vm2103_vm13, %v2102_v7, 0  ;;  %v2105_v18 = vsel %vm2103_vm13, %v2100_v2, %v2102_v7  ;;  %v2241_v25 = vpop.permute.xlu0 %2240  ;;  %v2265_v2 = vld [vmem:[#allocation17] sm:$0xff] }
 0x57a   : > { %4093 = vmatmul.mubr.msk.bf16.gmra.mrb[12].mxu0 %vm721_vm0, %v4746_v41  ;;  %v2118_v17 = vmul.bf16 %v2113_v11, %v6035_v51  ;;  %v2117_v0 = vmul.bf16 %v2105_v18, %v6041_v60  ;;  %v2262_v11 = vld [vmem:[#allocation16 + $0x8] sm:$0xff]  ;;  %v2264_v18 = vld [vmem:[#allocation16 + $0x18] sm:$0xff] }
 0x57b   : > { %1858 = vmatprep.mubr.bf16.mxu0 %v5323_v42 }
 0x57c   : > { %v2204_v21 = vpop.permute.xlu1 %2203 }
 0x57d   : > { %v2219_v35 = vpop.permute.xlu0 %2218 }
 0x580   : > { %v2236_v23 = vpop.permute.xlu1 %2235 }
 0x582   : > { %4096 = vmatmul.mubr.msk.bf16.vlgmr.msra.gmra.mrb[8].mxu0 %vm721_vm0, %v4747_v45 }
 0x583   : > { %1933 = vmatpush1.bf16.msra.mxu0 %v1907_v48  ;;  %1868 = vmatprep.mubr.bf16.mxu0 %v5323_v42  ;;  %v2251_v48 = vpop.permute.xlu0 %2250 }
 0x584   : > { %1934 = vmatprep.subr.bf16.mxu0 %v1910_v49  ;;  %v2214_v33 = vpop.permute.xlu1 %2213 }
 0x587   : > { %1935 = vmatpush1.bf16.msra.mxu0 %v1909_v53 }
 0x588   : > { %4104 = vmatprep.subr.msk.bf16.mxu0 %vm2001_vm12, %v1996_v55  ;;  %v2246_v43 = vpop.permute.xlu1 %2245 }
 0x58a   : > { %4097 = vmatmul.mubr.msk.bf16.gmra.mrb[12].mxu0 %vm721_vm0, %v4748_v54 }
 0x58b   : > { %1964 = vmatprep.mubr.bf16.mxu0 %v5323_v42 }
 0x592   : > { %4100 = vmatmul.mubr.msk.bf16.vlgmr.msra.gmra.mrb[8].mxu0 %vm721_vm0, %v4749_v57 }
 0x593   : > { %2035 = vmatpush1.bf16.msra.mxu0 %v2002_v59  ;;  %1974 = vmatprep.mubr.bf16.mxu0 %v5323_v42 }
 0x594   : > { %4105 = vmatprep.subr.msk.bf16.mxu0 %vm2001_vm12, %v2000_v61 }
 0x597   : > { %2037 = vmatpush1.bf16.msra.mxu0 %v2003_v63 }
 0x598   : > { %2140 = vmatprep.subr.bf16.mxu0 %v2116_v3 }
 0x59a   : > { %4101 = vmatmul.mubr.msk.bf16.gmra.mrb[12].mxu0 %vm721_vm0, %v4750_v8 }
 0x59b   : > { %2066 = vmatprep.mubr.bf16.mxu0 %v5323_v42 }
 0x5a2   : > { %4106 = vmatmul.mubr.msk.bf16.vlgmr.msra.gmra.mrb[8].mxu0 %vm721_vm0, %v4751_v15  ;;  %v2261_v15 = vld [vmem:[#allocation16] sm:$0xff] }
 0x5a3   : > { %2141 = vmatpush1.bf16.msra.mxu0 %v2115_v4  ;;  %2076 = vmatprep.mubr.bf16.mxu0 %v5323_v42  ;;  %v2266_v4 = vld [vmem:[#allocation17 + $0x8] sm:$0xff] }
 0x5a4   : > { %2142 = vmatprep.subr.bf16.mxu0 %v2118_v17  ;;  %v2263_v17 = vld [vmem:[#allocation16 + $0x10] sm:$0xff] }
 0x5a7   : > { %2143 = vmatpush1.bf16.msra.mxu0 %v2117_v0 }
 0x5aa   : > { %4107 = vmatmul.mubr.msk.bf16.gmra.mrb[12].mxu0 %vm721_vm0, %v4752_v1 }
 0x5ab   : > { %2172 = vmatprep.mubr.bf16.mxu0 %v5323_v42 }
 0x5b2   : > { %4110 = vmatmul.mubr.msk.bf16.vlgmr.msra.gmra.mrb[8].mxu0 %vm721_vm0, %v4753_v19 }
 0x5b3   : > { %2182 = vmatprep.mubr.bf16.mxu0 %v5323_v42 }
 0x5ba   : > { %4111 = vmatmul.mubr.msk.bf16.gmra.mrb[12].mxu0 %vm721_vm0, %v4754_v20 }
 0x5bb   : > { %2946 = vmatprep.mubr.bf16.mxu0 %v5323_v42 }
 0x685   : > { %v2174_v26 = vpop.f32.mrb[8].mxu0 }
 0x686   : > { %v2221_v12 = vadd.f32 %v2204_v21, %v2174_v26  ;;  %v2176_v27 = vpop.f32.mrb[9].mxu0 }
 0x687   : > { %v2222_v29 = vadd.f32 %v2204_v21, %v2176_v27  ;;  %v2178_v9 = vpop.f32.mrb[10].mxu0 }
 0x688   : > { %v6121_v30 = vadd.f32 %v2236_v23, %v2221_v12  ;;  %v2223_v31 = vadd.f32 %v2209_v22, %v2178_v9  ;;  %v2180_v32 = vpop.f32.mrb[11].mxu0  ;;  %v4853_v12 = vld [vmem:[#allocation5 + $0x8] sm:$0xff]  ;;  %v4854_v9 = vld [vmem:[#allocation5 + $0x10] sm:$0xff] }
 0x689   : > { %v6123_v5 = vadd.f32 %v2236_v23, %v2222_v29  ;;  %v2224_v34 = vadd.f32 %v2209_v22, %v2180_v32  ;;  %v4855_v32 = vld [vmem:[#allocation5 + $0x18] sm:$0xff] }
 0x68a   : > { %v6125_v16 = vadd.f32 %v2241_v25, %v2223_v31  ;;  %v2281_v55 = vmul.f32 %v6121_v30, %v6121_v30 }
 0x68b   : > { %v6127_v37 = vadd.f32 %v2241_v25, %v2224_v34  ;;  %v2269_v6 = vadd.f32 %v6123_v5, %v6121_v30  ;;  %v2282_v56 = vmul.f32 %v6123_v5, %v6123_v5  ;;  %v4857_v34 = vld [vmem:[#allocation7] sm:$0xff] }
 0x68c   : > { %v2283_v58 = vmul.f32 %v6125_v16, %v6125_v16 }
 0x68d   : > { %2270 = vadd.xlane.f32.xlu1 %v2269_v6  ;;  %v2184_v38 = vpop.f32.mrb[12].mxu0  ;;  %v2272_v39 = vadd.f32 %v6127_v37, %v6125_v16  ;;  %v2284_v59 = vmul.f32 %v6127_v37, %v6127_v37  ;;  %v2289_v61 = vadd.f32 %v2282_v56, %v2281_v55 }
 0x68e   : > { %v2225_v40 = vadd.f32 %v2214_v33, %v2184_v38  ;;  %v2186_v41 = vpop.f32.mrb[13].mxu0 }
 0x68f   : > { %v2226_v44 = vadd.f32 %v2214_v33, %v2186_v41  ;;  %v2188_v24 = vpop.f32.mrb[14].mxu0  ;;  %2273 = vadd.xlane.f32.xlu0 %v2272_v39  ;;  %v2292_v3 = vadd.f32 %v2284_v59, %v2283_v58  ;;  %v4856_v33 = vld [vmem:[#allocation5] sm:$0xff] }
 0x690   : > { %v6133_v45 = vadd.f32 %v2246_v43, %v2225_v40  ;;  %v2227_v46 = vadd.f32 %v2219_v35, %v2188_v24  ;;  %v2190_v47 = vpop.f32.mrb[15].mxu0 }
 0x691   : > { %v6135_v49 = vadd.f32 %v2246_v43, %v2226_v44  ;;  %v2228_v50 = vadd.f32 %v2219_v35, %v2190_v47 }
 0x692   : > { %v6137_v52 = vadd.f32 %v2251_v48, %v2227_v46  ;;  %v2285_v62 = vmul.f32 %v6133_v45, %v6133_v45 }
 0x693   : > { %v6139_v53 = vadd.f32 %v2251_v48, %v2228_v50  ;;  %v2275_v54 = vadd.f32 %v6135_v49, %v6133_v45  ;;  %v2286_v63 = vmul.f32 %v6135_v49, %v6135_v49 }
 0x694   : > { %v2287_v8 = vmul.f32 %v6137_v52, %v6137_v52 }
 0x695   : > { %2276 = vadd.xlane.f32.xlu0 %v2275_v54  ;;  %v2278_v57 = vadd.f32 %v6139_v53, %v6137_v52  ;;  %v2288_v10 = vmul.f32 %v6139_v53, %v6139_v53  ;;  %v2295_v7 = vadd.f32 %v2286_v63, %v2285_v62 }
 0x697   : > { %2279 = vadd.xlane.f32.xlu1 %v2278_v57  ;;  %v2298_v14 = vadd.f32 %v2288_v10, %v2287_v8 }
 0x699   : > { %2290 = vadd.xlane.f32.xlu0 %v2289_v61 }
 0x69b   : > { %2293 = vadd.xlane.f32.xlu1 %v2292_v3 }
 0x69d   : > { %2296 = vadd.xlane.f32.xlu0 %v2295_v7 }
 0x69f   : > { %2299 = vadd.xlane.f32.xlu1 %v2298_v14  ;;  %v4858_v14 = vld [vmem:[#allocation7 + $0x8] sm:$0xff] }
 0x6b0   : > { %2727 = vperm.xlu1 %4735, %v2261_v15  }
 0x6b3   : > { %2732 = vperm.xlu0 %4736, %v2262_v11  }
 0x6b4   : > { %2755 = vperm.xlu1 %4735, %v2265_v2   ;;  %v4859_v2 = vld [vmem:[#allocation7 + $0x10] sm:$0xff] }
 0x6b7   : > { %2760 = vperm.xlu0 %4736, %v2266_v4  }
 0x6b8   : > { %2737 = vperm.xlu1 %4735, %v2263_v17  }
 0x6bb   : > { %2742 = vperm.xlu0 %4736, %v2264_v18  }
 0x71a   : > { %v2271_v0 = vpop.xlane.xlu1 %2270 }
 0x71c   : > { %v2274_v1 = vpop.xlane.xlu0 %2273 }
 0x71d   : > { %v4405_v19 = vpack.c.bf16 %v2274_v1, %v2271_v0  ;;  %v4860_v1 = vld [vmem:[#allocation7 + $0x18] sm:$0xff] }
 0x71f   : > { %4406 = vmatprep.subr.bf16.mxu1 %v4405_v19 }
 0x720   : > { %4408 = vmatpush3.bf16.msra.mxu1 %v4405_v19 }
 0x722   : > { %v2277_v20 = vpop.xlane.xlu0 %2276 }
 0x724   : > { %v2280_v21 = vpop.xlane.xlu1 %2279 }
 0x725   : > { %v4409_v22 = vpack.c.bf16 %v2280_v21, %v2277_v20 }
 0x726   : > { %v2291_v23 = vpop.xlane.xlu0 %2290 }
 0x727   : > { %4410 = vmatprep.subr.bf16.mxu1 %v4409_v22 }
 0x728   : > { %v2294_v25 = vpop.xlane.xlu1 %2293  ;;  %4412 = vmatpush3.bf16.msra.mxu1 %v4409_v22 }
 0x729   : > { %v4413_v26 = vpack.c.bf16 %v2294_v25, %v2291_v23 }
 0x72a   : > { %v2297_v27 = vpop.xlane.xlu0 %2296 }
 0x72b   : > { %4326 = vmatmul.mubr.msk.f32.vlgmr.msra.gmra.mrb[8].mxu1 %vm721_vm0, %v4853_v12  ;;  %4414 = vmatprep.subr.bf16.mxu1 %v4413_v26 }
 0x72c   : > { %v2300_v29 = vpop.xlane.xlu1 %2299  ;;  %4416 = vmatpush3.bf16.msra.mxu1 %v4413_v26  ;;  %4328 = vmatprep.mubr.msk.f32.mxu1 %vm721_vm0, %v4854_v9 }
 0x72d   : > { %v4417_v31 = vpack.c.bf16 %v2300_v29, %v2297_v27 }
 0x72f   : > { %4329 = vmatmul.mubr.msk.f32.gmra.mrb[10].mxu1 %vm721_vm0, %v4855_v32  ;;  %4418 = vmatprep.subr.bf16.mxu1 %v4417_v31 }
 0x730   : > { %4420 = vmatpush3.bf16.msra.mxu1 %v4417_v31  ;;  %4339 = vmatprep.mubr.msk.f32.mxu1 %vm721_vm0, %v4856_v33 }
 0x733   : > { %4340 = vmatmul.mubr.msk.f32.vlgmr.msra.gmra.mrb[12].mxu1 %vm721_vm0, %v4853_v12 }
 0x734   : > { %4342 = vmatprep.mubr.msk.f32.mxu1 %vm721_vm0, %v4854_v9 }
 0x737   : > { %4343 = vmatmul.mubr.msk.f32.gmra.mrb[14].mxu1 %vm721_vm0, %v4855_v32 }
 0x738   : > { %4353 = vmatprep.mubr.msk.f32.mxu1 %vm721_vm0, %v4857_v34 }
 0x7fe   : > { %v4327_v35 = vpop.f32.mrb[8].mxu1 }
 0x7ff   : > { %v2472_v6 = vmul.f32 0.00390625, %v4327_v35  ;;  %v2367_v38 = vpop.f32.mrb[9].mxu1 }
 0x800   : > { %v2471_v39 = vmul.f32 0.00390625, %v2367_v38  ;;  %v2267_v38 = vld [vmem:[#allocation17 + $0x10] sm:$0xff] }
 0x801   : > { %v2480_v48 = vmul.f32 %v2472_v6, %v2472_v6 }
 0x802   : > { %v4421_v40 = vpack.c.bf16 %v2472_v6, %v2471_v39  ;;  %v4330_v41 = vpop.f32.mrb[10].mxu1  ;;  %v2479_v55 = vmul.f32 %v2471_v39, %v2471_v39  ;;  %v2268_v6 = vld [vmem:[#allocation17 + $0x18] sm:$0xff]  ;;  %v2733_v39 = vpop.permute.xlu0 %2732 }
 0x803   : > { %v2474_v43 = vmul.f32 0.00390625, %v4330_v41  ;;  %v2377_v44 = vpop.f32.mrb[11].mxu1 }
 0x804   : > { %v2473_v24 = vmul.f32 0.00390625, %v2377_v44  ;;  %4422 = vmatprep.subr.bf16.mxu1 %v4421_v40 }
 0x805   : > { %4424 = vmatpush3.bf16.msra.mxu1 %v4421_v40  ;;  %v2482_v61 = vmul.f32 %v2474_v43, %v2474_v43  ;;  %v2728_v40 = vpop.permute.xlu1 %2727 }
 0x806   : > { %v4425_v46 = vpack.c.bf16 %v2474_v43, %v2473_v24  ;;  %v4341_v47 = vpop.f32.mrb[12].mxu1  ;;  %v2481_v8 = vmul.f32 %v2473_v24, %v2473_v24  ;;  %v2761_v41 = vpop.permute.xlu0 %2760 }
 0x807   : > { %v2476_v50 = vmul.f32 0.00390625, %v4341_v47  ;;  %v2452_v54 = vpop.f32.mrb[13].mxu1 }
 0x808   : > { %v2475_v56 = vmul.f32 0.00390625, %v2452_v54  ;;  %4426 = vmatprep.subr.bf16.mxu1 %v4425_v46 }
 0x809   : > { %v2484_v57 = vsub.f32 %v2476_v50, %v2480_v48  ;;  %4428 = vmatpush3.bf16.msra.mxu1 %v4425_v46  ;;  %v2756_v43 = vpop.permute.xlu1 %2755 }
 0x80a   : > { %v2483_v58 = vsub.f32 %v2475_v56, %v2479_v55  ;;  %v4344_v59 = vpop.f32.mrb[14].mxu1  ;;  %v2743_v44 = vpop.permute.xlu0 %2742 }
 0x80b   : > { %v2488_v62 = vmax.f32 %v2484_v57, 0.0  ;;  %v2478_v63 = vmul.f32 0.00390625, %v4344_v59  ;;  %v2462_v3 = vpop.f32.mrb[15].mxu1 }
 0x80c   : > { %v2487_v10 = vmax.f32 %v2483_v58, 0.0  ;;  %v2477_v7 = vmul.f32 0.00390625, %v2462_v3  ;;  %4354 = vmatmul.mubr.msk.f32.vlgmr.msra.gmra.mrb[16].mxu1 %vm721_vm0, %v4858_v14 }
 0x80d   : > { %v2492_v15 = vadd.f32 1e-06, %v2488_v62  ;;  %v2486_v11 = vsub.f32 %v2478_v63, %v2482_v61  ;;  %4356 = vmatprep.mubr.msk.f32.mxu1 %vm721_vm0, %v4859_v2  ;;  %v2738_v24 = vpop.permute.xlu1 %2737 }
 0x80e   : > { %v2491_v4 = vadd.f32 1e-06, %v2487_v10  ;;  %v2485_v17 = vsub.f32 %v2477_v7, %v2481_v8 }
 0x80f   : > { %4813 = vrsqrt.f32 %v2492_v15  ;;  %v2490_v18 = vmax.f32 %v2486_v11, 0.0 }
 0x810   : > { %4815 = vrsqrt.f32 %v2491_v4  ;;  %v2489_v0 = vmax.f32 %v2485_v17, 0.0  ;;  %4357 = vmatmul.mubr.msk.f32.gmra.mrb[18].mxu1 %vm721_vm0, %v4860_v1 }
 0x811   : > { %v2494_v19 = vadd.f32 1e-06, %v2490_v18  ;;  %4367 = vmatprep.mubr.msk.f32.mxu1 %vm721_vm0, %v4857_v34 }
 0x812   : > { %v2493_v20 = vadd.f32 1e-06, %v2489_v0 }
 0x813   : > { %4817 = vrsqrt.f32 %v2494_v19 }
 0x814   : > { %4819 = vrsqrt.f32 %v2493_v20 }
 0x819   : > { %v4814_v21 = vpop.eup %4813 }
 0x81a   : > { %v4816_v22 = vpop.eup %4815 }
 0x81b   : > { %v4429_v23 = vpack.c.bf16 %v4814_v21, %v4816_v22 }
 0x81d   : > { %v4818_v25 = vpop.eup %4817  ;;  %4430 = vmatprep.subr.bf16.mxu1 %v4429_v23 }
 0x81e   : > { %v4820_v26 = vpop.eup %4819  ;;  %4432 = vmatpush3.bf16.msra.mxu1 %v4429_v23 }
 0x81f   : > { %v4433_v12 = vpack.c.bf16 %v4818_v25, %v4820_v26 }
 0x821   : > { %4434 = vmatprep.subr.bf16.mxu1 %v4433_v12 }
 0x822   : > { %4436 = vmatpush3.bf16.msra.mxu1 %v4433_v12 }
 0x825   : > { %4368 = vmatmul.mubr.msk.f32.vlgmr.msra.gmra.mrb[20].mxu1 %vm721_vm0, %v4858_v14 }
 0x826   : > { %4370 = vmatprep.mubr.msk.f32.mxu1 %vm721_vm0, %v4859_v2 }
 0x829   : > { %4371 = vmatmul.mubr.msk.f32.gmra.mrb[22].mxu1 %vm721_vm0, %v4860_v1 }
 0x82a   : > { %3015 = vmatprep.mubr.bf16.mxu1 %v5323_v42 }
 0x8df   : > { %v4355_v27 = vpop.f32.mrb[16].mxu1 }
 0x8e0   : > { %2676 = vperm.xlu1 %4735, %v4355_v27   ;;  %v2565_v29 = vpop.f32.mrb[17].mxu1 }
 0x8e1   : > { %2671 = vperm.xlu0 %4736, %v2565_v29  }
 0x8e3   : > { %v4358_v9 = vpop.f32.mrb[18].mxu1 }
 0x8e4   : > { %v2575_v31 = vpop.f32.mrb[19].mxu1 }
 0x8e5   : > { %2686 = vperm.xlu0 %4736, %v4358_v9   ;;  %2681 = vperm.xlu1 %4735, %v2575_v31  }
 0x8f8   : > { %v4369_v32 = vpop.f32.mrb[20].mxu1 }
 0x8f9   : > { %2704 = vperm.xlu0 %4736, %v4369_v32   ;;  %v2650_v33 = vpop.f32.mrb[21].mxu1 }
 0x8fa   : > { %2699 = vperm.xlu1 %4735, %v2650_v33  }
 0x8fc   : > { %v4372_v34 = vpop.f32.mrb[22].mxu1 }
 0x8fd   : > { %2714 = vperm.xlu0 %4736, %v4372_v34   ;;  %v2660_v35 = vpop.f32.mrb[23].mxu1 }
 0x8fe   : > { %2709 = vperm.xlu1 %4735, %v2660_v35  }
 0x901   : > { %2770 = vperm.xlu0 %4736, %v2268_v6  }
 0x902   : > { %2765 = vperm.xlu1 %4735, %v2267_v38  }
 0x95f   : > { %v2677_v47 = vpop.permute.xlu1 %2676 }
 0x960   : > { %v2672_v46 = vpop.permute.xlu0 %2671  ;;  %v2691_v54 = vsub.f32 %v6125_v16, %v2677_v47  ;;  %v2692_v55 = vsub.f32 %v6127_v37, %v2677_v47 }
 0x961   : > { %v2689_v56 = vsub.f32 %v6121_v30, %v2672_v46  ;;  %v2690_v57 = vsub.f32 %v6123_v5, %v2672_v46 }
 0x964   : > { %v2687_v48 = vpop.permute.xlu0 %2686  ;;  %v2682_v50 = vpop.permute.xlu1 %2681 }
 0x965   : > { %v2695_v8 = vsub.f32 %v6137_v52, %v2687_v48  ;;  %v2696_v10 = vsub.f32 %v6139_v53, %v2687_v48  ;;  %v2693_v16 = vsub.f32 %v6133_v45, %v2682_v50  ;;  %v2694_v37 = vsub.f32 %v6135_v49, %v2682_v50 }
 0x978   : > { %v2705_v58 = vpop.permute.xlu0 %2704 }
 0x979   : > { %v2719_v59 = vmul.f32 %v2705_v58, %v2691_v54  ;;  %v2720_v61 = vmul.f32 %v2705_v58, %v2692_v55  ;;  %v2700_v62 = vpop.permute.xlu1 %2699 }
 0x97a   : > { %v2717_v63 = vmul.f32 %v2700_v62, %v2689_v56  ;;  %v2718_v3 = vmul.f32 %v2700_v62, %v2690_v57 }
 0x97b   : > { %v2747_v7 = vmul.f32 %v2733_v39, %v2719_v59  ;;  %v2748_v14 = vmul.f32 %v2733_v39, %v2720_v61 }
 0x97c   : > { %v2745_v15 = vmul.f32 %v2728_v40, %v2717_v63  ;;  %v2746_v30 = vmul.f32 %v2728_v40, %v2718_v3  ;;  %v2715_v11 = vpop.permute.xlu0 %2714 }
 0x97d   : > { %v2775_v5 = vadd.f32 %v2761_v41, %v2747_v7  ;;  %v2776_v2 = vadd.f32 %v2761_v41, %v2748_v14  ;;  %v2723_v4 = vmul.f32 %v2715_v11, %v2695_v8  ;;  %v2724_v17 = vmul.f32 %v2715_v11, %v2696_v10  ;;  %v2710_v18 = vpop.permute.xlu1 %2709 }
 0x97e   : > { %v2773_v0 = vadd.f32 %v2756_v43, %v2745_v15  ;;  %v2774_v1 = vadd.f32 %v2756_v43, %v2746_v30  ;;  %v2721_v19 = vmul.f32 %v2710_v18, %v2693_v16  ;;  %v2722_v52 = vmul.f32 %v2710_v18, %v2694_v37 }
 0x97f   : > { %v4130_v20 = vmul.f32 -1.442695, %v2775_v5  ;;  %v4131_v53 = vmul.f32 -1.442695, %v2776_v2  ;;  %v2751_v21 = vmul.f32 %v2743_v44, %v2723_v4  ;;  %v2752_v22 = vmul.f32 %v2743_v44, %v2724_v17 }
 0x980   : > { %v4128_v23 = vmul.f32 -1.442695, %v2773_v0  ;;  %v4129_v45 = vmul.f32 -1.442695, %v2774_v1  ;;  %v2771_v25 = vpop.permute.xlu0 %2770  ;;  %v2749_v49 = vmul.f32 %v2738_v24, %v2721_v19  ;;  %v2750_v26 = vmul.f32 %v2738_v24, %v2722_v52  ;;  %v2843_v19 = vld [vmem:[#allocation20 + $0x10] sm:$0xff]  ;;  %v2844_v52 = vld [vmem:[#allocation20 + $0x18] sm:$0xff] }
 0x981   : > { %4821 = vpow2.f32 %v4130_v20  ;;  %v2779_v12 = vadd.f32 %v2771_v25, %v2751_v21  ;;  %v2780_v27 = vadd.f32 %v2771_v25, %v2752_v22  ;;  %v2766_v29 = vpop.permute.xlu1 %2765 }
 0x982   : > { %4823 = vpow2.f32 %v4131_v53  ;;  %v2777_v9 = vadd.f32 %v2766_v29, %v2749_v49  ;;  %v2778_v31 = vadd.f32 %v2766_v29, %v2750_v26 }
 0x983   : > { %4825 = vpow2.f32 %v4128_v23  ;;  %v4134_v32 = vmul.f32 -1.442695, %v2779_v12  ;;  %v4135_v33 = vmul.f32 -1.442695, %v2780_v27 }
 0x984   : > { %4827 = vpow2.f32 %v4129_v45  ;;  %v4132_v34 = vmul.f32 -1.442695, %v2777_v9  ;;  %v4133_v35 = vmul.f32 -1.442695, %v2778_v31 }
 0x985   : > { %4829 = vpow2.f32 %v4134_v32 }
 0x986   : > { %4831 = vpow2.f32 %v4135_v33  ;;  %v4755_v33 = vld [vmem:[#allocation19] sm:$0xff]  }
 0x987   : > { %4833 = vpow2.f32 %v4132_v34 }
 0x988   : > { %4835 = vpow2.f32 %v4133_v35 }
 0x98b   : > { %v4822_v6 = vpop.eup %4821 }
 0x98c   : > { %v4824_v38 = vpop.eup %4823  ;;  %v2807_v39 = vadd.f32 1.0, %v4822_v6 }
 0x98d   : > { %v4826_v40 = vpop.eup %4825  ;;  %v2808_v41 = vadd.f32 1.0, %v4824_v38 }
 0x98e   : > { %v4828_v43 = vpop.eup %4827  ;;  %4837 = vrcp.f32 %v2807_v39  ;;  %v2805_v44 = vadd.f32 1.0, %v4826_v40 }
 0x98f   : > { %v4830_v24 = vpop.eup %4829  ;;  %4839 = vrcp.f32 %v2808_v41  ;;  %v2806_v46 = vadd.f32 1.0, %v4828_v43 }
 0x990   : > { %v4832_v47 = vpop.eup %4831  ;;  %4841 = vrcp.f32 %v2805_v44  ;;  %v2811_v48 = vadd.f32 1.0, %v4830_v24 }
 0x991   : > { %v4834_v50 = vpop.eup %4833  ;;  %4843 = vrcp.f32 %v2806_v46  ;;  %v2812_v54 = vadd.f32 1.0, %v4832_v47  ;;  %v4756_v47 = vld [vmem:[#allocation19 + $0x8] sm:$0xff]  }
 0x992   : > { %v4836_v55 = vpop.eup %4835  ;;  %4845 = vrcp.f32 %v2811_v48  ;;  %v2809_v56 = vadd.f32 1.0, %v4834_v50 }
 0x993   : > { %4847 = vrcp.f32 %v2812_v54  ;;  %v2810_v57 = vadd.f32 1.0, %v4836_v55 }
 0x994   : > { %4849 = vrcp.f32 %v2809_v56 }
 0x995   : > { %4851 = vrcp.f32 %v2810_v57 }
 0x998   : > { %v4838_v58 = vpop.eup %4837 }
 0x999   : > { %v4840_v59 = vpop.eup %4839  ;;  %v2831_v61 = vmul.f32 %v4838_v58, %v2775_v5 }
 0x99a   : > { %v4842_v62 = vpop.eup %4841  ;;  %v2832_v63 = vmul.f32 %v4840_v59, %v2776_v2  ;;  %v4757_v59 = vld [vmem:[#allocation19 + $0x20] sm:$0xff]  }
 0x99b   : > { %v4844_v3 = vpop.eup %4843  ;;  %v2829_v8 = vmul.f32 %v4842_v62, %v2773_v0  ;;  %v2841_v0 = vld [vmem:[#allocation20] sm:$0xff] }
 0x99c   : > { %v4846_v10 = vpop.eup %4845  ;;  %v2830_v7 = vmul.f32 %v4844_v3, %v2774_v1  ;;  %v2842_v1 = vld [vmem:[#allocation20 + $0x8] sm:$0xff] }
 0x99d   : > { %v4848_v14 = vpop.eup %4847  ;;  %v6185_v16 = vpack.c.bf16 %v2831_v61, %v2829_v8  ;;  %v2835_v37 = vmul.f32 %v4846_v10, %v2779_v12 }
 0x99e   : > { %v4850_v15 = vpop.eup %4849  ;;  %v6187_v30 = vpack.c.bf16 %v2832_v63, %v2830_v7  ;;  %v2836_v11 = vmul.f32 %v4848_v14, %v2780_v27 }
 0x99f   : > { %v4852_v4 = vpop.eup %4851  ;;  %v2833_v17 = vmul.f32 %v4850_v15, %v2777_v9  ;;  %2849 = vrot.lane.b32.xlu1 %v6185_v16, %s5325_s3  ;;  %v4758_v15 = vld [vmem:[#allocation19 + $0x28] sm:$0xff]  }
 0x9a0   : > { %v2834_v5 = vmul.f32 %v4852_v4, %v2778_v31  ;;  %2851 = vrot.lane.b32.xlu0 %v6187_v30, %s5325_s3 }
 0x9a1   : > { %v6193_v2 = vpack.c.bf16 %v2835_v37, %v2833_v17 }
 0x9a2   : > { %v6195_v18 = vpack.c.bf16 %v2836_v11, %v2834_v5 }
 0x9a3   : > { %2853 = vrot.lane.b32.xlu1 %v6193_v2, %s5325_s3 }
 0x9a4   : > { %2855 = vrot.lane.b32.xlu0 %v6195_v18, %s5325_s3 }
 0x9a7   : > { %3036 = vrot.lane.b32.xlu1 %v6185_v16, %s5326_s29 }
 0x9a8   : > { %3038 = vrot.lane.b32.xlu0 %v6187_v30, %s5326_s29 }
 0x9ab   : > { %3040 = vrot.lane.b32.xlu1 %v6193_v2, %s5326_s29 }
 0x9ac   : > { %3042 = vrot.lane.b32.xlu0 %v6195_v18, %s5326_s29 }
 0x9af   : > { %3140 = vrot.lane.b32.xlu1 %v6185_v16, %s5327_s14 }
 0x9b0   : > { %3142 = vrot.lane.b32.xlu0 %v6187_v30, %s5327_s14 }
 0x9b3   : > { %3144 = vrot.lane.b32.xlu1 %v6193_v2, %s5327_s14 }
 0x9b4   : > { %3146 = vrot.lane.b32.xlu0 %v6195_v18, %s5327_s14 }
 0x9b7   : > { %3328 = vrot.lane.b32.xlu1 %v6187_v30, %s5328_s1 }
 0x9b8   : > { %3326 = vrot.lane.b32.xlu0 %v6185_v16, %s5328_s1 }
 0x9bb   : > { %3332 = vrot.lane.b32.xlu1 %v6195_v18, %s5328_s1 }
 0x9bc   : > { %3330 = vrot.lane.b32.xlu0 %v6193_v2, %s5328_s1 }
 0x9bf   : > { %3432 = vrot.lane.b32.xlu1 %v6187_v30, %s5329_s28 }
 0x9c0   : > { %3430 = vrot.lane.b32.xlu0 %v6185_v16, %s5329_s28 }
 0x9c3   : > { %3436 = vrot.lane.b32.xlu1 %v6195_v18, %s5329_s28 }
 0x9c4   : > { %3434 = vrot.lane.b32.xlu0 %v6193_v2, %s5329_s28 }
 0x9c7   : > { %3534 = vrot.lane.b32.xlu1 %v6185_v16, %s5330_s7 }
 0x9c8   : > { %3536 = vrot.lane.b32.xlu0 %v6187_v30, %s5330_s7 }
 0x9cb   : > { %3538 = vrot.lane.b32.xlu1 %v6193_v2, %s5330_s7 }
 0x9cc   : > { %3540 = vrot.lane.b32.xlu0 %v6195_v18, %s5330_s7 }
 0x9cf   : > { %3636 = vrot.lane.b32.xlu1 %v6187_v30, %s5331_s6 }
 0x9d0   : > { %3634 = vrot.lane.b32.xlu0 %v6185_v16, %s5331_s6 }
 0x9d3   : > { %2875 = vrot.lane.b32.xlu1 %v6185_v16, %s5324_s18 }
 0x9d4   : > { %2877 = vrot.lane.b32.xlu0 %v6187_v30, %s5324_s18 }
 0x9d7   : > { %3640 = vrot.lane.b32.xlu1 %v6195_v18, %s5331_s6 }
 0x9d8   : > { %3638 = vrot.lane.b32.xlu0 %v6193_v2, %s5331_s6 }
 0x9db   : > { %2879 = vrot.lane.b32.xlu1 %v6193_v2, %s5324_s18 }
 0x9dc   : > { %2881 = vrot.lane.b32.xlu0 %v6195_v18, %s5324_s18  ;;  %s5215_s18 = scalar_lea.vmem %s5214_s17, 1024 }
 0x9dd   : > { %p5217_p1 = scmp.lt.s32.totalorder %s5215_s18, %s5209_s27 }
 0x9df   : > { %3740 = vperm.xlu1 %4735, %v2841_v0   ;;  %v4759_v0 = vld [vmem:[#allocation19 + $0x30] sm:$0xff]   ;;  %p5218_p13 = por %p5217_p1, %p5216_p12 }
 0x9e0   : > { %3745 = vperm.xlu0 %4736, %v2842_v1  }
 0x9e1   : > { %p5219_p0 = pnand %p5218_p13, %p5212_p3 }
 0x9e3   : > { %3750 = vperm.xlu1 %4735, %v2843_v19  }
 0x9e4   : > { %3755 = vperm.xlu0 %4736, %v2844_v52  }
 0xa11   : > { %v2850_v20 = vpop.permute.xlu1 %2849 }
 0xa12   : > { %v2862_v53 = vsel %vm1303_vm5, 0, %v2850_v20  ;;  %v2852_v21 = vpop.permute.xlu0 %2851 }
 0xa13   : > { %v2867_v22 = vmul.bf16 %v2862_v53, %v6019_v13  ;;  %v2857_v23 = vsel %vm1303_vm5, %v2850_v20, %v2852_v21  ;;  %v4760_v21 = vld [vmem:[#allocation19 + $0x38] sm:$0xff]  }
 0xa14   : > { %v2868_v45 = vmul.bf16 %v2857_v23, %v6021_v36 }
 0xa15   : > { %v2854_v25 = vpop.permute.xlu1 %2853 }
 0xa16   : > { %v2865_v49 = vsel %vm1303_vm5, 0, %v2854_v25  ;;  %2983 = vmatprep.subr.bf16.mxu1 %v2868_v45  ;;  %v2856_v26 = vpop.permute.xlu0 %2855 }
 0xa17   : > { %v2869_v12 = vmul.bf16 %v2865_v49, %v6019_v13  ;;  %v2858_v27 = vsel %vm1303_vm5, %v2854_v25, %v2856_v26  ;;  %2984 = vmatpush1.bf16.msra.mxu1 %v2867_v22 }
 0xa18   : > { %v2870_v29 = vmul.bf16 %v2858_v27, %v6021_v36 }
 0xa19   : > { %v3037_v9 = vpop.permute.xlu1 %3036 }
 0xa1a   : > { %v3049_v31 = vsel %vm1495_vm7, 0, %v3037_v9  ;;  %2985 = vmatprep.subr.bf16.mxu1 %v2870_v29  ;;  %v3039_v32 = vpop.permute.xlu0 %3038 }
 0xa1b   : > { %v3054_v34 = vmul.bf16 %v3049_v31, %v6041_v60  ;;  %v3044_v35 = vsel %vm1495_vm7, %v3037_v9, %v3039_v32  ;;  %2986 = vmatpush1.bf16.msra.mxu1 %v2869_v12 }
 0xa1c   : > { %v3055_v6 = vmul.bf16 %v3044_v35, %v6035_v51 }
 0xa1d   : > { %v3041_v38 = vpop.permute.xlu1 %3040 }
 0xa1e   : > { %v3052_v39 = vsel %vm1495_vm7, 0, %v3041_v38  ;;  %4146 = vmatmul.mubr.msk.bf16.vlgmr.msra.gmra.mrb[24].mxu1 %vm721_vm0, %v4755_v33  ;;  %3079 = vmatprep.subr.bf16.mxu1 %v3055_v6  ;;  %v3043_v40 = vpop.permute.xlu0 %3042  ;;  %v4769_v33 = vld [vmem:[#allocation19 + $0x10] sm:$0xff]   ;;  %v4762_v6 = vld [vmem:[#allocation19 + $0x48] sm:$0xff]  }
 0xa1f   : > { %v3056_v41 = vmul.bf16 %v3052_v39, %v6041_v60  ;;  %v3045_v43 = vsel %vm1495_vm7, %v3041_v38, %v3043_v40  ;;  %3080 = vmatpush1.bf16.msra.mxu1 %v3054_v34  ;;  %3025 = vmatprep.mubr.bf16.mxu1 %v5323_v42  ;;  %v4771_v38 = vld [vmem:[#allocation19 + $0x18] sm:$0xff]   ;;  %v4763_v40 = vld [vmem:[#allocation19 + $0x50] sm:$0xff]  }
 0xa20   : > { %v3057_v44 = vmul.bf16 %v3045_v43, %v6035_v51 }
 0xa21   : > { %v3141_v24 = vpop.permute.xlu1 %3140 }
 0xa22   : > { %3081 = vmatprep.subr.bf16.mxu1 %v3057_v44  ;;  %v3143_v46 = vpop.permute.xlu0 %3142  ;;  %v3153_v57 = vsel %vm1601_vm9, 0, %v3141_v24 }
 0xa23   : > { %v3148_v48 = vsel %vm1601_vm9, %v3141_v24, %v3143_v46  ;;  %3082 = vmatpush1.bf16.msra.mxu1 %v3056_v41  ;;  %v3158_v62 = vmul.bf16 %v3153_v57, %v6019_v13  ;;  %v4764_v46 = vld [vmem:[#allocation19 + $0x58] sm:$0xff]  }
 0xa24   : > { %v3159_v50 = vmul.bf16 %v3148_v48, %v6021_v36 }
 0xa25   : > { %v3145_v54 = vpop.permute.xlu1 %3144 }
 0xa26   : > { %4147 = vmatmul.mubr.msk.bf16.gmra.mrb[28].mxu1 %vm721_vm0, %v4756_v47  ;;  %3183 = vmatprep.subr.bf16.mxu1 %v3159_v50  ;;  %v3147_v55 = vpop.permute.xlu0 %3146  ;;  %v3156_v3 = vsel %vm1601_vm9, 0, %v3145_v54 }
 0xa27   : > { %3111 = vmatprep.mubr.bf16.mxu1 %v5323_v42  ;;  %v3149_v61 = vsel %vm1601_vm9, %v3145_v54, %v3147_v55  ;;  %v3160_v7 = vmul.bf16 %v3156_v3, %v6019_v13  ;;  %v4766_v54 = vld [vmem:[#allocation19 + $0x68] sm:$0xff]   ;;  %v4770_v3 = vld [vmem:[#allocation19 + $0x80] sm:$0xff]  }
 0xa28   : > { %v3161_v8 = vmul.bf16 %v3149_v61, %v6021_v36 }
 0xa29   : > { %v3329_v56 = vpop.permute.xlu1 %3328 }
 0xa2a   : > { %v3327_v58 = vpop.permute.xlu0 %3326 }
 0xa2b   : > { %v3334_v45 = vsel %vm1789_vm10, %v3327_v58, %v3329_v56 }
 0xa2c   : > { %v3344_v26 = vmul.bf16 %v3334_v45, %v6041_v60 }
 0xa2d   : > { %v3333_v63 = vpop.permute.xlu1 %3332 }
 0xa2e   : > { %4150 = vmatmul.mubr.msk.bf16.vlgmr.msra.gmra.mrb[24].mxu1 %vm721_vm0, %v4757_v59  ;;  %v3331_v10 = vpop.permute.xlu0 %3330  ;;  %v3342_v49 = vsel %vm1789_vm10, %v3333_v63, 0 }
 0xa2f   : > { %3184 = vmatpush1.bf16.msra.mxu1 %v3158_v62  ;;  %3121 = vmatprep.mubr.bf16.mxu1 %v5323_v42  ;;  %v3347_v27 = vmul.bf16 %v3342_v49, %v6035_v51  ;;  %v3335_v29 = vsel %vm1789_vm10, %v3331_v10, %v3333_v63  ;;  %v4768_v63 = vld [vmem:[#allocation19 + $0x78] sm:$0xff]  }
 0xa30   : > { %3185 = vmatprep.subr.bf16.mxu1 %v3161_v8  ;;  %v3346_v34 = vmul.bf16 %v3335_v29, %v6041_v60 }
 0xa31   : > { %v3433_v14 = vpop.permute.xlu1 %3432 }
 0xa32   : > { %v3431_v37 = vpop.permute.xlu0 %3430  ;;  %v3443_v31 = vsel %vm1895_vm11, %v3433_v14, 0 }
 0xa33   : > { %3186 = vmatpush1.bf16.msra.mxu1 %v3160_v7  ;;  %v3449_v35 = vmul.bf16 %v3443_v31, %v6021_v36  ;;  %v3438_v39 = vsel %vm1895_vm11, %v3431_v37, %v3433_v14 }
 0xa34   : > { %3265 = vmatprep.subr.bf16.mxu1 %v6187_v30  ;;  %v3339_v30 = vsel %vm1789_vm10, %v3329_v56, 0  ;;  %v3448_v41 = vmul.bf16 %v3438_v39, %v6019_v13  ;;  %v4767_v56 = vld [vmem:[#allocation19 + $0x70] sm:$0xff]  }
 0xa35   : > { %v6288_v11 = vpop.permute.xlu1 %3436  ;;  %v3345_v20 = vmul.bf16 %v3339_v30, %v6035_v51 }
 0xa36   : > { %4151 = vmatmul.mubr.msk.bf16.gmra.mrb[28].mxu1 %vm721_vm0, %v4758_v15  ;;  %v3435_v4 = vpop.permute.xlu0 %3434  ;;  %v3446_v28 = vsel %vm1895_vm11, %v6288_v11, 0 }
 0xa37   : > { %3215 = vmatprep.mubr.bf16.mxu1 %v5323_v42  ;;  %v3451_v43 = vmul.bf16 %v3446_v28, %v6021_v36  ;;  %v3439_v44 = vsel %vm1895_vm11, %v3435_v4, %v6288_v11  ;;  %v4765_v36 = vld [vmem:[#allocation19 + $0x60] sm:$0xff]  }
 0xa38   : > { %v3450_v24 = vmul.bf16 %v3439_v44, %v6019_v13 }
 0xa39   : > { %v6292_v17 = vpop.permute.xlu1 %3534 }
 0xa3a   : > { %v6294_v5 = vpop.permute.xlu0 %3536 }
 0xa3b   : > { %v3542_v47 = vsel %vm2001_vm12, %v6292_v17, %v6294_v5 }
 0xa3d   : > { %v6296_v1 = vpop.permute.xlu1 %3538 }
 0xa3e   : > { %4154 = vmatmul.mubr.msk.bf16.vlgmr.msra.gmra.mrb[24].mxu1 %vm721_vm0, %v4759_v0  ;;  %v6299_v19 = vpop.permute.xlu0 %3540 }
 0xa3f   : > { %3266 = vmatpush1.bf16.msra.mxu1 %v6185_v16  ;;  %3225 = vmatprep.mubr.bf16.mxu1 %v5323_v42  ;;  %v3543_v13 = vsel %vm2001_vm12, %v6296_v1, %v6299_v19 }
 0xa40   : > { %3267 = vmatprep.subr.bf16.mxu1 %v6195_v18 }
 0xa41   : > { %v6305_v52 = vpop.permute.xlu1 %3636 }
 0xa42   : > { %v6308_v53 = vpop.permute.xlu0 %3634  ;;  %v3647_v48 = vsel %vm2103_vm13, %v6305_v52, 0 }
 0xa43   : > { %3268 = vmatpush1.bf16.msra.mxu1 %v6193_v2  ;;  %v4761_v2 = vld [vmem:[#allocation19 + $0x40] sm:$0xff]   ;;  %v3653_v50 = vmul.bf16 %v3647_v48, %v6035_v51  ;;  %v3642_v55 = vsel %vm2103_vm13, %v6308_v53, %v6305_v52 }
 0xa44   : > { %3369 = vmatprep.subr.bf16.mxu1 %v3345_v20  ;;  %v3652_v58 = vmul.bf16 %v3642_v55, %v6041_v60  ;;  %v4867_v48 = vld [vmem:[%s5805_s4 + $0x30] sm:$0xff] }
 0xa45   : > { %v2876_v22 = vpop.permute.xlu1 %2875 }
 0xa46   : > { %4155 = vmatmul.mubr.msk.bf16.gmra.mrb[28].mxu1 %vm721_vm0, %v4760_v21  ;;  %v2878_v23 = vpop.permute.xlu0 %2877 }
 0xa47   : > { %v2883_v16 = vsel %vm1332_vm1, %v2876_v22, %v2878_v23  ;;  %3297 = vmatprep.mubr.bf16.mxu1 %v5323_v42 }
 0xa48   : > { %2914 = vmatprep.subr.bf16.mxu0 %v2883_v16 }
 0xa49   : > { %4139 = vmatpush1.bf16.msk.msra.mxu0 %vm6011_vm3, %v2876_v22  ;;  %v6316_v18 = vpop.permute.xlu1 %3640  ;;  %v4861_v22 = vld [vmem:[%s5805_s4] sm:$0xff] }
 0xa4a   : > { %v6319_v25 = vpop.permute.xlu0 %3638  ;;  %v3650_v57 = vsel %vm2103_vm13, %v6316_v18, 0 }
 0xa4b   : > { %v3655_v59 = vmul.bf16 %v3650_v57, %v6035_v51  ;;  %v3643_v61 = vsel %vm2103_vm13, %v6319_v25, %v6316_v18  ;;  %v4772_v51 = vld [vmem:[#allocation19 + $0x88] sm:$0xff]   ;;  %v4862_v18 = vld [vmem:[%s5805_s4 + $0x8] sm:$0xff] }
 0xa4c   : > { %v3654_v62 = vmul.bf16 %v3643_v61, %v6041_v60 }
 0xa4d   : > { %v2880_v12 = vpop.permute.xlu1 %2879 }
 0xa4e   : > { %4158 = vmatmul.mubr.msk.bf16.vlgmr.msra.gmra.mrb[24].mxu1 %vm721_vm0, %v4761_v2  ;;  %v2882_v9 = vpop.permute.xlu0 %2881  ;;  %v4863_v2 = vld [vmem:[%s5805_s4 + $0x10] sm:$0xff] }
 0xa4f   : > { %3370 = vmatpush1.bf16.msra.mxu1 %v3344_v26  ;;  %v2884_v32 = vsel %vm1332_vm1, %v2880_v12, %v2882_v9  ;;  %3307 = vmatprep.mubr.bf16.mxu1 %v5323_v42 }
 0xa50   : > { %3371 = vmatprep.subr.bf16.mxu1 %v3347_v27  ;;  %2916 = vmatprep.subr.bf16.mxu0 %v2884_v32 }
 0xa51   : > { %4141 = vmatpush1.bf16.msk.msra.mxu0 %vm6011_vm3, %v2880_v12  ;;  %v4864_v12 = vld [vmem:[%s5805_s4 + $0x18] sm:$0xff] }
 0xa53   : > { %3372 = vmatpush1.bf16.msra.mxu1 %v3346_v34 }
 0xa54   : > { %3473 = vmatprep.subr.bf16.mxu1 %v3449_v35  ;;  %4142 = vmatmul.mubr.msk.bf16.vlgmr.msra.gmra.mrb[16].mxu0 %vm721_vm0, %v4769_v33 }
 0xa55   : > { %2956 = vmatprep.mubr.bf16.mxu0 %v5323_v42 }
 0xa56   : > { %4159 = vmatmul.mubr.msk.bf16.gmra.mrb[28].mxu1 %vm721_vm0, %v4762_v6 }
 0xa57   : > { %3401 = vmatprep.mubr.bf16.mxu1 %v5323_v42 }
 0xa5c   : > { %4143 = vmatmul.mubr.msk.bf16.gmra.mrb[20].mxu0 %vm721_vm0, %v4771_v38 }
 0xa5e   : > { %4162 = vmatmul.mubr.msk.bf16.vlgmr.msra.gmra.mrb[24].mxu1 %vm721_vm0, %v4763_v40  ;;  %v3741_v0 = vpop.permute.xlu1 %3740 }
 0xa5f   : > { %3474 = vmatpush1.bf16.msra.mxu1 %v3448_v41  ;;  %3411 = vmatprep.mubr.bf16.mxu1 %v5323_v42  ;;  %v3746_v20 = vpop.permute.xlu0 %3745 }
 0xa60   : > { %3475 = vmatprep.subr.bf16.mxu1 %v3451_v43  ;;  %v4865_v43 = vld [vmem:[%s5805_s4 + $0x20] sm:$0xff] }
 0xa62   : > { %v3751_v32 = vpop.permute.xlu1 %3750 }
 0xa63   : > { %3476 = vmatpush1.bf16.msra.mxu1 %v3450_v24  ;;  %v3756_v40 = vpop.permute.xlu0 %3755 }
 0xa64   : > { %4170 = vmatprep.subr.msk.bf16.mxu1 %vm2001_vm12, %v6294_v5 }
 0xa66   : > { %4163 = vmatmul.mubr.msk.bf16.gmra.mrb[28].mxu1 %vm721_vm0, %v4764_v46  ;;  %v4866_v46 = vld [vmem:[%s5805_s4 + $0x28] sm:$0xff] }
 0xa67   : > { %3505 = vmatprep.mubr.bf16.mxu1 %v5323_v42 }
 0xa6e   : > { %4166 = vmatmul.mubr.msk.bf16.vlgmr.msra.gmra.mrb[24].mxu1 %vm721_vm0, %v4765_v36 }
 0xa6f   : > { %3574 = vmatpush1.bf16.msra.mxu1 %v3542_v47  ;;  %3515 = vmatprep.mubr.bf16.mxu1 %v5323_v42 }
 0xa70   : > { %4171 = vmatprep.subr.msk.bf16.mxu1 %vm2001_vm12, %v6299_v19 }
 0xa73   : > { %3576 = vmatpush1.bf16.msra.mxu1 %v3543_v13 }
 0xa74   : > { %3677 = vmatprep.subr.bf16.mxu1 %v3653_v50 }
 0xa76   : > { %4167 = vmatmul.mubr.msk.bf16.gmra.mrb[28].mxu1 %vm721_vm0, %v4766_v54  ;;  %v4868_v54 = vld [vmem:[%s5805_s4 + $0x38] sm:$0xff] }
 0xa77   : > { %3605 = vmatprep.mubr.bf16.mxu1 %v5323_v42 }
 0xa7e   : > { %4172 = vmatmul.mubr.msk.bf16.vlgmr.msra.gmra.mrb[24].mxu1 %vm721_vm0, %v4767_v56 }
 0xa7f   : > { %3678 = vmatpush1.bf16.msra.mxu1 %v3652_v58  ;;  %3615 = vmatprep.mubr.bf16.mxu1 %v5323_v42 }
 0xa80   : > { %3679 = vmatprep.subr.bf16.mxu1 %v3655_v59 }
 0xa83   : > { %3680 = vmatpush1.bf16.msra.mxu1 %v3654_v62 }
 0xa86   : > { %4173 = vmatmul.mubr.msk.bf16.gmra.mrb[28].mxu1 %vm721_vm0, %v4768_v63 }
 0xa87   : > { %3709 = vmatprep.mubr.bf16.mxu1 %v5323_v42 }
 0xa8e   : > { %4176 = vmatmul.mubr.msk.bf16.vlgmr.msra.gmra.mrb[24].mxu1 %vm721_vm0, %v4770_v3 }
 0xa8f   : > { %3719 = vmatprep.mubr.bf16.mxu1 %v5323_v42 }
 0xa96   : > { %4177 = vmatmul.mubr.msk.bf16.gmra.mrb[28].mxu1 %vm721_vm0, %v4772_v51 }
 0xb27   : > { %v2948_v8 = vpop.f32.mrb[16].mxu0 }
 0xb28   : > { %v2950_v10 = vpop.f32.mrb[17].mxu0 }
 0xb29   : > { %v2952_v7 = vpop.f32.mrb[18].mxu0 }
 0xb2a   : > { %v2954_v14 = vpop.f32.mrb[19].mxu0 }
 0xb2f   : > { %v2958_v37 = vpop.f32.mrb[20].mxu0 }
 0xb30   : > { %v2960_v60 = vpop.f32.mrb[21].mxu0 }
 0xb31   : > { %v2962_v15 = vpop.f32.mrb[22].mxu0 }
 0xb32   : > { %v2964_v11 = vpop.f32.mrb[23].mxu0 }
 0xb61   : > { %v3711_v4 = vpop.f32.mrb[24].mxu1 }
 0xb62   : > { %v4437_v17 = vadd.f32 %v3711_v4, %v2948_v8  ;;  %v3713_v5 = vpop.f32.mrb[25].mxu1 }
 0xb63   : > { %v4438_v1 = vadd.f32 %v3713_v5, %v2950_v10  ;;  %v3715_v42 = vpop.f32.mrb[26].mxu1 }
 0xb64   : > { %v3758_v19 = vadd.f32 %v4437_v17, %v3741_v0  ;;  %v4439_v30 = vadd.f32 %v3715_v42, %v2952_v7  ;;  %v3717_v52 = vpop.f32.mrb[27].mxu1 }
 0xb65   : > { %v3759_v53 = vadd.f32 %v4438_v1, %v3741_v0  ;;  %v4440_v21 = vadd.f32 %v3717_v52, %v2954_v14 }
 0xb66   : > { %v3766_v23 = vadd.f32 %v4861_v22, %v3758_v19  ;;  %v3760_v16 = vadd.f32 %v4439_v30, %v3746_v20 }
 0xb67   : > { %v3767_v45 = vadd.f32 %v4862_v18, %v3759_v53  ;;  %v3761_v25 = vadd.f32 %v4440_v21, %v3746_v20 }
 0xb68   : > { %v3768_v49 = vadd.f32 %v4863_v2, %v3760_v16 }
 0xb69   : > { %v4191_v26 = vpack.c.bf16 %v3767_v45, %v3766_v23  ;;  %v3769_v27 = vadd.f32 %v4864_v12, %v3761_v25  ;;  %v3721_v29 = vpop.f32.mrb[28].mxu1 }
 0xb6a   : > { %v4441_v9 = vadd.f32 %v3721_v29, %v2958_v37  ;;  %v3723_v31 = vpop.f32.mrb[29].mxu1 }
 0xb6b   : > { %3798 = vst [vmem:[%s617_s9] sm:$0xff] %v4191_v26  ;;  %v4192_v33 = vpack.c.bf16 %v3769_v27, %v3768_v49  ;;  %v4442_v34 = vadd.f32 %v3723_v31, %v2960_v60  ;;  %v3725_v35 = vpop.f32.mrb[30].mxu1 }
 0xb6c   : > { %v3762_v6 = vadd.f32 %v4441_v9, %v3751_v32  ;;  %v4443_v38 = vadd.f32 %v3725_v35, %v2962_v15  ;;  %v3727_v39 = vpop.f32.mrb[31].mxu1 }
 0xb6d   : > { %3799 = vst [vmem:[%s617_s9 + $0x8] sm:$0xff] %v4192_v33  ;;  %v3763_v28 = vadd.f32 %v4442_v34, %v3751_v32  ;;  %v4444_v41 = vadd.f32 %v3727_v39, %v2964_v11 }
 0xb6e   : > { %v3770_v44 = vadd.f32 %v4865_v43, %v3762_v6  ;;  %v3764_v24 = vadd.f32 %v4443_v38, %v3756_v40 }
 0xb6f   : > { %v3771_v36 = vadd.f32 %v4866_v46, %v3763_v28  ;;  %v3765_v47 = vadd.f32 %v4444_v41, %v3756_v40 }
 0xb70   : > { %v3772_v13 = vadd.f32 %v4867_v48, %v3764_v24 }
 0xb71   : > { %v4193_v50 = vpack.c.bf16 %v3771_v36, %v3770_v44  ;;  %v3773_v55 = vadd.f32 %v4868_v54, %v3765_v47 }
 0xb73   : > { %3800 = vst [vmem:[%s617_s9 + $0x10] sm:$0xff] %v4193_v50  ;;  %v4194_v56 = vpack.c.bf16 %v3773_v55, %v3772_v13 }
 0xb75   : > { %3801 = vst [vmem:[%s617_s9 + $0x18] sm:$0xff] %v4194_v56 }
 0xb76   : > { %5222 = shalt.err (!%p5219_p0)
}
 0xb77   : > { %s5223_s4 = scalar_lea.hbm %s6401_s5, 512  ;;  %s5227_s14 = scalar_lea.hbm %s6524_s2, 2048 }
 0xb78   : > { %p5224_p2 = scmp.ne.s32.totalorder %s6401_s5, %s5223_s4  ;;  %p5228_p4 = scmp.lt.u32.totalorder %s6401_s5, %s6524_s2 }
 0xb79   : > { %p5229_p6 = scmp.lt.u32.totalorder %s5227_s14, %s5223_s4  ;;  %p5231_p5 = scmp.lt.u32.totalorder %s5223_s4, %s6401_s5 }
 0xb7a   : > { %p5225_p9 = pnand %p5224_p2, %p6525_p7 }
 0xb7b   : > { %p5230_p8 = por %p5229_p6, %p5228_p4 }
 0xb7c   : > { %p5226_p10 = pneg %p5225_p9 }
 0xb7d   : > { %p5232_p11 = por %p5231_p5, %p5230_p8 }
 0xb7f   : > { %p5233_p3 = pnand %p5232_p11, %p5226_p10 }
 0xb81   : > { %5236 = shalt.err (!%p5233_p3)
}
 0xb82   : > { %s5334_s7 = smov 128   ;;  %s5335_s6 = smov 8  }
 0xb83   : > { %4609 = dma.vmem_to_hbm [thread:$0]  (%p6525_p7), %s6395_s20, 512, %s6401_s5, %s3803_s8, %s5334_s7, %s5334_s7, %s5335_s6  }
 0xb84 PF: > { %p4674_p12 = scmp.ge.s32.totalorder %s5303_s24, 2  ;;  %s3832_s9 = sand.u32 1, %s5291_s21  }
 0xb85   : > { %p6526_p1 = scmp.ne.s32.totalorder %s6503_s30, 0  ;;  %s3833_s13 = scalar_lea.sflag [#allocation4], %s3832_s9 }
 0xb87   : > { %p4650_p13 = pnand %p4674_p12, %p6526_p1 }
 0xb89   : > { %5286 = dma.done.wait (!%p4650_p13), %s3833_s13, 512  }
 0xb8a   : > { %5288 = vsyncadd (!%p4650_p13), %s3833_s13, 4294966784  ;;  %p33_p0 = scmp.ge.s32.totalorder %s5678_s25, 6   ;;  %s6527_s21 = smov %s5295_s22 }
 0xb8b   : > { %s6528_s22 = smov %s5299_s23  ;;  %s6529_s23 = smov %s5689_s26 }
 0xb8c   : > { %s6530_s24 = smov %s5678_s25  ;;  %35 = sbr.rel (!%p33_p0) target bundleno = 26 (0x1a), region = 182 }
 0xb93   :  { %3838 = vsyncpa [#allocation3], 1 }
 0xb94   :  { %3840 = vsyncpa [#allocation3 + $0x1], 1 }
 0xb95   :  { %3841 = vsyncpa [#allocation6], 1 }
 0xb96   :  { %3842 = vsyncpa [#allocation9], 1 }
 0xb97   :  { %3843 = vsyncpa [#allocation12], 1 }
 0xb98   :  { %3844 = vsyncpa [#allocation15], 1 }
 0xb99   :  { %3846 = vsyncpa [#allocation15 + $0x1], 1 }
 0xb9a   :  { %3847 = vsyncpa [#allocation18], 1 }
 0xb9b   :  { %3848 = vsyncpa [#allocation21], 1 }
 0xb9c   :  { %3849 = vsyncpa [#allocation4], 1 }
 0xb9d   :  { %3851 = vsyncpa [#allocation4 + $0x1], 1 }

// kernel: spatio_temporal_res_block.3
= control target key start
LH: loop header
LB: loop body
LE: loop exit
PB: predicated region body
PF: predicated region fallthrough
CT: control target
= control target key end

     0   :  { %18 = vsyncpa [#allocation3], 0  ;;  %s7805_s0 = inlined_call_operand.hbm [shape: bf16[128,256], index: 0, kind: input, shape index: {}]   ;;  %s7806_s1 = inlined_call_operand.hbm [shape: f32[32,128], index: 1, kind: input, shape index: {}]   ;;  %s7807_s2 = inlined_call_operand.hbm [shape: f32[128,32], index: 2, kind: input, shape index: {}]   ;;  %s7808_s3 = inlined_call_operand.hbm [shape: f32[128,1], index: 3, kind: input, shape index: {}]   ;;  %s7809_s4 = inlined_call_operand.hbm [shape: f32[128,1], index: 4, kind: input, shape index: {}]   ;;  %s7810_s5 = inlined_call_operand.hbm [shape: bf16[3,32,32], index: 5, kind: input, shape index: {}]   ;;  %s7811_s6 = inlined_call_operand.hbm [shape: f32[32,1], index: 6, kind: input, shape index: {}]   ;;  %s7812_s7 = inlined_call_operand.hbm [shape: f32[32,4], index: 7, kind: input, shape index: {}]   ;;  %s7813_s8 = inlined_call_operand.hbm [shape: f32[128,1], index: 8, kind: input, shape index: {}]   ;;  %s7814_s9 = inlined_call_operand.hbm [shape: f32[128,1], index: 9, kind: input, shape index: {}]   ;;  %s7815_s10 = inlined_call_operand.hbm [shape: bf16[3,32,32], index: 10, kind: input, shape index: {}]   ;;  %s7816_s11 = inlined_call_operand.hbm [shape: f32[32,1], index: 11, kind: input, shape index: {}]   ;;  %s7817_s12 = inlined_call_operand.hbm [shape: f32[1,4], index: 12, kind: input, shape index: {}]   ;;  %s7818_s13 = inlined_call_operand.hbm [shape: f32[128,256], index: 13, kind: output, shape index: {}]  }
   0x1   :  { %19 = vsyncpa [#allocation7], 0 }
   0x2   :  { %20 = vsyncpa [#allocation10], 0 }
   0x3   :  { %21 = vsyncpa [#allocation13], 0 }
   0x4   :  { %22 = vsyncpa [#allocation16], 0 }
   0x5   :  { %23 = vsyncpa [#allocation19], 0 }
   0x6   :  { %24 = vsyncpa [#allocation22], 0 }
   0x7   :  { %25 = vsyncpa [#allocation5], 0 }
   0x8   :  { %26 = vsyncpa [#allocation4], 0  ;;  %s6105_s25 = smov [#allocation6]   ;;  %s6106_s27 = smov [#allocation9]  }
   0x9   :  { %s44_s26 = sshll.u32 %s6105_s25, 4  ;;  %s68_s28 = sshll.u32 %s6106_s27, 4  ;;  %s45_s26 = int_to_ptr.vmem [resolvable:$true] %s44_s26  ;;  %s6199_s28 = int_to_ptr.vmem [resolvable:$true] %s68_s28 }
   0xa   :  { %s5791_s14 = scalar_lea.hbm %s7806_s1, 512 }
   0xb   :  { %p5792_p0 = scmp.ne.s32.totalorder %s7806_s1, %s5791_s14  ;;  %p5795_p1 = scmp.lt.u32.totalorder %s5791_s14, %s7806_s1 }
   0xd   :  { %p5797_p2 = pnand %p5795_p1, %p5792_p0 }
   0xf   :  { %5800 = shalt.err (!%p5797_p2)
}
  0x10   :  { %s5801_s19 = scalar_lea.vmem %s45_s26, 512  ;;  %p5806_p4 = scmp.lt.s32.totalorder %s45_s26, %s45_s26 }
  0x11   :  { %p5802_p3 = scmp.ne.s32.totalorder %s45_s26, %s5801_s19  ;;  %p5807_p5 = scmp.lt.s32.totalorder %s5801_s19, %s5801_s19 }
  0x13   :  { %p5808_p6 = por %p5807_p5, %p5806_p4 }
  0x15   :  { %p5809_p7 = pnand %p5808_p6, %p5802_p3 }
  0x17   :  { %5812 = shalt.err (!%p5809_p7)
}
  0x18   :  { %s6107_s20 = smov 128   ;;  %s6108_s21 = smov 8  }
  0x19   :  { %50 = dma.hbm_to_vmem [thread:$0]  %s7806_s1, 512, %s45_s26, [#allocation7], %s6107_s20, %s6107_s20, %s6108_s21  }
  0x1a   :  { %s5813_s27 = scalar_lea.hbm %s7808_s3, 2048 }
  0x1b   :  { %p5814_p8 = scmp.ne.s32.totalorder %s7808_s3, %s5813_s27  ;;  %p5817_p9 = scmp.lt.u32.totalorder %s5813_s27, %s7808_s3 }
  0x1d   :  { %p5819_p10 = pnand %p5817_p9, %p5814_p8 }
  0x1f   :  { %5822 = shalt.err (!%p5819_p10)
}
  0x20   :  { %s5823_s16 = scalar_lea.vmem %s6199_s28, 2048  ;;  %p5828_p12 = scmp.lt.s32.totalorder %s6199_s28, %s6199_s28 }
  0x21   :  { %p5824_p11 = scmp.ne.s32.totalorder %s6199_s28, %s5823_s16  ;;  %p5829_p13 = scmp.lt.s32.totalorder %s5823_s16, %s5823_s16 }
  0x23   :  { %p5830_p0 = por %p5829_p13, %p5828_p12 }
  0x25   :  { %p5831_p1 = pnand %p5830_p0, %p5824_p11 }
  0x27   :  { %5834 = shalt.err (!%p5831_p1)
}
  0x28   :  { %74 = dma.hbm_to_vmem [thread:$0]  %s7808_s3, 2048, %s6199_s28, [#allocation10], %s6107_s20, %s6107_s20, %s6108_s21  }
  0x29   :  { %s6109_s17 = smov [#allocation12]   ;;  %s5835_s23 = scalar_lea.hbm %s7810_s5, 768 }
  0x2a   :  { %s92_s18 = sshll.u32 %s6109_s17, 4  ;;  %p5836_p2 = scmp.ne.s32.totalorder %s7810_s5, %s5835_s23  ;;  %s93_s18 = int_to_ptr.vmem [resolvable:$true] %s92_s18 }
  0x2b   :  { %p5839_p3 = scmp.lt.u32.totalorder %s5835_s23, %s7810_s5 }
  0x2d   :  { %p5841_p4 = pnand %p5839_p3, %p5836_p2 }
  0x2f   :  { %5844 = shalt.err (!%p5841_p4)
}
  0x30   :  { %s5845_s30 = scalar_lea.vmem %s93_s18, 768  ;;  %p5850_p6 = scmp.lt.s32.totalorder %s93_s18, %s93_s18 }
  0x31   :  { %p5846_p5 = scmp.ne.s32.totalorder %s93_s18, %s5845_s30  ;;  %p5851_p7 = scmp.lt.s32.totalorder %s5845_s30, %s5845_s30 }
  0x33   :  { %p5852_p8 = por %p5851_p7, %p5850_p6 }
  0x35   :  { %p5853_p9 = pnand %p5852_p8, %p5846_p5 }
  0x37   :  { %5856 = shalt.err (!%p5853_p9)
}
  0x38   :  { %s6110_s3 = smov 64   ;;  %s6111_s28 = smov 4  }
  0x39   :  { %98 = dma.hbm_to_vmem [thread:$0]  %s7810_s5, 768, %s93_s18, [#allocation13], %s6110_s3, %s6110_s3, %s6111_s28  }
  0x3a   :  { %s6112_s16 = smov [#allocation15]   ;;  %s6113_s26 = smov [#allocation18]  }
  0x3b   :  { %s116_s1 = sshll.u32 %s6112_s16, 4  ;;  %s140_s17 = sshll.u32 %s6113_s26, 4  ;;  %s117_s1 = int_to_ptr.vmem [resolvable:$true] %s116_s1  ;;  %s141_s17 = int_to_ptr.vmem [resolvable:$true] %s140_s17 }
  0x3c   :  { %s5857_s23 = scalar_lea.hbm %s7812_s7, 512 }
  0x3d   :  { %p5858_p10 = scmp.ne.s32.totalorder %s7812_s7, %s5857_s23  ;;  %p5861_p11 = scmp.lt.u32.totalorder %s5857_s23, %s7812_s7 }
  0x3f   :  { %p5863_p12 = pnand %p5861_p11, %p5858_p10 }
  0x41   :  { %5866 = shalt.err (!%p5863_p12)
}
  0x42   :  { %s5867_s5 = scalar_lea.vmem %s117_s1, 512  ;;  %p5872_p0 = scmp.lt.s32.totalorder %s117_s1, %s117_s1 }
  0x43   :  { %p5868_p13 = scmp.ne.s32.totalorder %s117_s1, %s5867_s5  ;;  %p5873_p1 = scmp.lt.s32.totalorder %s5867_s5, %s5867_s5 }
  0x45   :  { %p5874_p2 = por %p5873_p1, %p5872_p0 }
  0x47   :  { %p5875_p3 = pnand %p5874_p2, %p5868_p13 }
  0x49   :  { %5878 = shalt.err (!%p5875_p3)
}
  0x4a   :  { %122 = dma.hbm_to_vmem [thread:$0]  %s7812_s7, 512, %s117_s1, [#allocation16], %s6107_s20, %s6107_s20, %s6108_s21  }
  0x4b   :  { %s5879_s16 = scalar_lea.hbm %s7814_s9, 2048 }
  0x4c   :  { %p5880_p4 = scmp.ne.s32.totalorder %s7814_s9, %s5879_s16  ;;  %p5883_p5 = scmp.lt.u32.totalorder %s5879_s16, %s7814_s9 }
  0x4e   :  { %p5885_p6 = pnand %p5883_p5, %p5880_p4 }
  0x50   :  { %5888 = shalt.err (!%p5885_p6)
}
  0x51   :  { %s5889_s24 = scalar_lea.vmem %s141_s17, 2048  ;;  %p5894_p8 = scmp.lt.s32.totalorder %s141_s17, %s141_s17 }
  0x52   :  { %p5890_p7 = scmp.ne.s32.totalorder %s141_s17, %s5889_s24  ;;  %p5895_p9 = scmp.lt.s32.totalorder %s5889_s24, %s5889_s24 }
  0x54   :  { %p5896_p10 = por %p5895_p9, %p5894_p8 }
  0x56   :  { %p5897_p11 = pnand %p5896_p10, %p5890_p7 }
  0x58   :  { %5900 = shalt.err (!%p5897_p11)
}
  0x59   :  { %146 = dma.hbm_to_vmem [thread:$0]  %s7814_s9, 2048, %s141_s17, [#allocation19], %s6107_s20, %s6107_s20, %s6108_s21  }
  0x5a   :  { %s6114_s25 = smov [#allocation2]   ;;  %s6115_s29 = smov [#allocation8]  }
  0x5b   :  { %s32_s27 = sshll.u32 %s6114_s25, 4  ;;  %s56_s5 = sshll.u32 %s6115_s29, 4  ;;  %s33_s27 = int_to_ptr.vmem [resolvable:$true] %s32_s27  ;;  %s57_s5 = int_to_ptr.vmem [resolvable:$true] %s56_s5 }
  0x5c   :  { %s5901_s14 = scalar_lea.hbm %s7805_s0, 2048 }
  0x5d   :  { %p5902_p12 = scmp.ne.s32.totalorder %s7805_s0, %s5901_s14  ;;  %p5905_p13 = scmp.lt.u32.totalorder %s5901_s14, %s7805_s0 }
  0x5f   :  { %p5907_p0 = pnand %p5905_p13, %p5902_p12 }
  0x61   :  { %5910 = shalt.err (!%p5907_p0)
}
  0x62   :  { %s5911_s9 = scalar_lea.vmem %s33_s27, 2048  ;;  %p5916_p2 = scmp.lt.s32.totalorder %s33_s27, %s33_s27 }
  0x63   :  { %p5912_p1 = scmp.ne.s32.totalorder %s33_s27, %s5911_s9  ;;  %p5917_p3 = scmp.lt.s32.totalorder %s5911_s9, %s5911_s9 }
  0x65   :  { %p5918_p4 = por %p5917_p3, %p5916_p2 }
  0x67   :  { %p5919_p5 = pnand %p5918_p4, %p5912_p1 }
  0x69   :  { %5922 = shalt.err (!%p5919_p5)
}
  0x6a   :  { %38 = dma.hbm_to_vmem [thread:$0]  %s7805_s0, 2048, %s33_s27, [#allocation3], %s6107_s20, %s6107_s20, %s6108_s21  }
  0x6b   :  { %s5923_s7 = scalar_lea.hbm %s7807_s2, 2048 }
  0x6c   :  { %p5924_p6 = scmp.ne.s32.totalorder %s7807_s2, %s5923_s7  ;;  %p5927_p7 = scmp.lt.u32.totalorder %s5923_s7, %s7807_s2 }
  0x6e   :  { %p5929_p8 = pnand %p5927_p7, %p5924_p6 }
  0x70   :  { %5932 = shalt.err (!%p5929_p8)
}
  0x71   :  { %s5933_s30 = scalar_lea.vmem %s57_s5, 2048  ;;  %p5938_p10 = scmp.lt.s32.totalorder %s57_s5, %s57_s5 }
  0x72   :  { %p5934_p9 = scmp.ne.s32.totalorder %s57_s5, %s5933_s30  ;;  %p5939_p11 = scmp.lt.s32.totalorder %s5933_s30, %s5933_s30 }
  0x74   :  { %p5940_p12 = por %p5939_p11, %p5938_p10 }
  0x76   :  { %p5941_p13 = pnand %p5940_p12, %p5934_p9 }
  0x78   :  { %5944 = shalt.err (!%p5941_p13)
}
  0x79   :  { %62 = dma.hbm_to_vmem [thread:$0]  %s7807_s2, 2048, %s57_s5, [#allocation7], %s6107_s20, %s6107_s20, %s6108_s21  }
  0x7a   :  { %s6116_s14 = smov [#allocation11]   ;;  %s6117_s16 = smov [#allocation14]  }
  0x7b   :  { %s80_s15 = sshll.u32 %s6116_s14, 4  ;;  %s104_s26 = sshll.u32 %s6117_s16, 4  ;;  %s81_s15 = int_to_ptr.vmem [resolvable:$true] %s80_s15  ;;  %s105_s26 = int_to_ptr.vmem [resolvable:$true] %s104_s26 }
  0x7c   :  { %s5945_s17 = scalar_lea.hbm %s7809_s4, 2048 }
  0x7d   :  { %p5946_p0 = scmp.ne.s32.totalorder %s7809_s4, %s5945_s17  ;;  %p5949_p1 = scmp.lt.u32.totalorder %s5945_s17, %s7809_s4 }
  0x7f   :  { %p5951_p2 = pnand %p5949_p1, %p5946_p0 }
  0x81   :  { %5954 = shalt.err (!%p5951_p2)
}
  0x82   :  { %s5955_s2 = scalar_lea.vmem %s81_s15, 2048  ;;  %p5960_p4 = scmp.lt.s32.totalorder %s81_s15, %s81_s15 }
  0x83   :  { %p5956_p3 = scmp.ne.s32.totalorder %s81_s15, %s5955_s2  ;;  %p5961_p5 = scmp.lt.s32.totalorder %s5955_s2, %s5955_s2 }
  0x85   :  { %p5962_p6 = por %p5961_p5, %p5960_p4 }
  0x87   :  { %p5963_p7 = pnand %p5962_p6, %p5956_p3 }
  0x89   :  { %5966 = shalt.err (!%p5963_p7)
}
  0x8a   :  { %86 = dma.hbm_to_vmem [thread:$0]  %s7809_s4, 2048, %s81_s15, [#allocation10], %s6107_s20, %s6107_s20, %s6108_s21  }
  0x8b   :  { %s5967_s18 = scalar_lea.hbm %s7811_s6, 512 }
  0x8c   :  { %p5968_p8 = scmp.ne.s32.totalorder %s7811_s6, %s5967_s18  ;;  %p5971_p9 = scmp.lt.u32.totalorder %s5967_s18, %s7811_s6 }
  0x8e   :  { %p5973_p10 = pnand %p5971_p9, %p5968_p8 }
  0x90   :  { %5976 = shalt.err (!%p5973_p10)
}
  0x91   :  { %s5977_s16 = scalar_lea.vmem %s105_s26, 512  ;;  %p5982_p12 = scmp.lt.s32.totalorder %s105_s26, %s105_s26 }
  0x92   :  { %p5978_p11 = scmp.ne.s32.totalorder %s105_s26, %s5977_s16  ;;  %p5983_p13 = scmp.lt.s32.totalorder %s5977_s16, %s5977_s16 }
  0x94   :  { %p5984_p0 = por %p5983_p13, %p5982_p12 }
  0x96   :  { %p5985_p1 = pnand %p5984_p0, %p5978_p11 }
  0x98   :  { %5988 = shalt.err (!%p5985_p1)
}
  0x99   :  { %110 = dma.hbm_to_vmem [thread:$0]  %s7811_s6, 512, %s105_s26, [#allocation13], %s6107_s20, %s6107_s20, %s6108_s21  }
  0x9a   :  { %s6118_s19 = smov [#allocation17]   ;;  %s6119_s17 = smov [#allocation20]  }
  0x9b   :  { %s128_s9 = sshll.u32 %s6118_s19, 4  ;;  %s152_s22 = sshll.u32 %s6119_s17, 4  ;;  %s129_s9 = int_to_ptr.vmem [resolvable:$true] %s128_s9  ;;  %s153_s22 = int_to_ptr.vmem [resolvable:$true] %s152_s22 }
  0x9c   :  { %s5989_s7 = scalar_lea.hbm %s7813_s8, 2048 }
  0x9d   :  { %p5990_p2 = scmp.ne.s32.totalorder %s7813_s8, %s5989_s7  ;;  %p5993_p3 = scmp.lt.u32.totalorder %s5989_s7, %s7813_s8 }
  0x9f   :  { %p5995_p4 = pnand %p5993_p3, %p5990_p2 }
  0xa1   :  { %5998 = shalt.err (!%p5995_p4)
}
  0xa2   :  { %s5999_s6 = scalar_lea.vmem %s129_s9, 2048  ;;  %p6004_p6 = scmp.lt.s32.totalorder %s129_s9, %s129_s9 }
  0xa3   :  { %p6000_p5 = scmp.ne.s32.totalorder %s129_s9, %s5999_s6  ;;  %p6005_p7 = scmp.lt.s32.totalorder %s5999_s6, %s5999_s6 }
  0xa5   :  { %p6006_p8 = por %p6005_p7, %p6004_p6 }
  0xa7   :  { %p6007_p9 = pnand %p6006_p8, %p6000_p5 }
  0xa9   :  { %6010 = shalt.err (!%p6007_p9)
}
  0xaa   :  { %134 = dma.hbm_to_vmem [thread:$0]  %s7813_s8, 2048, %s129_s9, [#allocation16], %s6107_s20, %s6107_s20, %s6108_s21  }
  0xab   :  { %s6011_s0 = scalar_lea.hbm %s7815_s10, 768 }
  0xac   :  { %p6012_p10 = scmp.ne.s32.totalorder %s7815_s10, %s6011_s0  ;;  %p6015_p11 = scmp.lt.u32.totalorder %s6011_s0, %s7815_s10 }
  0xae   :  { %p6017_p12 = pnand %p6015_p11, %p6012_p10 }
  0xb0   :  { %6020 = shalt.err (!%p6017_p12)
}
  0xb1   :  { %s6021_s15 = scalar_lea.vmem %s153_s22, 768  ;;  %p6026_p0 = scmp.lt.s32.totalorder %s153_s22, %s153_s22 }
  0xb2   :  { %p6022_p13 = scmp.ne.s32.totalorder %s153_s22, %s6021_s15  ;;  %p6027_p1 = scmp.lt.s32.totalorder %s6021_s15, %s6021_s15 }
  0xb4   :  { %p6028_p2 = por %p6027_p1, %p6026_p0 }
  0xb6   :  { %p6029_p3 = pnand %p6028_p2, %p6022_p13 }
  0xb8   :  { %6032 = shalt.err (!%p6029_p3)
}
  0xb9   :  { %158 = dma.hbm_to_vmem [thread:$0]  %s7815_s10, 768, %s153_s22, [#allocation19], %s6110_s3, %s6110_s3, %s6111_s28  }
  0xba   :  { %s6120_s9 = smov [#allocation21]   ;;  %s6033_s7 = scalar_lea.hbm %s7816_s11, 512 }
  0xbb   :  { %s164_s17 = sshll.u32 %s6120_s9, 4  ;;  %p6034_p4 = scmp.ne.s32.totalorder %s7816_s11, %s6033_s7  ;;  %s165_s17 = int_to_ptr.vmem [resolvable:$true] %s164_s17 }
  0xbc   :  { %p6037_p5 = scmp.lt.u32.totalorder %s6033_s7, %s7816_s11 }
  0xbe   :  { %p6039_p6 = pnand %p6037_p5, %p6034_p4 }
  0xc0   :  { %6042 = shalt.err (!%p6039_p6)
}
  0xc1   :  { %s6043_s6 = scalar_lea.vmem %s165_s17, 512  ;;  %p6048_p8 = scmp.lt.s32.totalorder %s165_s17, %s165_s17 }
  0xc2   :  { %p6044_p7 = scmp.ne.s32.totalorder %s165_s17, %s6043_s6  ;;  %p6049_p9 = scmp.lt.s32.totalorder %s6043_s6, %s6043_s6 }
  0xc4   :  { %p6050_p10 = por %p6049_p9, %p6048_p8 }
  0xc6   :  { %p6051_p11 = pnand %p6050_p10, %p6044_p7 }
  0xc8   :  { %6054 = shalt.err (!%p6051_p11)
}
  0xc9   :  { %170 = dma.hbm_to_vmem [thread:$0]  %s7816_s11, 512, %s165_s17, [#allocation22], %s6107_s20, %s6107_s20, %s6108_s21  }
  0xca   :  { %s6055_s26 = scalar_lea.hbm %s7817_s12, 16 }
  0xcb   :  { %p6056_p12 = scmp.ne.s32.totalorder %s7817_s12, %s6055_s26  ;;  %p6059_p13 = scmp.lt.u32.totalorder %s6055_s26, %s7817_s12 }
  0xcd   :  { %p6061_p0 = pnand %p6059_p13, %p6056_p12 }
  0xcf   :  { %6064 = shalt.err (!%p6061_p0)
}
  0xd0   :  { %s6121_s27 = smov [#allocation23]  }
  0xd1   :  { %178 = dma.hbm_to_smem %s7817_s12, 16, %s6121_s27, [#allocation5]  }
  0xd2   :  { %6087 = dma.done.wait [#allocation3], 2048  }
  0xd3   :  { %6088 = vsyncadd [#allocation3], 4294965248 }
  0xd4   :  { %6089 = dma.done.wait [#allocation7], 2560  }
  0xd5   :  { %6090 = vsyncadd [#allocation7], 4294964736 }
  0xd6   :  { %6091 = dma.done.wait [#allocation10], 4096  }
  0xd7   :  { %6092 = vsyncadd [#allocation10], 4294963200 }
  0xd8   :  { %6093 = dma.done.wait [#allocation13], 1280  }
  0xd9   :  { %6094 = vsyncadd [#allocation13], 4294966016 }
  0xda   :  { %6095 = dma.done.wait [#allocation16], 2560  }
  0xdb   :  { %6096 = vsyncadd [#allocation16], 4294964736 }
  0xdc   :  { %6097 = dma.done.wait [#allocation19], 2816  }
  0xdd   :  { %6098 = vsyncadd [#allocation19], 4294964480 }
  0xde   :  { %6099 = dma.done.wait [#allocation22], 512  }
  0xdf   :  { %6100 = vsyncadd [#allocation22], 4294966784 }
  0xe0   :  { %6101 = dma.done.wait [#allocation5], 16  }
  0xe1   :  { %6102 = vsyncadd [#allocation5], 4294967280 }
  0xe2   :  { %218 = sfence }
  0xe3   :  { %v220_v0 = vld [vmem:[#allocation2] sm:$0xff]  ;;  %v221_v1 = vld [vmem:[#allocation2 + $0x8] sm:$0xff]  ;;  %v222_v6 = vld [vmem:[#allocation2 + $0x10] sm:$0xff]  ;;  %vm647_vm0 = vcmask 261120   ;;  %s4391_s11 = sld [smem:[#allocation23]]  ;;  %s4754_s12 = sld [smem:[#allocation23 + $0x1]] }
  0xe4   :  { %v6398_v2 = vunpack.c.l.bf16 %v220_v0  ;;  %v6400_v3 = vunpack.c.h.bf16 %v220_v0  ;;  %v6402_v4 = vunpack.c.l.bf16 %v221_v1  ;;  %v6404_v5 = vunpack.c.h.bf16 %v221_v1  ;;  %v223_v12 = vld [vmem:[#allocation2 + $0x18] sm:$0xff]  ;;  %v224_v20 = vld [vmem:[#allocation2 + $0x20] sm:$0xff]  ;;  %v225_v24 = vld [vmem:[#allocation2 + $0x28] sm:$0xff]  ;;  %s4755_s20 = sld [smem:[#allocation23 + $0x2]]  ;;  %s4756_s21 = sld [smem:[#allocation23 + $0x3]] }
  0xe5   :  { %v6418_v15 = vunpack.c.l.bf16 %v222_v6  ;;  %v6420_v16 = vunpack.c.h.bf16 %v222_v6  ;;  %v6422_v18 = vunpack.c.l.bf16 %v223_v12  ;;  %v6424_v19 = vunpack.c.h.bf16 %v223_v12  ;;  %v226_v37 = vld [vmem:[#allocation2 + $0x30] sm:$0xff]  ;;  %v227_v41 = vld [vmem:[#allocation2 + $0x38] sm:$0xff]  ;;  %v228_v51 = vld [vmem:[#allocation2 + $0x40] sm:$0xff]  ;;  %s6126_s4 = smov [#allocation24]  }
  0xe6   :  { %7879 = vst [vmem:[#allocation34_spill] sm:$0xff] %v6398_v2  ;;  %7880 = vst [vmem:[#allocation35_spill] sm:$0xff] %v6400_v3  ;;  %v320_v7 = vadd.f32 %v6400_v3, %v6398_v2  ;;  %v368_v8 = vmul.f32 %v6398_v2, %v6398_v2  ;;  %v369_v9 = vmul.f32 %v6400_v3, %v6400_v3  ;;  %v6438_v29 = vunpack.c.l.bf16 %v224_v20  ;;  %v229_v55 = vld [vmem:[#allocation2 + $0x48] sm:$0xff]  ;;  %v230_v1 = vld [vmem:[#allocation2 + $0x50] sm:$0xff]  ;;  %s4555_s15 = sshll.u32 %s6126_s4, 4  ;;  %s4556_s15 = int_to_ptr.vmem [resolvable:$true] %s4555_s15 }
  0xe7   :  { %7881 = vst [vmem:[#allocation36_spill] sm:$0xff] %v6402_v4  ;;  %7882 = vst [vmem:[#allocation37_spill] sm:$0xff] %v6404_v5  ;;  %v370_v10 = vmul.f32 %v6402_v4, %v6402_v4  ;;  %v371_v11 = vmul.f32 %v6404_v5, %v6404_v5  ;;  %v323_v14 = vadd.f32 %v6404_v5, %v6402_v4  ;;  %v6440_v30 = vunpack.c.h.bf16 %v224_v20  ;;  %s6065_s8 = scalar_lea.vmem %s4556_s15, 4096  ;;  %p6070_p2 = scmp.lt.s32.totalorder %s4556_s15, %s4556_s15 }
  0xe8   :  { %321 = vadd.xlane.f32.xlu0 %v320_v7  ;;  %v400_v13 = vadd.f32 %v369_v9, %v368_v8  ;;  %7883 = vst [vmem:[#allocation38_spill] sm:$0xff] %v6418_v15  ;;  %7884 = vst [vmem:[#allocation39_spill] sm:$0xff] %v6420_v16  ;;  %v326_v21 = vadd.f32 %v6420_v16, %v6418_v15  ;;  %v372_v22 = vmul.f32 %v6418_v15, %v6418_v15  ;;  %v231_v9 = vld [vmem:[#allocation2 + $0x58] sm:$0xff]  ;;  %p6066_p1 = scmp.ne.s32.totalorder %s4556_s15, %s6065_s8  ;;  %p6071_p3 = scmp.lt.s32.totalorder %s6065_s8, %s6065_s8 }
  0xe9   :  { %v403_v17 = vadd.f32 %v371_v11, %v370_v10  ;;  %7885 = vst [vmem:[#allocation40_spill] sm:$0xff] %v6422_v18  ;;  %7886 = vst [vmem:[#allocation41_spill] sm:$0xff] %v6424_v19  ;;  %v373_v23 = vmul.f32 %v6420_v16, %v6420_v16  ;;  %v329_v25 = vadd.f32 %v6424_v19, %v6422_v18  ;;  %v6442_v32 = vunpack.c.l.bf16 %v225_v24 }
  0xea   :  { %401 = vadd.xlane.f32.xlu1 %v400_v13  ;;  %v374_v26 = vmul.f32 %v6422_v18, %v6422_v18  ;;  %v375_v27 = vmul.f32 %v6424_v19, %v6424_v19  ;;  %7887 = vst [vmem:[#allocation42_spill] sm:$0xff] %v6438_v29  ;;  %7888 = vst [vmem:[#allocation43_spill] sm:$0xff] %v6440_v30  ;;  %v6444_v33 = vunpack.c.h.bf16 %v225_v24  ;;  %v6458_v43 = vunpack.c.l.bf16 %v226_v37  ;;  %p6072_p4 = por %p6071_p3, %p6070_p2 }
  0xeb   :  { %v406_v28 = vadd.f32 %v373_v23, %v372_v22  ;;  %7889 = vst [vmem:[#allocation44_spill] sm:$0xff] %v6442_v32  ;;  %v332_v34 = vadd.f32 %v6440_v30, %v6438_v29  ;;  %v376_v35 = vmul.f32 %v6438_v29, %v6438_v29  ;;  %v377_v36 = vmul.f32 %v6440_v30, %v6440_v30  ;;  %v232_v23 = vld [vmem:[#allocation2 + $0x60] sm:$0xff] }
  0xec   :  { %324 = vadd.xlane.f32.xlu0 %v323_v14  ;;  %v409_v31 = vadd.f32 %v375_v27, %v374_v26  ;;  %7890 = vst [vmem:[#allocation45_spill] sm:$0xff] %v6444_v33  ;;  %v335_v38 = vadd.f32 %v6444_v33, %v6442_v32  ;;  %v378_v39 = vmul.f32 %v6442_v32, %v6442_v32  ;;  %7891 = vst [vmem:[#allocation46_spill] sm:$0xff] %v6458_v43  ;;  %v233_v27 = vld [vmem:[#allocation2 + $0x68] sm:$0xff]  ;;  %p6073_p5 = pnand %p6072_p4, %p6066_p1 }
  0xed   :  { %v379_v40 = vmul.f32 %v6444_v33, %v6444_v33  ;;  %v412_v42 = vadd.f32 %v377_v36, %v376_v35  ;;  %v6460_v44 = vunpack.c.h.bf16 %v226_v37  ;;  %v6462_v46 = vunpack.c.l.bf16 %v227_v41 }
  0xee   :  { %404 = vadd.xlane.f32.xlu1 %v403_v17  ;;  %v6464_v47 = vunpack.c.h.bf16 %v227_v41  ;;  %v380_v49 = vmul.f32 %v6458_v43, %v6458_v43  ;;  %v6478_v57 = vunpack.c.l.bf16 %v228_v51  ;;  %v6480_v58 = vunpack.c.h.bf16 %v228_v51  ;;  %v234_v41 = vld [vmem:[#allocation2 + $0x70] sm:$0xff] }
  0xef   :  { %7892 = vst [vmem:[#allocation47_spill] sm:$0xff] %v6460_v44  ;;  %v415_v45 = vadd.f32 %v379_v40, %v378_v39  ;;  %7893 = vst [vmem:[#allocation48_spill] sm:$0xff] %v6462_v46  ;;  %v338_v48 = vadd.f32 %v6460_v44, %v6458_v43  ;;  %v381_v50 = vmul.f32 %v6460_v44, %v6460_v44  ;;  %v6482_v60 = vunpack.c.l.bf16 %v229_v55 }
  0xf0   :  { %327 = vadd.xlane.f32.xlu0 %v326_v21  ;;  %7894 = vst [vmem:[#allocation49_spill] sm:$0xff] %v6464_v47  ;;  %v341_v52 = vadd.f32 %v6464_v47, %v6462_v46  ;;  %v382_v53 = vmul.f32 %v6462_v46, %v6462_v46  ;;  %v383_v54 = vmul.f32 %v6464_v47, %v6464_v47  ;;  %7895 = vst [vmem:[#allocation50_spill] sm:$0xff] %v6478_v57 }
  0xf1   :  { %v418_v56 = vadd.f32 %v381_v50, %v380_v49  ;;  %7896 = vst [vmem:[#allocation51_spill] sm:$0xff] %v6480_v58  ;;  %7897 = vst [vmem:[#allocation52_spill] sm:$0xff] %v6482_v60  ;;  %v6484_v61 = vunpack.c.h.bf16 %v229_v55  ;;  %v344_v62 = vadd.f32 %v6480_v58, %v6478_v57  ;;  %v384_v63 = vmul.f32 %v6478_v57, %v6478_v57  ;;  %v235_v49 = vld [vmem:[#allocation2 + $0x78] sm:$0xff] }
  0xf2   :  { %330 = vadd.xlane.f32.xlu1 %v329_v25  ;;  %v421_v59 = vadd.f32 %v383_v54, %v382_v53  ;;  %v385_v0 = vmul.f32 %v6480_v58, %v6480_v58  ;;  %v386_v7 = vmul.f32 %v6482_v60, %v6482_v60  ;;  %v6498_v11 = vunpack.c.l.bf16 %v230_v1 }
  0xf3   :  { %7898 = vst [vmem:[#allocation53_spill] sm:$0xff] %v6484_v61  ;;  %v347_v6 = vadd.f32 %v6484_v61, %v6482_v60  ;;  %v387_v8 = vmul.f32 %v6484_v61, %v6484_v61  ;;  %v6500_v12 = vunpack.c.h.bf16 %v230_v1  ;;  %v6502_v14 = vunpack.c.l.bf16 %v231_v9 }
  0xf4   :  { %407 = vadd.xlane.f32.xlu0 %v406_v28  ;;  %v424_v10 = vadd.f32 %v385_v0, %v384_v63  ;;  %7899 = vst [vmem:[#allocation54_spill] sm:$0xff] %v6498_v11  ;;  %v6504_v17 = vunpack.c.h.bf16 %v231_v9  ;;  %v388_v21 = vmul.f32 %v6498_v11, %v6498_v11  ;;  %v6522_v36 = vunpack.c.l.bf16 %v233_v27 }
  0xf5   :  { %7900 = vst [vmem:[#allocation55_spill] sm:$0xff] %v6500_v12  ;;  %v427_v13 = vadd.f32 %v387_v8, %v386_v7  ;;  %7901 = vst [vmem:[#allocation56_spill] sm:$0xff] %v6502_v14  ;;  %v350_v20 = vadd.f32 %v6500_v12, %v6498_v11  ;;  %v389_v22 = vmul.f32 %v6500_v12, %v6500_v12  ;;  %v6524_v37 = vunpack.c.h.bf16 %v233_v27  ;;  %v268_v8 = vld [vmem:[#allocation6] sm:$0xff] }
  0xf6   :  { %410 = vadd.xlane.f32.xlu1 %v409_v31  ;;  %7902 = vst [vmem:[#allocation57_spill] sm:$0xff] %v6504_v17  ;;  %v353_v24 = vadd.f32 %v6504_v17, %v6502_v14  ;;  %v390_v25 = vmul.f32 %v6502_v14, %v6502_v14  ;;  %v391_v26 = vmul.f32 %v6504_v17, %v6504_v17  ;;  %v6518_v31 = vunpack.c.l.bf16 %v232_v23 }
  0xf7   :  { %v430_v28 = vadd.f32 %v389_v22, %v388_v21  ;;  %7905 = vst [vmem:[#allocation60_spill] sm:$0xff] %v6522_v36  ;;  %7906 = vst [vmem:[#allocation61_spill] sm:$0xff] %v6524_v37  ;;  %v6538_v51 = vunpack.c.l.bf16 %v234_v41  ;;  %v6542_v54 = vunpack.c.l.bf16 %v235_v49  ;;  %v6544_v55 = vunpack.c.h.bf16 %v235_v49  ;;  %4949 = vmatprep.mubr.f32.mxu0 %v268_v8  ;;  %4987 = vmatprep.mubr.f32.mxu1 %v268_v8 }
  0xf8   :  { %333 = vadd.xlane.f32.xlu0 %v332_v34  ;;  %7903 = vst [vmem:[#allocation58_spill] sm:$0xff] %v6518_v31  ;;  %v6520_v34 = vunpack.c.h.bf16 %v232_v23  ;;  %v433_v35 = vadd.f32 %v391_v26, %v390_v25  ;;  %v392_v39 = vmul.f32 %v6518_v31, %v6518_v31 }
  0xf9   :  { %7907 = vst [vmem:[#allocation62_spill] sm:$0xff] %v6538_v51  ;;  %7909 = vst [vmem:[#allocation64_spill] sm:$0xff] %v6542_v54  ;;  %v365_v63 = vadd.f32 %v6544_v55, %v6542_v54  ;;  %v398_v0 = vmul.f32 %v6542_v54, %v6542_v54  ;;  %v399_v1 = vmul.f32 %v6544_v55, %v6544_v55 }
  0xfa   :  { %336 = vadd.xlane.f32.xlu1 %v335_v38  ;;  %7904 = vst [vmem:[#allocation59_spill] sm:$0xff] %v6520_v34  ;;  %v356_v38 = vadd.f32 %v6520_v34, %v6518_v31  ;;  %v393_v40 = vmul.f32 %v6520_v34, %v6520_v34  ;;  %7910 = vst [vmem:[#allocation65_spill] sm:$0xff] %v6544_v55 }
  0xfb   :  { %v445_v7 = vadd.f32 %v399_v1, %v398_v0 }
  0xfc   :  { %413 = vadd.xlane.f32.xlu0 %v412_v42  ;;  %v359_v42 = vadd.f32 %v6524_v37, %v6522_v36  ;;  %v436_v50 = vadd.f32 %v393_v40, %v392_v39 }
  0xfe   :  { %416 = vadd.xlane.f32.xlu1 %v415_v45  ;;  %v394_v45 = vmul.f32 %v6522_v36, %v6522_v36 }
 0x100   :  { %339 = vadd.xlane.f32.xlu0 %v338_v48  ;;  %v395_v48 = vmul.f32 %v6524_v37, %v6524_v37 }
 0x102   :  { %342 = vadd.xlane.f32.xlu1 %v341_v52  ;;  %v6540_v52 = vunpack.c.h.bf16 %v234_v41  ;;  %v439_v53 = vadd.f32 %v395_v48, %v394_v45 }
 0x104   :  { %419 = vadd.xlane.f32.xlu0 %v418_v56  ;;  %7908 = vst [vmem:[#allocation63_spill] sm:$0xff] %v6540_v52  ;;  %v362_v56 = vadd.f32 %v6540_v52, %v6538_v51 }
 0x106   :  { %422 = vadd.xlane.f32.xlu1 %v421_v59  ;;  %v396_v59 = vmul.f32 %v6538_v51, %v6538_v51 }
 0x108   :  { %345 = vadd.xlane.f32.xlu0 %v344_v62  ;;  %v397_v62 = vmul.f32 %v6540_v52, %v6540_v52 }
 0x10a   :  { %348 = vadd.xlane.f32.xlu1 %v347_v6  ;;  %v442_v6 = vadd.f32 %v397_v62, %v396_v59 }
 0x10c   :  { %425 = vadd.xlane.f32.xlu0 %v424_v10 }
 0x10e   :  { %428 = vadd.xlane.f32.xlu1 %v427_v13 }
 0x110   :  { %351 = vadd.xlane.f32.xlu0 %v350_v20 }
 0x112   :  { %354 = vadd.xlane.f32.xlu1 %v353_v24 }
 0x114   :  { %431 = vadd.xlane.f32.xlu0 %v430_v28 }
 0x116   :  { %434 = vadd.xlane.f32.xlu1 %v433_v35 }
 0x118   :  { %357 = vadd.xlane.f32.xlu0 %v356_v38 }
 0x11a   :  { %360 = vadd.xlane.f32.xlu1 %v359_v42 }
 0x11c   :  { %437 = vadd.xlane.f32.xlu0 %v436_v50 }
 0x11e   :  { %440 = vadd.xlane.f32.xlu1 %v439_v53 }
 0x120   :  { %363 = vadd.xlane.f32.xlu0 %v362_v56 }
 0x122   :  { %366 = vadd.xlane.f32.xlu1 %v365_v63 }
 0x124   :  { %443 = vadd.xlane.f32.xlu0 %v442_v6 }
 0x126   :  { %446 = vadd.xlane.f32.xlu1 %v445_v7 }
 0x175   :  { %v322_v9 = vpop.xlane.xlu0 %321 }
 0x177   :  { %v402_v10 = vpop.xlane.xlu1 %401 }
 0x179   :  { %v325_v13 = vpop.xlane.xlu0 %324 }
 0x17a   :  { %v5197_v20 = vpack.c.bf16 %v325_v13, %v322_v9 }
 0x17b   :  { %v405_v21 = vpop.xlane.xlu1 %404 }
 0x17c   :  { %5198 = vmatprep.subr.bf16.mxu0 %v5197_v20  ;;  %v5229_v22 = vpack.c.bf16 %v405_v21, %v402_v10 }
 0x17d   :  { %5200 = vmatpush3.bf16.msra.mxu0 %v5197_v20  ;;  %v328_v23 = vpop.xlane.xlu0 %327 }
 0x17e   :  { %5230 = vmatprep.subr.bf16.mxu1 %v5229_v22 }
 0x17f   :  { %5232 = vmatpush3.bf16.msra.mxu1 %v5229_v22  ;;  %v331_v24 = vpop.xlane.xlu1 %330 }
 0x180   :  { %v5201_v25 = vpack.c.bf16 %v331_v24, %v328_v23 }
 0x181   :  { %v408_v26 = vpop.xlane.xlu0 %407 }
 0x182   :  { %5202 = vmatprep.subr.bf16.mxu0 %v5201_v25 }
 0x183   :  { %v411_v27 = vpop.xlane.xlu1 %410  ;;  %5204 = vmatpush3.bf16.msra.mxu0 %v5201_v25 }
 0x184   :  { %v5233_v28 = vpack.c.bf16 %v411_v27, %v408_v26 }
 0x185   :  { %v334_v35 = vpop.xlane.xlu0 %333 }
 0x186   :  { %5234 = vmatprep.subr.bf16.mxu1 %v5233_v28 }
 0x187   :  { %v337_v38 = vpop.xlane.xlu1 %336  ;;  %5236 = vmatpush3.bf16.msra.mxu1 %v5233_v28 }
 0x188   :  { %v5205_v39 = vpack.c.bf16 %v337_v38, %v334_v35 }
 0x189   :  { %v414_v40 = vpop.xlane.xlu0 %413 }
 0x18a   :  { %5206 = vmatprep.subr.bf16.mxu0 %v5205_v39 }
 0x18b   :  { %v417_v41 = vpop.xlane.xlu1 %416  ;;  %5208 = vmatpush3.bf16.msra.mxu0 %v5205_v39 }
 0x18c   :  { %v5237_v42 = vpack.c.bf16 %v417_v41, %v414_v40  ;;  %v269_v40 = vld [vmem:[#allocation6 + $0x8] sm:$0xff] }
 0x18d   :  { %v340_v45 = vpop.xlane.xlu0 %339 }
 0x18e   :  { %5238 = vmatprep.subr.bf16.mxu1 %v5237_v42 }
 0x18f   :  { %v343_v48 = vpop.xlane.xlu1 %342  ;;  %5240 = vmatpush3.bf16.msra.mxu1 %v5237_v42  ;;  %v270_v42 = vld [vmem:[#allocation6 + $0x10] sm:$0xff] }
 0x190   :  { %v5209_v49 = vpack.c.bf16 %v343_v48, %v340_v45  ;;  %v271_v45 = vld [vmem:[#allocation6 + $0x18] sm:$0xff]  ;;  %v272_v48 = vld [vmem:[#allocation8] sm:$0xff] }
 0x191   :  { %v420_v50 = vpop.xlane.xlu0 %419 }
 0x192   :  { %5210 = vmatprep.subr.bf16.mxu0 %v5209_v49 }
 0x193   :  { %v423_v53 = vpop.xlane.xlu1 %422  ;;  %5212 = vmatpush3.bf16.msra.mxu0 %v5209_v49  ;;  %v292_v49 = vld [vmem:[#allocation9 + $0x20] sm:$0xff] }
 0x194   :  { %v5241_v56 = vpack.c.bf16 %v423_v53, %v420_v50  ;;  %v7819_v50 = vmov 0   ;;  %v293_v53 = vld [vmem:[#allocation9 + $0x28] sm:$0xff] }
 0x195   :  { %v346_v59 = vpop.xlane.xlu0 %345  ;;  %5477 = vset.pattern.permute.xlu1 %v7819_v50  ;;  %5478 = vset.pattern.permute.xlu0 %v7819_v50 }
 0x196   :  { %5242 = vmatprep.subr.bf16.mxu1 %v5241_v56  ;;  %1232 = vperm.xlu1 %5477, %v292_v49  }
 0x197   :  { %v349_v62 = vpop.xlane.xlu1 %348  ;;  %5244 = vmatpush3.bf16.msra.mxu1 %v5241_v56  ;;  %v309_v56 = vld [vmem:[#allocation11 + $0x28] sm:$0xff] }
 0x198   :  { %v5213_v63 = vpack.c.bf16 %v349_v62, %v346_v59  ;;  %1349 = vperm.xlu0 %5478, %v309_v56   ;;  %v295_v59 = vld [vmem:[#allocation9 + $0x38] sm:$0xff]  ;;  %v308_v62 = vld [vmem:[#allocation11 + $0x20] sm:$0xff] }
 0x199   :  { %v426_v0 = vpop.xlane.xlu0 %425 }
 0x19a   :  { %5214 = vmatprep.subr.bf16.mxu0 %v5213_v63  ;;  %1237 = vperm.xlu1 %5477, %v293_v53  }
 0x19b   :  { %v429_v1 = vpop.xlane.xlu1 %428  ;;  %5216 = vmatpush3.bf16.msra.mxu0 %v5213_v63  ;;  %v311_v63 = vld [vmem:[#allocation11 + $0x38] sm:$0xff] }
 0x19c   :  { %v5245_v6 = vpack.c.bf16 %v429_v1, %v426_v0  ;;  %1247 = vperm.xlu0 %5478, %v295_v59   ;;  %v294_v0 = vld [vmem:[#allocation9 + $0x30] sm:$0xff]  ;;  %v289_v1 = vld [vmem:[#allocation9 + $0x8] sm:$0xff] }
 0x19d   :  { %v352_v7 = vpop.xlane.xlu0 %351 }
 0x19e   :  { %5246 = vmatprep.subr.bf16.mxu1 %v5245_v6  ;;  %1344 = vperm.xlu1 %5477, %v308_v62  }
 0x19f   :  { %v355_v8 = vpop.xlane.xlu1 %354  ;;  %5248 = vmatpush3.bf16.msra.mxu1 %v5245_v6  ;;  %v310_v6 = vld [vmem:[#allocation11 + $0x30] sm:$0xff] }
 0x1a0   :  { %v5217_v9 = vpack.c.bf16 %v355_v8, %v352_v7  ;;  %1359 = vperm.xlu0 %5478, %v311_v63   ;;  %v305_v7 = vld [vmem:[#allocation11 + $0x8] sm:$0xff]  ;;  %v288_v8 = vld [vmem:[#allocation9] sm:$0xff] }
 0x1a1   :  { %v432_v10 = vpop.xlane.xlu0 %431 }
 0x1a2   :  { %5218 = vmatprep.subr.bf16.mxu0 %v5217_v9  ;;  %1242 = vperm.xlu1 %5477, %v294_v0  }
 0x1a3   :  { %v435_v13 = vpop.xlane.xlu1 %434  ;;  %5220 = vmatpush3.bf16.msra.mxu0 %v5217_v9  ;;  %v291_v9 = vld [vmem:[#allocation9 + $0x18] sm:$0xff] }
 0x1a4   :  { %v5249_v20 = vpack.c.bf16 %v435_v13, %v432_v10  ;;  %1217 = vperm.xlu0 %5478, %v289_v1   ;;  %v304_v10 = vld [vmem:[#allocation11] sm:$0xff]  ;;  %v307_v13 = vld [vmem:[#allocation11 + $0x18] sm:$0xff] }
 0x1a5   :  { %v358_v21 = vpop.xlane.xlu0 %357 }
 0x1a6   :  { %5250 = vmatprep.subr.bf16.mxu1 %v5249_v20  ;;  %1354 = vperm.xlu1 %5477, %v310_v6  }
 0x1a7   :  { %v361_v22 = vpop.xlane.xlu1 %360  ;;  %5252 = vmatpush3.bf16.msra.mxu1 %v5249_v20  ;;  %v290_v20 = vld [vmem:[#allocation9 + $0x10] sm:$0xff] }
 0x1a8   :  { %v5221_v23 = vpack.c.bf16 %v361_v22, %v358_v21  ;;  %1329 = vperm.xlu0 %5478, %v305_v7   ;;  %v306_v21 = vld [vmem:[#allocation11 + $0x10] sm:$0xff] }
 0x1a9   :  { %v438_v24 = vpop.xlane.xlu0 %437 }
 0x1aa   :  { %5222 = vmatprep.subr.bf16.mxu0 %v5221_v23  ;;  %1212 = vperm.xlu1 %5477, %v288_v8  }
 0x1ab   :  { %v441_v25 = vpop.xlane.xlu1 %440  ;;  %5224 = vmatpush3.bf16.msra.mxu0 %v5221_v23 }
 0x1ac   :  { %v5253_v26 = vpack.c.bf16 %v441_v25, %v438_v24  ;;  %1227 = vperm.xlu0 %5478, %v291_v9  }
 0x1ad   :  { %v364_v27 = vpop.xlane.xlu0 %363 }
 0x1ae   :  { %5254 = vmatprep.subr.bf16.mxu1 %v5253_v26  ;;  %1324 = vperm.xlu1 %5477, %v304_v10  }
 0x1af   :  { %v367_v28 = vpop.xlane.xlu1 %366  ;;  %5256 = vmatpush3.bf16.msra.mxu1 %v5253_v26 }
 0x1b0   :  { %v5225_v35 = vpack.c.bf16 %v367_v28, %v364_v27  ;;  %1339 = vperm.xlu0 %5478, %v307_v13   ;;  %v273_v13 = vld [vmem:[#allocation8 + $0x8] sm:$0xff] }
 0x1b1   :  { %v444_v38 = vpop.xlane.xlu0 %443 }
 0x1b2   :  { %5226 = vmatprep.subr.bf16.mxu0 %v5225_v35  ;;  %1222 = vperm.xlu1 %5477, %v290_v20  }
 0x1b3   :  { %v447_v39 = vpop.xlane.xlu1 %446  ;;  %5228 = vmatpush3.bf16.msra.mxu0 %v5225_v35 }
 0x1b4   :  { %v5257_v41 = vpack.c.bf16 %v447_v39, %v444_v38 }
 0x1b6   :  { %4950 = vmatmul.mubr.f32.vlgmr.msra.gmra.mrb[0].mxu0 %v269_v40  ;;  %5258 = vmatprep.subr.bf16.mxu1 %v5257_v41 }
 0x1b7   :  { %5260 = vmatpush3.bf16.msra.mxu1 %v5257_v41  ;;  %4952 = vmatprep.mubr.f32.mxu0 %v270_v42 }
 0x1b8   :  { %1334 = vperm.xlu1 %5477, %v306_v21  }
 0x1ba   :  { %4953 = vmatmul.mubr.f32.gmra.mrb[2].mxu0 %v271_v45  ;;  %4988 = vmatmul.mubr.f32.vlgmr.msra.gmra.mrb[0].mxu1 %v269_v40 }
 0x1bb   :  { %4990 = vmatprep.mubr.f32.mxu1 %v270_v42  ;;  %5001 = vmatprep.mubr.msk.f32.mxu0 %vm647_vm0, %v272_v48 }
 0x1be   :  { %4991 = vmatmul.mubr.f32.gmra.mrb[2].mxu1 %v271_v45 }
 0x1bf   :  { %5033 = vmatprep.mubr.msk.f32.mxu1 %vm647_vm0, %v272_v48 }
 0x289   :  { %v4951_v22 = vpop.f32.mrb[0].mxu0 }
 0x28a   :  { %v620_v23 = vmul.f32 0.0009765625, %v4951_v22  ;;  %v514_v24 = vpop.f32.mrb[1].mxu0  ;;  %v274_v22 = vld [vmem:[#allocation8 + $0x10] sm:$0xff] }
 0x28b   :  { %v619_v25 = vmul.f32 0.0009765625, %v514_v24 }
 0x28c   :  { %v628_v35 = vmul.f32 %v620_v23, %v620_v23 }
 0x28d   :  { %v5261_v26 = vpack.c.bf16 %v620_v23, %v619_v25  ;;  %v4954_v27 = vpop.f32.mrb[2].mxu0  ;;  %v4989_v28 = vpop.f32.mrb[0].mxu1  ;;  %v627_v42 = vmul.f32 %v619_v25, %v619_v25 }
 0x28e   :  { %v622_v38 = vmul.f32 0.0009765625, %v4954_v27  ;;  %v624_v39 = vmul.f32 0.0009765625, %v4989_v28  ;;  %v524_v40 = vpop.f32.mrb[3].mxu0  ;;  %v599_v41 = vpop.f32.mrb[1].mxu1  ;;  %v276_v28 = vld [vmem:[#allocation8 + $0x20] sm:$0xff] }
 0x28f   :  { %v621_v45 = vmul.f32 0.0009765625, %v524_v40  ;;  %v623_v48 = vmul.f32 0.0009765625, %v599_v41  ;;  %5262 = vmatprep.subr.bf16.mxu0 %v5261_v26  ;;  %v279_v40 = vld [vmem:[#allocation8 + $0x38] sm:$0xff] }
 0x290   :  { %v632_v49 = vsub.f32 %v624_v39, %v628_v35  ;;  %5264 = vmatpush3.bf16.msra.mxu0 %v5261_v26  ;;  %v630_v62 = vmul.f32 %v622_v38, %v622_v38  ;;  %v275_v26 = vld [vmem:[#allocation8 + $0x18] sm:$0xff]  ;;  %v277_v35 = vld [vmem:[#allocation8 + $0x28] sm:$0xff] }
 0x291   :  { %v5265_v53 = vpack.c.bf16 %v622_v38, %v621_v45  ;;  %v631_v56 = vsub.f32 %v623_v48, %v627_v42  ;;  %v4992_v59 = vpop.f32.mrb[2].mxu1  ;;  %v629_v6 = vmul.f32 %v621_v45, %v621_v45  ;;  %v278_v38 = vld [vmem:[#allocation8 + $0x30] sm:$0xff]  ;;  %v280_v42 = vld [vmem:[#allocation8 + $0x40] sm:$0xff] }
 0x292   :  { %v636_v63 = vmax.f32 %v632_v49, 0.0  ;;  %v626_v0 = vmul.f32 0.0009765625, %v4992_v59  ;;  %v609_v1 = vpop.f32.mrb[3].mxu1  ;;  %v281_v49 = vld [vmem:[#allocation8 + $0x48] sm:$0xff] }
 0x293   :  { %v635_v7 = vmax.f32 %v631_v56, 0.0  ;;  %v625_v8 = vmul.f32 0.0009765625, %v609_v1  ;;  %5266 = vmatprep.subr.bf16.mxu0 %v5265_v53  ;;  %v282_v56 = vld [vmem:[#allocation8 + $0x50] sm:$0xff] }
 0x294   :  { %v640_v9 = vadd.f32 1e-06, %v636_v63  ;;  %v634_v10 = vsub.f32 %v626_v0, %v630_v62  ;;  %5268 = vmatpush3.bf16.msra.mxu0 %v5265_v53  ;;  %v283_v62 = vld [vmem:[#allocation8 + $0x58] sm:$0xff]  ;;  %v284_v63 = vld [vmem:[#allocation8 + $0x60] sm:$0xff]  ;;  %v285_v0 = vld [vmem:[#allocation8 + $0x68] sm:$0xff] }
 0x295   :  { %v639_v20 = vadd.f32 1e-06, %v635_v7  ;;  %v633_v21 = vsub.f32 %v625_v8, %v629_v6  ;;  %v286_v1 = vld [vmem:[#allocation8 + $0x70] sm:$0xff]  ;;  %v287_v6 = vld [vmem:[#allocation8 + $0x78] sm:$0xff] }
 0x296   :  { %5499 = vrsqrt.f32 %v640_v9  ;;  %v638_v23 = vmax.f32 %v634_v10, 0.0 }
 0x297   :  { %5501 = vrsqrt.f32 %v639_v20  ;;  %v637_v24 = vmax.f32 %v633_v21, 0.0  ;;  %5002 = vmatmul.mubr.msk.f32.vlgmr.msra.gmra.mrb[4].mxu0 %vm647_vm0, %v273_v13 }
 0x298   :  { %v642_v25 = vadd.f32 1e-06, %v638_v23  ;;  %5004 = vmatprep.mubr.msk.f32.mxu0 %vm647_vm0, %v274_v22 }
 0x299   :  { %v641_v27 = vadd.f32 1e-06, %v637_v24 }
 0x29a   :  { %5503 = vrsqrt.f32 %v642_v25 }
 0x29b   :  { %5505 = vrsqrt.f32 %v641_v27  ;;  %5005 = vmatmul.mubr.msk.f32.gmra.mrb[6].mxu0 %vm647_vm0, %v275_v26 }
 0x29c   :  { %5007 = vmatprep.mubr.msk.f32.mxu0 %vm647_vm0, %v276_v28 }
 0x29f   :  { %5008 = vmatmul.mubr.msk.f32.gmra.mrb[8].mxu0 %vm647_vm0, %v277_v35 }
 0x2a0   :  { %v5500_v39 = vpop.eup %5499  ;;  %5010 = vmatprep.mubr.msk.f32.mxu0 %vm647_vm0, %v278_v38 }
 0x2a1   :  { %v5502_v41 = vpop.eup %5501 }
 0x2a2   :  { %v5269_v45 = vpack.c.bf16 %v5500_v39, %v5502_v41 }
 0x2a3   :  { %5011 = vmatmul.mubr.msk.f32.gmra.mrb[10].mxu0 %vm647_vm0, %v279_v40 }
 0x2a4   :  { %v5504_v48 = vpop.eup %5503  ;;  %5270 = vmatprep.subr.bf16.mxu1 %v5269_v45  ;;  %5013 = vmatprep.mubr.msk.f32.mxu0 %vm647_vm0, %v280_v42 }
 0x2a5   :  { %v5506_v53 = vpop.eup %5505  ;;  %5272 = vmatpush3.bf16.msra.mxu1 %v5269_v45 }
 0x2a6   :  { %v5273_v59 = vpack.c.bf16 %v5504_v48, %v5506_v53 }
 0x2a7   :  { %5014 = vmatmul.mubr.msk.f32.gmra.mrb[12].mxu0 %vm647_vm0, %v281_v49 }
 0x2a8   :  { %5274 = vmatprep.subr.bf16.mxu1 %v5273_v59  ;;  %5016 = vmatprep.mubr.msk.f32.mxu0 %vm647_vm0, %v282_v56 }
 0x2a9   :  { %5276 = vmatpush3.bf16.msra.mxu1 %v5273_v59 }
 0x2ab   :  { %5017 = vmatmul.mubr.msk.f32.gmra.mrb[14].mxu0 %vm647_vm0, %v283_v62 }
 0x2ac   :  { %5034 = vmatmul.mubr.msk.f32.vlgmr.msra.gmra.mrb[4].mxu1 %vm647_vm0, %v273_v13  ;;  %5019 = vmatprep.mubr.msk.f32.mxu0 %vm647_vm0, %v284_v63 }
 0x2ad   :  { %5036 = vmatprep.mubr.msk.f32.mxu1 %vm647_vm0, %v274_v22 }
 0x2af   :  { %5020 = vmatmul.mubr.msk.f32.gmra.mrb[16].mxu0 %vm647_vm0, %v285_v0 }
 0x2b0   :  { %5037 = vmatmul.mubr.msk.f32.gmra.mrb[6].mxu1 %vm647_vm0, %v275_v26  ;;  %5022 = vmatprep.mubr.msk.f32.mxu0 %vm647_vm0, %v286_v1 }
 0x2b1   :  { %5039 = vmatprep.mubr.msk.f32.mxu1 %vm647_vm0, %v276_v28 }
 0x2b3   :  { %5023 = vmatmul.mubr.msk.f32.gmra.mrb[18].mxu0 %vm647_vm0, %v287_v6 }
 0x2b4   :  { %5040 = vmatmul.mubr.msk.f32.gmra.mrb[8].mxu1 %vm647_vm0, %v277_v35  ;;  %1732 = vmatprep.mubr.bf16.mxu0 %v7819_v50 }
 0x2b5   :  { %5042 = vmatprep.mubr.msk.f32.mxu1 %vm647_vm0, %v278_v38 }
 0x2b8   :  { %5043 = vmatmul.mubr.msk.f32.gmra.mrb[10].mxu1 %vm647_vm0, %v279_v40 }
 0x2b9   :  { %5045 = vmatprep.mubr.msk.f32.mxu1 %vm647_vm0, %v280_v42 }
 0x2bc   :  { %5046 = vmatmul.mubr.msk.f32.gmra.mrb[12].mxu1 %vm647_vm0, %v281_v49 }
 0x2bd   :  { %5048 = vmatprep.mubr.msk.f32.mxu1 %vm647_vm0, %v282_v56 }
 0x2c0   :  { %5049 = vmatmul.mubr.msk.f32.gmra.mrb[14].mxu1 %vm647_vm0, %v283_v62  ;;  %v297_v62 = vld [vmem:[#allocation9 + $0x48] sm:$0xff] }
 0x2c1   :  { %5051 = vmatprep.mubr.msk.f32.mxu1 %vm647_vm0, %v284_v63 }
 0x2c4   :  { %5052 = vmatmul.mubr.msk.f32.gmra.mrb[16].mxu1 %vm647_vm0, %v285_v0 }
 0x2c5   :  { %5054 = vmatprep.mubr.msk.f32.mxu1 %vm647_vm0, %v286_v1  ;;  %v313_v1 = vld [vmem:[#allocation11 + $0x48] sm:$0xff] }
 0x2c8   :  { %5055 = vmatmul.mubr.msk.f32.gmra.mrb[18].mxu1 %vm647_vm0, %v287_v6 }
 0x2c9   :  { %1858 = vmatprep.mubr.bf16.mxu1 %v7819_v50 }
 0x36a   :  { %v5003_v7 = vpop.f32.mrb[4].mxu0 }
 0x36b   :  { %993 = vperm.xlu0 %5478, %v5003_v7   ;;  %v762_v8 = vpop.f32.mrb[5].mxu0 }
 0x36c   :  { %988 = vperm.xlu1 %5477, %v762_v8   ;;  %v299_v8 = vld [vmem:[#allocation9 + $0x58] sm:$0xff] }
 0x36e   :  { %v5006_v9 = vpop.f32.mrb[6].mxu0 }
 0x36f   :  { %1003 = vperm.xlu0 %5478, %v5006_v9   ;;  %v772_v10 = vpop.f32.mrb[7].mxu0  ;;  %v296_v9 = vld [vmem:[#allocation9 + $0x40] sm:$0xff] }
 0x370   :  { %998 = vperm.xlu1 %5477, %v772_v10  }
 0x372   :  { %v5009_v13 = vpop.f32.mrb[8].mxu0 }
 0x373   :  { %v782_v20 = vpop.f32.mrb[9].mxu0 }
 0x374   :  { %1013 = vperm.xlu1 %5477, %v5009_v13   ;;  %1008 = vperm.xlu0 %5478, %v782_v20   ;;  %v315_v20 = vld [vmem:[#allocation11 + $0x58] sm:$0xff] }
 0x376   :  { %v5012_v21 = vpop.f32.mrb[10].mxu0 }
 0x377   :  { %v792_v22 = vpop.f32.mrb[11].mxu0 }
 0x378   :  { %1023 = vperm.xlu1 %5477, %v5012_v21   ;;  %v312_v21 = vld [vmem:[#allocation11 + $0x40] sm:$0xff] }
 0x37a   :  { %v5015_v23 = vpop.f32.mrb[12].mxu0 }
 0x37b   :  { %1033 = vperm.xlu0 %5478, %v5015_v23   ;;  %v802_v24 = vpop.f32.mrb[13].mxu0  ;;  %v314_v23 = vld [vmem:[#allocation11 + $0x50] sm:$0xff] }
 0x37c   :  { %1018 = vperm.xlu1 %5477, %v792_v22   ;;  %v298_v22 = vld [vmem:[#allocation9 + $0x50] sm:$0xff] }
 0x37e   :  { %v5018_v25 = vpop.f32.mrb[14].mxu0 }
 0x37f   :  { %v5035_v26 = vpop.f32.mrb[4].mxu1  ;;  %v812_v27 = vpop.f32.mrb[15].mxu0 }
 0x380   :  { %1028 = vperm.xlu1 %5477, %v802_v24   ;;  %1105 = vperm.xlu0 %5478, %v5035_v26   ;;  %v907_v28 = vpop.f32.mrb[5].mxu1  ;;  %v301_v24 = vld [vmem:[#allocation9 + $0x68] sm:$0xff]  ;;  %v6594_v26 = vpop.permute.xlu1 %1232 }
 0x382   :  { %v5021_v35 = vpop.f32.mrb[16].mxu0 }
 0x383   :  { %v5038_v38 = vpop.f32.mrb[6].mxu1  ;;  %v822_v39 = vpop.f32.mrb[17].mxu0 }
 0x384   :  { %1100 = vperm.xlu1 %5477, %v907_v28   ;;  %1115 = vperm.xlu0 %5478, %v5038_v38   ;;  %v917_v40 = vpop.f32.mrb[7].mxu1  ;;  %v300_v28 = vld [vmem:[#allocation9 + $0x60] sm:$0xff] }
 0x385   :  { %v316_v38 = vld [vmem:[#allocation11 + $0x60] sm:$0xff] }
 0x386   :  { %v5024_v41 = vpop.f32.mrb[18].mxu0 }
 0x387   :  { %v5041_v42 = vpop.f32.mrb[8].mxu1  ;;  %v832_v45 = vpop.f32.mrb[19].mxu0 }
 0x388   :  { %1110 = vperm.xlu1 %5477, %v917_v40   ;;  %v927_v48 = vpop.f32.mrb[9].mxu1  ;;  %v6598_v40 = vpop.permute.xlu0 %1349 }
 0x38b   :  { %v5044_v49 = vpop.f32.mrb[10].mxu1 }
 0x38c   :  { %1125 = vperm.xlu1 %5477, %v5041_v42   ;;  %1135 = vperm.xlu0 %5478, %v5044_v49   ;;  %v937_v53 = vpop.f32.mrb[11].mxu1  ;;  %v319_v42 = vld [vmem:[#allocation11 + $0x78] sm:$0xff] }
 0x38d   :  { %v2283_v49 = vld [vmem:[#allocation14 + $0x8] sm:$0xff] }
 0x38f   :  { %v5047_v56 = vpop.f32.mrb[12].mxu1 }
 0x390   :  { %1120 = vperm.xlu1 %5477, %v927_v48   ;;  %1043 = vperm.xlu0 %5478, %v5018_v25   ;;  %v947_v59 = vpop.f32.mrb[13].mxu1  ;;  %v317_v25 = vld [vmem:[#allocation11 + $0x68] sm:$0xff] }
 0x393   :  { %v5050_v63 = vpop.f32.mrb[14].mxu1 }
 0x394   :  { %1257 = vperm.xlu0 %5478, %v297_v62   ;;  %1130 = vperm.xlu1 %5477, %v937_v53   ;;  %v957_v0 = vpop.f32.mrb[15].mxu1  ;;  %v6606_v53 = vld [vmem:[#allocation15 + $0x8] sm:$0xff] }
 0x397   :  { %v5053_v6 = vpop.f32.mrb[16].mxu1 }
 0x398   :  { %1369 = vperm.xlu0 %5478, %v313_v1   ;;  %1038 = vperm.xlu1 %5477, %v812_v27   ;;  %v967_v7 = vpop.f32.mrb[17].mxu1  ;;  %v303_v27 = vld [vmem:[#allocation9 + $0x78] sm:$0xff] }
 0x39b   :  { %v5056_v10 = vpop.f32.mrb[18].mxu1 }
 0x39c   :  { %1267 = vperm.xlu0 %5478, %v299_v8   ;;  %1252 = vperm.xlu1 %5477, %v296_v9   ;;  %v977_v13 = vpop.f32.mrb[19].mxu1  ;;  %v6615_v8 = vld [vmem:[#allocation15] sm:$0xff]  ;;  %v2284_v9 = vld [vmem:[#allocation14 + $0x10] sm:$0xff] }
 0x3a0   :  { %1379 = vperm.xlu0 %5478, %v315_v20   ;;  %1364 = vperm.xlu1 %5477, %v312_v21   ;;  %v6619_v20 = vld [vmem:[#allocation15 + $0x10] sm:$0xff] }
 0x3a4   :  { %1053 = vperm.xlu0 %5478, %v5021_v35   ;;  %1262 = vperm.xlu1 %5477, %v298_v22   ;;  %v6596_v35 = vpop.permute.xlu1 %1237 }
 0x3a8   :  { %1374 = vperm.xlu1 %5477, %v314_v23   ;;  %1145 = vperm.xlu0 %5478, %v5047_v56   ;;  %v318_v56 = vld [vmem:[#allocation11 + $0x70] sm:$0xff] }
 0x3ac   :  { %1048 = vperm.xlu1 %5477, %v822_v39   ;;  %1155 = vperm.xlu0 %5478, %v5050_v63   ;;  %v302_v39 = vld [vmem:[#allocation9 + $0x70] sm:$0xff]  ;;  %v2285_v63 = vld [vmem:[#allocation14 + $0x18] sm:$0xff] }
 0x3b0   :  { %1140 = vperm.xlu1 %5477, %v947_v59   ;;  %1063 = vperm.xlu0 %5478, %v5024_v41   ;;  %v6600_v41 = vpop.permute.xlu1 %1344 }
 0x3b4   :  { %1277 = vperm.xlu0 %5478, %v301_v24   ;;  %1150 = vperm.xlu1 %5477, %v957_v0   ;;  %v6604_v48 = vpop.permute.xlu1 %1242  ;;  %v2282_v0 = vld [vmem:[#allocation14] sm:$0xff] }
 0x3b8   :  { %1389 = vperm.xlu0 %5478, %v317_v25   ;;  %1058 = vperm.xlu1 %5477, %v832_v45   ;;  %v6602_v45 = vpop.permute.xlu0 %1247  ;;  %v6610_v62 = vpop.permute.xlu1 %1354 }
 0x3bc   :  { %1287 = vperm.xlu0 %5478, %v303_v27   ;;  %1272 = vperm.xlu1 %5477, %v300_v28   ;;  %v6608_v59 = vpop.permute.xlu0 %1359 }
 0x3c0   :  { %1384 = vperm.xlu1 %5477, %v316_v38   ;;  %1165 = vperm.xlu0 %5478, %v5053_v6   ;;  %v1218_v1 = vpop.permute.xlu0 %1217  ;;  %v1213_v6 = vpop.permute.xlu1 %1212 }
 0x3c4   :  { %1282 = vperm.xlu1 %5477, %v302_v39   ;;  %1175 = vperm.xlu0 %5478, %v5056_v10   ;;  %v1330_v10 = vpop.permute.xlu0 %1329 }
 0x3c8   :  { %1160 = vperm.xlu1 %5477, %v967_v7   ;;  %1399 = vperm.xlu0 %5478, %v319_v42   ;;  %v6613_v7 = vld [vmem:[#allocation15 + $0x18] sm:$0xff]  ;;  %v1228_v21 = vpop.permute.xlu0 %1227 }
 0x3cc   :  { %2297 = vperm.xlu0 %5478, %v2283_v49   ;;  %1170 = vperm.xlu1 %5477, %v977_v13   ;;  %v1325_v13 = vpop.permute.xlu1 %1324  ;;  %v1340_v23 = vpop.permute.xlu0 %1339 }
 0x3d0   :  { %2325 = vperm.xlu0 %5478, %v6606_v53   ;;  %1394 = vperm.xlu1 %5477, %v318_v56   ;;  %v1223_v22 = vpop.permute.xlu1 %1222 }
 0x3d4   :  { %2307 = vperm.xlu0 %5478, %v2285_v63   ;;  %2292 = vperm.xlu1 %5477, %v2282_v0   ;;  %v6622_v24 = vpop.permute.xlu1 %1334 }
 0x3d8   :  { %2335 = vperm.xlu0 %5478, %v6613_v7   ;;  %2320 = vperm.xlu1 %5477, %v6615_v8  }
 0x3dc   :  { %2302 = vperm.xlu1 %5477, %v2284_v9  }
 0x3e0   :  { %2330 = vperm.xlu1 %5477, %v6619_v20  }
 0x3ea   :  { %v994_v25 = vpop.permute.xlu0 %993 }
 0x3eb   :  { %v989_v27 = vpop.permute.xlu1 %988  ;;  %v1068_v0 = vsub.f32 %v6402_v4, %v994_v25  ;;  %v1069_v9 = vsub.f32 %v6404_v5, %v994_v25 }
 0x3ec   :  { %v1066_v31 = vsub.f32 %v6398_v2, %v989_v27  ;;  %v1067_v55 = vsub.f32 %v6400_v3, %v989_v27 }
 0x3ee   :  { %v1004_v38 = vpop.permute.xlu0 %1003 }
 0x3ef   :  { %v999_v28 = vpop.permute.xlu1 %998  ;;  %v1072_v36 = vsub.f32 %v6422_v18, %v1004_v38  ;;  %v1073_v12 = vsub.f32 %v6424_v19, %v1004_v38 }
 0x3f3   :  { %v1014_v39 = vpop.permute.xlu1 %1013  ;;  %v6624_v42 = vpop.permute.xlu0 %1008 }
 0x3f7   :  { %v1024_v49 = vpop.permute.xlu1 %1023 }
 0x3fa   :  { %v6626_v56 = vpop.permute.xlu0 %1033 }
 0x3fb   :  { %v6628_v63 = vpop.permute.xlu1 %1018 }
 0x3ff   :  { %v6632_v50 = vpop.permute.xlu1 %1028  ;;  %v1106_v52 = vpop.permute.xlu0 %1105 }
 0x400   :  { %v1180_v51 = vmul.f32 %v1106_v52, %v1068_v0  ;;  %v1181_v34 = vmul.f32 %v1106_v52, %v1069_v9  ;;  %v1070_v9 = vsub.f32 %v6418_v15, %v999_v28 }
 0x402   :  { %v1292_v54 = vmul.f32 %v1218_v1, %v1180_v51  ;;  %v1293_v37 = vmul.f32 %v1218_v1, %v1181_v34  ;;  %v1071_v1 = vsub.f32 %v6420_v16, %v999_v28 }
 0x403   :  { %v1101_v11 = vpop.permute.xlu1 %1100  ;;  %v1116_v58 = vpop.permute.xlu0 %1115 }
 0x404   :  { %v6638_v4 = vadd.f32 %v1330_v10, %v1292_v54  ;;  %v6640_v25 = vadd.f32 %v1330_v10, %v1293_v37  ;;  %v1178_v5 = vmul.f32 %v1101_v11, %v1066_v31  ;;  %v1179_v17 = vmul.f32 %v1101_v11, %v1067_v55 }
 0x405   :  { %v1184_v0 = vmul.f32 %v1116_v58, %v1072_v36  ;;  %v1185_v52 = vmul.f32 %v1116_v58, %v1073_v12  ;;  %v1076_v58 = vsub.f32 %v6442_v32, %v1014_v39  ;;  %v1077_v36 = vsub.f32 %v6444_v33, %v1014_v39 }
 0x406   :  { %v4608_v27 = vmul.f32 -1.442695, %v6638_v4  ;;  %v1290_v51 = vmul.f32 %v1213_v6, %v1178_v5  ;;  %v1291_v34 = vmul.f32 %v1213_v6, %v1179_v17  ;;  %v4609_v38 = vmul.f32 -1.442695, %v6640_v25 }
 0x407   :  { %v1296_v19 = vmul.f32 %v1228_v21, %v1184_v0  ;;  %v1111_v18 = vpop.permute.xlu1 %1110  ;;  %v1297_v31 = vmul.f32 %v1228_v21, %v1185_v52  ;;  %v1080_v55 = vsub.f32 %v6462_v46, %v1024_v49  ;;  %v1081_v39 = vsub.f32 %v6464_v47, %v1024_v49 }
 0x408   :  { %v6646_v54 = vadd.f32 %v1325_v13, %v1290_v51  ;;  %v6648_v37 = vadd.f32 %v1325_v13, %v1291_v34  ;;  %v1182_v11 = vmul.f32 %v1111_v18, %v1070_v9  ;;  %v1183_v12 = vmul.f32 %v1111_v18, %v1071_v1 }
 0x409   :  { %5507 = vpow2.f32 %v4608_v27  ;;  %v6654_v6 = vadd.f32 %v1340_v23, %v1296_v19  ;;  %v6657_v0 = vadd.f32 %v1340_v23, %v1297_v31  ;;  %v1074_v19 = vsub.f32 %v6438_v29, %v6624_v42 }
 0x40a   :  { %v4606_v5 = vmul.f32 -1.442695, %v6646_v54  ;;  %v1294_v17 = vmul.f32 %v1223_v22, %v1182_v11  ;;  %5509 = vpow2.f32 %v4609_v38  ;;  %v1295_v10 = vmul.f32 %v1223_v22, %v1183_v12 }
 0x40b   :  { %v1126_v28 = vpop.permute.xlu1 %1125  ;;  %v1136_v13 = vpop.permute.xlu0 %1135  ;;  %v4607_v21 = vmul.f32 -1.442695, %v6648_v37  ;;  %v1075_v22 = vsub.f32 %v6440_v30, %v6624_v42  ;;  %v4612_v34 = vmul.f32 -1.442695, %v6654_v6 }
 0x40c   :  { %v1188_v52 = vmul.f32 %v1126_v28, %v1076_v58  ;;  %v1189_v18 = vmul.f32 %v1126_v28, %v1077_v36  ;;  %5511 = vpow2.f32 %v4606_v5  ;;  %v6661_v9 = vadd.f32 %v6622_v24, %v1294_v17 }
 0x40d   :  { %v1192_v27 = vmul.f32 %v1136_v13, %v1080_v55  ;;  %v6671_v1 = vadd.f32 %v6622_v24, %v1295_v10  ;;  %v1193_v49 = vmul.f32 %v1136_v13, %v1081_v39  ;;  %5513 = vpow2.f32 %v4607_v21 }
 0x40e   :  { %v1300_v51 = vmul.f32 %v6596_v35, %v1188_v52  ;;  %v1301_v23 = vmul.f32 %v6596_v35, %v1189_v18  ;;  %v4613_v58 = vmul.f32 -1.442695, %v6657_v0  ;;  %v4610_v35 = vmul.f32 -1.442695, %v6661_v9 }
 0x40f   :  { %v1304_v38 = vmul.f32 %v6602_v45, %v1192_v27  ;;  %v1121_v31 = vpop.permute.xlu1 %1120  ;;  %v6674_v11 = vpop.permute.xlu0 %1043  ;;  %v1078_v17 = vsub.f32 %v6458_v43, %v6628_v63  ;;  %5515 = vpow2.f32 %v4612_v34  ;;  %v4611_v55 = vmul.f32 -1.442695, %v6671_v1 }
 0x410   :  { %v6678_v42 = vadd.f32 %v6598_v40, %v1300_v51  ;;  %v1186_v12 = vmul.f32 %v1121_v31, %v1074_v19  ;;  %v6682_v36 = vadd.f32 %v6598_v40, %v1301_v23  ;;  %v1187_v5 = vmul.f32 %v1121_v31, %v1075_v22 }
 0x411   :  { %v6685_v24 = vadd.f32 %v6608_v59, %v1304_v38  ;;  %v1305_v10 = vmul.f32 %v6602_v45, %v1193_v49  ;;  %v1079_v40 = vsub.f32 %v6460_v44, %v6628_v63  ;;  %5517 = vpow2.f32 %v4613_v58 }
 0x412   :  { %v4616_v52 = vmul.f32 -1.442695, %v6678_v42  ;;  %v1298_v18 = vmul.f32 %v6594_v26, %v1186_v12  ;;  %5519 = vpow2.f32 %v4610_v35  ;;  %v4617_v27 = vmul.f32 -1.442695, %v6682_v36 }
 0x413   :  { %v1131_v28 = vpop.permute.xlu1 %1130  ;;  %v6691_v13 = vpop.permute.xlu0 %1257  ;;  %v4620_v22 = vmul.f32 -1.442695, %v6685_v24  ;;  %v1299_v45 = vmul.f32 %v6594_v26, %v1187_v5  ;;  %5521 = vpow2.f32 %v4611_v55  ;;  %v6701_v34 = vadd.f32 %v6608_v59, %v1305_v10 }
 0x414   :  { %v5508_v21 = vpop.eup %5507  ;;  %v1190_v19 = vmul.f32 %v1131_v28, %v1078_v17  ;;  %v1191_v51 = vmul.f32 %v1131_v28, %v1079_v40  ;;  %v6123_v31 = vmov 1   ;;  %5523 = vpow2.f32 %v4616_v52 }
 0x415   :  { %v5510_v39 = vpop.eup %5509  ;;  %5479 = vset.pattern.permute.xlu1 %v6123_v31  ;;  %5480 = vset.pattern.permute.xlu0 %v6123_v31  ;;  %v1532_v58 = vadd.f32 1.0, %v5508_v21  ;;  %v6709_v12 = vadd.f32 %v6600_v41, %v1298_v18  ;;  %5525 = vpow2.f32 %v4617_v27  ;;  %v6714_v5 = vadd.f32 %v6600_v41, %v1299_v45 }
 0x416   :  { %v5512_v23 = vpop.eup %5511  ;;  %v1302_v63 = vmul.f32 %v6604_v48, %v1190_v19  ;;  %2355 = vperm.xlu1 %5479, %v6615_v8   ;;  %2359 = vperm.xlu0 %5480, %v6606_v53   ;;  %v1533_v26 = vadd.f32 1.0, %v5510_v39  ;;  %5527 = vpow2.f32 %v4620_v22  ;;  %v1303_v17 = vmul.f32 %v6604_v48, %v1191_v51 }
 0x417   :  { %v6704_v49 = vpop.permute.xlu1 %1038  ;;  %v6706_v38 = vpop.permute.xlu0 %1369  ;;  %v1530_v35 = vadd.f32 1.0, %v5512_v23  ;;  %v4621_v55 = vmul.f32 -1.442695, %v6701_v34  ;;  %5529 = vrcp.f32 %v1532_v58  ;;  %v4614_v40 = vmul.f32 -1.442695, %v6709_v12 }
 0x418   :  { %v5514_v59 = vpop.eup %5513  ;;  %v6719_v10 = vadd.f32 %v6610_v62, %v1302_v63  ;;  %v6124_v52 = vmov 2   ;;  %5531 = vrcp.f32 %v1533_v26  ;;  %v4615_v39 = vmul.f32 -1.442695, %v6714_v5 }
 0x419   :  { %v5516_v41 = vpop.eup %5515  ;;  %v1531_v18 = vadd.f32 1.0, %v5514_v59  ;;  %5533 = vrcp.f32 %v1530_v35  ;;  %v6730_v27 = vadd.f32 %v6610_v62, %v1303_v17 }
 0x41a   :  { %2363 = vperm.xlu1 %5479, %v6619_v20   ;;  %5481 = vset.pattern.permute.xlu0 %v6124_v52  ;;  %5535 = vpow2.f32 %v4621_v55  ;;  %v4618_v22 = vmul.f32 -1.442695, %v6719_v10  ;;  %v1536_v23 = vadd.f32 1.0, %v5516_v41 }
 0x41b   :  { %v6721_v28 = vpop.permute.xlu1 %1252  ;;  %v6723_v21 = vpop.permute.xlu0 %1267  ;;  %2387 = vperm.xlu0 %5481, %v6615_v8   ;;  %5537 = vpow2.f32 %v4614_v40  ;;  %v4619_v62 = vmul.f32 -1.442695, %v6730_v27 }
 0x41c   :  { %v5518_v48 = vpop.eup %5517  ;;  %5539 = vrcp.f32 %v1531_v18  ;;  %v6125_v18 = vmov 3  }
 0x41d   :  { %v5520_v19 = vpop.eup %5519  ;;  %v1537_v31 = vadd.f32 1.0, %v5518_v48  ;;  %5541 = vpow2.f32 %v4615_v39  ;;  %v1084_v39 = vsub.f32 %v6482_v60, %v6626_v56 }
 0x41e   :  { %2367 = vperm.xlu1 %5479, %v6613_v7   ;;  %v5522_v63 = vpop.eup %5521  ;;  %v1534_v59 = vadd.f32 1.0, %v5520_v19  ;;  %5543 = vpow2.f32 %v4618_v22  ;;  %v1085_v19 = vsub.f32 %v6484_v61, %v6626_v56 }
 0x41f   :  { %v6733_v45 = vpop.permute.xlu1 %1364  ;;  %v6735_v51 = vpop.permute.xlu0 %1379  ;;  %2399 = vperm.xlu0 %5481, %v6613_v7   ;;  %5545 = vrcp.f32 %v1536_v23  ;;  %v1535_v40 = vadd.f32 1.0, %v5522_v63 }
 0x420   :  { %v5524_v58 = vpop.eup %5523  ;;  %5547 = vrcp.f32 %v1537_v31 }
 0x421   :  { %v5526_v26 = vpop.eup %5525  ;;  %v1540_v41 = vadd.f32 1.0, %v5524_v58  ;;  %5549 = vpow2.f32 %v4619_v62 }
 0x422   :  { %v5528_v55 = vpop.eup %5527  ;;  %5482 = vset.pattern.permute.xlu1 %v6124_v52  ;;  %v1541_v22 = vadd.f32 1.0, %v5526_v26  ;;  %5551 = vrcp.f32 %v1534_v59  ;;  %v7911_v59 = vmov 0  }
 0x423   :  { %v6740_v35 = vpop.permute.xlu1 %1262  ;;  %v6742_v17 = vpop.permute.xlu0 %1053  ;;  %2391 = vperm.xlu1 %5482, %v6606_v53   ;;  %5484 = vset.pattern.permute.xlu0 %v6125_v18  ;;  %v1544_v52 = vadd.f32 1.0, %v5528_v55  ;;  %5553 = vrcp.f32 %v1535_v40  ;;  %v1082_v40 = vsub.f32 %v6478_v57, %v6632_v50 }
 0x424   :  { %v6745_v48 = vpop.eup %5529  ;;  %2423 = vperm.xlu0 %5484, %v6606_v53   ;;  %5555 = vrcp.f32 %v1540_v41  ;;  %v1088_v41 = vsub.f32 %v6502_v14, %v6674_v11 }
 0x425   :  { %v6752_v23 = vpop.eup %5531  ;;  %5557 = vrcp.f32 %v1541_v22 }
 0x426   :  { %v6756_v58 = vpop.eup %5533  ;;  %5559 = vrcp.f32 %v1544_v52  ;;  %v7913_v52 = vld [vmem:[#allocation51_spill] sm:$0xff] }
 0x427   :  { %v6754_v63 = vpop.permute.xlu1 %1374  ;;  %v1146_v31 = vpop.permute.xlu0 %1145  ;;  %2395 = vperm.xlu1 %5482, %v6619_v20  }
 0x428   :  { %v1196_v47 = vmul.f32 %v1146_v31, %v1084_v39  ;;  %v1197_v46 = vmul.f32 %v1146_v31, %v1085_v19  ;;  %v5536_v60 = vpop.eup %5535  ;;  %5486 = vset.pattern.permute.xlu0 %v7911_v59 }
 0x429   :  { %v5538_v56 = vpop.eup %5537  ;;  %v1545_v62 = vadd.f32 1.0, %v5536_v60 }
 0x42a   :  { %v1308_v53 = vmul.f32 %v6691_v13, %v1196_v47  ;;  %v1309_v26 = vmul.f32 %v6691_v13, %v1197_v46  ;;  %v6762_v55 = vpop.eup %5539  ;;  %v1538_v39 = vadd.f32 1.0, %v5538_v56  ;;  %v7912_v47 = vld [vmem:[#allocation57_spill] sm:$0xff]  ;;  %v1083_v56 = vsub.f32 %v7913_v52, %v6632_v50 }
 0x42b   :  { %v6768_v19 = vpop.permute.xlu1 %1048  ;;  %v1156_v22 = vpop.permute.xlu0 %1155  ;;  %5561 = vrcp.f32 %v1545_v62  ;;  %v1089_v46 = vsub.f32 %v7912_v47, %v6674_v11  ;;  %5483 = vset.pattern.permute.xlu1 %v6125_v18 }
 0x42c   :  { %v5542_v60 = vpop.eup %5541  ;;  %v6773_v13 = vadd.f32 %v6706_v38, %v1308_v53  ;;  %v6776_v31 = vadd.f32 %v6706_v38, %v1309_v26  ;;  %5563 = vrcp.f32 %v1538_v39  ;;  %v1200_v14 = vmul.f32 %v1156_v22, %v1088_v41  ;;  %2419 = vperm.xlu1 %5483, %v6615_v8  }
 0x42d   :  { %v5544_v61 = vpop.eup %5543  ;;  %v1539_v57 = vadd.f32 1.0, %v5542_v60  ;;  %v1201_v53 = vmul.f32 %v1156_v22, %v1089_v46  ;;  %v7914_v22 = vld [vmem:[#allocation54_spill] sm:$0xff] }
 0x42e   :  { %v6780_v44 = vpop.eup %5545  ;;  %v1542_v62 = vadd.f32 1.0, %v5544_v61  ;;  %v4624_v43 = vmul.f32 -1.442695, %v6773_v13  ;;  %v4625_v11 = vmul.f32 -1.442695, %v6776_v31  ;;  %v1312_v26 = vmul.f32 %v6723_v21, %v1200_v14 }
 0x42f   :  { %v6785_v38 = vpop.eup %5547  ;;  %5565 = vrcp.f32 %v1539_v57  ;;  %v1141_v50 = vpop.permute.xlu1 %1140  ;;  %v1313_v18 = vmul.f32 %v6723_v21, %v1201_v53  ;;  %v1086_v8 = vsub.f32 %v7914_v22, %v6704_v49 }
 0x430   :  { %v6788_v60 = vpop.permute.xlu0 %1063  ;;  %v5550_v39 = vpop.eup %5549  ;;  %5567 = vrcp.f32 %v1542_v62  ;;  %v1194_v61 = vmul.f32 %v1141_v50, %v1082_v40  ;;  %v1195_v41 = vmul.f32 %v1141_v50, %v1083_v56  ;;  %v6796_v57 = vadd.f32 %v6735_v51, %v1312_v26  ;;  %2427 = vperm.xlu1 %5483, %v6619_v20   ;;  %v7915_v62 = vld [vmem:[#allocation55_spill] sm:$0xff] }
 0x431   :  { %v6791_v47 = vpop.eup %5551  ;;  %v1543_v52 = vadd.f32 1.0, %v5550_v39  ;;  %5569 = vpow2.f32 %v4624_v43  ;;  %v6801_v46 = vadd.f32 %v6735_v51, %v1313_v18  ;;  %v1087_v43 = vsub.f32 %v7915_v62, %v6704_v49 }
 0x432   :  { %v6798_v14 = vpop.eup %5553  ;;  %5571 = vpow2.f32 %v4625_v11  ;;  %v1306_v21 = vmul.f32 %v6721_v28, %v1194_v61  ;;  %v1307_v40 = vmul.f32 %v6721_v28, %v1195_v41  ;;  %v4628_v53 = vmul.f32 -1.442695, %v6796_v57 }
 0x433   :  { %v5556_v56 = vpop.eup %5555  ;;  %5573 = vrcp.f32 %v1543_v52  ;;  %v1151_v26 = vpop.permute.xlu1 %1150  ;;  %v4629_v51 = vmul.f32 -1.442695, %v6801_v46 }
 0x434   :  { %v6809_v50 = vpop.permute.xlu0 %1277  ;;  %v5558_v11 = vpop.eup %5557  ;;  %v6813_v39 = vadd.f32 %v6733_v45, %v1306_v21  ;;  %v6816_v28 = vadd.f32 %v6733_v45, %v1307_v40  ;;  %v1198_v20 = vmul.f32 %v1151_v26, %v1086_v8  ;;  %5575 = vpow2.f32 %v4628_v53  ;;  %2431 = vperm.xlu1 %5483, %v6613_v7  }
 0x435   :  { %v5560_v18 = vpop.eup %5559  ;;  %v1199_v52 = vmul.f32 %v1151_v26, %v1087_v43  ;;  %5577 = vpow2.f32 %v4629_v51  ;;  %v1628_v43 = vmul.f32 %v6745_v48, %v6638_v4  ;;  %v1629_v26 = vmul.f32 %v6752_v23, %v6640_v25 }
 0x436   :  { %v5562_v61 = vpop.eup %5561  ;;  %v4622_v49 = vmul.f32 -1.442695, %v6813_v39  ;;  %v4623_v41 = vmul.f32 -1.442695, %v6816_v28  ;;  %v1310_v62 = vmul.f32 %v6740_v35, %v1198_v20  ;;  %v1626_v4 = vmul.f32 %v6756_v58, %v6646_v54  ;;  %v7917_v58 = vld [vmem:[#allocation61_spill] sm:$0xff] }
 0x437   :  { %v5564_v22 = vpop.eup %5563  ;;  %v1311_v21 = vmul.f32 %v6740_v35, %v1199_v52  ;;  %v6823_v33 = vpop.permute.xlu1 %1058  ;;  %v1636_v35 = vmul.f32 %v5556_v56, %v6678_v42  ;;  %v1627_v25 = vmul.f32 %v6762_v55, %v6648_v37  ;;  %v7916_v56 = vld [vmem:[#allocation60_spill] sm:$0xff]  ;;  %v1630_v37 = vmul.f32 %v6791_v47, %v6661_v9 }
 0x438   :  { %v6825_v45 = vpop.permute.xlu0 %1389  ;;  %5579 = vpow2.f32 %v4622_v49  ;;  %v6828_v8 = vadd.f32 %v6754_v63, %v1310_v62  ;;  %v1634_v40 = vmul.f32 %v5564_v22, %v6709_v12  ;;  %v1637_v12 = vmul.f32 %v5558_v11, %v6682_v36  ;;  %5485 = vset.pattern.permute.xlu1 %v7911_v59 }
 0x439   :  { %v5566_v53 = vpop.eup %5565  ;;  %5581 = vpow2.f32 %v4623_v41  ;;  %v6834_v7 = vadd.f32 %v6754_v63, %v1311_v21  ;;  %v1092_v54 = vsub.f32 %v7916_v56, %v6742_v17  ;;  %v1093_v11 = vsub.f32 %v7917_v58, %v6742_v17 }
 0x43a   :  { %v5568_v51 = vpop.eup %5567  ;;  %v4626_v20 = vmul.f32 -1.442695, %v6828_v8  ;;  %v1635_v62 = vmul.f32 %v5566_v53, %v6714_v5  ;;  %v6846_v22 = vpack.c.bf16 %v1636_v35, %v1634_v40  ;;  %v1641_v17 = vmul.f32 %v5562_v61, %v6701_v34 }
 0x43b   :  { %v5570_v48 = vpop.eup %5569  ;;  %v4627_v63 = vmul.f32 -1.442695, %v6834_v7  ;;  %v1638_v42 = vmul.f32 %v5568_v51, %v6719_v10  ;;  %v6851_v23 = vpop.permute.xlu1 %1272  ;;  %v1640_v10 = vmul.f32 %v5560_v18, %v6685_v24  ;;  %v1658_v40 = vpack.c.bf16 %v1628_v43, %v1626_v4  ;;  %v7918_v4 = vld [vmem:[#allocation64_spill] sm:$0xff] }
 0x43c   :  { %v6853_v5 = vpop.permute.xlu0 %1287  ;;  %v5572_v36 = vpop.eup %5571  ;;  %5583 = vpow2.f32 %v4626_v20  ;;  %v6859_v52 = vpack.c.bf16 %v1637_v12, %v1635_v62  ;;  %v1548_v41 = vadd.f32 1.0, %v5570_v48  ;;  %v1659_v24 = vpack.c.bf16 %v1629_v26, %v1627_v25  ;;  %v6890_v48 = vld [vmem:[#allocation12 + $0x10] sm:$0xff]  }
 0x43d   :  { %v5574_v49 = vpop.eup %5573  ;;  %5585 = vpow2.f32 %v4627_v63  ;;  %v1549_v55 = vadd.f32 1.0, %v5572_v36  ;;  %v6870_v35 = vpack.c.bf16 %v1640_v10, %v1638_v42  ;;  %v1632_v47 = vmul.f32 %v6780_v44, %v6654_v6  ;;  %v6888_v6 = vld [vmem:[#allocation12 + $0x20] sm:$0xff]   ;;  %v7919_v42 = vld [vmem:[#allocation65_spill] sm:$0xff] }
 0x43e   :  { %1700 = vmatprep.subr.bf16.mxu0 %v6859_v52  ;;  %1826 = vmatprep.subr.bf16.mxu1 %v6859_v52  ;;  %v1639_v21 = vmul.f32 %v5574_v49, %v6730_v27  ;;  %v5576_v53 = vpop.eup %5575  ;;  %5587 = vrcp.f32 %v1548_v41  ;;  %v1631_v43 = vmul.f32 %v6798_v14, %v6671_v1  ;;  %v1633_v62 = vmul.f32 %v6785_v38, %v6657_v0  ;;  %v7920_v10 = vld [vmem:[#allocation58_spill] sm:$0xff] }
 0x43f   :  { %1701 = vmatpush1.bf16.msra.mxu0 %v6846_v22  ;;  %1827 = vmatpush1.bf16.msra.mxu1 %v6846_v22  ;;  %v6872_v18 = vpop.permute.xlu1 %1384  ;;  %v5578_v51 = vpop.eup %5577  ;;  %v1552_v20 = vadd.f32 1.0, %v5576_v53  ;;  %v6882_v26 = vpack.c.bf16 %v1632_v47, %v1630_v37  ;;  %5589 = vrcp.f32 %v1549_v55  ;;  %v1096_v44 = vsub.f32 %v7918_v4, %v6788_v60 }
 0x440   :  { %v1166_v9 = vpop.permute.xlu0 %1165  ;;  %v6876_v27 = vpack.c.bf16 %v1641_v17, %v1639_v21  ;;  %v1553_v38 = vadd.f32 1.0, %v5578_v51  ;;  %v1097_v25 = vsub.f32 %v7919_v42, %v6788_v60  ;;  %v1090_v60 = vsub.f32 %v7920_v10, %v6768_v19  ;;  %v7921_v17 = vld [vmem:[#allocation59_spill] sm:$0xff] }
 0x441   :  { %v1204_v34 = vmul.f32 %v1166_v9, %v1092_v54  ;;  %v1205_v61 = vmul.f32 %v1166_v9, %v1093_v11  ;;  %5591 = vrcp.f32 %v1552_v20  ;;  %v1661_v37 = vpack.c.bf16 %v1633_v62, %v1631_v43 }
 0x442   :  { %v5580_v12 = vpop.eup %5579  ;;  %1702 = vmatprep.subr.bf16.mxu0 %v6876_v27  ;;  %1828 = vmatprep.subr.bf16.mxu1 %v6876_v27  ;;  %v1091_v53 = vsub.f32 %v7921_v17, %v6768_v19 }
 0x443   :  { %v1316_v1 = vmul.f32 %v6809_v50, %v1204_v34  ;;  %v1317_v14 = vmul.f32 %v6809_v50, %v1205_v61  ;;  %v5582_v0 = vpop.eup %5581  ;;  %v1546_v63 = vadd.f32 1.0, %v5580_v12  ;;  %1703 = vmatpush1.bf16.msra.mxu0 %v6870_v35  ;;  %1829 = vmatpush1.bf16.msra.mxu1 %v6870_v35  ;;  %v6898_v36 = vpop.permute.xlu1 %1282  ;;  %v7922_v12 = vld [vmem:[#allocation62_spill] sm:$0xff] }
 0x444   :  { %v1176_v54 = vpop.permute.xlu0 %1175  ;;  %v1547_v11 = vadd.f32 1.0, %v5582_v0  ;;  %1769 = vmatprep.subr.bf16.mxu0 %v1659_v24  ;;  %1895 = vmatprep.subr.bf16.mxu1 %v1659_v24  ;;  %v6928_v0 = vld [vmem:[#allocation12 + $0x28] sm:$0xff]  }
 0x445   :  { %v6901_v49 = vadd.f32 %v6825_v45, %v1316_v1  ;;  %v6904_v50 = vadd.f32 %v6825_v45, %v1317_v14  ;;  %v1208_v41 = vmul.f32 %v1176_v54, %v1096_v44  ;;  %5593 = vrcp.f32 %v1546_v63 }
 0x446   :  { %v1209_v55 = vmul.f32 %v1176_v54, %v1097_v25  ;;  %v5584_v21 = vpop.eup %5583  ;;  %5595 = vrcp.f32 %v1547_v11  ;;  %4640 = vmatmul.mubr.msk.bf16.vlgmr.msra.gmra.mrb[20].mxu0 %vm647_vm0, %v6888_v6  ;;  %4646 = vmatmul.mubr.msk.bf16.vlgmr.msra.gmra.mrb[20].mxu1 %vm647_vm0, %v6890_v48  ;;  %v1094_v44 = vsub.f32 %v7922_v12, %v6823_v33 }
 0x447   :  { %v4632_v45 = vmul.f32 -1.442695, %v6901_v49  ;;  %v1320_v24 = vmul.f32 %v6853_v5, %v1208_v41  ;;  %v5586_v9 = vpop.eup %5585  ;;  %5597 = vrcp.f32 %v1553_v38  ;;  %v1550_v47 = vadd.f32 1.0, %v5584_v21  ;;  %1770 = vmatpush1.bf16.msra.mxu0 %v1658_v40  ;;  %1896 = vmatpush1.bf16.msra.mxu1 %v1658_v40  ;;  %v1161_v20 = vpop.permute.xlu1 %1160  ;;  %v6930_v38 = vld [vmem:[#allocation12 + $0x18] sm:$0xff]  }
 0x448   :  { %v4633_v51 = vmul.f32 -1.442695, %v6904_v50  ;;  %v1321_v19 = vmul.f32 %v6853_v5, %v1209_v55  ;;  %v1400_v34 = vpop.permute.xlu0 %1399  ;;  %v1551_v61 = vadd.f32 1.0, %v5586_v9  ;;  %1771 = vmatprep.subr.bf16.mxu0 %v1661_v37  ;;  %1897 = vmatprep.subr.bf16.mxu1 %v1661_v37  ;;  %v1202_v43 = vmul.f32 %v1161_v20, %v1090_v60  ;;  %v7923_v5 = vld [vmem:[#allocation63_spill] sm:$0xff]  ;;  %v5588_v54 = vpop.eup %5587 }
 0x449   :  { %5599 = vpow2.f32 %v4632_v45  ;;  %v1203_v62 = vmul.f32 %v1161_v20, %v1091_v53  ;;  %1742 = vmatprep.mubr.bf16.mxu0 %v7911_v59  ;;  %1868 = vmatprep.mubr.bf16.mxu1 %v7911_v59  ;;  %v6922_v40 = vadd.f32 %v1400_v34, %v1320_v24  ;;  %v1095_v14 = vsub.f32 %v7923_v5, %v6823_v33  ;;  %v5590_v33 = vpop.eup %5589 }
 0x44a   :  { %5601 = vrcp.f32 %v1550_v47  ;;  %v6924_v1 = vadd.f32 %v1400_v34, %v1321_v19  ;;  %v1314_v63 = vmul.f32 %v6851_v23, %v1202_v43 }
 0x44b   :  { %5603 = vrcp.f32 %v1551_v61  ;;  %v1315_v25 = vmul.f32 %v6851_v23, %v1203_v62  ;;  %1772 = vmatpush1.bf16.msra.mxu0 %v6882_v26  ;;  %1898 = vmatpush1.bf16.msra.mxu1 %v6882_v26  ;;  %v4636_v11 = vmul.f32 -1.442695, %v6922_v40  ;;  %v1171_v60 = vpop.permute.xlu1 %1170  ;;  %v5592_v53 = vpop.eup %5591  ;;  %v1645_v62 = vmul.f32 %v5590_v33, %v6776_v31 }
 0x44c   :  { %5605 = vpow2.f32 %v4633_v51  ;;  %v4637_v41 = vmul.f32 -1.442695, %v6924_v1  ;;  %v6939_v37 = vadd.f32 %v6872_v18, %v1314_v63  ;;  %v1206_v21 = vmul.f32 %v1171_v60, %v1094_v44 }
 0x44d   :  { %v6942_v55 = vadd.f32 %v6872_v18, %v1315_v25  ;;  %v1207_v23 = vmul.f32 %v1171_v60, %v1095_v14  ;;  %5607 = vpow2.f32 %v4636_v11  ;;  %v6961_v14 = vld [vmem:[#allocation12] sm:$0xff]   ;;  %v1644_v63 = vmul.f32 %v5588_v54, %v6773_v13 }
 0x44e   :  { %4641 = vmatmul.mubr.msk.bf16.gmra.mrb[24].mxu0 %vm647_vm0, %v6928_v0  ;;  %4647 = vmatmul.mubr.msk.bf16.gmra.mrb[24].mxu1 %vm647_vm0, %v6930_v38  ;;  %v4630_v26 = vmul.f32 -1.442695, %v6939_v37  ;;  %v1318_v24 = vmul.f32 %v6898_v36, %v1206_v21  ;;  %5609 = vpow2.f32 %v4637_v41  ;;  %v1648_v54 = vmul.f32 %v5592_v53, %v6796_v57  ;;  %v6990_v53 = vld [vmem:[#allocation12 + $0x8] sm:$0xff]  }
 0x44f   :  { %v4631_v45 = vmul.f32 -1.442695, %v6942_v55  ;;  %v5594_v9 = vpop.eup %5593  ;;  %1801 = vmatprep.mubr.bf16.mxu0 %v7911_v59  ;;  %1927 = vmatprep.mubr.bf16.mxu1 %v7911_v59  ;;  %v1319_v18 = vmul.f32 %v6898_v36, %v1207_v23  ;;  %v1395_v47 = vpop.permute.xlu1 %1394 }
 0x450   :  { %v5596_v51 = vpop.eup %5595  ;;  %5611 = vpow2.f32 %v4630_v26  ;;  %v6954_v20 = vadd.f32 %v1395_v47, %v1318_v24  ;;  %v1642_v19 = vmul.f32 %v5594_v9, %v6813_v39 }
 0x451   :  { %v5598_v34 = vpop.eup %5597  ;;  %5613 = vpow2.f32 %v4631_v45  ;;  %v6957_v61 = vadd.f32 %v1395_v47, %v1319_v18  ;;  %v1643_v43 = vmul.f32 %v5596_v51, %v6816_v28 }
 0x452   :  { %v4634_v36 = vmul.f32 -1.442695, %v6954_v20  ;;  %v6968_v60 = vpack.c.bf16 %v1644_v63, %v1642_v19  ;;  %v1649_v13 = vmul.f32 %v5598_v34, %v6801_v46 }
 0x453   :  { %v5600_v44 = vpop.eup %5599  ;;  %v4635_v11 = vmul.f32 -1.442695, %v6957_v61  ;;  %v6966_v41 = vpack.c.bf16 %v1645_v62, %v1643_v43 }
 0x454   :  { %v5602_v25 = vpop.eup %5601  ;;  %5615 = vpow2.f32 %v4634_v36  ;;  %v1556_v33 = vadd.f32 1.0, %v5600_v44 }
 0x455   :  { %v5604_v39 = vpop.eup %5603  ;;  %v1646_v28 = vmul.f32 %v5602_v25, %v6828_v8  ;;  %1948 = vmatprep.subr.bf16.mxu1 %v6966_v41  ;;  %2009 = vmatprep.subr.bf16.mxu0 %v6966_v41  ;;  %5617 = vpow2.f32 %v4635_v11 }
 0x456   :  { %v5606_v21 = vpop.eup %5605  ;;  %v1647_v31 = vmul.f32 %v5604_v39, %v6834_v7  ;;  %4644 = vmatmul.mubr.msk.bf16.vlgmr.msra.gmra.mrb[20].mxu0 %vm647_vm0, %v6890_v48  ;;  %4650 = vmatmul.mubr.msk.bf16.vlgmr.msra.gmra.mrb[20].mxu1 %vm647_vm0, %v6961_v14  ;;  %5619 = vrcp.f32 %v1556_v33 }
 0x457   :  { %1811 = vmatprep.mubr.bf16.mxu0 %v7911_v59  ;;  %1937 = vmatprep.mubr.bf16.mxu1 %v7911_v59  ;;  %v5608_v23 = vpop.eup %5607  ;;  %v1557_v7 = vadd.f32 1.0, %v5606_v21  ;;  %v6986_v46 = vpack.c.bf16 %v1648_v54, %v1646_v28 }
 0x458   :  { %v6982_v8 = vpack.c.bf16 %v1649_v13, %v1647_v31  ;;  %1949 = vmatpush1.bf16.msra.mxu1 %v6968_v60  ;;  %2010 = vmatpush1.bf16.msra.mxu0 %v6968_v60  ;;  %v5610_v26 = vpop.eup %5609  ;;  %v1560_v9 = vadd.f32 1.0, %v5608_v23 }
 0x459   :  { %5621 = vrcp.f32 %v1557_v7  ;;  %v1561_v47 = vadd.f32 1.0, %v5610_v26 }
 0x45a   :  { %1950 = vmatprep.subr.bf16.mxu1 %v6982_v8  ;;  %2011 = vmatprep.subr.bf16.mxu0 %v6982_v8  ;;  %v5612_v57 = vpop.eup %5611 }
 0x45b   :  { %v5614_v45 = vpop.eup %5613  ;;  %v1554_v24 = vadd.f32 1.0, %v5612_v57 }
 0x45c   :  { %v1555_v18 = vadd.f32 1.0, %v5614_v45  ;;  %1951 = vmatpush1.bf16.msra.mxu1 %v6986_v46  ;;  %2012 = vmatpush1.bf16.msra.mxu0 %v6986_v46 }
 0x45d   :  { %5623 = vrcp.f32 %v1554_v24  ;;  %2062 = vmatprep.subr.bf16.mxu0 %v6859_v52 }
 0x45e   :  { %v5616_v51 = vpop.eup %5615  ;;  %5625 = vrcp.f32 %v1555_v18  ;;  %4645 = vmatmul.mubr.msk.bf16.gmra.mrb[24].mxu0 %vm647_vm0, %v6930_v38  ;;  %4651 = vmatmul.mubr.msk.bf16.gmra.mrb[24].mxu1 %vm647_vm0, %v6990_v53 }
 0x45f   :  { %5627 = vrcp.f32 %v1560_v9  ;;  %v1558_v19 = vadd.f32 1.0, %v5616_v51  ;;  %1980 = vmatprep.mubr.bf16.mxu1 %v7911_v59  ;;  %2041 = vmatprep.mubr.bf16.mxu0 %v7911_v59  ;;  %v5618_v34 = vpop.eup %5617 }
 0x460   :  { %5629 = vrcp.f32 %v1561_v47  ;;  %v1559_v43 = vadd.f32 1.0, %v5618_v34  ;;  %v5620_v52 = vpop.eup %5619 }
 0x461   :  { %5631 = vrcp.f32 %v1558_v19  ;;  %v1652_v28 = vmul.f32 %v5620_v52, %v6901_v49 }
 0x462   :  { %5633 = vrcp.f32 %v1559_v43 }
 0x463   :  { %v5622_v62 = vpop.eup %5621 }
 0x464   :  { %v1653_v39 = vmul.f32 %v5622_v62, %v6904_v50  ;;  %v7050_v50 = vpop.permute.xlu1 %2292 }
 0x466   :  { %4652 = vmatmul.mubr.msk.bf16.vlgmr.msra.gmra.mrb[20].mxu1 %vm647_vm0, %v6888_v6  ;;  %4654 = vmatmul.mubr.msk.bf16.vlgmr.msra.gmra.mrb[28].mxu0 %vm647_vm0, %v6890_v48 }
 0x467   :  { %v5624_v44 = vpop.eup %5623  ;;  %2063 = vmatpush1.bf16.msra.mxu0 %v6846_v22  ;;  %1990 = vmatprep.mubr.bf16.mxu1 %v7911_v59 }
 0x468   :  { %v5626_v36 = vpop.eup %5625  ;;  %2064 = vmatprep.subr.bf16.mxu0 %v6876_v27  ;;  %2051 = vmatprep.mubr.bf16.mxu0 %v7911_v59  ;;  %v1650_v63 = vmul.f32 %v5624_v44, %v6939_v37 }
 0x469   :  { %v5628_v25 = vpop.eup %5627  ;;  %v1651_v11 = vmul.f32 %v5626_v36, %v6942_v55 }
 0x46a   :  { %v5630_v21 = vpop.eup %5629  ;;  %v1670_v13 = vpack.c.bf16 %v1652_v28, %v1650_v63  ;;  %v1656_v33 = vmul.f32 %v5628_v25, %v6922_v40  ;;  %v7052_v40 = vpop.permute.xlu0 %2297 }
 0x46b   :  { %v5632_v31 = vpop.eup %5631  ;;  %2065 = vmatpush1.bf16.msra.mxu0 %v6870_v35  ;;  %v1671_v22 = vpack.c.bf16 %v1653_v39, %v1651_v11  ;;  %v1657_v37 = vmul.f32 %v5630_v21, %v6924_v1 }
 0x46c   :  { %v1654_v54 = vmul.f32 %v5632_v31, %v6954_v20  ;;  %v5634_v27 = vpop.eup %5633 }
 0x46d   :  { %2115 = vmatprep.subr.bf16.mxu0 %v1671_v22  ;;  %2176 = vmatprep.subr.bf16.mxu1 %v1671_v22  ;;  %v1655_v55 = vmul.f32 %v5634_v27, %v6957_v61 }
 0x46e   :  { %4653 = vmatmul.mubr.msk.bf16.gmra.mrb[24].mxu1 %vm647_vm0, %v6928_v0  ;;  %4655 = vmatmul.mubr.msk.bf16.gmra.mrb[32].mxu0 %vm647_vm0, %v6930_v38  ;;  %v1672_v35 = vpack.c.bf16 %v1656_v33, %v1654_v54  ;;  %v2326_v1 = vpop.permute.xlu0 %2325 }
 0x46f   :  { %2094 = vmatprep.mubr.bf16.mxu0 %v7911_v59  ;;  %2177 = vmatpush1.bf16.msra.mxu1 %v1670_v13  ;;  %v1673_v49 = vpack.c.bf16 %v1657_v37, %v1655_v55 }
 0x470   :  { %2208 = vmatprep.mubr.bf16.mxu1 %v7911_v59 }
 0x471   :  { %2178 = vmatprep.subr.bf16.mxu1 %v1673_v49 }
 0x472   :  { %v7066_v57 = vpop.permute.xlu0 %2307 }
 0x473   :  { %2179 = vmatpush1.bf16.msra.mxu1 %v1672_v35 }
 0x474   :  { %2229 = vmatprep.subr.bf16.mxu1 %v6966_v41 }
 0x476   :  { %4656 = vmatmul.mubr.msk.bf16.vlgmr.msra.gmra.mrb[28].mxu0 %vm647_vm0, %v6961_v14  ;;  %4660 = vmatmul.mubr.msk.bf16.vlgmr.msra.gmra.mrb[28].mxu1 %vm647_vm0, %v6890_v48  ;;  %v5771_v48 = vld [vmem:[#allocation6] sm:$0xff]  ;;  %v2336_v39 = vpop.permute.xlu0 %2335 }
 0x477   :  { %2116 = vmatpush1.bf16.msra.mxu0 %v1670_v13  ;;  %2104 = vmatprep.mubr.bf16.mxu0 %v7911_v59 }
 0x478   :  { %2117 = vmatprep.subr.bf16.mxu0 %v1673_v49  ;;  %2230 = vmatpush1.bf16.msra.mxu1 %v6968_v60 }
 0x479   :  { %2231 = vmatprep.subr.bf16.mxu1 %v6982_v8  ;;  %2218 = vmatprep.mubr.bf16.mxu1 %v7911_v59 }
 0x47b   :  { %2118 = vmatpush1.bf16.msra.mxu0 %v1672_v35 }
 0x47c   :  { %2232 = vmatpush1.bf16.msra.mxu1 %v6986_v46 }
 0x47e   :  { %4657 = vmatmul.mubr.msk.bf16.gmra.mrb[32].mxu0 %vm647_vm0, %v6990_v53  ;;  %4661 = vmatmul.mubr.msk.bf16.gmra.mrb[32].mxu1 %vm647_vm0, %v6930_v38 }
 0x47f   :  { %2147 = vmatprep.mubr.bf16.mxu0 %v7911_v59  ;;  %2261 = vmatprep.mubr.bf16.mxu1 %v7911_v59 }
 0x486   :  { %4658 = vmatmul.mubr.msk.bf16.vlgmr.msra.gmra.mrb[28].mxu0 %vm647_vm0, %v6888_v6  ;;  %4662 = vmatmul.mubr.msk.bf16.vlgmr.msra.gmra.mrb[28].mxu1 %vm647_vm0, %v6961_v14  ;;  %v2321_v6 = vpop.permute.xlu1 %2320 }
 0x487   :  { %2157 = vmatprep.mubr.bf16.mxu0 %v7911_v59  ;;  %2271 = vmatprep.mubr.bf16.mxu1 %v7911_v59 }
 0x48a   :  { %v7059_v23 = vpop.permute.xlu1 %2302 }
 0x48e   :  { %4659 = vmatmul.mubr.msk.bf16.gmra.mrb[32].mxu0 %vm647_vm0, %v6928_v0  ;;  %4663 = vmatmul.mubr.msk.bf16.gmra.mrb[32].mxu1 %vm647_vm0, %v6990_v53  ;;  %v2331_v52 = vpop.permute.xlu1 %2330 }
 0x48f   :  { %5089 = vmatprep.mubr.f32.mxu0 %v5771_v48  ;;  %5127 = vmatprep.mubr.f32.mxu1 %v5771_v48 }
 0x495   :  { %v2356_v55 = vpop.permute.xlu1 %2355 }
 0x529   :  { %v1803_v38 = vpop.f32.mrb[20].mxu0 }
 0x52a   :  { %v2310_v20 = vadd.f32 %v7050_v50, %v1803_v38  ;;  %v1805_v61 = vpop.f32.mrb[21].mxu0 }
 0x52b   :  { %v2311_v14 = vadd.f32 %v7050_v50, %v1805_v61  ;;  %v1807_v41 = vpop.f32.mrb[22].mxu0 }
 0x52c   :  { %v7056_v0 = vadd.f32 %v2321_v6, %v2310_v20  ;;  %v2312_v60 = vadd.f32 %v7052_v40, %v1807_v41  ;;  %v1809_v8 = vpop.f32.mrb[23].mxu0 }
 0x52d   :  { %v7061_v7 = vadd.f32 %v2321_v6, %v2311_v14  ;;  %v2313_v46 = vadd.f32 %v7052_v40, %v1809_v8  ;;  %v2360_v14 = vpop.permute.xlu0 %2359 }
 0x52e   :  { %v7064_v26 = vadd.f32 %v2326_v1, %v2312_v60  ;;  %v2522_v24 = vmul.f32 %v7056_v0, %v7056_v0 }
 0x52f   :  { %v7068_v53 = vadd.f32 %v2326_v1, %v2313_v46  ;;  %v2474_v45 = vadd.f32 %v7061_v7, %v7056_v0  ;;  %v2523_v9 = vmul.f32 %v7061_v7, %v7061_v7 }
 0x530   :  { %v2524_v34 = vmul.f32 %v7064_v26, %v7064_v26 }
 0x531   :  { %2475 = vadd.xlane.f32.xlu0 %v2474_v45  ;;  %v1813_v18 = vpop.f32.mrb[24].mxu0  ;;  %v2477_v47 = vadd.f32 %v7068_v53, %v7064_v26  ;;  %v2525_v43 = vmul.f32 %v7068_v53, %v7068_v53  ;;  %v2554_v36 = vadd.f32 %v2523_v9, %v2522_v24  ;;  %v2364_v24 = vpop.permute.xlu1 %2363 }
 0x532   :  { %v2314_v51 = vadd.f32 %v7059_v23, %v1813_v18  ;;  %v1815_v19 = vpop.f32.mrb[25].mxu0 }
 0x533   :  { %v2315_v62 = vadd.f32 %v7059_v23, %v1815_v19  ;;  %v1817_v44 = vpop.f32.mrb[26].mxu0  ;;  %2478 = vadd.xlane.f32.xlu1 %v2477_v47  ;;  %v2557_v22 = vadd.f32 %v2525_v43, %v2524_v34 }
 0x534   :  { %v7084_v63 = vadd.f32 %v2331_v52, %v2314_v51  ;;  %v2316_v25 = vadd.f32 %v7066_v57, %v1817_v44  ;;  %v1819_v11 = vpop.f32.mrb[27].mxu0 }
 0x535   :  { %v7087_v28 = vadd.f32 %v2331_v52, %v2315_v62  ;;  %v2317_v21 = vadd.f32 %v7066_v57, %v1819_v11  ;;  %2555 = vadd.xlane.f32.xlu0 %v2554_v36 }
 0x536   :  { %v7090_v31 = vadd.f32 %v2336_v39, %v2316_v25  ;;  %v2526_v27 = vmul.f32 %v7084_v63, %v7084_v63 }
 0x537   :  { %v7092_v13 = vadd.f32 %v2336_v39, %v2317_v21  ;;  %v2480_v54 = vadd.f32 %v7087_v28, %v7084_v63  ;;  %v2527_v33 = vmul.f32 %v7087_v28, %v7087_v28  ;;  %v2368_v39 = vpop.permute.xlu1 %2367 }
 0x538   :  { %v2528_v48 = vmul.f32 %v7090_v31, %v7090_v31 }
 0x539   :  { %v1982_v37 = vpop.f32.mrb[20].mxu1  ;;  %2558 = vadd.xlane.f32.xlu0 %v2557_v22  ;;  %2481 = vadd.xlane.f32.xlu1 %v2480_v54  ;;  %v2529_v6 = vmul.f32 %v7092_v13, %v7092_v13  ;;  %v2560_v20 = vadd.f32 %v2527_v33, %v2526_v27  ;;  %v2483_v61 = vadd.f32 %v7092_v13, %v7090_v31 }
 0x53a   :  { %v2346_v35 = vadd.f32 %v7050_v50, %v1982_v37  ;;  %v1984_v49 = vpop.f32.mrb[21].mxu1 }
 0x53b   :  { %v2347_v1 = vadd.f32 %v7050_v50, %v1984_v49  ;;  %v1986_v38 = vpop.f32.mrb[22].mxu1  ;;  %v2563_v18 = vadd.f32 %v2529_v6, %v2528_v48 }
 0x53c   :  { %v7108_v41 = vadd.f32 %v2356_v55, %v2346_v35  ;;  %v2348_v60 = vadd.f32 %v7052_v40, %v1986_v38  ;;  %v1988_v8 = vpop.f32.mrb[23].mxu1 }
 0x53d   :  { %v7111_v46 = vadd.f32 %v2356_v55, %v2347_v1  ;;  %v2349_v45 = vadd.f32 %v7052_v40, %v1988_v8  ;;  %2561 = vadd.xlane.f32.xlu1 %v2560_v20  ;;  %2484 = vadd.xlane.f32.xlu0 %v2483_v61  ;;  %v2392_v8 = vpop.permute.xlu1 %2391 }
 0x53e   :  { %v7114_v9 = vadd.f32 %v2360_v14, %v2348_v60  ;;  %v2530_v19 = vmul.f32 %v7108_v41, %v7108_v41 }
 0x53f   :  { %v7116_v47 = vadd.f32 %v2360_v14, %v2349_v45  ;;  %v2486_v51 = vadd.f32 %v7111_v46, %v7108_v41  ;;  %v2531_v34 = vmul.f32 %v7111_v46, %v7111_v46  ;;  %v2388_v45 = vpop.permute.xlu0 %2387 }
 0x540   :  { %v2532_v44 = vmul.f32 %v7114_v9, %v7114_v9 }
 0x541   :  { %v1992_v43 = vpop.f32.mrb[24].mxu1  ;;  %2487 = vadd.xlane.f32.xlu1 %v2486_v51  ;;  %2564 = vadd.xlane.f32.xlu0 %v2563_v18  ;;  %v2533_v36 = vmul.f32 %v7116_v47, %v7116_v47  ;;  %v2566_v21 = vadd.f32 %v2531_v34, %v2530_v19  ;;  %v2489_v22 = vadd.f32 %v7116_v47, %v7114_v9  ;;  %v2396_v18 = vpop.permute.xlu1 %2395 }
 0x542   :  { %v2350_v52 = vadd.f32 %v7059_v23, %v1992_v43  ;;  %v1994_v62 = vpop.f32.mrb[25].mxu1 }
 0x543   :  { %v2351_v25 = vadd.f32 %v7059_v23, %v1994_v62  ;;  %v1996_v11 = vpop.f32.mrb[26].mxu1  ;;  %v2569_v49 = vadd.f32 %v2533_v36, %v2532_v44  ;;  %v7154_v51 = vpop.permute.xlu0 %2399 }
 0x544   :  { %v7132_v54 = vadd.f32 %v2364_v24, %v2350_v52  ;;  %v2352_v27 = vadd.f32 %v7066_v57, %v1996_v11  ;;  %v1998_v33 = vpop.f32.mrb[27].mxu1 }
 0x545   :  { %v7135_v37 = vadd.f32 %v2364_v24, %v2351_v25  ;;  %v2353_v55 = vadd.f32 %v7066_v57, %v1998_v33  ;;  %2567 = vadd.xlane.f32.xlu1 %v2566_v21  ;;  %2490 = vadd.xlane.f32.xlu0 %v2489_v22  ;;  %v2420_v19 = vpop.permute.xlu1 %2419 }
 0x546   :  { %v7138_v35 = vadd.f32 %v2368_v39, %v2352_v27  ;;  %v2534_v1 = vmul.f32 %v7132_v54, %v7132_v54 }
 0x547   :  { %v7140_v48 = vadd.f32 %v2368_v39, %v2353_v55  ;;  %v2492_v6 = vadd.f32 %v7135_v37, %v7132_v54  ;;  %v2535_v38 = vmul.f32 %v7135_v37, %v7135_v37  ;;  %v2424_v34 = vpop.permute.xlu0 %2423 }
 0x548   :  { %v2536_v14 = vmul.f32 %v7138_v35, %v7138_v35 }
 0x549   :  { %2493 = vadd.xlane.f32.xlu1 %v2492_v6  ;;  %2570 = vadd.xlane.f32.xlu0 %v2569_v49  ;;  %v2572_v20 = vadd.f32 %v2535_v38, %v2534_v1  ;;  %v2495_v61 = vadd.f32 %v7140_v48, %v7138_v35  ;;  %v2537_v60 = vmul.f32 %v7140_v48, %v7140_v48 }
 0x54b   :  { %v2575_v24 = vadd.f32 %v2537_v60, %v2536_v14 }
 0x54d   :  { %2573 = vadd.xlane.f32.xlu1 %v2572_v20  ;;  %2496 = vadd.xlane.f32.xlu0 %v2495_v61 }
 0x551   :  { %2576 = vadd.xlane.f32.xlu0 %v2575_v24 }
 0x559   :  { %v2149_v43 = vpop.f32.mrb[28].mxu0  ;;  %v2263_v52 = vpop.f32.mrb[28].mxu1 }
 0x55a   :  { %v2378_v62 = vadd.f32 %v7050_v50, %v2149_v43  ;;  %v2151_v44 = vpop.f32.mrb[29].mxu0  ;;  %v2410_v36 = vadd.f32 %v7050_v50, %v2263_v52  ;;  %v2265_v25 = vpop.f32.mrb[29].mxu1 }
 0x55b   :  { %v2379_v11 = vadd.f32 %v7050_v50, %v2151_v44  ;;  %v2153_v39 = vpop.f32.mrb[30].mxu0  ;;  %v2411_v21 = vadd.f32 %v7050_v50, %v2265_v25  ;;  %v2267_v22 = vpop.f32.mrb[30].mxu1 }
 0x55c   :  { %v7160_v27 = vadd.f32 %v2388_v45, %v2378_v62  ;;  %v2380_v33 = vadd.f32 %v7052_v40, %v2153_v39  ;;  %v2155_v55 = vpop.f32.mrb[31].mxu0  ;;  %v7163_v49 = vadd.f32 %v2420_v19, %v2410_v36  ;;  %v2412_v6 = vadd.f32 %v7052_v40, %v2267_v22  ;;  %v2269_v1 = vpop.f32.mrb[31].mxu1 }
 0x55d   :  { %v7166_v38 = vadd.f32 %v2388_v45, %v2379_v11  ;;  %v2381_v20 = vadd.f32 %v7052_v40, %v2155_v55  ;;  %v7169_v61 = vadd.f32 %v2420_v19, %v2411_v21  ;;  %v2413_v14 = vadd.f32 %v7052_v40, %v2269_v1 }
 0x55e   :  { %7924 = vst [vmem:[#allocation66_spill] sm:$0xff] %v7163_v49  ;;  %v7172_v50 = vadd.f32 %v2392_v8, %v2380_v33  ;;  %v7178_v43 = vadd.f32 %v2424_v34, %v2412_v6  ;;  %v2546_v6 = vmul.f32 %v7163_v49, %v7163_v49 }
 0x55f   :  { %7925 = vst [vmem:[#allocation67_spill] sm:$0xff] %v7169_v61  ;;  %v7174_v60 = vadd.f32 %v2392_v8, %v2381_v20  ;;  %v2498_v24 = vadd.f32 %v7166_v38, %v7160_v27  ;;  %v7180_v52 = vadd.f32 %v2424_v34, %v2413_v14  ;;  %v2510_v40 = vadd.f32 %v7169_v61, %v7163_v49 }
 0x560   :  { %7926 = vst [vmem:[#allocation68_spill] sm:$0xff] %v7172_v50  ;;  %7928 = vst [vmem:[#allocation70_spill] sm:$0xff] %v7178_v43  ;;  %v2538_v34 = vmul.f32 %v7160_v27, %v7160_v27  ;;  %v2539_v39 = vmul.f32 %v7166_v38, %v7166_v38  ;;  %v2540_v33 = vmul.f32 %v7172_v50, %v7172_v50 }
 0x561   :  { %7927 = vst [vmem:[#allocation69_spill] sm:$0xff] %v7174_v60  ;;  %7929 = vst [vmem:[#allocation71_spill] sm:$0xff] %v7180_v52  ;;  %v2159_v62 = vpop.f32.mrb[32].mxu0  ;;  %2499 = vadd.xlane.f32.xlu1 %v2498_v24  ;;  %v2501_v45 = vadd.f32 %v7174_v60, %v7172_v50  ;;  %v2273_v19 = vpop.f32.mrb[32].mxu1  ;;  %v2513_v11 = vadd.f32 %v7180_v52, %v7178_v43  ;;  %v2541_v55 = vmul.f32 %v7174_v60, %v7174_v60 }
 0x562   :  { %v2161_v44 = vpop.f32.mrb[33].mxu0  ;;  %v2275_v36 = vpop.f32.mrb[33].mxu1  ;;  %v2382_v1 = vadd.f32 %v7059_v23, %v2159_v62  ;;  %v2578_v14 = vadd.f32 %v2539_v39, %v2538_v34  ;;  %v2547_v24 = vmul.f32 %v7169_v61, %v7169_v61  ;;  %v2549_v5 = vmul.f32 %v7180_v52, %v7180_v52 }
 0x563   :  { %v2163_v8 = vpop.f32.mrb[34].mxu0  ;;  %2502 = vadd.xlane.f32.xlu0 %v2501_v45  ;;  %v2277_v25 = vpop.f32.mrb[34].mxu1  ;;  %v2383_v20 = vadd.f32 %v7059_v23, %v2161_v44  ;;  %v2548_v45 = vmul.f32 %v7178_v43, %v7178_v43  ;;  %v2581_v4 = vadd.f32 %v2541_v55, %v2540_v33  ;;  %v2414_v33 = vadd.f32 %v7059_v23, %v2273_v19 }
 0x564   :  { %v2165_v21 = vpop.f32.mrb[35].mxu0  ;;  %v2279_v22 = vpop.f32.mrb[35].mxu1  ;;  %v7208_v62 = vadd.f32 %v2396_v18, %v2382_v1  ;;  %v2415_v55 = vadd.f32 %v7059_v23, %v2275_v36 }
 0x565   :  { %2511 = vadd.xlane.f32.xlu1 %v2510_v40  ;;  %v2384_v40 = vadd.f32 %v7066_v57, %v2163_v8  ;;  %v2385_v42 = vadd.f32 %v7066_v57, %v2165_v21  ;;  %v7210_v44 = vadd.f32 %v2396_v18, %v2383_v20  ;;  %v2593_v8 = vadd.f32 %v2549_v5, %v2548_v45  ;;  %v2428_v21 = vpop.permute.xlu1 %2427 }
 0x566   :  { %v7234_v36 = vadd.f32 %v2428_v21, %v2414_v33  ;;  %v7236_v1 = vadd.f32 %v2428_v21, %v2415_v55 }
 0x567   :  { %2514 = vadd.xlane.f32.xlu0 %v2513_v11  ;;  %v2590_v11 = vadd.f32 %v2547_v24, %v2546_v6  ;;  %v7213_v34 = vadd.f32 %v7154_v51, %v2384_v40  ;;  %v7216_v39 = vadd.f32 %v7154_v51, %v2385_v42  ;;  %v2504_v18 = vadd.f32 %v7210_v44, %v7208_v62 }
 0x568   :  { %v2543_v6 = vmul.f32 %v7210_v44, %v7210_v44  ;;  %v2416_v42 = vadd.f32 %v7066_v57, %v2277_v25  ;;  %v2417_v51 = vadd.f32 %v7066_v57, %v2279_v22  ;;  %7932 = vst [vmem:[#allocation74_spill] sm:$0xff] %v7234_v36  ;;  %7933 = vst [vmem:[#allocation75_spill] sm:$0xff] %v7236_v1 }
 0x569   :  { %2579 = vadd.xlane.f32.xlu1 %v2578_v14  ;;  %7930 = vst [vmem:[#allocation72_spill] sm:$0xff] %v7213_v34  ;;  %7931 = vst [vmem:[#allocation73_spill] sm:$0xff] %v7216_v39  ;;  %v2507_v5 = vadd.f32 %v7216_v39, %v7213_v34  ;;  %v2544_v23 = vmul.f32 %v7213_v34, %v7213_v34  ;;  %v2545_v19 = vmul.f32 %v7216_v39, %v7216_v39  ;;  %v2432_v14 = vpop.permute.xlu1 %2431 }
 0x56a   :  { %v7238_v25 = vadd.f32 %v2432_v14, %v2416_v42  ;;  %v7240_v57 = vadd.f32 %v2432_v14, %v2417_v51  ;;  %v2516_v24 = vadd.f32 %v7236_v1, %v7234_v36  ;;  %v2550_v45 = vmul.f32 %v7234_v36, %v7234_v36 }
 0x56b   :  { %2582 = vadd.xlane.f32.xlu0 %v2581_v4  ;;  %v2542_v4 = vmul.f32 %v7208_v62, %v7208_v62  ;;  %v2587_v22 = vadd.f32 %v2545_v19, %v2544_v23  ;;  %v2551_v40 = vmul.f32 %v7236_v1, %v7236_v1 }
 0x56c   :  { %7934 = vst [vmem:[#allocation76_spill] sm:$0xff] %v7238_v25  ;;  %7935 = vst [vmem:[#allocation77_spill] sm:$0xff] %v7240_v57  ;;  %v2553_v21 = vmul.f32 %v7240_v57, %v7240_v57 }
 0x56d   :  { %2591 = vadd.xlane.f32.xlu1 %v2590_v11  ;;  %v2584_v20 = vadd.f32 %v2543_v6, %v2542_v4  ;;  %v2519_v11 = vadd.f32 %v7240_v57, %v7238_v25  ;;  %v2596_v33 = vadd.f32 %v2551_v40, %v2550_v45 }
 0x56f   :  { %2594 = vadd.xlane.f32.xlu0 %v2593_v8  ;;  %v2552_v8 = vmul.f32 %v7238_v25, %v7238_v25 }
 0x571   :  { %2505 = vadd.xlane.f32.xlu1 %v2504_v18  ;;  %v2599_v55 = vadd.f32 %v2553_v21, %v2552_v8 }
 0x573   :  { %2508 = vadd.xlane.f32.xlu0 %v2507_v5 }
 0x575   :  { %2585 = vadd.xlane.f32.xlu1 %v2584_v20 }
 0x577   :  { %2588 = vadd.xlane.f32.xlu0 %v2587_v22 }
 0x579   :  { %2517 = vadd.xlane.f32.xlu1 %v2516_v24 }
 0x57b   :  { %2520 = vadd.xlane.f32.xlu0 %v2519_v11 }
 0x57d   :  { %2597 = vadd.xlane.f32.xlu1 %v2596_v33 }
 0x57f   :  { %2600 = vadd.xlane.f32.xlu0 %v2599_v55 }
 0x5be   :  { %v2476_v18 = vpop.xlane.xlu0 %2475 }
 0x5c0   :  { %v2479_v4 = vpop.xlane.xlu1 %2478 }
 0x5c1   :  { %v5277_v6 = vpack.c.bf16 %v2479_v4, %v2476_v18 }
 0x5c2   :  { %v2556_v42 = vpop.xlane.xlu0 %2555 }
 0x5c3   :  { %5278 = vmatprep.subr.bf16.mxu0 %v5277_v6 }
 0x5c4   :  { %5280 = vmatpush3.bf16.msra.mxu0 %v5277_v6 }
 0x5c6   :  { %v2482_v51 = vpop.xlane.xlu1 %2481  ;;  %v2559_v5 = vpop.xlane.xlu0 %2558 }
 0x5c7   :  { %v5309_v23 = vpack.c.bf16 %v2559_v5, %v2556_v42 }
 0x5c9   :  { %5310 = vmatprep.subr.bf16.mxu1 %v5309_v23 }
 0x5ca   :  { %v2562_v19 = vpop.xlane.xlu1 %2561  ;;  %5312 = vmatpush3.bf16.msra.mxu1 %v5309_v23  ;;  %v2485_v20 = vpop.xlane.xlu0 %2484 }
 0x5cb   :  { %v5281_v14 = vpack.c.bf16 %v2485_v20, %v2482_v51 }
 0x5cd   :  { %5282 = vmatprep.subr.bf16.mxu0 %v5281_v14 }
 0x5ce   :  { %v2488_v22 = vpop.xlane.xlu1 %2487  ;;  %5284 = vmatpush3.bf16.msra.mxu0 %v5281_v14  ;;  %v2565_v24 = vpop.xlane.xlu0 %2564 }
 0x5cf   :  { %v5313_v45 = vpack.c.bf16 %v2565_v24, %v2562_v19 }
 0x5d1   :  { %5314 = vmatprep.subr.bf16.mxu1 %v5313_v45 }
 0x5d2   :  { %v2568_v40 = vpop.xlane.xlu1 %2567  ;;  %5316 = vmatpush3.bf16.msra.mxu1 %v5313_v45  ;;  %v2491_v11 = vpop.xlane.xlu0 %2490 }
 0x5d3   :  { %v5285_v8 = vpack.c.bf16 %v2491_v11, %v2488_v22 }
 0x5d5   :  { %5286 = vmatprep.subr.bf16.mxu0 %v5285_v8 }
 0x5d6   :  { %5288 = vmatpush3.bf16.msra.mxu0 %v5285_v8  ;;  %v2571_v21 = vpop.xlane.xlu0 %2570  ;;  %v2494_v55 = vpop.xlane.xlu1 %2493 }
 0x5d7   :  { %v5317_v33 = vpack.c.bf16 %v2571_v21, %v2568_v40 }
 0x5d9   :  { %5318 = vmatprep.subr.bf16.mxu1 %v5317_v33 }
 0x5da   :  { %5320 = vmatpush3.bf16.msra.mxu1 %v5317_v33  ;;  %v2497_v18 = vpop.xlane.xlu0 %2496  ;;  %v2574_v6 = vpop.xlane.xlu1 %2573 }
 0x5db   :  { %v5289_v4 = vpack.c.bf16 %v2497_v18, %v2494_v55 }
 0x5dd   :  { %5290 = vmatprep.subr.bf16.mxu0 %v5289_v4 }
 0x5de   :  { %5292 = vmatpush3.bf16.msra.mxu0 %v5289_v4  ;;  %v2577_v42 = vpop.xlane.xlu0 %2576 }
 0x5df   :  { %v5321_v51 = vpack.c.bf16 %v2577_v42, %v2574_v6 }
 0x5e1   :  { %5322 = vmatprep.subr.bf16.mxu1 %v5321_v51 }
 0x5e2   :  { %5324 = vmatpush3.bf16.msra.mxu1 %v5321_v51 }
 0x5ee   :  { %v2500_v5 = vpop.xlane.xlu1 %2499 }
 0x5f0   :  { %v2503_v23 = vpop.xlane.xlu0 %2502 }
 0x5f1   :  { %v5293_v19 = vpack.c.bf16 %v2503_v23, %v2500_v5 }
 0x5f2   :  { %v2512_v20 = vpop.xlane.xlu1 %2511 }
 0x5f3   :  { %5294 = vmatprep.subr.bf16.mxu0 %v5293_v19 }
 0x5f4   :  { %5296 = vmatpush3.bf16.msra.mxu0 %v5293_v19  ;;  %v2515_v14 = vpop.xlane.xlu0 %2514 }
 0x5f5   :  { %v5301_v18 = vpack.c.bf16 %v2515_v14, %v2512_v20  ;;  %v5772_v20 = vld [vmem:[#allocation6 + $0x8] sm:$0xff]  ;;  %v5773_v14 = vld [vmem:[#allocation6 + $0x10] sm:$0xff] }
 0x5f6   :  { %v2580_v22 = vpop.xlane.xlu1 %2579 }
 0x5f8   :  { %v2583_v24 = vpop.xlane.xlu0 %2582 }
 0x5f9   :  { %v5325_v45 = vpack.c.bf16 %v2583_v24, %v2580_v22 }
 0x5fa   :  { %v2592_v40 = vpop.xlane.xlu1 %2591 }
 0x5fb   :  { %5326 = vmatprep.subr.bf16.mxu1 %v5325_v45 }
 0x5fc   :  { %5328 = vmatpush3.bf16.msra.mxu1 %v5325_v45  ;;  %v2595_v11 = vpop.xlane.xlu0 %2594  ;;  %v5774_v45 = vld [vmem:[#allocation6 + $0x18] sm:$0xff] }
 0x5fd   :  { %v5333_v51 = vpack.c.bf16 %v2595_v11, %v2592_v40  ;;  %v5775_v40 = vld [vmem:[#allocation8] sm:$0xff]  ;;  %v2446_v11 = vld [vmem:[#allocation17 + $0x20] sm:$0xff] }
 0x5fe   :  { %v2506_v8 = vpop.xlane.xlu1 %2505  ;;  %3336 = vperm.xlu1 %5485, %v2446_v11  }
 0x600   :  { %v2509_v21 = vpop.xlane.xlu0 %2508 }
 0x601   :  { %v5297_v33 = vpack.c.bf16 %v2509_v21, %v2506_v8  ;;  %v2447_v8 = vld [vmem:[#allocation17 + $0x28] sm:$0xff]  ;;  %v2462_v21 = vld [vmem:[#allocation18 + $0x20] sm:$0xff] }
 0x602   :  { %v2586_v55 = vpop.xlane.xlu1 %2585  ;;  %3448 = vperm.xlu0 %5486, %v2462_v21   ;;  %3341 = vperm.xlu1 %5485, %v2447_v8  }
 0x603   :  { %5298 = vmatprep.subr.bf16.mxu0 %v5297_v33 }
 0x604   :  { %5300 = vmatpush3.bf16.msra.mxu0 %v5297_v33  ;;  %v2589_v4 = vpop.xlane.xlu0 %2588  ;;  %v2448_v33 = vld [vmem:[#allocation17 + $0x30] sm:$0xff] }
 0x605   :  { %v5329_v6 = vpack.c.bf16 %v2589_v4, %v2586_v55  ;;  %5302 = vmatprep.subr.bf16.mxu0 %v5301_v18  ;;  %v2463_v55 = vld [vmem:[#allocation18 + $0x28] sm:$0xff]  ;;  %v2449_v4 = vld [vmem:[#allocation17 + $0x38] sm:$0xff] }
 0x606   :  { %v2518_v42 = vpop.xlane.xlu1 %2517  ;;  %3346 = vperm.xlu0 %5486, %v2448_v33   ;;  %3453 = vperm.xlu1 %5485, %v2463_v55  }
 0x607   :  { %5330 = vmatprep.subr.bf16.mxu1 %v5329_v6 }
 0x608   :  { %5304 = vmatpush3.bf16.msra.mxu0 %v5301_v18  ;;  %5332 = vmatpush3.bf16.msra.mxu1 %v5329_v6  ;;  %v2521_v5 = vpop.xlane.xlu0 %2520  ;;  %v2464_v18 = vld [vmem:[#allocation18 + $0x30] sm:$0xff]  ;;  %v2442_v6 = vld [vmem:[#allocation17] sm:$0xff] }
 0x609   :  { %v5305_v23 = vpack.c.bf16 %v2521_v5, %v2518_v42  ;;  %5334 = vmatprep.subr.bf16.mxu1 %v5333_v51  ;;  %v2465_v42 = vld [vmem:[#allocation18 + $0x38] sm:$0xff]  ;;  %v2443_v5 = vld [vmem:[#allocation17 + $0x8] sm:$0xff] }
 0x60a   :  { %v2598_v19 = vpop.xlane.xlu1 %2597  ;;  %3458 = vperm.xlu0 %5486, %v2464_v18   ;;  %3351 = vperm.xlu1 %5485, %v2449_v4  }
 0x60b   :  { %5306 = vmatprep.subr.bf16.mxu0 %v5305_v23 }
 0x60c   :  { %5308 = vmatpush3.bf16.msra.mxu0 %v5305_v23  ;;  %5336 = vmatpush3.bf16.msra.mxu1 %v5333_v51  ;;  %v2601_v22 = vpop.xlane.xlu0 %2600  ;;  %v2458_v51 = vld [vmem:[#allocation18] sm:$0xff]  ;;  %v2444_v23 = vld [vmem:[#allocation17 + $0x10] sm:$0xff] }
 0x60d   :  { %v5337_v24 = vpack.c.bf16 %v2601_v22, %v2598_v19  ;;  %v2459_v19 = vld [vmem:[#allocation18 + $0x8] sm:$0xff]  ;;  %v2460_v22 = vld [vmem:[#allocation18 + $0x10] sm:$0xff] }
 0x60e   :  { %3316 = vperm.xlu0 %5486, %v2442_v6   ;;  %3463 = vperm.xlu1 %5485, %v2465_v42  }
 0x60f   :  { %5090 = vmatmul.mubr.f32.vlgmr.msra.gmra.mrb[36].mxu0 %v5772_v20  ;;  %5338 = vmatprep.subr.bf16.mxu1 %v5337_v24 }
 0x610   :  { %5340 = vmatpush3.bf16.msra.mxu1 %v5337_v24  ;;  %5092 = vmatprep.mubr.f32.mxu0 %v5773_v14  ;;  %v2445_v24 = vld [vmem:[#allocation17 + $0x18] sm:$0xff] }
 0x612   :  { %3428 = vperm.xlu0 %5486, %v2458_v51   ;;  %3321 = vperm.xlu1 %5485, %v2443_v5  }
 0x613   :  { %5093 = vmatmul.mubr.f32.gmra.mrb[38].mxu0 %v5774_v45  ;;  %5128 = vmatmul.mubr.f32.vlgmr.msra.gmra.mrb[36].mxu1 %v5772_v20  ;;  %v2450_v20 = vld [vmem:[#allocation17 + $0x40] sm:$0xff] }
 0x614   :  { %5130 = vmatprep.mubr.f32.mxu1 %v5773_v14  ;;  %5141 = vmatprep.mubr.msk.f32.mxu0 %vm647_vm0, %v5775_v40  ;;  %v2461_v14 = vld [vmem:[#allocation18 + $0x18] sm:$0xff] }
 0x616   :  { %3326 = vperm.xlu0 %5486, %v2444_v23   ;;  %3433 = vperm.xlu1 %5485, %v2459_v19  }
 0x617   :  { %5131 = vmatmul.mubr.f32.gmra.mrb[38].mxu1 %v5774_v45  ;;  %v2466_v45 = vld [vmem:[#allocation18 + $0x40] sm:$0xff] }
 0x618   :  { %5173 = vmatprep.mubr.msk.f32.mxu1 %vm647_vm0, %v5775_v40  ;;  %v2451_v40 = vld [vmem:[#allocation17 + $0x48] sm:$0xff] }
 0x61a   :  { %3438 = vperm.xlu0 %5486, %v2460_v22   ;;  %3331 = vperm.xlu1 %5485, %v2445_v24  }
 0x61e   :  { %3356 = vperm.xlu0 %5486, %v2450_v20   ;;  %3443 = vperm.xlu1 %5485, %v2461_v14  }
 0x622   :  { %3468 = vperm.xlu0 %5486, %v2466_v45   ;;  %3361 = vperm.xlu1 %5485, %v2451_v40  }
 0x6e2   :  { %v5091_v11 = vpop.f32.mrb[36].mxu0 }
 0x6e3   :  { %v2773_v8 = vmul.f32 0.0009765625, %v5091_v11  ;;  %v2668_v21 = vpop.f32.mrb[37].mxu0 }
 0x6e4   :  { %v2772_v33 = vmul.f32 0.0009765625, %v2668_v21 }
 0x6e5   :  { %v2781_v6 = vmul.f32 %v2773_v8, %v2773_v8 }
 0x6e6   :  { %v5341_v55 = vpack.c.bf16 %v2773_v8, %v2772_v33  ;;  %v5094_v18 = vpop.f32.mrb[38].mxu0  ;;  %v5129_v4 = vpop.f32.mrb[36].mxu1  ;;  %v2780_v19 = vmul.f32 %v2772_v33, %v2772_v33 }
 0x6e7   :  { %v2775_v42 = vmul.f32 0.0009765625, %v5094_v18  ;;  %v2777_v51 = vmul.f32 0.0009765625, %v5129_v4  ;;  %v2678_v5 = vpop.f32.mrb[39].mxu0  ;;  %v2753_v23 = vpop.f32.mrb[37].mxu1 }
 0x6e8   :  { %v2774_v22 = vmul.f32 0.0009765625, %v2678_v5  ;;  %v2776_v24 = vmul.f32 0.0009765625, %v2753_v23  ;;  %5342 = vmatprep.subr.bf16.mxu0 %v5341_v55 }
 0x6e9   :  { %v2785_v20 = vsub.f32 %v2777_v51, %v2781_v6  ;;  %5344 = vmatpush3.bf16.msra.mxu0 %v5341_v55  ;;  %v2783_v11 = vmul.f32 %v2775_v42, %v2775_v42  ;;  %v5776_v6 = vld [vmem:[#allocation8 + $0x8] sm:$0xff]  ;;  %v5777_v51 = vld [vmem:[#allocation8 + $0x10] sm:$0xff] }
 0x6ea   :  { %v5345_v14 = vpack.c.bf16 %v2775_v42, %v2774_v22  ;;  %v2784_v45 = vsub.f32 %v2776_v24, %v2780_v19  ;;  %v5132_v40 = vpop.f32.mrb[38].mxu1  ;;  %v2782_v56 = vmul.f32 %v2774_v22, %v2774_v22  ;;  %v5781_v22 = vld [vmem:[#allocation8 + $0x30] sm:$0xff] }
 0x6eb   :  { %v2789_v12 = vmax.f32 %v2785_v20, 0.0  ;;  %v2779_v21 = vmul.f32 0.0009765625, %v5132_v40  ;;  %v2763_v58 = vpop.f32.mrb[39].mxu1  ;;  %v5783_v40 = vld [vmem:[#allocation8 + $0x40] sm:$0xff] }
 0x6ec   :  { %v2788_v17 = vmax.f32 %v2784_v45, 0.0  ;;  %v2778_v8 = vmul.f32 0.0009765625, %v2763_v58  ;;  %5346 = vmatprep.subr.bf16.mxu0 %v5345_v14  ;;  %v5778_v58 = vld [vmem:[#allocation8 + $0x18] sm:$0xff] }
 0x6ed   :  { %v2793_v18 = vadd.f32 1e-06, %v2789_v12  ;;  %v2787_v4 = vsub.f32 %v2779_v21, %v2783_v11  ;;  %5348 = vmatpush3.bf16.msra.mxu0 %v5345_v14  ;;  %v5779_v12 = vld [vmem:[#allocation8 + $0x20] sm:$0xff]  ;;  %v5782_v14 = vld [vmem:[#allocation8 + $0x38] sm:$0xff] }
 0x6ee   :  { %v2792_v33 = vadd.f32 1e-06, %v2788_v17  ;;  %v2786_v5 = vsub.f32 %v2778_v8, %v2782_v56  ;;  %v5780_v56 = vld [vmem:[#allocation8 + $0x28] sm:$0xff] }
 0x6ef   :  { %5635 = vrsqrt.f32 %v2793_v18  ;;  %v2791_v23 = vmax.f32 %v2787_v4, 0.0  ;;  %v5784_v8 = vld [vmem:[#allocation8 + $0x48] sm:$0xff]  ;;  %v5785_v18 = vld [vmem:[#allocation8 + $0x50] sm:$0xff]  ;;  %v5786_v4 = vld [vmem:[#allocation8 + $0x58] sm:$0xff] }
 0x6f0   :  { %5637 = vrsqrt.f32 %v2792_v33  ;;  %v2790_v55 = vmax.f32 %v2786_v5, 0.0  ;;  %5142 = vmatmul.mubr.msk.f32.vlgmr.msra.gmra.mrb[40].mxu0 %vm647_vm0, %v5776_v6  ;;  %v5787_v33 = vld [vmem:[#allocation8 + $0x60] sm:$0xff]  ;;  %v5788_v5 = vld [vmem:[#allocation8 + $0x68] sm:$0xff] }
 0x6f1   :  { %v2795_v42 = vadd.f32 1e-06, %v2791_v23  ;;  %5144 = vmatprep.mubr.msk.f32.mxu0 %vm647_vm0, %v5777_v51  ;;  %v5789_v23 = vld [vmem:[#allocation8 + $0x70] sm:$0xff] }
 0x6f2   :  { %v2794_v19 = vadd.f32 1e-06, %v2790_v55  ;;  %v5790_v55 = vld [vmem:[#allocation8 + $0x78] sm:$0xff] }
 0x6f3   :  { %5639 = vrsqrt.f32 %v2795_v42 }
 0x6f4   :  { %5641 = vrsqrt.f32 %v2794_v19  ;;  %5145 = vmatmul.mubr.msk.f32.gmra.mrb[42].mxu0 %vm647_vm0, %v5778_v58 }
 0x6f5   :  { %5147 = vmatprep.mubr.msk.f32.mxu0 %vm647_vm0, %v5779_v12 }
 0x6f8   :  { %5148 = vmatmul.mubr.msk.f32.gmra.mrb[44].mxu0 %vm647_vm0, %v5780_v56 }
 0x6f9   :  { %v5636_v17 = vpop.eup %5635  ;;  %5150 = vmatprep.mubr.msk.f32.mxu0 %vm647_vm0, %v5781_v22 }
 0x6fa   :  { %v5638_v24 = vpop.eup %5637 }
 0x6fb   :  { %v5349_v20 = vpack.c.bf16 %v5636_v17, %v5638_v24 }
 0x6fc   :  { %5151 = vmatmul.mubr.msk.f32.gmra.mrb[46].mxu0 %vm647_vm0, %v5782_v14 }
 0x6fd   :  { %v5640_v45 = vpop.eup %5639  ;;  %5350 = vmatprep.subr.bf16.mxu1 %v5349_v20  ;;  %5153 = vmatprep.mubr.msk.f32.mxu0 %vm647_vm0, %v5783_v40 }
 0x6fe   :  { %v5642_v11 = vpop.eup %5641  ;;  %5352 = vmatpush3.bf16.msra.mxu1 %v5349_v20 }
 0x6ff   :  { %v5353_v21 = vpack.c.bf16 %v5640_v45, %v5642_v11 }
 0x700   :  { %5154 = vmatmul.mubr.msk.f32.gmra.mrb[48].mxu0 %vm647_vm0, %v5784_v8 }
 0x701   :  { %5354 = vmatprep.subr.bf16.mxu1 %v5353_v21  ;;  %5156 = vmatprep.mubr.msk.f32.mxu0 %vm647_vm0, %v5785_v18 }
 0x702   :  { %5356 = vmatpush3.bf16.msra.mxu1 %v5353_v21 }
 0x704   :  { %5157 = vmatmul.mubr.msk.f32.gmra.mrb[50].mxu0 %vm647_vm0, %v5786_v4 }
 0x705   :  { %5174 = vmatmul.mubr.msk.f32.vlgmr.msra.gmra.mrb[40].mxu1 %vm647_vm0, %v5776_v6  ;;  %5159 = vmatprep.mubr.msk.f32.mxu0 %vm647_vm0, %v5787_v33 }
 0x706   :  { %5176 = vmatprep.mubr.msk.f32.mxu1 %vm647_vm0, %v5777_v51 }
 0x708   :  { %5160 = vmatmul.mubr.msk.f32.gmra.mrb[52].mxu0 %vm647_vm0, %v5788_v5 }
 0x709   :  { %5177 = vmatmul.mubr.msk.f32.gmra.mrb[42].mxu1 %vm647_vm0, %v5778_v58  ;;  %5162 = vmatprep.mubr.msk.f32.mxu0 %vm647_vm0, %v5789_v23 }
 0x70a   :  { %5179 = vmatprep.mubr.msk.f32.mxu1 %vm647_vm0, %v5779_v12 }
 0x70c   :  { %5163 = vmatmul.mubr.msk.f32.gmra.mrb[54].mxu0 %vm647_vm0, %v5790_v55 }
 0x70d   :  { %5180 = vmatmul.mubr.msk.f32.gmra.mrb[44].mxu1 %vm647_vm0, %v5780_v56  ;;  %3836 = vmatprep.mubr.bf16.mxu0 %v7911_v59 }
 0x70e   :  { %5182 = vmatprep.mubr.msk.f32.mxu1 %vm647_vm0, %v5781_v22 }
 0x711   :  { %5183 = vmatmul.mubr.msk.f32.gmra.mrb[46].mxu1 %vm647_vm0, %v5782_v14 }
 0x712   :  { %5185 = vmatprep.mubr.msk.f32.mxu1 %vm647_vm0, %v5783_v40 }
 0x715   :  { %5186 = vmatmul.mubr.msk.f32.gmra.mrb[48].mxu1 %vm647_vm0, %v5784_v8 }
 0x716   :  { %5188 = vmatprep.mubr.msk.f32.mxu1 %vm647_vm0, %v5785_v18 }
 0x719   :  { %5189 = vmatmul.mubr.msk.f32.gmra.mrb[50].mxu1 %vm647_vm0, %v5786_v4 }
 0x71a   :  { %5191 = vmatprep.mubr.msk.f32.mxu1 %vm647_vm0, %v5787_v33 }
 0x71d   :  { %5192 = vmatmul.mubr.msk.f32.gmra.mrb[52].mxu1 %vm647_vm0, %v5788_v5 }
 0x71e   :  { %5194 = vmatprep.mubr.msk.f32.mxu1 %vm647_vm0, %v5789_v23 }
 0x721   :  { %5195 = vmatmul.mubr.msk.f32.gmra.mrb[54].mxu1 %vm647_vm0, %v5790_v55  ;;  %v2452_v55 = vld [vmem:[#allocation17 + $0x50] sm:$0xff] }
 0x722   :  { %3962 = vmatprep.mubr.bf16.mxu1 %v7911_v59 }
 0x7c3   :  { %v5143_v6 = vpop.f32.mrb[40].mxu0 }
 0x7c4   :  { %3097 = vperm.xlu1 %5485, %v5143_v6   ;;  %v2866_v42 = vpop.f32.mrb[41].mxu0 }
 0x7c5   :  { %3092 = vperm.xlu0 %5486, %v2866_v42  }
 0x7c7   :  { %v5146_v51 = vpop.f32.mrb[42].mxu0 }
 0x7c8   :  { %3107 = vperm.xlu1 %5485, %v5146_v51   ;;  %v2876_v19 = vpop.f32.mrb[43].mxu0  ;;  %v2468_v51 = vld [vmem:[#allocation18 + $0x50] sm:$0xff] }
 0x7c9   :  { %3102 = vperm.xlu0 %5486, %v2876_v19  }
 0x7cb   :  { %v5149_v58 = vpop.f32.mrb[44].mxu0 }
 0x7cc   :  { %v2886_v12 = vpop.f32.mrb[45].mxu0 }
 0x7cd   :  { %3117 = vperm.xlu0 %5486, %v5149_v58   ;;  %3112 = vperm.xlu1 %5485, %v2886_v12  }
 0x7cf   :  { %v5152_v56 = vpop.f32.mrb[46].mxu0 }
 0x7d0   :  { %v2896_v17 = vpop.f32.mrb[47].mxu0 }
 0x7d1   :  { %3127 = vperm.xlu1 %5485, %v5152_v56  }
 0x7d3   :  { %v5155_v22 = vpop.f32.mrb[48].mxu0 }
 0x7d4   :  { %v2906_v24 = vpop.f32.mrb[49].mxu0 }
 0x7d5   :  { %3122 = vperm.xlu1 %5485, %v2896_v17   ;;  %3132 = vperm.xlu0 %5486, %v2906_v24   ;;  %v2454_v24 = vld [vmem:[#allocation17 + $0x60] sm:$0xff] }
 0x7d7   :  { %v5158_v20 = vpop.f32.mrb[50].mxu0 }
 0x7d8   :  { %v5175_v14 = vpop.f32.mrb[40].mxu1  ;;  %v2916_v45 = vpop.f32.mrb[51].mxu0 }
 0x7d9   :  { %3137 = vperm.xlu1 %5485, %v5155_v22   ;;  %v3011_v40 = vpop.f32.mrb[41].mxu1 }
 0x7da   :  { %3204 = vperm.xlu0 %5486, %v3011_v40   ;;  %v2453_v40 = vld [vmem:[#allocation17 + $0x58] sm:$0xff] }
 0x7db   :  { %v5161_v11 = vpop.f32.mrb[52].mxu0 }
 0x7dc   :  { %v5178_v21 = vpop.f32.mrb[42].mxu1  ;;  %v2926_v8 = vpop.f32.mrb[53].mxu0 }
 0x7dd   :  { %3209 = vperm.xlu1 %5485, %v5175_v14   ;;  %v3021_v18 = vpop.f32.mrb[43].mxu1 }
 0x7de   :  { %3142 = vperm.xlu0 %5486, %v2916_v45   ;;  %v2467_v45 = vld [vmem:[#allocation18 + $0x48] sm:$0xff] }
 0x7df   :  { %v5164_v4 = vpop.f32.mrb[54].mxu0 }
 0x7e0   :  { %v5181_v33 = vpop.f32.mrb[44].mxu1  ;;  %v2936_v5 = vpop.f32.mrb[55].mxu0 }
 0x7e1   :  { %3147 = vperm.xlu1 %5485, %v5158_v20   ;;  %v3031_v23 = vpop.f32.mrb[45].mxu1 }
 0x7e2   :  { %3214 = vperm.xlu0 %5486, %v3021_v18   ;;  %v2470_v18 = vld [vmem:[#allocation18 + $0x60] sm:$0xff] }
 0x7e4   :  { %v5184_v6 = vpop.f32.mrb[46].mxu1 }
 0x7e5   :  { %3219 = vperm.xlu1 %5485, %v5178_v21   ;;  %v3041_v42 = vpop.f32.mrb[47].mxu1  ;;  %v2469_v21 = vld [vmem:[#allocation18 + $0x58] sm:$0xff] }
 0x7e6   :  { %3366 = vperm.xlu0 %5486, %v2452_v55   ;;  %v2472_v55 = vld [vmem:[#allocation18 + $0x70] sm:$0xff] }
 0x7e8   :  { %v5187_v19 = vpop.f32.mrb[48].mxu1 }
 0x7e9   :  { %3229 = vperm.xlu1 %5485, %v5181_v33   ;;  %v3051_v58 = vpop.f32.mrb[49].mxu1  ;;  %v7288_v33 = vpop.permute.xlu1 %3336 }
 0x7ea   :  { %3478 = vperm.xlu0 %5486, %v2468_v51  }
 0x7ec   :  { %v5190_v12 = vpop.f32.mrb[50].mxu1 }
 0x7ed   :  { %3224 = vperm.xlu1 %5485, %v3031_v23   ;;  %v3061_v56 = vpop.f32.mrb[51].mxu1  ;;  %v7290_v23 = vpop.permute.xlu1 %3341 }
 0x7ee   :  { %3152 = vperm.xlu0 %5486, %v2926_v8   ;;  %v2456_v8 = vld [vmem:[#allocation17 + $0x70] sm:$0xff] }
 0x7f0   :  { %v5193_v17 = vpop.f32.mrb[52].mxu1 }
 0x7f1   :  { %3239 = vperm.xlu1 %5485, %v5184_v6   ;;  %v3071_v22 = vpop.f32.mrb[53].mxu1  ;;  %v7292_v6 = vpop.permute.xlu0 %3448 }
 0x7f2   :  { %3162 = vperm.xlu0 %5486, %v2936_v5   ;;  %v2455_v5 = vld [vmem:[#allocation17 + $0x68] sm:$0xff]  ;;  %v7294_v51 = vpop.permute.xlu1 %3453 }
 0x7f4   :  { %v5196_v20 = vpop.f32.mrb[54].mxu1 }
 0x7f5   :  { %3234 = vperm.xlu1 %5485, %v3041_v42   ;;  %v3081_v14 = vpop.f32.mrb[55].mxu1  ;;  %v4386_v42 = vld [vmem:[#allocation21] sm:$0xff] }
 0x7f6   :  { %3376 = vperm.xlu0 %5486, %v2454_v24  }
 0x7f9   :  { %3473 = vperm.xlu1 %5485, %v2467_v45   ;;  %v2473_v45 = vld [vmem:[#allocation18 + $0x78] sm:$0xff] }
 0x7fa   :  { %3244 = vperm.xlu0 %5486, %v3051_v58   ;;  %v7296_v58 = vpop.permute.xlu0 %3346 }
 0x7fd   :  { %3371 = vperm.xlu1 %5485, %v2453_v40  }
 0x7fe   :  { %3254 = vperm.xlu0 %5486, %v3061_v56   ;;  %v2457_v56 = vld [vmem:[#allocation17 + $0x78] sm:$0xff]  ;;  %v7300_v24 = vpop.permute.xlu0 %3458 }
 0x801   :  { %3483 = vperm.xlu1 %5485, %v2469_v21   ;;  %v4387_v21 = vld [vmem:[#allocation21 + $0x8] sm:$0xff] }
 0x802   :  { %3488 = vperm.xlu0 %5486, %v2470_v18  }
 0x805   :  { %3157 = vperm.xlu1 %5485, %v5161_v11   ;;  %v2471_v11 = vld [vmem:[#allocation18 + $0x68] sm:$0xff] }
 0x806   :  { %3386 = vperm.xlu0 %5486, %v2456_v8   ;;  %v4389_v8 = vld [vmem:[#allocation21 + $0x18] sm:$0xff] }
 0x809   :  { %3167 = vperm.xlu1 %5485, %v5164_v4   ;;  %v4388_v4 = vld [vmem:[#allocation21 + $0x10] sm:$0xff] }
 0x80a   :  { %3264 = vperm.xlu0 %5486, %v3071_v22   ;;  %v7298_v22 = vpop.permute.xlu1 %3351 }
 0x80d   :  { %3381 = vperm.xlu1 %5485, %v2455_v5  }
 0x80e   :  { %3274 = vperm.xlu0 %5486, %v3081_v14   ;;  %v7302_v14 = vpop.permute.xlu1 %3463 }
 0x811   :  { %3249 = vperm.xlu1 %5485, %v5187_v19   ;;  %v3317_v19 = vpop.permute.xlu0 %3316 }
 0x812   :  { %3498 = vperm.xlu0 %5486, %v2472_v55  }
 0x815   :  { %3259 = vperm.xlu1 %5485, %v5190_v12   ;;  %v3322_v12 = vpop.permute.xlu1 %3321  ;;  %v3429_v40 = vpop.permute.xlu0 %3428 }
 0x816   :  { %4394 = vperm.xlu0 %5486, %v4386_v42  }
 0x819   :  { %3493 = vperm.xlu1 %5485, %v2471_v11   ;;  %v3434_v18 = vpop.permute.xlu1 %3433  ;;  %v3327_v5 = vpop.permute.xlu0 %3326 }
 0x81a   :  { %4404 = vperm.xlu0 %5486, %v4388_v4  }
 0x81d   :  { %3391 = vperm.xlu1 %5485, %v2457_v56   ;;  %v7304_v55 = vpop.permute.xlu1 %3331  ;;  %v7306_v42 = vpop.permute.xlu0 %3438 }
 0x821   :  { %3269 = vperm.xlu1 %5485, %v5193_v17   ;;  %v7308_v11 = vpop.permute.xlu1 %3443  ;;  %v7310_v4 = vpop.permute.xlu0 %3356 }
 0x825   :  { %3279 = vperm.xlu1 %5485, %v5196_v20   ;;  %v7312_v17 = vpop.permute.xlu1 %3361  ;;  %v7314_v20 = vpop.permute.xlu0 %3468 }
 0x826   :  { %7936 = vst [vmem:[#allocation78_spill] sm:$0xff] %v7312_v17 }
 0x829   :  { %3503 = vperm.xlu1 %5485, %v2473_v45  }
 0x82d   :  { %4399 = vperm.xlu1 %5485, %v4387_v21  }
 0x831   :  { %4409 = vperm.xlu1 %5485, %v4389_v8  }
 0x843   :  { %v3098_v56 = vpop.permute.xlu1 %3097 }
 0x844   :  { %v3093_v45 = vpop.permute.xlu0 %3092  ;;  %v3172_v25 = vsub.f32 %v7064_v26, %v3098_v56  ;;  %v3173_v1 = vsub.f32 %v7068_v53, %v3098_v56 }
 0x845   :  { %v3170_v15 = vsub.f32 %v7056_v0, %v3093_v45  ;;  %v3171_v59 = vsub.f32 %v7061_v7, %v3093_v45 }
 0x847   :  { %v3108_v10 = vpop.permute.xlu1 %3107 }
 0x848   :  { %v3103_v32 = vpop.permute.xlu0 %3102 }
 0x849   :  { %v3174_v0 = vsub.f32 %v7084_v63, %v3103_v32 }
 0x84c   :  { %v7316_v21 = vpop.permute.xlu1 %3112  ;;  %v3118_v30 = vpop.permute.xlu0 %3117 }
 0x84d   :  { %v3180_v63 = vsub.f32 %v7114_v9, %v3118_v30 }
 0x850   :  { %v7318_v8 = vpop.permute.xlu1 %3127 }
 0x854   :  { %v7320_v29 = vpop.permute.xlu1 %3122  ;;  %v7322_v16 = vpop.permute.xlu0 %3132 }
 0x858   :  { %v7325_v3 = vpop.permute.xlu1 %3137 }
 0x859   :  { %v3205_v2 = vpop.permute.xlu0 %3204 }
 0x85a   :  { %v3282_v57 = vmul.f32 %v3205_v2, %v3170_v15  ;;  %v3283_v43 = vmul.f32 %v3205_v2, %v3171_v59  ;;  %v3175_v2 = vsub.f32 %v7087_v28, %v3103_v32 }
 0x85c   :  { %v3210_v52 = vpop.permute.xlu1 %3209  ;;  %v3394_v36 = vmul.f32 %v3317_v19, %v3282_v57  ;;  %v3395_v49 = vmul.f32 %v3317_v19, %v3283_v43  ;;  %v3181_v43 = vsub.f32 %v7116_v47, %v3118_v30  ;;  %v3178_v30 = vsub.f32 %v7108_v41, %v7316_v21 }
 0x85d   :  { %v7329_v17 = vpop.permute.xlu0 %3142  ;;  %v3284_v61 = vmul.f32 %v3210_v52, %v3172_v25  ;;  %v3285_v39 = vmul.f32 %v3210_v52, %v3173_v1  ;;  %v3176_v52 = vsub.f32 %v7090_v31, %v3108_v10 }
 0x85e   :  { %v7335_v15 = vadd.f32 %v3429_v40, %v3394_v36  ;;  %v7338_v59 = vadd.f32 %v3429_v40, %v3395_v49 }
 0x85f   :  { %v3396_v7 = vmul.f32 %v3322_v12, %v3284_v61  ;;  %v3397_v26 = vmul.f32 %v3322_v12, %v3285_v39  ;;  %v3177_v39 = vsub.f32 %v7092_v13, %v3108_v10 }
 0x860   :  { %v7332_v34 = vpop.permute.xlu1 %3147  ;;  %v4696_v1 = vmul.f32 -1.442695, %v7335_v15  ;;  %v4697_v28 = vmul.f32 -1.442695, %v7338_v59 }
 0x861   :  { %v3215_v60 = vpop.permute.xlu0 %3214  ;;  %v7344_v25 = vadd.f32 %v3434_v18, %v3396_v7  ;;  %v7349_v57 = vadd.f32 %v3434_v18, %v3397_v26  ;;  %v3184_v18 = vsub.f32 %v7138_v35, %v7318_v8 }
 0x862   :  { %v3286_v45 = vmul.f32 %v3215_v60, %v3174_v0  ;;  %v3287_v61 = vmul.f32 %v3215_v60, %v3175_v2  ;;  %5643 = vpow2.f32 %v4696_v1  ;;  %v3179_v60 = vsub.f32 %v7111_v46, %v7316_v21 }
 0x863   :  { %v4698_v40 = vmul.f32 -1.442695, %v7344_v25  ;;  %v4699_v56 = vmul.f32 -1.442695, %v7349_v57  ;;  %5645 = vpow2.f32 %v4697_v28  ;;  %v3185_v1 = vsub.f32 %v7140_v48, %v7318_v8 }
 0x864   :  { %v3220_v50 = vpop.permute.xlu1 %3219  ;;  %v3398_v36 = vmul.f32 %v3327_v5, %v3286_v45  ;;  %v3399_v47 = vmul.f32 %v3327_v5, %v3287_v61 }
 0x865   :  { %v7340_v53 = vpop.permute.xlu0 %3366  ;;  %v3288_v49 = vmul.f32 %v3220_v50, %v3176_v52  ;;  %v3289_v9 = vmul.f32 %v3220_v50, %v3177_v39  ;;  %5647 = vpow2.f32 %v4698_v40 }
 0x866   :  { %v7358_v10 = vadd.f32 %v7306_v42, %v3398_v36  ;;  %v7378_v26 = vadd.f32 %v7306_v42, %v3399_v47  ;;  %5649 = vpow2.f32 %v4699_v56 }
 0x867   :  { %v3400_v41 = vmul.f32 %v7304_v55, %v3288_v49  ;;  %v3401_v46 = vmul.f32 %v7304_v55, %v3289_v9 }
 0x868   :  { %v3230_v32 = vpop.permute.xlu1 %3229 }
 0x869   :  { %v3292_v19 = vmul.f32 %v3230_v32, %v3180_v63  ;;  %v3293_v31 = vmul.f32 %v3230_v32, %v3181_v43  ;;  %v7352_v12 = vpop.permute.xlu0 %3478  ;;  %v3182_v43 = vsub.f32 %v7132_v54, %v7320_v29  ;;  %v7390_v42 = vadd.f32 %v7308_v11, %v3400_v41 }
 0x86a   :  { %v7398_v48 = vadd.f32 %v7308_v11, %v3401_v46  ;;  %v3183_v54 = vsub.f32 %v7135_v37, %v7320_v29  ;;  %v4701_v32 = vmul.f32 -1.442695, %v7378_v26 }
 0x86b   :  { %v3404_v13 = vmul.f32 %v7290_v23, %v3292_v19  ;;  %v3405_v0 = vmul.f32 %v7290_v23, %v3293_v31  ;;  %v4700_v23 = vmul.f32 -1.442695, %v7358_v10  ;;  %v4702_v40 = vmul.f32 -1.442695, %v7390_v42 }
 0x86c   :  { %v3225_v50 = vpop.permute.xlu1 %3224  ;;  %v5644_v49 = vpop.eup %5643  ;;  %v4703_v37 = vmul.f32 -1.442695, %v7398_v48 }
 0x86d   :  { %v7369_v5 = vadd.f32 %v7294_v51, %v3404_v13  ;;  %v3290_v7 = vmul.f32 %v3225_v50, %v3178_v30  ;;  %v7371_v45 = vpop.permute.xlu0 %3152  ;;  %v7375_v21 = vadd.f32 %v7294_v51, %v3405_v0  ;;  %v3291_v35 = vmul.f32 %v3225_v50, %v3179_v60  ;;  %v5646_v60 = vpop.eup %5645 }
 0x86e   :  { %v3186_v50 = vsub.f32 %v7160_v27, %v7322_v16 }
 0x86f   :  { %v4706_v2 = vmul.f32 -1.442695, %v7369_v5  ;;  %v3402_v52 = vmul.f32 %v7288_v33, %v3290_v7  ;;  %v4707_v63 = vmul.f32 -1.442695, %v7375_v21  ;;  %v3403_v55 = vmul.f32 %v7288_v33, %v3291_v35  ;;  %v5648_v0 = vpop.eup %5647 }
 0x870   :  { %v3240_v51 = vpop.permute.xlu1 %3239 }
 0x871   :  { %5651 = vpow2.f32 %v4706_v2  ;;  %v7393_v61 = vadd.f32 %v7292_v6, %v3402_v52  ;;  %v7395_v36 = vpop.permute.xlu0 %3162  ;;  %v7401_v8 = vadd.f32 %v7292_v6, %v3403_v55  ;;  %v3296_v33 = vmul.f32 %v3240_v51, %v3184_v18  ;;  %v5650_v2 = vpop.eup %5649 }
 0x872   :  { %v3297_v39 = vmul.f32 %v3240_v51, %v3185_v1  ;;  %5653 = vpow2.f32 %v4700_v23  ;;  %v3634_v18 = vadd.f32 1.0, %v5644_v49 }
 0x873   :  { %v4704_v28 = vmul.f32 -1.442695, %v7393_v61  ;;  %5655 = vpow2.f32 %v4707_v63  ;;  %v4705_v19 = vmul.f32 -1.442695, %v7401_v8  ;;  %v3408_v11 = vmul.f32 %v7298_v22, %v3296_v33 }
 0x874   :  { %v3409_v31 = vmul.f32 %v7298_v22, %v3297_v39  ;;  %v3235_v6 = vpop.permute.xlu1 %3234 }
 0x875   :  { %5657 = vpow2.f32 %v4704_v28  ;;  %v3294_v9 = vmul.f32 %v3235_v6, %v3182_v43  ;;  %v3295_v30 = vmul.f32 %v3235_v6, %v3183_v54  ;;  %v7411_v29 = vpop.permute.xlu0 %3376  ;;  %v7415_v47 = vadd.f32 %v7302_v14, %v3408_v11 }
 0x876   :  { %5659 = vpow2.f32 %v4705_v19  ;;  %v7418_v13 = vadd.f32 %v7302_v14, %v3409_v31  ;;  %v3187_v43 = vsub.f32 %v7166_v38, %v7322_v16  ;;  %v3190_v54 = vsub.f32 %v7208_v62, %v7329_v17 }
 0x877   :  { %5661 = vpow2.f32 %v4701_v32  ;;  %v3406_v22 = vmul.f32 %v7296_v58, %v3294_v9  ;;  %v3407_v56 = vmul.f32 %v7296_v58, %v3295_v30  ;;  %v4710_v41 = vmul.f32 -1.442695, %v7415_v47 }
 0x878   :  { %v7425_v7 = vpop.permute.xlu1 %3473  ;;  %5663 = vpow2.f32 %v4702_v40  ;;  %v4711_v46 = vmul.f32 -1.442695, %v7418_v13  ;;  %v3191_v28 = vsub.f32 %v7210_v44, %v7329_v17  ;;  %v3635_v31 = vadd.f32 1.0, %v5646_v60 }
 0x879   :  { %v7429_v14 = vadd.f32 %v7300_v24, %v3406_v22  ;;  %v7432_v35 = vadd.f32 %v7300_v24, %v3407_v56  ;;  %v3245_v23 = vpop.permute.xlu0 %3244  ;;  %5665 = vpow2.f32 %v4703_v37  ;;  %v3636_v6 = vadd.f32 1.0, %v5648_v0 }
 0x87a   :  { %v3298_v58 = vmul.f32 %v3245_v23, %v3186_v50  ;;  %5667 = vrcp.f32 %v3634_v18  ;;  %v3299_v19 = vmul.f32 %v3245_v23, %v3187_v43  ;;  %v3637_v44 = vadd.f32 1.0, %v5650_v2 }
 0x87b   :  { %v5652_v52 = vpop.eup %5651  ;;  %v4708_v27 = vmul.f32 -1.442695, %v7429_v14  ;;  %5669 = vpow2.f32 %v4710_v41  ;;  %v4709_v63 = vmul.f32 -1.442695, %v7432_v35 }
 0x87c   :  { %v3644_v1 = vadd.f32 1.0, %v5652_v52  ;;  %v7436_v55 = vpop.permute.xlu1 %3371  ;;  %v5654_v51 = vpop.eup %5653  ;;  %5671 = vpow2.f32 %v4711_v46  ;;  %v3410_v24 = vmul.f32 %v7310_v4, %v3298_v58  ;;  %v3411_v60 = vmul.f32 %v7310_v4, %v3299_v19 }
 0x87d   :  { %v3255_v33 = vpop.permute.xlu0 %3254  ;;  %v5656_v39 = vpop.eup %5655  ;;  %v3638_v22 = vadd.f32 1.0, %v5654_v51 }
 0x87e   :  { %5673 = vrcp.f32 %v3644_v1  ;;  %v3645_v49 = vadd.f32 1.0, %v5656_v39  ;;  %v7448_v62 = vadd.f32 %v7314_v20, %v3410_v24  ;;  %v3302_v30 = vmul.f32 %v3255_v33, %v3190_v54 }
 0x87f   :  { %v5658_v32 = vpop.eup %5657  ;;  %5675 = vpow2.f32 %v4708_v27  ;;  %v3303_v17 = vmul.f32 %v3255_v33, %v3191_v28  ;;  %v7463_v1 = vadd.f32 %v7314_v20, %v3411_v60  ;;  %v7937_v20 = vld [vmem:[#allocation68_spill] sm:$0xff] }
 0x880   :  { %v5660_v11 = vpop.eup %5659  ;;  %v3642_v16 = vadd.f32 1.0, %v5658_v32  ;;  %5677 = vpow2.f32 %v4709_v63  ;;  %v7445_v38 = vpop.permute.xlu1 %3483  ;;  %v4712_v46 = vmul.f32 -1.442695, %v7448_v62  ;;  %v3414_v23 = vmul.f32 %v7340_v53, %v3302_v30  ;;  %v7939_v30 = vld [vmem:[#allocation66_spill] sm:$0xff] }
 0x881   :  { %v5662_v40 = vpop.eup %5661  ;;  %5679 = vrcp.f32 %v3645_v49  ;;  %v3643_v9 = vadd.f32 1.0, %v5660_v11  ;;  %v7450_v37 = vpop.permute.xlu0 %3488  ;;  %v3415_v52 = vmul.f32 %v7340_v53, %v3303_v17  ;;  %v3188_v49 = vsub.f32 %v7937_v20, %v7325_v3 }
 0x882   :  { %5681 = vrcp.f32 %v3642_v16  ;;  %v5664_v18 = vpop.eup %5663  ;;  %v3639_v0 = vadd.f32 1.0, %v5662_v40  ;;  %v7468_v33 = vadd.f32 %v7352_v12, %v3414_v23  ;;  %v4713_v11 = vmul.f32 -1.442695, %v7463_v1  ;;  %v7938_v16 = vld [vmem:[#allocation69_spill] sm:$0xff] }
 0x883   :  { %5683 = vrcp.f32 %v3643_v9  ;;  %v5666_v56 = vpop.eup %5665  ;;  %v7471_v32 = vadd.f32 %v7352_v12, %v3415_v52  ;;  %v3189_v40 = vsub.f32 %v7938_v16, %v7325_v3  ;;  %v3640_v9 = vadd.f32 1.0, %v5664_v18  ;;  %v7941_v52 = vld [vmem:[#allocation73_spill] sm:$0xff] }
 0x884   :  { %5685 = vrcp.f32 %v3635_v31  ;;  %v7453_v50 = vpop.permute.xlu1 %3157  ;;  %v7455_v41 = vpop.eup %5667  ;;  %v3641_v54 = vadd.f32 1.0, %v5666_v56 }
 0x885   :  { %5687 = vrcp.f32 %v3636_v6  ;;  %v7459_v2 = vpop.permute.xlu0 %3386  ;;  %v5670_v58 = vpop.eup %5669  ;;  %v4717_v18 = vmul.f32 -1.442695, %v7471_v32 }
 0x886   :  { %5689 = vrcp.f32 %v3637_v44  ;;  %v5672_v27 = vpop.eup %5671  ;;  %v3648_v4 = vadd.f32 1.0, %v5670_v58  ;;  %v3194_v44 = vsub.f32 %v7939_v30, %v7371_v45  ;;  %v7507_v30 = vmul.f32 %v7455_v41, %v7335_v15 }
 0x887   :  { %5691 = vrcp.f32 %v3638_v22  ;;  %v3649_v51 = vadd.f32 1.0, %v5672_v27  ;;  %v7940_v22 = vld [vmem:[#allocation72_spill] sm:$0xff]  ;;  %v3193_v27 = vsub.f32 %v7941_v52, %v7332_v34 }
 0x888   :  { %v5674_v63 = vpop.eup %5673  ;;  %5693 = vrcp.f32 %v3639_v0  ;;  %v7465_v43 = vpop.permute.xlu1 %3167  ;;  %v3192_v60 = vsub.f32 %v7940_v22, %v7332_v34  ;;  %v4716_v0 = vmul.f32 -1.442695, %v7468_v33 }
 0x889   :  { %v5676_v24 = vpop.eup %5675  ;;  %5695 = vpow2.f32 %v4712_v46  ;;  %v3265_v31 = vpop.permute.xlu0 %3264  ;;  %v3740_v3 = vmul.f32 %v5674_v63, %v7369_v5 }
 0x88a   :  { %v5678_v39 = vpop.eup %5677  ;;  %5697 = vrcp.f32 %v3648_v4  ;;  %v3646_v53 = vadd.f32 1.0, %v5676_v24  ;;  %v3306_v23 = vmul.f32 %v3265_v31, %v3194_v44  ;;  %v7942_v24 = vld [vmem:[#allocation67_spill] sm:$0xff]  ;;  %v7945_v44 = vld [vmem:[#allocation78_spill] sm:$0xff] }
 0x88b   :  { %v5680_v28 = vpop.eup %5679  ;;  %5699 = vrcp.f32 %v3649_v51  ;;  %v3647_v19 = vadd.f32 1.0, %v5678_v39  ;;  %v3195_v39 = vsub.f32 %v7942_v24, %v7371_v45 }
 0x88c   :  { %v5682_v6 = vpop.eup %5681  ;;  %5701 = vrcp.f32 %v3646_v53  ;;  %v7480_v12 = vpop.permute.xlu1 %3381  ;;  %v3741_v51 = vmul.f32 %v5680_v28, %v7375_v21  ;;  %v7944_v21 = vld [vmem:[#allocation75_spill] sm:$0xff]  ;;  %v3418_v45 = vmul.f32 %v7411_v29, %v3306_v23 }
 0x88d   :  { %v5684_v17 = vpop.eup %5683  ;;  %v3738_v56 = vmul.f32 %v5682_v6, %v7393_v61  ;;  %5703 = vrcp.f32 %v3647_v19  ;;  %v3199_v28 = vsub.f32 %v7944_v21, %v7395_v36  ;;  %v3307_v6 = vmul.f32 %v3265_v31, %v3195_v39  ;;  %v3275_v16 = vpop.permute.xlu0 %3274 }
 0x88e   :  { %v5686_v46 = vpop.eup %5685  ;;  %5705 = vrcp.f32 %v3641_v54  ;;  %v3739_v4 = vmul.f32 %v5684_v17, %v7401_v8  ;;  %v7943_v54 = vld [vmem:[#allocation74_spill] sm:$0xff] }
 0x88f   :  { %v5688_v58 = vpop.eup %5687  ;;  %5707 = vpow2.f32 %v4713_v11  ;;  %v3198_v5 = vsub.f32 %v7943_v54, %v7395_v36  ;;  %v7496_v53 = vpack.c.bf16 %v3740_v3, %v3738_v56  ;;  %v3731_v22 = vmul.f32 %v5686_v46, %v7338_v59 }
 0x890   :  { %v5690_v61 = vpop.eup %5689  ;;  %5709 = vrcp.f32 %v3640_v9  ;;  %v3250_v63 = vpop.permute.xlu1 %3249  ;;  %v7498_v11 = vpack.c.bf16 %v3741_v51, %v3739_v4  ;;  %v3732_v36 = vmul.f32 %v5688_v58, %v7344_v25  ;;  %v3419_v25 = vmul.f32 %v7411_v29, %v3307_v6 }
 0x891   :  { %v5692_v20 = vpop.eup %5691  ;;  %5711 = vpow2.f32 %v4716_v0  ;;  %v3300_v19 = vmul.f32 %v3250_v63, %v3188_v49  ;;  %v3301_v34 = vmul.f32 %v3250_v63, %v3189_v40  ;;  %v3733_v15 = vmul.f32 %v5690_v61, %v7349_v57 }
 0x892   :  { %v7500_v8 = vpop.eup %5693  ;;  %5713 = vpow2.f32 %v4717_v18  ;;  %3804 = vmatprep.subr.bf16.mxu0 %v7498_v11  ;;  %3930 = vmatprep.subr.bf16.mxu1 %v7498_v11  ;;  %v3310_v56 = vmul.f32 %v3275_v16, %v3198_v5  ;;  %v7526_v58 = vadd.f32 %v7450_v37, %v3418_v45  ;;  %v3311_v52 = vmul.f32 %v3275_v16, %v3199_v28  ;;  %v7553_v45 = vld [vmem:[#allocation20 + $0x20] sm:$0xff]  }
 0x893   :  { %v5696_v9 = vpop.eup %5695  ;;  %v3412_v49 = vmul.f32 %v7945_v44, %v3300_v19  ;;  %v3413_v40 = vmul.f32 %v7945_v44, %v3301_v34  ;;  %3805 = vmatpush1.bf16.msra.mxu0 %v7496_v53  ;;  %3931 = vmatpush1.bf16.msra.mxu1 %v7496_v53  ;;  %v3499_v19 = vpop.permute.xlu0 %3498  ;;  %v7551_v28 = vadd.f32 %v7450_v37, %v3419_v25  ;;  %v7563_v37 = vld [vmem:[#allocation20 + $0x10] sm:$0xff]  }
 0x894   :  { %v5698_v17 = vpop.eup %5697  ;;  %v3260_v31 = vpop.permute.xlu1 %3259  ;;  %v3650_v5 = vadd.f32 1.0, %v5696_v9  ;;  %v3763_v6 = vpack.c.bf16 %v3733_v15, %v3731_v22  ;;  %v3735_v22 = vmul.f32 %v7500_v8, %v7378_v26 }
 0x895   :  { %v5700_v41 = vpop.eup %5699  ;;  %v7519_v0 = vadd.f32 %v7425_v7, %v3412_v49  ;;  %v7522_v3 = vadd.f32 %v7425_v7, %v3413_v40  ;;  %v3304_v18 = vmul.f32 %v3260_v31, %v3192_v60  ;;  %v3305_v4 = vmul.f32 %v3260_v31, %v3193_v27 }
 0x896   :  { %v5702_v23 = vpop.eup %5701  ;;  %v3744_v57 = vmul.f32 %v5698_v17, %v7415_v47  ;;  %v3745_v27 = vmul.f32 %v5700_v41, %v7418_v13  ;;  %v3422_v47 = vmul.f32 %v7459_v2, %v3310_v56  ;;  %v3734_v13 = vmul.f32 %v5692_v20, %v7358_v10  ;;  %v7946_v41 = vld [vmem:[#allocation70_spill] sm:$0xff] }
 0x897   :  { %v5704_v59 = vpop.eup %5703  ;;  %v3742_v46 = vmul.f32 %v5702_v23, %v7429_v14  ;;  %v4714_v51 = vmul.f32 -1.442695, %v7519_v0  ;;  %v4715_v61 = vmul.f32 -1.442695, %v7522_v3  ;;  %v3416_v60 = vmul.f32 %v7436_v55, %v3304_v18  ;;  %v7947_v18 = vld [vmem:[#allocation71_spill] sm:$0xff] }
 0x898   :  { %v5706_v7 = vpop.eup %5705  ;;  %v3417_v24 = vmul.f32 %v7436_v55, %v3305_v4  ;;  %v7534_v29 = vpop.permute.xlu1 %3493  ;;  %v3743_v39 = vmul.f32 %v5704_v59, %v7432_v35  ;;  %v3423_v49 = vmul.f32 %v7459_v2, %v3311_v52  ;;  %v4720_v20 = vmul.f32 -1.442695, %v7526_v58  ;;  %v7948_v59 = vld [vmem:[#allocation76_spill] sm:$0xff] }
 0x899   :  { %v5708_v54 = vpop.eup %5707  ;;  %5715 = vpow2.f32 %v4714_v51  ;;  %v7539_v14 = vpack.c.bf16 %v3744_v57, %v3742_v46  ;;  %v7542_v34 = vadd.f32 %v7445_v38, %v3416_v60  ;;  %v3737_v16 = vmul.f32 %v5706_v7, %v7398_v48  ;;  %v7950_v60 = vld [vmem:[#allocation77_spill] sm:$0xff] }
 0x89a   :  { %v5710_v63 = vpop.eup %5709  ;;  %5717 = vpow2.f32 %v4715_v61  ;;  %v7545_v55 = vadd.f32 %v7445_v38, %v3417_v24  ;;  %v7547_v21 = vpack.c.bf16 %v3745_v27, %v3743_v39  ;;  %v3651_v44 = vadd.f32 1.0, %v5708_v54 }
 0x89b   :  { %v5712_v35 = vpop.eup %5711  ;;  %v4718_v38 = vmul.f32 -1.442695, %v7542_v34  ;;  %5719 = vrcp.f32 %v3650_v5  ;;  %v7566_v48 = vadd.f32 %v3499_v19, %v3422_v47  ;;  %v3762_v2 = vpack.c.bf16 %v3732_v36, %v7507_v30  ;;  %v7595_v5 = vld [vmem:[#allocation20 + $0x28] sm:$0xff]   ;;  %v7597_v47 = vld [vmem:[#allocation20 + $0x18] sm:$0xff]  }
 0x89c   :  { %v5714_v9 = vpop.eup %5713  ;;  %v4719_v40 = vmul.f32 -1.442695, %v7545_v55  ;;  %3806 = vmatprep.subr.bf16.mxu0 %v7547_v21  ;;  %3932 = vmatprep.subr.bf16.mxu1 %v7547_v21  ;;  %v7561_v10 = vpop.permute.xlu1 %3391  ;;  %v3736_v17 = vmul.f32 %v5710_v63, %v7390_v42  ;;  %v3654_v31 = vadd.f32 1.0, %v5712_v35  ;;  %v3196_v56 = vsub.f32 %v7946_v41, %v7453_v50 }
 0x89d   :  { %3807 = vmatpush1.bf16.msra.mxu0 %v7539_v14  ;;  %3933 = vmatpush1.bf16.msra.mxu1 %v7539_v14  ;;  %5721 = vpow2.f32 %v4718_v38  ;;  %v3655_v15 = vadd.f32 1.0, %v5714_v9  ;;  %v3197_v23 = vsub.f32 %v7947_v18, %v7453_v50  ;;  %v4721_v30 = vmul.f32 -1.442695, %v7551_v28 }
 0x89e   :  { %3873 = vmatprep.subr.bf16.mxu0 %v3763_v6  ;;  %3999 = vmatprep.subr.bf16.mxu1 %v3763_v6  ;;  %5723 = vpow2.f32 %v4719_v40  ;;  %v7579_v36 = vadd.f32 %v3499_v19, %v3423_v49  ;;  %v3765_v26 = vpack.c.bf16 %v3737_v16, %v3735_v22  ;;  %v4724_v8 = vmul.f32 -1.442695, %v7566_v48 }
 0x89f   :  { %5725 = vrcp.f32 %v3651_v44  ;;  %v3764_v52 = vpack.c.bf16 %v3736_v17, %v3734_v13  ;;  %v3200_v57 = vsub.f32 %v7948_v59, %v7465_v43  ;;  %v7949_v61 = vmov 0  }
 0x8a0   :  { %4730 = vmatmul.mubr.msk.bf16.vlgmr.msra.gmra.mrb[56].mxu0 %vm647_vm0, %v7553_v45  ;;  %4736 = vmatmul.mubr.msk.bf16.vlgmr.msra.gmra.mrb[56].mxu1 %vm647_vm0, %v7563_v37  ;;  %v3270_v42 = vpop.permute.xlu1 %3269  ;;  %5727 = vpow2.f32 %v4720_v20  ;;  %v3201_v24 = vsub.f32 %v7950_v60, %v7465_v43  ;;  %v4725_v27 = vmul.f32 -1.442695, %v7579_v36 }
 0x8a1   :  { %3874 = vmatpush1.bf16.msra.mxu0 %v3762_v2  ;;  %4000 = vmatpush1.bf16.msra.mxu1 %v3762_v2  ;;  %v3308_v50 = vmul.f32 %v3270_v42, %v3196_v56  ;;  %v3309_v25 = vmul.f32 %v3270_v42, %v3197_v23  ;;  %5729 = vrcp.f32 %v3654_v31  ;;  %v7621_v56 = vld [vmem:[#allocation20] sm:$0xff]  }
 0x8a2   :  { %3875 = vmatprep.subr.bf16.mxu0 %v3765_v26  ;;  %4001 = vmatprep.subr.bf16.mxu1 %v3765_v26  ;;  %5731 = vrcp.f32 %v3655_v15 }
 0x8a3   :  { %v5716_v4 = vpop.eup %5715  ;;  %v3420_v46 = vmul.f32 %v7480_v12, %v3308_v50  ;;  %v3421_v51 = vmul.f32 %v7480_v12, %v3309_v25  ;;  %3846 = vmatprep.mubr.bf16.mxu0 %v7949_v61  ;;  %3972 = vmatprep.mubr.bf16.mxu1 %v7949_v61  ;;  %5733 = vpow2.f32 %v4721_v30 }
 0x8a4   :  { %v5718_v7 = vpop.eup %5717  ;;  %v3652_v39 = vadd.f32 1.0, %v5716_v4  ;;  %v3280_v54 = vpop.permute.xlu1 %3279  ;;  %5735 = vpow2.f32 %v4724_v8 }
 0x8a5   :  { %v3653_v63 = vadd.f32 1.0, %v5718_v7  ;;  %v7600_v12 = vadd.f32 %v7534_v29, %v3420_v46  ;;  %v7603_v19 = vadd.f32 %v7534_v29, %v3421_v51  ;;  %3876 = vmatpush1.bf16.msra.mxu0 %v3764_v52  ;;  %4002 = vmatpush1.bf16.msra.mxu1 %v3764_v52  ;;  %v3312_v43 = vmul.f32 %v3280_v54, %v3200_v57  ;;  %v5720_v13 = vpop.eup %5719 }
 0x8a6   :  { %5737 = vrcp.f32 %v3652_v39  ;;  %v3313_v35 = vmul.f32 %v3280_v54, %v3201_v24  ;;  %v3746_v50 = vmul.f32 %v5720_v13, %v7448_v62  ;;  %v7635_v24 = vld [vmem:[#allocation20 + $0x8] sm:$0xff]  }
 0x8a7   :  { %5739 = vrcp.f32 %v3653_v63  ;;  %v4722_v6 = vmul.f32 -1.442695, %v7600_v12  ;;  %v4723_v16 = vmul.f32 -1.442695, %v7603_v19  ;;  %v5722_v9 = vpop.eup %5721  ;;  %v3424_v29 = vmul.f32 %v7561_v10, %v3312_v43 }
 0x8a8   :  { %5741 = vpow2.f32 %v4725_v27  ;;  %4731 = vmatmul.mubr.msk.bf16.gmra.mrb[60].mxu0 %vm647_vm0, %v7595_v5  ;;  %4737 = vmatmul.mubr.msk.bf16.gmra.mrb[60].mxu1 %vm647_vm0, %v7597_v47  ;;  %v3425_v44 = vmul.f32 %v7561_v10, %v3313_v35  ;;  %v3504_v49 = vpop.permute.xlu1 %3503  ;;  %v5724_v38 = vpop.eup %5723  ;;  %v3656_v40 = vadd.f32 1.0, %v5722_v9 }
 0x8a9   :  { %5743 = vpow2.f32 %v4722_v6  ;;  %3905 = vmatprep.mubr.bf16.mxu0 %v7949_v61  ;;  %4031 = vmatprep.mubr.bf16.mxu1 %v7949_v61  ;;  %v5726_v20 = vpop.eup %5725  ;;  %v3657_v2 = vadd.f32 1.0, %v5724_v38  ;;  %v7615_v17 = vadd.f32 %v3504_v49, %v3424_v29 }
 0x8aa   :  { %5745 = vpow2.f32 %v4723_v16  ;;  %v7617_v31 = vadd.f32 %v3504_v49, %v3425_v44  ;;  %v5728_v22 = vpop.eup %5727  ;;  %v3747_v59 = vmul.f32 %v5726_v20, %v7463_v1 }
 0x8ab   :  { %5747 = vrcp.f32 %v3656_v40  ;;  %v5730_v15 = vpop.eup %5729  ;;  %v4726_v10 = vmul.f32 -1.442695, %v7615_v17  ;;  %v3658_v42 = vadd.f32 1.0, %v5728_v22 }
 0x8ac   :  { %5749 = vrcp.f32 %v3657_v2  ;;  %v4727_v41 = vmul.f32 -1.442695, %v7617_v31  ;;  %v5732_v18 = vpop.eup %5731  ;;  %v3750_v63 = vmul.f32 %v5730_v15, %v7468_v33 }
 0x8ad   :  { %v5734_v23 = vpop.eup %5733  ;;  %5751 = vpow2.f32 %v4726_v10  ;;  %v3751_v43 = vmul.f32 %v5732_v18, %v7471_v32 }
 0x8ae   :  { %v5736_v30 = vpop.eup %5735  ;;  %5753 = vpow2.f32 %v4727_v41  ;;  %v3659_v25 = vadd.f32 1.0, %v5734_v23 }
 0x8af   :  { %5755 = vrcp.f32 %v3658_v42  ;;  %v3662_v39 = vadd.f32 1.0, %v5736_v30  ;;  %v7951_v30 = vld [vmem:[#allocation34_spill] sm:$0xff] }
 0x8b0   :  { %v5738_v26 = vpop.eup %5737  ;;  %4734 = vmatmul.mubr.msk.bf16.vlgmr.msra.gmra.mrb[56].mxu0 %vm647_vm0, %v7563_v37  ;;  %4740 = vmatmul.mubr.msk.bf16.vlgmr.msra.gmra.mrb[56].mxu1 %vm647_vm0, %v7621_v56  ;;  %5757 = vrcp.f32 %v3659_v25 }
 0x8b1   :  { %v5740_v8 = vpop.eup %5739  ;;  %v3748_v52 = vmul.f32 %v5738_v26, %v7519_v0  ;;  %3915 = vmatprep.mubr.bf16.mxu0 %v7949_v61  ;;  %4041 = vmatprep.mubr.bf16.mxu1 %v7949_v61 }
 0x8b2   :  { %v5742_v4 = vpop.eup %5741  ;;  %v3749_v57 = vmul.f32 %v5740_v8, %v7522_v3  ;;  %v7952_v8 = vld [vmem:[#allocation35_spill] sm:$0xff] }
 0x8b3   :  { %v5744_v46 = vpop.eup %5743  ;;  %v7633_v51 = vpack.c.bf16 %v3748_v52, %v3746_v50  ;;  %v3663_v1 = vadd.f32 1.0, %v5742_v4  ;;  %v7953_v52 = vld [vmem:[#allocation36_spill] sm:$0xff] }
 0x8b4   :  { %v5746_v7 = vpop.eup %5745  ;;  %v3660_v60 = vadd.f32 1.0, %v5744_v46  ;;  %v7637_v62 = vpack.c.bf16 %v3749_v57, %v3747_v59  ;;  %v7954_v57 = vld [vmem:[#allocation37_spill] sm:$0xff] }
 0x8b5   :  { %v5748_v0 = vpop.eup %5747  ;;  %v3661_v27 = vadd.f32 1.0, %v5746_v7 }
 0x8b6   :  { %v5750_v54 = vpop.eup %5749  ;;  %v3752_v3 = vmul.f32 %v5748_v0, %v7542_v34  ;;  %5759 = vrcp.f32 %v3660_v60  ;;  %4052 = vmatprep.subr.bf16.mxu1 %v7637_v62  ;;  %4113 = vmatprep.subr.bf16.mxu0 %v7637_v62 }
 0x8b7   :  { %5761 = vrcp.f32 %v3661_v27  ;;  %4053 = vmatpush1.bf16.msra.mxu1 %v7633_v51  ;;  %4114 = vmatpush1.bf16.msra.mxu0 %v7633_v51  ;;  %v3753_v35 = vmul.f32 %v5750_v54, %v7545_v55  ;;  %v5752_v13 = vpop.eup %5751 }
 0x8b8   :  { %4735 = vmatmul.mubr.msk.bf16.gmra.mrb[60].mxu0 %vm647_vm0, %v7597_v47  ;;  %4741 = vmatmul.mubr.msk.bf16.gmra.mrb[60].mxu1 %vm647_vm0, %v7635_v24  ;;  %v3772_v33 = vpack.c.bf16 %v3752_v3, %v3750_v63  ;;  %v5754_v34 = vpop.eup %5753  ;;  %5763 = vrcp.f32 %v3662_v39  ;;  %v3664_v6 = vadd.f32 1.0, %v5752_v13  ;;  %v7955_v3 = vld [vmem:[#allocation38_spill] sm:$0xff]  ;;  %v7956_v13 = vld [vmem:[#allocation39_spill] sm:$0xff] }
 0x8b9   :  { %v3773_v16 = vpack.c.bf16 %v3753_v35, %v3751_v43  ;;  %4084 = vmatprep.mubr.bf16.mxu1 %v7949_v61  ;;  %4145 = vmatprep.mubr.bf16.mxu0 %v7949_v61  ;;  %5765 = vrcp.f32 %v3663_v1  ;;  %v3665_v32 = vadd.f32 1.0, %v5754_v34  ;;  %v5756_v55 = vpop.eup %5755 }
 0x8ba   :  { %5767 = vrcp.f32 %v3664_v6  ;;  %v5758_v9 = vpop.eup %5757  ;;  %v3754_v49 = vmul.f32 %v5756_v55, %v7526_v58  ;;  %v7957_v6 = vld [vmem:[#allocation40_spill] sm:$0xff] }
 0x8bb   :  { %4054 = vmatprep.subr.bf16.mxu1 %v3773_v16  ;;  %4115 = vmatprep.subr.bf16.mxu0 %v3773_v16  ;;  %5769 = vrcp.f32 %v3665_v32  ;;  %v7958_v32 = vld [vmem:[#allocation41_spill] sm:$0xff] }
 0x8bc   :  { %4055 = vmatpush1.bf16.msra.mxu1 %v3772_v33  ;;  %4116 = vmatpush1.bf16.msra.mxu0 %v3772_v33 }
 0x8bd   :  { %4166 = vmatprep.subr.bf16.mxu0 %v7498_v11  ;;  %v3755_v11 = vmul.f32 %v5758_v9, %v7551_v28 }
 0x8c0   :  { %v5760_v29 = vpop.eup %5759  ;;  %4742 = vmatmul.mubr.msk.bf16.vlgmr.msra.gmra.mrb[56].mxu1 %vm647_vm0, %v7553_v45  ;;  %4744 = vmatmul.mubr.msk.bf16.vlgmr.msra.gmra.mrb[64].mxu0 %vm647_vm0, %v7563_v37 }
 0x8c1   :  { %v5762_v44 = vpop.eup %5761  ;;  %v3756_v38 = vmul.f32 %v5760_v29, %v7600_v12  ;;  %4167 = vmatpush1.bf16.msra.mxu0 %v7496_v53  ;;  %4094 = vmatprep.mubr.bf16.mxu1 %v7949_v61  ;;  %v4455_v29 = vstv %s4754_s12 }
 0x8c2   :  { %4168 = vmatprep.subr.bf16.mxu0 %v7547_v21  ;;  %4155 = vmatprep.mubr.bf16.mxu0 %v7949_v61  ;;  %v3757_v40 = vmul.f32 %v5762_v44, %v7603_v19  ;;  %v5764_v20 = vpop.eup %5763 }
 0x8c3   :  { %v3774_v2 = vpack.c.bf16 %v3756_v38, %v3754_v49  ;;  %v5766_v22 = vpop.eup %5765  ;;  %v3758_v53 = vmul.f32 %v5764_v20, %v7566_v48 }
 0x8c4   :  { %v3775_v15 = vpack.c.bf16 %v3757_v40, %v3755_v11  ;;  %v5768_v10 = vpop.eup %5767  ;;  %v3759_v21 = vmul.f32 %v5766_v22, %v7579_v36  ;;  %v4420_v36 = vstv %s4391_s11 }
 0x8c5   :  { %4169 = vmatpush1.bf16.msra.mxu0 %v7539_v14  ;;  %v5770_v58 = vpop.eup %5769  ;;  %v3760_v12 = vmul.f32 %v5768_v10, %v7615_v17  ;;  %v7704_v17 = vpop.permute.xlu1 %4399  ;;  %v7959_v10 = vld [vmem:[#allocation42_spill] sm:$0xff] }
 0x8c6   :  { %4219 = vmatprep.subr.bf16.mxu0 %v3775_v15  ;;  %4280 = vmatprep.subr.bf16.mxu1 %v3775_v15  ;;  %v3761_v28 = vmul.f32 %v5770_v58, %v7617_v31 }
 0x8c7   :  { %4281 = vmatpush1.bf16.msra.mxu1 %v3774_v2  ;;  %v3776_v19 = vpack.c.bf16 %v3760_v12, %v3758_v53  ;;  %v7960_v12 = vld [vmem:[#allocation43_spill] sm:$0xff] }
 0x8c8   :  { %4743 = vmatmul.mubr.msk.bf16.gmra.mrb[60].mxu1 %vm647_vm0, %v7595_v5  ;;  %4745 = vmatmul.mubr.msk.bf16.gmra.mrb[68].mxu0 %vm647_vm0, %v7597_v47  ;;  %v3777_v14 = vpack.c.bf16 %v3761_v28, %v3759_v21 }
 0x8c9   :  { %4198 = vmatprep.mubr.bf16.mxu0 %v7949_v61  ;;  %4312 = vmatprep.mubr.bf16.mxu1 %v7949_v61 }
 0x8ca   :  { %4282 = vmatprep.subr.bf16.mxu1 %v3777_v14 }
 0x8cb   :  { %4283 = vmatpush1.bf16.msra.mxu1 %v3776_v19 }
 0x8cc   :  { %4333 = vmatprep.subr.bf16.mxu1 %v7637_v62 }
 0x8d0   :  { %4746 = vmatmul.mubr.msk.bf16.vlgmr.msra.gmra.mrb[64].mxu0 %vm647_vm0, %v7621_v56  ;;  %4750 = vmatmul.mubr.msk.bf16.vlgmr.msra.gmra.mrb[64].mxu1 %vm647_vm0, %v7563_v37  ;;  %v7701_v37 = vpop.permute.xlu0 %4394 }
 0x8d1   :  { %4220 = vmatpush1.bf16.msra.mxu0 %v3774_v2  ;;  %4334 = vmatpush1.bf16.msra.mxu1 %v7633_v51 }
 0x8d2   :  { %4221 = vmatprep.subr.bf16.mxu0 %v3777_v14  ;;  %4335 = vmatprep.subr.bf16.mxu1 %v3773_v16 }
 0x8d3   :  { %4208 = vmatprep.mubr.bf16.mxu0 %v7949_v61  ;;  %4322 = vmatprep.mubr.bf16.mxu1 %v7949_v61 }
 0x8d4   :  { %v7712_v59 = vpop.permute.xlu0 %4404 }
 0x8d5   :  { %4222 = vmatpush1.bf16.msra.mxu0 %v3776_v19  ;;  %4336 = vmatpush1.bf16.msra.mxu1 %v3772_v33  ;;  %v7961_v19 = vld [vmem:[#allocation44_spill] sm:$0xff] }
 0x8d8   :  { %4747 = vmatmul.mubr.msk.bf16.gmra.mrb[68].mxu0 %vm647_vm0, %v7635_v24  ;;  %4751 = vmatmul.mubr.msk.bf16.gmra.mrb[68].mxu1 %vm647_vm0, %v7597_v47 }
 0x8d9   :  { %4251 = vmatprep.mubr.bf16.mxu0 %v7949_v61  ;;  %4365 = vmatprep.mubr.bf16.mxu1 %v7949_v61 }
 0x8e0   :  { %4748 = vmatmul.mubr.msk.bf16.vlgmr.msra.gmra.mrb[64].mxu0 %vm647_vm0, %v7553_v45  ;;  %4752 = vmatmul.mubr.msk.bf16.vlgmr.msra.gmra.mrb[64].mxu1 %vm647_vm0, %v7621_v56 }
 0x8e1   :  { %4261 = vmatprep.mubr.bf16.mxu0 %v7949_v61  ;;  %4375 = vmatprep.mubr.bf16.mxu1 %v7949_v61 }
 0x8e8   :  { %4749 = vmatmul.mubr.msk.bf16.gmra.mrb[68].mxu0 %vm647_vm0, %v7595_v5  ;;  %4753 = vmatmul.mubr.msk.bf16.gmra.mrb[68].mxu1 %vm647_vm0, %v7635_v24  ;;  %v7716_v24 = vpop.permute.xlu1 %4409 }
 0x983   :  { %v3907_v48 = vpop.f32.mrb[56].mxu0 }
 0x984   :  { %v4412_v45 = vadd.f32 %v7701_v37, %v3907_v48  ;;  %v3909_v47 = vpop.f32.mrb[57].mxu0  ;;  %v7962_v48 = vld [vmem:[#allocation45_spill] sm:$0xff] }
 0x985   :  { %v4413_v31 = vadd.f32 %v7701_v37, %v3909_v47  ;;  %v3911_v41 = vpop.f32.mrb[58].mxu0 }
 0x986   :  { %v4421_v61 = vmul.f32 %v4420_v36, %v4412_v45  ;;  %v4414_v56 = vadd.f32 %v7704_v17, %v3911_v41  ;;  %v3913_v5 = vpop.f32.mrb[59].mxu0 }
 0x987   :  { %v4422_v18 = vmul.f32 %v4420_v36, %v4413_v31  ;;  %v4415_v23 = vadd.f32 %v7704_v17, %v3913_v5 }
 0x988   :  { %v4429_v26 = vadd.f32 %v4421_v61, %v7951_v30  ;;  %v4423_v42 = vmul.f32 %v4420_v36, %v4414_v56 }
 0x989   :  { %v4430_v50 = vadd.f32 %v4422_v18, %v7952_v8  ;;  %v4424_v25 = vmul.f32 %v4420_v36, %v4415_v23 }
 0x98a   :  { %4437 = vst [vmem:[#allocation24] sm:$0xff] %v4429_v26  ;;  %v4431_v4 = vadd.f32 %v4423_v42, %v7953_v52  ;;  %v7963_v26 = vld [vmem:[#allocation46_spill] sm:$0xff] }
 0x98b   :  { %4438 = vst [vmem:[#allocation24 + $0x8] sm:$0xff] %v4430_v50  ;;  %v4432_v46 = vadd.f32 %v4424_v25, %v7954_v57  ;;  %v3917_v51 = vpop.f32.mrb[60].mxu0  ;;  %v7964_v50 = vld [vmem:[#allocation47_spill] sm:$0xff] }
 0x98c   :  { %4439 = vst [vmem:[#allocation24 + $0x10] sm:$0xff] %v4431_v4  ;;  %v4416_v7 = vadd.f32 %v7712_v59, %v3917_v51  ;;  %v3919_v60 = vpop.f32.mrb[61].mxu0  ;;  %v7965_v4 = vld [vmem:[#allocation48_spill] sm:$0xff] }
 0x98d   :  { %4440 = vst [vmem:[#allocation24 + $0x18] sm:$0xff] %v4432_v46  ;;  %v4417_v62 = vadd.f32 %v7712_v59, %v3919_v60  ;;  %v3921_v0 = vpop.f32.mrb[62].mxu0  ;;  %v7966_v46 = vld [vmem:[#allocation49_spill] sm:$0xff]  ;;  %v7741_v60 = vstv %s4755_s20 }
 0x98e   :  { %v4425_v39 = vmul.f32 %v4420_v36, %v4416_v7  ;;  %v4418_v27 = vadd.f32 %v7716_v24, %v3921_v0  ;;  %v3923_v54 = vpop.f32.mrb[63].mxu0  ;;  %v7743_v0 = vstv %s4756_s21 }
 0x98f   :  { %v4426_v63 = vmul.f32 %v4420_v36, %v4417_v62  ;;  %v4419_v1 = vadd.f32 %v7716_v24, %v3923_v54 }
 0x990   :  { %v4433_v43 = vadd.f32 %v4425_v39, %v7955_v3  ;;  %v4427_v35 = vmul.f32 %v4420_v36, %v4418_v27 }
 0x991   :  { %v4434_v33 = vadd.f32 %v4426_v63, %v7956_v13  ;;  %v4428_v34 = vmul.f32 %v4420_v36, %v4419_v1 }
 0x992   :  { %4441 = vst [vmem:[#allocation24 + $0x20] sm:$0xff] %v4433_v43  ;;  %v4435_v16 = vadd.f32 %v4427_v35, %v7957_v6 }
 0x993   :  { %4442 = vst [vmem:[#allocation24 + $0x28] sm:$0xff] %v4434_v33  ;;  %v4436_v55 = vadd.f32 %v4428_v34, %v7958_v32  ;;  %v4086_v9 = vpop.f32.mrb[56].mxu1 }
 0x994   :  { %4443 = vst [vmem:[#allocation24 + $0x30] sm:$0xff] %v4435_v16  ;;  %v4447_v44 = vadd.f32 %v7701_v37, %v4086_v9  ;;  %v4088_v49 = vpop.f32.mrb[57].mxu1 }
 0x995   :  { %4444 = vst [vmem:[#allocation24 + $0x38] sm:$0xff] %v4436_v55  ;;  %v4448_v38 = vadd.f32 %v7701_v37, %v4088_v49  ;;  %v4090_v11 = vpop.f32.mrb[58].mxu1 }
 0x996   :  { %v4456_v40 = vmul.f32 %v4455_v29, %v4447_v44  ;;  %v4449_v20 = vadd.f32 %v7704_v17, %v4090_v11  ;;  %v4092_v2 = vpop.f32.mrb[59].mxu1  ;;  %v7967_v44 = vld [vmem:[#allocation50_spill] sm:$0xff] }
 0x997   :  { %v4457_v22 = vmul.f32 %v4455_v29, %v4448_v38  ;;  %v4450_v15 = vadd.f32 %v7704_v17, %v4092_v2  ;;  %v7968_v38 = vld [vmem:[#allocation58_spill] sm:$0xff]  ;;  %v7969_v2 = vld [vmem:[#allocation51_spill] sm:$0xff] }
 0x998   :  { %v4464_v58 = vadd.f32 %v4456_v40, %v7959_v10  ;;  %v4458_v53 = vmul.f32 %v4455_v29, %v4449_v20 }
 0x999   :  { %v4465_v21 = vadd.f32 %v4457_v22, %v7960_v12  ;;  %v4459_v28 = vmul.f32 %v4455_v29, %v4450_v15  ;;  %v7970_v15 = vld [vmem:[#allocation59_spill] sm:$0xff]  ;;  %v7971_v12 = vld [vmem:[#allocation52_spill] sm:$0xff] }
 0x99a   :  { %4472 = vst [vmem:[#allocation24 + $0x40] sm:$0xff] %v4464_v58  ;;  %v4466_v14 = vadd.f32 %v4458_v53, %v7961_v19  ;;  %v7973_v19 = vld [vmem:[#allocation53_spill] sm:$0xff] }
 0x99b   :  { %4473 = vst [vmem:[#allocation24 + $0x48] sm:$0xff] %v4465_v21  ;;  %v4467_v36 = vadd.f32 %v4459_v28, %v7962_v48  ;;  %v4096_v45 = vpop.f32.mrb[60].mxu1  ;;  %v7972_v21 = vld [vmem:[#allocation60_spill] sm:$0xff]  ;;  %v7974_v48 = vld [vmem:[#allocation61_spill] sm:$0xff] }
 0x99c   :  { %4474 = vst [vmem:[#allocation24 + $0x50] sm:$0xff] %v4466_v14  ;;  %v4451_v47 = vadd.f32 %v7712_v59, %v4096_v45  ;;  %v4098_v31 = vpop.f32.mrb[61].mxu1 }
 0x99d   :  { %4475 = vst [vmem:[#allocation24 + $0x58] sm:$0xff] %v4467_v36  ;;  %v4452_v41 = vadd.f32 %v7712_v59, %v4098_v31  ;;  %v4100_v61 = vpop.f32.mrb[62].mxu1 }
 0x99e   :  { %v4460_v56 = vmul.f32 %v4455_v29, %v4451_v47  ;;  %v4453_v5 = vadd.f32 %v7716_v24, %v4100_v61  ;;  %v4102_v18 = vpop.f32.mrb[63].mxu1 }
 0x99f   :  { %v4461_v23 = vmul.f32 %v4455_v29, %v4452_v41  ;;  %v4454_v30 = vadd.f32 %v7716_v24, %v4102_v18 }
 0x9a0   :  { %v4468_v42 = vadd.f32 %v4460_v56, %v7963_v26  ;;  %v4462_v8 = vmul.f32 %v4455_v29, %v4453_v5 }
 0x9a1   :  { %v4469_v25 = vadd.f32 %v4461_v23, %v7964_v50  ;;  %v4463_v52 = vmul.f32 %v4455_v29, %v4454_v30 }
 0x9a2   :  { %4476 = vst [vmem:[#allocation24 + $0x60] sm:$0xff] %v4468_v42  ;;  %v4470_v57 = vadd.f32 %v4462_v8, %v7965_v4 }
 0x9a3   :  { %4477 = vst [vmem:[#allocation24 + $0x68] sm:$0xff] %v4469_v25  ;;  %v4471_v51 = vadd.f32 %v4463_v52, %v7966_v46 }
 0x9a4   :  { %4478 = vst [vmem:[#allocation24 + $0x70] sm:$0xff] %v4470_v57 }
 0x9a5   :  { %4479 = vst [vmem:[#allocation24 + $0x78] sm:$0xff] %v4471_v51  ;;  %v7975_v51 = vld [vmem:[#allocation54_spill] sm:$0xff] }
 0x9b3   :  { %v4253_v7 = vpop.f32.mrb[64].mxu0  ;;  %v4367_v62 = vpop.f32.mrb[64].mxu1 }
 0x9b4   :  { %v4482_v39 = vadd.f32 %v7701_v37, %v4253_v7  ;;  %v4517_v27 = vadd.f32 %v7701_v37, %v4367_v62  ;;  %v4255_v54 = vpop.f32.mrb[65].mxu0  ;;  %v4369_v63 = vpop.f32.mrb[65].mxu1  ;;  %v7976_v62 = vld [vmem:[#allocation62_spill] sm:$0xff] }
 0x9b5   :  { %v4483_v1 = vadd.f32 %v7701_v37, %v4255_v54  ;;  %v4518_v3 = vadd.f32 %v7701_v37, %v4369_v63  ;;  %v4257_v43 = vpop.f32.mrb[66].mxu0  ;;  %v4371_v35 = vpop.f32.mrb[66].mxu1  ;;  %v7977_v63 = vld [vmem:[#allocation55_spill] sm:$0xff] }
 0x9b6   :  { %v4491_v13 = vmul.f32 %v7741_v60, %v4482_v39  ;;  %v4526_v33 = vmul.f32 %v7743_v0, %v4517_v27  ;;  %v4484_v34 = vadd.f32 %v7704_v17, %v4257_v43  ;;  %v4519_v6 = vadd.f32 %v7704_v17, %v4371_v35  ;;  %v4259_v16 = vpop.f32.mrb[67].mxu0  ;;  %v4373_v32 = vpop.f32.mrb[67].mxu1 }
 0x9b7   :  { %v4492_v55 = vmul.f32 %v7741_v60, %v4483_v1  ;;  %v4527_v9 = vmul.f32 %v7743_v0, %v4518_v3  ;;  %v4485_v29 = vadd.f32 %v7704_v17, %v4259_v16  ;;  %v4520_v37 = vadd.f32 %v7704_v17, %v4373_v32  ;;  %v7978_v3 = vld [vmem:[#allocation63_spill] sm:$0xff]  ;;  %v7981_v16 = vld [vmem:[#allocation57_spill] sm:$0xff] }
 0x9b8   :  { %v4499_v49 = vadd.f32 %v4491_v13, %v7967_v44  ;;  %v4534_v11 = vadd.f32 %v4526_v33, %v7968_v38  ;;  %v4493_v40 = vmul.f32 %v7741_v60, %v4484_v34  ;;  %v4528_v20 = vmul.f32 %v7743_v0, %v4519_v6  ;;  %v7980_v34 = vld [vmem:[#allocation64_spill] sm:$0xff] }
 0x9b9   :  { %v4500_v22 = vadd.f32 %v4492_v55, %v7969_v2  ;;  %v4535_v10 = vadd.f32 %v4527_v9, %v7970_v15  ;;  %v4494_v58 = vmul.f32 %v7741_v60, %v4485_v29  ;;  %v4529_v53 = vmul.f32 %v7743_v0, %v4520_v37  ;;  %v7982_v55 = vld [vmem:[#allocation65_spill] sm:$0xff] }
 0x9ba   :  { %4507 = vst [vmem:[#allocation24 + $0x80] sm:$0xff] %v4499_v49  ;;  %4542 = vst [vmem:[#allocation24 + $0xc0] sm:$0xff] %v4534_v11  ;;  %v4501_v17 = vadd.f32 %v4493_v40, %v7971_v12  ;;  %v4536_v28 = vadd.f32 %v4528_v20, %v7972_v21 }
 0x9bb   :  { %4508 = vst [vmem:[#allocation24 + $0x88] sm:$0xff] %v4500_v22  ;;  %4543 = vst [vmem:[#allocation24 + $0xc8] sm:$0xff] %v4535_v10  ;;  %v4502_v14 = vadd.f32 %v4494_v58, %v7973_v19  ;;  %v4537_v36 = vadd.f32 %v4529_v53, %v7974_v48  ;;  %v4263_v45 = vpop.f32.mrb[68].mxu0  ;;  %v4377_v47 = vpop.f32.mrb[68].mxu1 }
 0x9bc   :  { %4509 = vst [vmem:[#allocation24 + $0x90] sm:$0xff] %v4501_v17  ;;  %4544 = vst [vmem:[#allocation24 + $0xd0] sm:$0xff] %v4536_v28  ;;  %v4486_v31 = vadd.f32 %v7712_v59, %v4263_v45  ;;  %v4521_v41 = vadd.f32 %v7712_v59, %v4377_v47  ;;  %v4265_v61 = vpop.f32.mrb[69].mxu0  ;;  %v4379_v56 = vpop.f32.mrb[69].mxu1 }
 0x9bd   :  { %4510 = vst [vmem:[#allocation24 + $0x98] sm:$0xff] %v4502_v14  ;;  %4545 = vst [vmem:[#allocation24 + $0xd8] sm:$0xff] %v4537_v36  ;;  %v4487_v5 = vadd.f32 %v7712_v59, %v4265_v61  ;;  %v4522_v18 = vadd.f32 %v7712_v59, %v4379_v56  ;;  %v4267_v23 = vpop.f32.mrb[70].mxu0  ;;  %v4381_v30 = vpop.f32.mrb[70].mxu1 }
 0x9be   :  { %v4495_v26 = vmul.f32 %v7741_v60, %v4486_v31  ;;  %v4530_v42 = vmul.f32 %v7743_v0, %v4521_v41  ;;  %v4488_v8 = vadd.f32 %v7716_v24, %v4267_v23  ;;  %v4523_v50 = vadd.f32 %v7716_v24, %v4381_v30  ;;  %v4269_v25 = vpop.f32.mrb[71].mxu0  ;;  %v4383_v52 = vpop.f32.mrb[71].mxu1 }
 0x9bf   :  { %v4496_v4 = vmul.f32 %v7741_v60, %v4487_v5  ;;  %v4531_v57 = vmul.f32 %v7743_v0, %v4522_v18  ;;  %v4489_v46 = vadd.f32 %v7716_v24, %v4269_v25  ;;  %v4524_v59 = vadd.f32 %v7716_v24, %v4383_v52  ;;  %v7979_v24 = vld [vmem:[#allocation56_spill] sm:$0xff] }
 0x9c0   :  { %v4503_v7 = vadd.f32 %v4495_v26, %v7975_v51  ;;  %v4538_v39 = vadd.f32 %v4530_v42, %v7976_v62  ;;  %v4497_v27 = vmul.f32 %v7741_v60, %v4488_v8  ;;  %v4532_v54 = vmul.f32 %v7743_v0, %v4523_v50 }
 0x9c1   :  { %v4504_v1 = vadd.f32 %v4496_v4, %v7977_v63  ;;  %v4539_v43 = vadd.f32 %v4531_v57, %v7978_v3  ;;  %v4498_v35 = vmul.f32 %v7741_v60, %v4489_v46  ;;  %v4533_v13 = vmul.f32 %v7743_v0, %v4524_v59 }
 0x9c2   :  { %4511 = vst [vmem:[#allocation24 + $0xa0] sm:$0xff] %v4503_v7  ;;  %4546 = vst [vmem:[#allocation24 + $0xe0] sm:$0xff] %v4538_v39  ;;  %v4505_v33 = vadd.f32 %v4497_v27, %v7979_v24  ;;  %v4540_v6 = vadd.f32 %v4532_v54, %v7980_v34 }
 0x9c3   :  { %4512 = vst [vmem:[#allocation24 + $0xa8] sm:$0xff] %v4504_v1  ;;  %4547 = vst [vmem:[#allocation24 + $0xe8] sm:$0xff] %v4539_v43  ;;  %v4506_v32 = vadd.f32 %v4498_v35, %v7981_v16  ;;  %v4541_v9 = vadd.f32 %v4533_v13, %v7982_v55 }
 0x9c4   :  { %4513 = vst [vmem:[#allocation24 + $0xb0] sm:$0xff] %v4505_v33  ;;  %4548 = vst [vmem:[#allocation24 + $0xf0] sm:$0xff] %v4540_v6 }
 0x9c5   :  { %4514 = vst [vmem:[#allocation24 + $0xb8] sm:$0xff] %v4506_v32  ;;  %4549 = vst [vmem:[#allocation24 + $0xf8] sm:$0xff] %v4541_v9 }
 0x9c6   :  { %6076 = shalt.err (!%p6073_p5)
}
 0x9c7   :  { %s6077_s17 = scalar_lea.hbm %s7818_s13, 4096 }
 0x9c8   :  { %p6078_p6 = scmp.ne.s32.totalorder %s7818_s13, %s6077_s17  ;;  %p6081_p7 = scmp.lt.u32.totalorder %s6077_s17, %s7818_s13 }
 0x9ca   :  { %p6083_p8 = pnand %p6081_p7, %p6078_p6 }
 0x9cc   :  { %6086 = shalt.err (!%p6083_p8)
}
 0x9cd   :  { %s6127_s5 = smov 256   ;;  %s6128_s1 = smov 16  }
 0x9ce   :  { %4561 = dma.vmem_to_hbm [thread:$0]  %s4556_s15, 4096, %s7818_s13, [#allocation4], %s6127_s5, %s6127_s5, %s6128_s1  }
 0x9cf   :  { %6103 = dma.done.wait [#allocation4], 4096  }
 0x9d0   :  { %6104 = vsyncadd [#allocation4], 4294963200 }
 0x9d1   :  { %4565 = vsyncpa [#allocation3], 1 }
 0x9d2   :  { %4566 = vsyncpa [#allocation7], 1 }
 0x9d3   :  { %4567 = vsyncpa [#allocation10], 1 }
 0x9d4   :  { %4568 = vsyncpa [#allocation13], 1 }
 0x9d5   :  { %4569 = vsyncpa [#allocation16], 1 }
 0x9d6   :  { %4570 = vsyncpa [#allocation19], 1 }
 0x9d7   :  { %4571 = vsyncpa [#allocation22], 1 }
 0x9d8   :  { %4572 = vsyncpa [#allocation4], 1 }
 0x9d9   :  { %4573 = vsyncpa [#allocation5], 1 }

</bundles_post_ra>
